<compile_context>
chip_gen: v7x
topology: tpu7x:2x2x1
jax: 0.10.0
libtpu: 0.0.40
codegen_flags: <defaults>
</compile_context>

<pallas_src>
import jax
import jax.numpy as jnp
from jax.experimental import pallas as pl
from jax.experimental.pallas import tpu as pltpu

FEAT_C, FEAT_H, FEAT_W = 1024, 7, 7
FEAT_DIM = FEAT_C * FEAT_H * FEAT_W          # 50176 == dense_layer_1 in_features
N1 = 128                                      # dense_layer_1 out_features
K_TILE = FEAT_DIM // 2                        # 25088, multiple of 128 -> 2 steps

# Row offsets inside the packed tail-parameter matrix (matrix starts are all
# multiples of 8, so static slices stay sublane-aligned).
_OFF_W1C, _OFF_W2, _OFF_W3, _OFF_WC1 = 0, 256, 384, 448
_OFF_WP1, _OFF_WP2, _OFF_WC2 = 512, 520, 536
_OFF_B1, _OFF_B1C, _OFF_B2, _OFF_B3 = 568, 569, 570, 571
_OFF_BP1, _OFF_BP2, _OFF_BC1, _OFF_BC2 = 572, 573, 574, 575
_OFF_WF, _OFF_BF = 576, 577
TAIL_ROWS = 584                               # padded to a multiple of 8


# ----------------------------------------------------------------------------
# Single fused kernel.
#   grid axis k tiles the 50176-long contraction of dense_layer_1
#   (in-kernel bf16 cast of f32 activations, bf16 weights, f32 accumulator).
#   On the last grid step the entire small dense tail runs as an epilogue on
#   VMEM-resident data (packed parameter matrix + action):
#     d1 (2,128) -[reshape(1,256) folded into split-weight matmuls]->
#       Linear(256,128) -> Linear(128,64) -> Linear(64,32)            = h
#     action (3,5 zero-padded to 3,8) -> Linear(5,16) -> Linear(16,32) = a
#     comb = reshape(concat([a, h], 0), (2,64))  [again split-weight, batched]
#       -> Linear(64,32) -> Linear(32,8) -> Linear(8,1)               = out (2,1)
# ----------------------------------------------------------------------------
def _critic_kernel(right_ref, left_ref, w1t_ref, act_ref, tail_ref,
                   o_ref, acc_ref):
    k = pl.program_id(0)

    @pl.when(k == 0)
    def _init():
        acc_ref[...] = jnp.zeros_like(acc_ref)

    # In-kernel f32 -> bf16 cast + stack of the two eyes (VPU work hidden
    # under the 6.4 MB bf16 weight-tile DMA), then one MXU contraction.
    x = jnp.concatenate(
        [right_ref[...].astype(jnp.bfloat16),
         left_ref[...].astype(jnp.bfloat16)], axis=0)          # (2, K_TILE) bf16
    acc_ref[...] += jnp.dot(x, w1t_ref[...],
                            preferred_element_type=jnp.float32)

    @pl.when(k == pl.num_programs(0) - 1)
    def _tail():
        tp = tail_ref                                            # (584, 128) f32

        def dot(a, b):
            return jnp.dot(a, b, preferred_element_type=jnp.float32)

        d1 = acc_ref[...] + tp[_OFF_B1:_OFF_B1 + 1, :]           # (2, 128)

        # xf = d1.reshape(1, 256) folded into split-weight matmuls:
        #   xf @ W1c.T = d1[0] @ W1c.T[:128] + d1[1] @ W1c.T[128:]
        h = (dot(d1[0:1, :], tp[_OFF_W1C:_OFF_W1C + 128, :])
             + dot(d1[1:2, :], tp[_OFF_W1C + 128:_OFF_W1C + 256, :])
             + tp[_OFF_B1C:_OFF_B1C + 1, :])                     # (1, 128)
        h = (dot(h, tp[_OFF_W2:_OFF_W2 + 128, 0:64])
             + tp[_OFF_B2:_OFF_B2 + 1, 0:64])                    # (1, 64)
        h = (dot(h, tp[_OFF_W3:_OFF_W3 + 64, 0:32])
             + tp[_OFF_B3:_OFF_B3 + 1, 0:32])                    # (1, 32)

        # action branch: dense_layer_parallel_1 -> dense_layer_parallel_2
        # (contraction dim zero-padded 5 -> 8 on both sides: identical result)
        a = (dot(act_ref[...], tp[_OFF_WP1:_OFF_WP1 + 8, 0:16])
             + tp[_OFF_BP1:_OFF_BP1 + 1, 0:16])                  # (3, 16)
        a = (dot(a, tp[_OFF_WP2:_OFF_WP2 + 16, 0:32])
             + tp[_OFF_BP2:_OFF_BP2 + 1, 0:32])                  # (3, 32)

        # comb = concat([a, h], 0).reshape(2, 64): row0 = [a0|a1], row1 = [a2|h]
        # Split-weight matmuls, batched over BOTH output rows (one MXU chain).
        left = jnp.concatenate([a[0:1, :], a[2:3, :]], axis=0)   # (2, 32)
        right = jnp.concatenate([a[1:2, :], h], axis=0)          # (2, 32)
        c = (dot(left, tp[_OFF_WC1:_OFF_WC1 + 32, 0:32])
             + dot(right, tp[_OFF_WC1 + 32:_OFF_WC1 + 64, 0:32])
             + tp[_OFF_BC1:_OFF_BC1 + 1, 0:32])                  # (2, 32)
        c = (dot(c, tp[_OFF_WC2:_OFF_WC2 + 32, 0:8])
             + tp[_OFF_BC2:_OFF_BC2 + 1, 0:8])                   # (2, 8)
        # dense_layer_final as a lane reduction (avoids degenerate N=1 matmul)
        o_ref[...] = (jnp.sum(c * tp[_OFF_WF:_OFF_WF + 1, 0:8],
                              axis=1, keepdims=True)
                      + tp[_OFF_BF:_OFF_BF + 1, 0:1])            # (2, 1)


def critic_fused(right_flat, left_flat, act_pad, p):
    n_k = FEAT_DIM // K_TILE
    tail = p["tail"]

    cost = pl.CostEstimate(
        flops=2 * 2 * FEAT_DIM * N1,
        transcendentals=0,
        bytes_accessed=int(FEAT_DIM * N1 * 2            # bf16 weight stream
                           + 2 * FEAT_DIM * 4           # f32 activations
                           + tail.size * 4
                           + act_pad.size * 4
                           + 2 * 4),
    )

    return pl.pallas_call(
        _critic_kernel,
        out_shape=jax.ShapeDtypeStruct((2, 1), jnp.float32),
        grid_spec=pltpu.PrefetchScalarGridSpec(
            num_scalar_prefetch=0,
            grid=(n_k,),
            in_specs=[
                pl.BlockSpec((1, K_TILE), lambda k: (0, k)),    # right eye f32
                pl.BlockSpec((1, K_TILE), lambda k: (0, k)),    # left eye f32
                pl.BlockSpec((K_TILE, N1), lambda k: (k, 0)),   # bf16 w1_t tile
                pl.BlockSpec(act_pad.shape, lambda k: (0, 0)),  # action (3,8)
                pl.BlockSpec(tail.shape, lambda k: (0, 0)),     # packed tail
            ],
            out_specs=pl.BlockSpec((2, 1), lambda k: (0, 0)),
            scratch_shapes=[pltpu.VMEM((2, N1), jnp.float32)],
        ),
        compiler_params=pltpu.CompilerParams(
            dimension_semantics=("arbitrary",),
            vmem_limit_bytes=32 * 1024 * 1024,
        ),
        cost_estimate=cost,
    )(right_flat, left_flat, p["w1_t"], act_pad, tail)


# ----------------------------------------------------------------------------
# Parameter init (deterministic, torch nn.Linear-style uniform(+-1/sqrt(fan_in)))
# All transposes / pads / packing / dtype casts are done ONCE here.
# ----------------------------------------------------------------------------
def init_params(key):
    def linear(k, out_f, in_f):
        kw, kb = jax.random.split(k)
        bound = float(in_f) ** -0.5
        w = jax.random.uniform(kw, (out_f, in_f), jnp.float32, -bound, bound)
        b = jax.random.uniform(kb, (1, out_f), jnp.float32, -bound, bound)
        return w, b

    keys = jax.random.split(key, 9)
    w1, b1 = linear(keys[0], 128, FEAT_DIM)   # dense_layer_1
    w1c, b1c = linear(keys[1], 128, 256)      # dense_layer_1_conc
    w2, b2 = linear(keys[2], 64, 128)         # dense_layer_2
    w3, b3 = linear(keys[3], 32, 64)          # dense_layer_3
    wp1, bp1 = linear(keys[4], 16, 5)         # dense_layer_parallel_1
    wp2, bp2 = linear(keys[5], 32, 16)        # dense_layer_parallel_2
    wc1, bc1 = linear(keys[6], 32, 64)        # dense_layer_comb_1
    wc2, bc2 = linear(keys[7], 8, 32)         # dense_layer_comb_2
    wf, bf = linear(keys[8], 1, 8)            # dense_layer_final

    # Pack every tail parameter into ONE (TAIL_ROWS, 128) f32 matrix so the
    # epilogue needs a single constant-index prologue DMA.
    def place(buf, row, mat):
        r, c = mat.shape
        return buf.at[row:row + r, 0:c].set(mat)

    tail = jnp.zeros((TAIL_ROWS, 128), jnp.float32)
    tail = place(tail, _OFF_W1C, w1c.T)                            # (256,128)
    tail = place(tail, _OFF_W2, w2.T)                              # (128, 64)
    tail = place(tail, _OFF_W3, w3.T)                              # (64, 32)
    tail = place(tail, _OFF_WC1, wc1.T)                            # (64, 32)
    tail = place(tail, _OFF_WP1, jnp.pad(wp1.T, ((0, 3), (0, 0)))) # (8, 16)
    tail = place(tail, _OFF_WP2, wp2.T)                            # (16, 32)
    tail = place(tail, _OFF_WC2, wc2.T)                            # (32, 8)
    tail = place(tail, _OFF_B1, b1)
    tail = place(tail, _OFF_B1C, b1c)
    tail = place(tail, _OFF_B2, b2)
    tail = place(tail, _OFF_B3, b3)
    tail = place(tail, _OFF_BP1, bp1)
    tail = place(tail, _OFF_BP2, bp2)
    tail = place(tail, _OFF_BC1, bc1)
    tail = place(tail, _OFF_BC2, bc2)
    tail = place(tail, _OFF_WF, wf)                                # (1, 8)
    tail = place(tail, _OFF_BF, bf)                                # (1, 1)

    return {
        # dense_layer_1: pre-transposed (K, N) and pre-cast to bf16.
        "w1_t": w1.T.astype(jnp.bfloat16),                         # (50176, 128)
        "tail": tail,                                              # packed params
        # raw f32 copies kept only for the pure-JAX reference check.
        "b1": b1, "w1c": w1c, "b1c": b1c, "w2": w2, "b2": b2,
        "w3": w3, "b3": b3, "wp1": wp1, "bp1": bp1, "wp2": wp2, "bp2": bp2,
        "wc1": wc1, "bc1": bc1, "wc2": wc2, "bc2": bc2, "wf": wf, "bf": bf,
    }


# ----------------------------------------------------------------------------
# Forward pass: only free reshapes + a tiny (3,5)->(3,8) pad in plain JAX,
# everything else in the single fused Pallas kernel.
# ----------------------------------------------------------------------------
@jax.jit
def critic_forward(right_feat, left_feat, action, params):
    right_flat = right_feat.reshape(1, -1)            # (1, 50176) f32, free
    left_flat = left_feat.reshape(1, -1)               # (1, 50176) f32, free
    act_pad = jnp.pad(action, ((0, 0), (0, 3)))        # (3, 8), numerically id.
    return critic_fused(right_flat, left_flat, act_pad, params)   # (2, 1)


# Pure-JAX reference of the same dataflow (uses the same bf16-rounded w1 /
# activations so the comparison isolates kernel mechanics, not quantization).
def reference_forward(right_feat, left_feat, action, p):
    flat = jnp.concatenate([right_feat, left_feat], axis=0).reshape(2, -1)
    flat = flat.astype(jnp.bfloat16).astype(jnp.float32)
    d1 = flat @ p["w1_t"].astype(jnp.float32) + p["b1"]            # (2, 128)
    xf = d1.reshape(1, -1)                                         # (1, 256)
    h = xf @ p["w1c"].T + p["b1c"]
    h = h @ p["w2"].T + p["b2"]
    h = h @ p["w3"].T + p["b3"]                                    # (1, 32)
    a = action @ p["wp1"].T + p["bp1"]
    a = a @ p["wp2"].T + p["bp2"]                                  # (3, 32)
    comb = jnp.concatenate([a, h], axis=0).reshape(2, -1)          # (2, 64)
    c = comb @ p["wc1"].T + p["bc1"]
    c = c @ p["wc2"].T + p["bc2"]
    return c @ p["wf"].T + p["bf"]                                 # (2, 1)


if __name__ == "__main__":
    key = jax.random.PRNGKey(0)
    kp, kr, kl, ka = jax.random.split(key, 4)
    params = init_params(kp)

    # stand-ins for the frozen MobileNetV1 last_hidden_state of each eye (NCHW)
    right_feat = jax.random.normal(kr, (1, FEAT_C, FEAT_H, FEAT_W), jnp.float32)
    left_feat = jax.random.normal(kl, (1, FEAT_C, FEAT_H, FEAT_W), jnp.float32)
    # action: (3, 5) — the only shape consistent with comb.reshape(2, 64)
    action = jax.random.normal(ka, (3, 5), jnp.float32)

    out = critic_forward(right_feat, left_feat, action, params)
    out = jax.block_until_ready(out)
    assert out.shape == (2, 1) and out.dtype == jnp.float32

    ref = reference_forward(right_feat, left_feat, action, params)
    assert bool(jnp.allclose(out, ref, rtol=5e-2, atol=5e-2)), (out, ref)
    print("KERNEL_OK")
</pallas_src>

<mosaic_0001>
module attributes {stable_mosaic.version = 11 : i64} {
  func.func @_critic_kernel(%arg0: i32, %arg1: memref<1x25088xf32, #tpu.memory_space<vmem>>, %arg2: memref<1x25088xf32, #tpu.memory_space<vmem>>, %arg3: memref<25088x128xbf16, #tpu.memory_space<vmem>>, %arg4: memref<3x8xf32, #tpu.memory_space<vmem>>, %arg5: memref<584x128xf32, #tpu.memory_space<vmem>>, %arg6: memref<2x1xf32, #tpu.memory_space<vmem>>, %arg7: memref<2x128xf32, #tpu.memory_space<vmem>>) attributes {dimension_semantics = [#tpu.dimension_semantics<arbitrary>], iteration_bounds = array<i64: 2>, scalar_prefetch = 0 : i64, scratch_operands = 1 : i64, tpu.core_type = #tpu.core_type<tc>, window_params = [{transform_indices = @transform_0, window_bounds = array<i64: 1, 25088>}, {transform_indices = @transform_1, window_bounds = array<i64: 1, 25088>}, {transform_indices = @transform_2, window_bounds = array<i64: 25088, 128>}, {pipeline_mode = #tpu.pipeline_mode<synchronous>, transform_indices = @transform_3, window_bounds = array<i64: 3, 8>}, {pipeline_mode = #tpu.pipeline_mode<synchronous>, transform_indices = @transform_4, window_bounds = array<i64: 584, 128>}, {pipeline_mode = #tpu.pipeline_mode<synchronous>, transform_indices = @transform_5, window_bounds = array<i64: 2, 1>}]} {
    %c0_i32 = arith.constant 0 : i32
    %0 = arith.cmpi eq, %arg0, %c0_i32 : i32
    %1 = arith.extui %0 : i1 to i32
    %c0_i32_0 = arith.constant 0 : i32
    %2 = arith.cmpi ne, %1, %c0_i32_0 : i32
    scf.if %2 {
      %cst_11 = arith.constant 0.000000e+00 : f32
      %16 = vector.broadcast %cst_11 : f32 to vector<2x128xf32>
      %c0_12 = arith.constant 0 : index
      %c0_13 = arith.constant 0 : index
      %17 = vector.load %arg7[%c0_12, %c0_13] : memref<2x128xf32, #tpu.memory_space<vmem>>, vector<2x128xf32>
      tpu.vector_store %arg7[%c0_12, %c0_13], %16 {strides = array<i32>} : memref<2x128xf32, #tpu.memory_space<vmem>>, vector<2x128xf32>,
    } else {
    }
    %c0 = arith.constant 0 : index
    %c0_1 = arith.constant 0 : index
    %3 = vector.load %arg1[%c0, %c0_1] : memref<1x25088xf32, #tpu.memory_space<vmem>>, vector<1x25088xf32>
    %4 = arith.truncf %3 : vector<1x25088xf32> to vector<1x25088xbf16>
    %c0_2 = arith.constant 0 : index
    %c0_3 = arith.constant 0 : index
    %5 = vector.load %arg2[%c0_2, %c0_3] : memref<1x25088xf32, #tpu.memory_space<vmem>>, vector<1x25088xf32>
    %6 = arith.truncf %5 : vector<1x25088xf32> to vector<1x25088xbf16>
    %7 = tpu.concatenate %4, %6 in 0 : vector<1x25088xbf16>, vector<1x25088xbf16> -> vector<2x25088xbf16>
    %c0_4 = arith.constant 0 : index
    %c0_5 = arith.constant 0 : index
    %8 = vector.load %arg7[%c0_4, %c0_5] : memref<2x128xf32, #tpu.memory_space<vmem>>, vector<2x128xf32>
    %c0_6 = arith.constant 0 : index
    %c0_7 = arith.constant 0 : index
    %9 = vector.load %arg3[%c0_6, %c0_7] : memref<25088x128xbf16, #tpu.memory_space<vmem>>, vector<25088x128xbf16>
    %cst = arith.constant dense<0.000000e+00> : vector<2x128xf32>
    %10 = tpu.matmul %7, %9, %cst {dimension_numbers = #tpu.dot_dimension_numbers<[1], [0], [0], [1], [0, 0, 1, 1], [], []>} : vector<2x25088xbf16>, vector<25088x128xbf16>, vector<2x128xf32> -> vector<2x128xf32>
    %11 = arith.addf %8, %10 : vector<2x128xf32>
    %c0_8 = arith.constant 0 : index
    %c0_9 = arith.constant 0 : index
    %12 = vector.load %arg7[%c0_8, %c0_9] : memref<2x128xf32, #tpu.memory_space<vmem>>, vector<2x128xf32>
    tpu.vector_store %arg7[%c0_8, %c0_9], %11 {strides = array<i32>} : memref<2x128xf32, #tpu.memory_space<vmem>>, vector<2x128xf32>,
    %c1_i32 = arith.constant 1 : i32
    %13 = arith.cmpi eq, %arg0, %c1_i32 : i32
    %14 = arith.extui %13 : i1 to i32
    %c0_i32_10 = arith.constant 0 : i32
    %15 = arith.cmpi ne, %14, %c0_i32_10 : i32
    scf.if %15 {
      %c0_11 = arith.constant 0 : index
      %c0_12 = arith.constant 0 : index
      %16 = vector.load %arg7[%c0_11, %c0_12] : memref<2x128xf32, #tpu.memory_space<vmem>>, vector<2x128xf32>
      %c568 = arith.constant 568 : index
      %c0_13 = arith.constant 0 : index
      %17 = vector.load %arg5[%c568, %c0_13] : memref<584x128xf32, #tpu.memory_space<vmem>>, vector<1x128xf32>
      %18 = vector.broadcast %17 : vector<1x128xf32> to vector<2x128xf32>
      %19 = arith.addf %16, %18 : vector<2x128xf32>
      %20 = vector.extract_strided_slice %19 {offsets = [0, 0], sizes = [1, 128], strides = [1, 1]} : vector<2x128xf32> to vector<1x128xf32>
      %c0_14 = arith.constant 0 : index
      %c0_15 = arith.constant 0 : index
      %21 = vector.load %arg5[%c0_14, %c0_15] : memref<584x128xf32, #tpu.memory_space<vmem>>, vector<128x128xf32>
      %cst_16 = arith.constant dense<0.000000e+00> : vector<1x128xf32>
      %22 = tpu.matmul %20, %21, %cst_16 {dimension_numbers = #tpu.dot_dimension_numbers<[1], [0], [0], [1], [0, 0, 1, 1], [], []>} : vector<1x128xf32>, vector<128x128xf32>, vector<1x128xf32> -> vector<1x128xf32>
      %23 = vector.extract_strided_slice %19 {offsets = [1, 0], sizes = [1, 128], strides = [1, 1]} : vector<2x128xf32> to vector<1x128xf32>
      %c128 = arith.constant 128 : index
      %c0_17 = arith.constant 0 : index
      %24 = vector.load %arg5[%c128, %c0_17] : memref<584x128xf32, #tpu.memory_space<vmem>>, vector<128x128xf32>
      %cst_18 = arith.constant dense<0.000000e+00> : vector<1x128xf32>
      %25 = tpu.matmul %23, %24, %cst_18 {dimension_numbers = #tpu.dot_dimension_numbers<[1], [0], [0], [1], [0, 0, 1, 1], [], []>} : vector<1x128xf32>, vector<128x128xf32>, vector<1x128xf32> -> vector<1x128xf32>
      %26 = arith.addf %22, %25 : vector<1x128xf32>
      %c569 = arith.constant 569 : index
      %c0_19 = arith.constant 0 : index
      %27 = vector.load %arg5[%c569, %c0_19] : memref<584x128xf32, #tpu.memory_space<vmem>>, vector<1x128xf32>
      %28 = arith.addf %26, %27 : vector<1x128xf32>
      %c256 = arith.constant 256 : index
      %c0_20 = arith.constant 0 : index
      %29 = vector.load %arg5[%c256, %c0_20] : memref<584x128xf32, #tpu.memory_space<vmem>>, vector<128x64xf32>
      %cst_21 = arith.constant dense<0.000000e+00> : vector<1x64xf32>
      %30 = tpu.matmul %28, %29, %cst_21 {dimension_numbers = #tpu.dot_dimension_numbers<[1], [0], [0], [1], [0, 0, 1, 1], [], []>} : vector<1x128xf32>, vector<128x64xf32>, vector<1x64xf32> -> vector<1x64xf32>
      %c570 = arith.constant 570 : index
      %c0_22 = arith.constant 0 : index
      %31 = vector.load %arg5[%c570, %c0_22] : memref<584x128xf32, #tpu.memory_space<vmem>>, vector<1x64xf32>
      %32 = arith.addf %30, %31 : vector<1x64xf32>
      %c384 = arith.constant 384 : index
      %c0_23 = arith.constant 0 : index
      %33 = vector.load %arg5[%c384, %c0_23] : memref<584x128xf32, #tpu.memory_space<vmem>>, vector<64x32xf32>
      %cst_24 = arith.constant dense<0.000000e+00> : vector<1x32xf32>
      %34 = tpu.matmul %32, %33, %cst_24 {dimension_numbers = #tpu.dot_dimension_numbers<[1], [0], [0], [1], [0, 0, 1, 1], [], []>} : vector<1x64xf32>, vector<64x32xf32>, vector<1x32xf32> -> vector<1x32xf32>
      %c571 = arith.constant 571 : index
      %c0_25 = arith.constant 0 : index
      %35 = vector.load %arg5[%c571, %c0_25] : memref<584x128xf32, #tpu.memory_space<vmem>>, vector<1x32xf32>
      %36 = arith.addf %34, %35 : vector<1x32xf32>
      %c0_26 = arith.constant 0 : index
      %c0_27 = arith.constant 0 : index
      %37 = vector.load %arg4[%c0_26, %c0_27] : memref<3x8xf32, #tpu.memory_space<vmem>>, vector<3x8xf32>
      %c512 = arith.constant 512 : index
      %c0_28 = arith.constant 0 : index
      %38 = vector.load %arg5[%c512, %c0_28] : memref<584x128xf32, #tpu.memory_space<vmem>>, vector<8x16xf32>
      %cst_29 = arith.constant dense<0.000000e+00> : vector<3x16xf32>
      %39 = tpu.matmul %37, %38, %cst_29 {dimension_numbers = #tpu.dot_dimension_numbers<[1], [0], [0], [1], [0, 0, 1, 1], [], []>} : vector<3x8xf32>, vector<8x16xf32>, vector<3x16xf32> -> vector<3x16xf32>
      %c572 = arith.constant 572 : index
      %c0_30 = arith.constant 0 : index
      %40 = vector.load %arg5[%c572, %c0_30] : memref<584x128xf32, #tpu.memory_space<vmem>>, vector<1x16xf32>
      %41 = vector.broadcast %40 : vector<1x16xf32> to vector<3x16xf32>
      %42 = arith.addf %39, %41 : vector<3x16xf32>
      %c520 = arith.constant 520 : index
      %c0_31 = arith.constant 0 : index
      %43 = vector.load %arg5[%c520, %c0_31] : memref<584x128xf32, #tpu.memory_space<vmem>>, vector<16x32xf32>
      %cst_32 = arith.constant dense<0.000000e+00> : vector<3x32xf32>
      %44 = tpu.matmul %42, %43, %cst_32 {dimension_numbers = #tpu.dot_dimension_numbers<[1], [0], [0], [1], [0, 0, 1, 1], [], []>} : vector<3x16xf32>, vector<16x32xf32>, vector<3x32xf32> -> vector<3x32xf32>
      %c573 = arith.constant 573 : index
      %c0_33 = arith.constant 0 : index
      %45 = vector.load %arg5[%c573, %c0_33] : memref<584x128xf32, #tpu.memory_space<vmem>>, vector<1x32xf32>
      %46 = vector.broadcast %45 : vector<1x32xf32> to vector<3x32xf32>
      %47 = arith.addf %44, %46 : vector<3x32xf32>
      %48 = vector.extract_strided_slice %47 {offsets = [0, 0], sizes = [1, 32], strides = [1, 1]} : vector<3x32xf32> to vector<1x32xf32>
      %49 = vector.extract_strided_slice %47 {offsets = [2, 0], sizes = [1, 32], strides = [1, 1]} : vector<3x32xf32> to vector<1x32xf32>
      %50 = tpu.concatenate %48, %49 in 0 : vector<1x32xf32>, vector<1x32xf32> -> vector<2x32xf32>
      %51 = vector.extract_strided_slice %47 {offsets = [1, 0], sizes = [1, 32], strides = [1, 1]} : vector<3x32xf32> to vector<1x32xf32>
      %52 = tpu.concatenate %51, %36 in 0 : vector<1x32xf32>, vector<1x32xf32> -> vector<2x32xf32>
      %c448 = arith.constant 448 : index
      %c0_34 = arith.constant 0 : index
      %53 = vector.load %arg5[%c448, %c0_34] : memref<584x128xf32, #tpu.memory_space<vmem>>, vector<32x32xf32>
      %cst_35 = arith.constant dense<0.000000e+00> : vector<2x32xf32>
      %54 = tpu.matmul %50, %53, %cst_35 {dimension_numbers = #tpu.dot_dimension_numbers<[1], [0], [0], [1], [0, 0, 1, 1], [], []>} : vector<2x32xf32>, vector<32x32xf32>, vector<2x32xf32> -> vector<2x32xf32>
      %c480 = arith.constant 480 : index
      %c0_36 = arith.constant 0 : index
      %55 = vector.load %arg5[%c480, %c0_36] : memref<584x128xf32, #tpu.memory_space<vmem>>, vector<32x32xf32>
      %cst_37 = arith.constant dense<0.000000e+00> : vector<2x32xf32>
      %56 = tpu.matmul %52, %55, %cst_37 {dimension_numbers = #tpu.dot_dimension_numbers<[1], [0], [0], [1], [0, 0, 1, 1], [], []>} : vector<2x32xf32>, vector<32x32xf32>, vector<2x32xf32> -> vector<2x32xf32>
      %57 = arith.addf %54, %56 : vector<2x32xf32>
      %c574 = arith.constant 574 : index
      %c0_38 = arith.constant 0 : index
      %58 = vector.load %arg5[%c574, %c0_38] : memref<584x128xf32, #tpu.memory_space<vmem>>, vector<1x32xf32>
      %59 = vector.broadcast %58 : vector<1x32xf32> to vector<2x32xf32>
      %60 = arith.addf %57, %59 : vector<2x32xf32>
      %c536 = arith.constant 536 : index
      %c0_39 = arith.constant 0 : index
      %61 = vector.load %arg5[%c536, %c0_39] : memref<584x128xf32, #tpu.memory_space<vmem>>, vector<32x8xf32>
      %cst_40 = arith.constant dense<0.000000e+00> : vector<2x8xf32>
      %62 = tpu.matmul %60, %61, %cst_40 {dimension_numbers = #tpu.dot_dimension_numbers<[1], [0], [0], [1], [0, 0, 1, 1], [], []>} : vector<2x32xf32>, vector<32x8xf32>, vector<2x8xf32> -> vector<2x8xf32>
      %c575 = arith.constant 575 : index
      %c0_41 = arith.constant 0 : index
      %63 = vector.load %arg5[%c575, %c0_41] : memref<584x128xf32, #tpu.memory_space<vmem>>, vector<1x8xf32>
      %64 = vector.broadcast %63 : vector<1x8xf32> to vector<2x8xf32>
      %65 = arith.addf %62, %64 : vector<2x8xf32>
      %c576 = arith.constant 576 : index
      %c0_42 = arith.constant 0 : index
      %66 = vector.load %arg5[%c576, %c0_42] : memref<584x128xf32, #tpu.memory_space<vmem>>, vector<1x8xf32>
      %67 = vector.broadcast %66 : vector<1x8xf32> to vector<2x8xf32>
      %68 = arith.mulf %65, %67 : vector<2x8xf32>
      %cst_43 = arith.constant dense<0.000000e+00> : vector<2xf32>
      %69 = vector.multi_reduction <add>, %68, %cst_43 [1] : vector<2x8xf32> to vector<2xf32>
      %70 = vector.shape_cast %69 : vector<2xf32> to vector<2x1xf32>
      %c577 = arith.constant 577 : index
      %c0_44 = arith.constant 0 : index
      %71 = vector.load %arg5[%c577, %c0_44] : memref<584x128xf32, #tpu.memory_space<vmem>>, vector<1x1xf32>
      %72 = vector.broadcast %71 : vector<1x1xf32> to vector<2x1xf32>
      %73 = arith.addf %70, %72 : vector<2x1xf32>
      %c0_45 = arith.constant 0 : index
      %c0_46 = arith.constant 0 : index
      %74 = vector.load %arg6[%c0_45, %c0_46] : memref<2x1xf32, #tpu.memory_space<vmem>>, vector<2x1xf32>
      tpu.vector_store %arg6[%c0_45, %c0_46], %73 {strides = array<i32>} : memref<2x1xf32, #tpu.memory_space<vmem>>, vector<2x1xf32>,
    } else {
    }
    return
  }
  func.func @transform_0(%arg0: i32) -> (i32, i32) {
    %c0_i32 = arith.constant 0 : i32
    %c0_i32_0 = arith.constant 0 : i32
    return %c0_i32, %arg0 : i32, i32
  }
  func.func @transform_1(%arg0: i32) -> (i32, i32) {
    %c0_i32 = arith.constant 0 : i32
    %c0_i32_0 = arith.constant 0 : i32
    return %c0_i32, %arg0 : i32, i32
  }
  func.func @transform_2(%arg0: i32) -> (i32, i32) {
    %c0_i32 = arith.constant 0 : i32
    %c0_i32_0 = arith.constant 0 : i32
    return %arg0, %c0_i32 : i32, i32
  }
  func.func @transform_3(%arg0: i32) -> (i32, i32) {
    %c0_i32 = arith.constant 0 : i32
    %c0_i32_0 = arith.constant 0 : i32
    %c0_i32_1 = arith.constant 0 : i32
    return %c0_i32, %c0_i32_0 : i32, i32
  }
  func.func @transform_4(%arg0: i32) -> (i32, i32) {
    %c0_i32 = arith.constant 0 : i32
    %c0_i32_0 = arith.constant 0 : i32
    %c0_i32_1 = arith.constant 0 : i32
    return %c0_i32, %c0_i32_0 : i32, i32
  }
  func.func @transform_5(%arg0: i32) -> (i32, i32) {
    %c0_i32 = arith.constant 0 : i32
    %c0_i32_0 = arith.constant 0 : i32
    %c0_i32_1 = arith.constant 0 : i32
    return %c0_i32, %c0_i32_0 : i32, i32
  }
}

</mosaic_0001>

<bundles_post_ra>
// kernel: critic_forward.1
= control target key start
LH: loop header
LB: loop body
LE: loop exit
PB: predicated region body
PF: predicated region fallthrough
CT: control target
= control target key end

     0   :  { %s26716_s18 = smov 0   ;;  %s30092_s0 = inlined_call_operand.vmem [shape: f32[1,50176], index: 0, kind: input, shape index: {}]   ;;  %s30093_s1 = inlined_call_operand.vmem [shape: f32[1,50176], index: 1, kind: input, shape index: {}]   ;;  %s30094_s2 = inlined_call_operand.vmem [shape: bf16[50176,128], index: 2, kind: input, shape index: {}]   ;;  %s30095_s3 = inlined_call_operand.vmem [shape: f32[3,8], index: 3, kind: input, shape index: {}]   ;;  %s30096_s4 = inlined_call_operand.vmem [shape: f32[584,128], index: 4, kind: input, shape index: {}]   ;;  %s30097_s5 = inlined_call_operand.vmem [shape: f32[2,1], index: 5, kind: output, shape index: {}]  }
   0x1 LB: > { %s26722_s19 = sadd.s32 4294967295, %s26680_s18   ;;  %p20997_p0 = scmp.ge.s32.totalorder %s26680_s18, 1  ;;  %s26680_s18 = sphi %s26716_s18, %s15_s18  }
   0x2   : > { %p203_p1 = scmp.lt.s32.totalorder %s26680_s18, 3 }
   0x4   : > { %p204_p2 = pnand %p20997_p0, %p203_p1 }
   0x5   : > { %s234_s20 = smul.u32 (!%p204_p2), 196, %s26722_s19  ;;  %p20999_p5 = scmp.ne.s32.totalorder (!%p204_p2), %s26722_s19, 0 }
   0x6   : > { %207 = sbr.rel (%p204_p2) target bundleno = 3268 (0xcc4), region = 40 }
   0x7   : > { %s244_s21 = smul.u32 (!%p204_p2), 3136, %s26722_s19  ;;  %p235_p3 = scmp.lt.s32.totalorder (!%p204_p2), %s234_s20, 391 }
   0x9   : > { %p245_p4 = scmp.lt.s32.totalorder (!%p204_p2), %s244_s21, 6271 }
   0xd   : > { %s30101_s20 = smov (!%p235_p3, %s234_s20), 391  ;;  %s30103_s21 = smov (!%p245_p4, %s244_s21), 6271 }
   0xe   : > { %s26731_s24 = scalar_lea.vmem %s30092_s0, %s30101_s20  ;;  %s26736_s27 = scalar_lea.vmem %s30093_s1, %s30101_s20  ;;  %v26682_v0 = vmov (!%p20999_p5), 0.0  }
   0xf   : > { %s20998_s28 = sshll.u32 %s30103_s21, 2  ;;  %254 = sbr.rel (%p20999_p5) target bundleno = 22 (0x16), region = 44  ;;  %255 = vst [vmem:[#allocation2] sm:$0x3] (!%p20999_p5), %v26682_v0 }
  0x10   : > { %s26741_s6 = scalar_lea.vmem %s30094_s2, %s20998_s28 }
  0x16 PF: > { %v25106_v1 = vld [vmem:[%s26741_s6 + $0x40] sm:$0xff]   ;;  %v25110_v5 = vld [vmem:[%s26741_s6 + $0x48] sm:$0xff]   ;;  %v25114_v9 = vld [vmem:[%s26741_s6 + $0x50] sm:$0xff]   ;;  %v306_v20 = vlaneseq  ;;  %vm3492_vm0 = vcmask 1040384   ;;  %vm3493_vm1 = vsmask.f32 256 }
  0x17   : > { %v25107_v2 = vld [vmem:[%s26741_s6 + $0xc0] sm:$0xff]   ;;  %22584 = vmatprep.subr.bf16.mxu0 %v25106_v1  ;;  %v25111_v6 = vld [vmem:[%s26741_s6 + $0xc8] sm:$0xff]   ;;  %v25115_v10 = vld [vmem:[%s26741_s6 + $0xd0] sm:$0xff]   ;;  %p22568_p6 = scmp.ne.s32.totalorder %s26722_s19, 1 }
  0x18   : > { %v25108_v3 = vld [vmem:[%s26741_s6] sm:$0xff]   ;;  %22606 = vmatprep.subr.bf16.mxu1 %v25107_v2  ;;  %v25112_v7 = vld [vmem:[%s26741_s6 + $0x8] sm:$0xff]   ;;  %v25116_v11 = vld [vmem:[%s26741_s6 + $0x10] sm:$0xff]   ;;  %v26767_v25 = vshrl.u32 %v306_v20, 7  ;;  %vm26684_vm3 = vmmov (!%p22568_p6), 0   ;;  %vm20442_vm4 = vcmask (!%p22568_p6), 523264  }
  0x19   : > { %v25109_v4 = vld [vmem:[%s26741_s6 + $0x80] sm:$0xff]   ;;  %22585 = vmatpush3.bf16.msra.mxu0 %v25108_v3  ;;  %v25113_v8 = vld [vmem:[%s26741_s6 + $0x88] sm:$0xff]   ;;  %v25117_v12 = vld [vmem:[%s26741_s6 + $0x90] sm:$0xff]   ;;  %vm20523_vm5 = vcmask (!%p22568_p6), 64512   ;;  %vm20604_vm6 = vcmask (!%p22568_p6), 130048   ;;  %vm20695_vm7 = vcmask (!%p22568_p6), 261120  }
  0x1a   : > { %22607 = vmatpush3.bf16.msra.mxu1 %v25109_v4  ;;  %22586 = vmatprep.subr.bf16.mxu0 %v25110_v5  ;;  %v25118_v13 = vld [vmem:[%s26741_s6 + $0x58] sm:$0xff]   ;;  %v25122_v17 = vld [vmem:[%s26741_s6 + $0x60] sm:$0xff]   ;;  %v25126_v22 = vld [vmem:[%s26741_s6 + $0x68] sm:$0xff]   ;;  %v26774_v30 = vsub.s32 1, %v26767_v25  ;;  %v26778_v32 = vsub.s32 3, %v26767_v25  ;;  %v26782_v34 = vsub.s32 0, %v26767_v25 }
  0x1b   : > { %22608 = vmatprep.subr.bf16.mxu1 %v25111_v6  ;;  %v25119_v14 = vld [vmem:[%s26741_s6 + $0xd8] sm:$0xff]   ;;  %v25123_v18 = vld [vmem:[%s26741_s6 + $0xe0] sm:$0xff]   ;;  %v25127_v23 = vld [vmem:[%s26741_s6 + $0xe8] sm:$0xff]   ;;  %v26786_v36 = vsub.s32 2, %v26767_v25  ;;  %v26790_v38 = vsub.s32 5, %v26767_v25  ;;  %v26794_v40 = vsub.s32 7, %v26767_v25 }
  0x1c   : > { %v25120_v15 = vld [vmem:[%s26741_s6 + $0x18] sm:$0xff]   ;;  %v25124_v19 = vld [vmem:[%s26741_s6 + $0x20] sm:$0xff]   ;;  %v25128_v24 = vld [vmem:[%s26741_s6 + $0x28] sm:$0xff]   ;;  %vm20936_vm8 = vcmask (!%p22568_p6), 58368   ;;  %vm20946_vm9 = vcmask (!%p22568_p6), 1024  }
  0x1d   : > { %22587 = vmatpush3.bf16.msra.mxu0 %v25112_v7  ;;  %v25121_v16 = vld [vmem:[%s26741_s6 + $0x98] sm:$0xff]   ;;  %v25125_v21 = vld [vmem:[%s26741_s6 + $0xa0] sm:$0xff]   ;;  %v25129_v26 = vld [vmem:[%s26741_s6 + $0xa8] sm:$0xff]  }
  0x1e   : > { %22609 = vmatpush3.bf16.msra.mxu1 %v25113_v8  ;;  %22588 = vmatprep.subr.bf16.mxu0 %v25114_v9  ;;  %v25130_v27 = vld [vmem:[%s26741_s6 + $0x70] sm:$0xff]   ;;  %v25134_v33 = vld [vmem:[%s26741_s6 + $0x78] sm:$0xff]   ;;  %v26797_v41 = vld [vmem:[%s26731_s24] sm:$0xff] }
  0x1f   : > { %22610 = vmatprep.subr.bf16.mxu1 %v25115_v10  ;;  %v25131_v28 = vld [vmem:[%s26741_s6 + $0xf0] sm:$0xff]   ;;  %v25135_v35 = vld [vmem:[%s26741_s6 + $0xf8] sm:$0xff]   ;;  %v26800_v42 = vld [vmem:[%s26736_s27] sm:$0xff]  ;;  %v313_v43 = vrot.slane %v26797_v41, %v26774_v30  ;;  %v321_v45 = vrot.slane %v26797_v41, %v26778_v32  ;;  %v309_v48 = vrot.slane %v26797_v41, %v26782_v34  ;;  %v317_v50 = vrot.slane %v26797_v41, %v26786_v36 }
  0x20   : > { %v25132_v29 = vld [vmem:[%s26741_s6 + $0x30] sm:$0xff]   ;;  %v25136_v37 = vld [vmem:[%s26741_s6 + $0x38] sm:$0xff]   ;;  %v1539_v44 = vrot.slane %v26800_v42, %v26774_v30  ;;  %v1547_v46 = vrot.slane %v26800_v42, %v26778_v32  ;;  %v25138_v47 = vld [vmem:[%s26741_s6 + $0x140] sm:$0xff]   ;;  %v1535_v49 = vrot.slane %v26800_v42, %v26782_v34  ;;  %v1543_v51 = vrot.slane %v26800_v42, %v26786_v36 }
  0x21   : > { %22589 = vmatpush3.bf16.msra.mxu0 %v25116_v11  ;;  %v25133_v31 = vld [vmem:[%s26741_s6 + $0xb0] sm:$0xff]   ;;  %v25137_v39 = vld [vmem:[%s26741_s6 + $0xb8] sm:$0xff]   ;;  %v25139_v52 = vld [vmem:[%s26741_s6 + $0x1c0] sm:$0xff]   ;;  %v1287_v53 = vpack.c.bf16 %v313_v43, %v313_v43  ;;  %v1289_v56 = vpack.c.bf16 %v321_v45, %v321_v45  ;;  %v1286_v58 = vpack.c.bf16 %v309_v48, %v309_v48  ;;  %v1288_v60 = vpack.c.bf16 %v317_v50, %v317_v50 }
  0x22   : > { %22611 = vmatpush3.bf16.msra.mxu1 %v25117_v12  ;;  %22590 = vmatprep.subr.bf16.mxu0 %v25118_v13  ;;  %v2513_v54 = vpack.c.bf16 %v1539_v44, %v1539_v44  ;;  %vm26821_vm2 = vmand %vm3492_vm0, %vm3493_vm1  ;;  %v2515_v57 = vpack.c.bf16 %v1547_v46, %v1547_v46  ;;  %v2512_v59 = vpack.c.bf16 %v1535_v49, %v1535_v49  ;;  %v25140_v62 = vld [vmem:[%s26741_s6 + $0x100] sm:$0xff]   ;;  %v25142_v6 = vld [vmem:[%s26741_s6 + $0x148] sm:$0xff]   ;;  %v26864_v45 = vsub.s32 4, %v26767_v25 }
  0x23   : > { %22612 = vmatprep.subr.bf16.mxu1 %v25119_v14  ;;  %v2514_v61 = vpack.c.bf16 %v1543_v51, %v1543_v51  ;;  %v25141_v63 = vld [vmem:[%s26741_s6 + $0x180] sm:$0xff]   ;;  %v329_v2 = vrot.slane %v26797_v41, %v26790_v38  ;;  %v1555_v3 = vrot.slane %v26800_v42, %v26790_v38  ;;  %v25143_v7 = vld [vmem:[%s26741_s6 + $0x1c8] sm:$0xff]   ;;  %v337_v8 = vrot.slane %v26797_v41, %v26794_v40 }
  0x24   : > { %v2712_v0 = vshll.u32 %v2513_v54, 16  ;;  %v2718_v1 = vshll.u32 %v2515_v57, 16  ;;  %v2709_v4 = vshll.u32 %v2512_v59, 16  ;;  %v1563_v9 = vrot.slane %v26800_v42, %v26794_v40  ;;  %v25156_v43 = vld [vmem:[%s26741_s6 + $0x120] sm:$0xff]   ;;  %v25158_v46 = vld [vmem:[%s26741_s6 + $0x168] sm:$0xff]   ;;  %v25164_v54 = vld [vmem:[%s26741_s6 + $0x130] sm:$0xff]  }
  0x25   : > { %22591 = vmatpush3.bf16.msra.mxu0 %v25120_v15  ;;  %v2715_v5 = vshll.u32 %v2514_v61, 16  ;;  %v1291_v12 = vpack.c.bf16 %v329_v2, %v329_v2  ;;  %v2517_v13 = vpack.c.bf16 %v1555_v3, %v1555_v3  ;;  %v25157_v44 = vld [vmem:[%s26741_s6 + $0x1a0] sm:$0xff]   ;;  %v25159_v48 = vld [vmem:[%s26741_s6 + $0x1e8] sm:$0xff]   ;;  %v1551_v51 = vrot.slane %v26800_v42, %v26864_v45  ;;  %v25167_v61 = vld [vmem:[%s26741_s6 + $0x1f8] sm:$0xff]  }
  0x26   : > { %22613 = vmatpush3.bf16.msra.mxu1 %v25121_v16  ;;  %22592 = vmatprep.subr.bf16.mxu0 %v25122_v17  ;;  %v3496_v10 = vsel %vm26821_vm2, %v1287_v53, %v2712_v0  ;;  %v3498_v11 = vsel %vm26821_vm2, %v1289_v56, %v2718_v1  ;;  %v3495_v14 = vsel %vm26821_vm2, %v1286_v58, %v2709_v4  ;;  %v25144_v16 = vld [vmem:[%s26741_s6 + $0x108] sm:$0xff]   ;;  %v25165_v56 = vld [vmem:[%s26741_s6 + $0x1b0] sm:$0xff]   ;;  %v25166_v58 = vld [vmem:[%s26741_s6 + $0x178] sm:$0xff]  }
  0x27   : > { %22614 = vmatprep.subr.bf16.mxu1 %v25123_v18  ;;  %16268 = vmatprep.mubr.bf16.mxu0 %v3496_v10  ;;  %v3497_v15 = vsel %vm26821_vm2, %v1288_v60, %v2715_v5  ;;  %v25145_v17 = vld [vmem:[%s26741_s6 + $0x188] sm:$0xff]   ;;  %v2724_v18 = vshll.u32 %v2517_v13, 16  ;;  %v2519_v20 = vpack.c.bf16 %v1563_v9, %v1563_v9  ;;  %v2516_v57 = vpack.c.bf16 %v1551_v51, %v1551_v51  ;;  %v25170_v4 = vld [vmem:[%s26741_s6 + $0x240] sm:$0xff]   ;;  %v25178_v13 = vld [vmem:[%s26741_s6 + $0x250] sm:$0xff]  }
  0x28   : > { %16308 = vmatprep.mubr.bf16.mxu1 %v3498_v11  ;;  %v25160_v49 = vld [vmem:[%s26741_s6 + $0x128] sm:$0xff]   ;;  %v325_v59 = vrot.slane %v26797_v41, %v26864_v45  ;;  %v25172_v5 = vld [vmem:[%s26741_s6 + $0x200] sm:$0xff]  }
  0x29   : > { %22593 = vmatpush3.bf16.msra.mxu0 %v25124_v19  ;;  %v1293_v19 = vpack.c.bf16 %v337_v8, %v337_v8  ;;  %v25161_v50 = vld [vmem:[%s26741_s6 + $0x1a8] sm:$0xff]   ;;  %v2721_v0 = vshll.u32 %v2516_v57, 16  ;;  %v25203_v57 = vld [vmem:[%s26741_s6 + $0x3c0] sm:$0xff]  }
  0x2a   : > { %22615 = vmatpush3.bf16.msra.mxu1 %v25125_v21  ;;  %22594 = vmatprep.subr.bf16.mxu0 %v25126_v22  ;;  %v25146_v21 = vld [vmem:[%s26741_s6 + $0x150] sm:$0xff]   ;;  %v1290_v1 = vpack.c.bf16 %v325_v59, %v325_v59  ;;  %v25174_v9 = vld [vmem:[%s26741_s6 + $0x248] sm:$0xff]  }
  0x2b   : > { %22616 = vmatprep.subr.bf16.mxu1 %v25127_v23  ;;  %v25147_v22 = vld [vmem:[%s26741_s6 + $0x1d0] sm:$0xff]   ;;  %v3500_v23 = vsel %vm26821_vm2, %v1291_v12, %v2724_v18  ;;  %v25175_v10 = vld [vmem:[%s26741_s6 + $0x2c8] sm:$0xff]   ;;  %v25183_v18 = vld [vmem:[%s26741_s6 + $0x2d8] sm:$0xff]  }
  0x2c   : > { %v25176_v11 = vld [vmem:[%s26741_s6 + $0x208] sm:$0xff]  }
  0x2d   : > { %22595 = vmatpush3.bf16.msra.mxu0 %v25128_v24  ;;  %v2730_v24 = vshll.u32 %v2519_v20, 16  ;;  %v25177_v12 = vld [vmem:[%s26741_s6 + $0x288] sm:$0xff]   ;;  %v25185_v20 = vld [vmem:[%s26741_s6 + $0x298] sm:$0xff]  }
  0x2e   : > { %22617 = vmatpush3.bf16.msra.mxu1 %v25129_v26  ;;  %22596 = vmatprep.subr.bf16.mxu0 %v25130_v27  ;;  %v25148_v26 = vld [vmem:[%s26741_s6 + $0x110] sm:$0xff]  }
  0x2f   : > { %22618 = vmatprep.subr.bf16.mxu1 %v25131_v28  ;;  %v25149_v27 = vld [vmem:[%s26741_s6 + $0x190] sm:$0xff]   ;;  %v3502_v28 = vsel %vm26821_vm2, %v1293_v19, %v2730_v24  ;;  %v25184_v19 = vld [vmem:[%s26741_s6 + $0x218] sm:$0xff]   ;;  %v25189_v24 = vld [vmem:[%s26741_s6 + $0x2a0] sm:$0xff]  }
  0x31   : > { %22597 = vmatpush3.bf16.msra.mxu0 %v25132_v29  ;;  %v25150_v29 = vld [vmem:[%s26741_s6 + $0x158] sm:$0xff]  }
  0x32   : > { %22619 = vmatpush3.bf16.msra.mxu1 %v25133_v31  ;;  %22598 = vmatprep.subr.bf16.mxu0 %v25134_v33  ;;  %v25151_v31 = vld [vmem:[%s26741_s6 + $0x1d8] sm:$0xff]  }
  0x33   : > { %22620 = vmatprep.subr.bf16.mxu1 %v25135_v35  ;;  %v25152_v33 = vld [vmem:[%s26741_s6 + $0x118] sm:$0xff]  }
  0x34   : > { %v25153_v35 = vld [vmem:[%s26741_s6 + $0x198] sm:$0xff]  }
  0x35   : > { %22599 = vmatpush3.bf16.msra.mxu0 %v25136_v37  ;;  %v25154_v37 = vld [vmem:[%s26741_s6 + $0x160] sm:$0xff]  }
  0x36   : > { %22621 = vmatpush3.bf16.msra.mxu1 %v25137_v39  ;;  %22628 = vmatprep.subr.bf16.mxu0 %v25138_v47  ;;  %v25155_v39 = vld [vmem:[%s26741_s6 + $0x1e0] sm:$0xff]   ;;  %v26868_v47 = vsub.s32 6, %v26767_v25  ;;  %v25163_v25 = vld [vmem:[%s26741_s6 + $0x1f0] sm:$0xff]  }
  0x37   : > { %22650 = vmatprep.subr.bf16.mxu1 %v25139_v52  ;;  %v25162_v52 = vld [vmem:[%s26741_s6 + $0x170] sm:$0xff]  }
  0x38   : > { %16269 = vmatmul.mubr.bf16.vlgmr.msra.gmra.mrb[0].mxu0 %v3495_v14  ;;  %v1559_v53 = vrot.slane %v26800_v42, %v26868_v47  ;;  %v333_v60 = vrot.slane %v26797_v41, %v26868_v47  ;;  %v25171_v41 = vld [vmem:[%s26741_s6 + $0x2c0] sm:$0xff]   ;;  %v25179_v14 = vld [vmem:[%s26741_s6 + $0x2d0] sm:$0xff]  }
  0x39   : > { %16309 = vmatmul.mubr.bf16.vlgmr.msra.gmra.mrb[0].mxu1 %v3497_v15  ;;  %22629 = vmatpush3.bf16.msra.mxu0 %v25140_v62  ;;  %v25168_v62 = vld [vmem:[%s26741_s6 + $0x138] sm:$0xff]   ;;  %v25180_v15 = vld [vmem:[%s26741_s6 + $0x210] sm:$0xff]  }
  0x3a   : > { %22651 = vmatpush3.bf16.msra.mxu1 %v25141_v63  ;;  %22630 = vmatprep.subr.bf16.mxu0 %v25142_v6  ;;  %v2518_v42 = vpack.c.bf16 %v1559_v53, %v1559_v53  ;;  %v25169_v63 = vld [vmem:[%s26741_s6 + $0x1b8] sm:$0xff]   ;;  %v1292_v2 = vpack.c.bf16 %v333_v60, %v333_v60  ;;  %v25173_v6 = vld [vmem:[%s26741_s6 + $0x280] sm:$0xff]  }
  0x3b   : > { %22652 = vmatprep.subr.bf16.mxu1 %v25143_v7  ;;  %16348 = vmatprep.mubr.bf16.mxu0 %v3500_v23  ;;  %v3499_v7 = vsel %vm26821_vm2, %v1290_v1, %v2721_v0  ;;  %v25188_v23 = vld [vmem:[%s26741_s6 + $0x220] sm:$0xff]  }
  0x3c   : > { %16388 = vmatprep.mubr.bf16.mxu1 %v3502_v28  ;;  %v2727_v3 = vshll.u32 %v2518_v42, 16  ;;  %v25192_v28 = vld [vmem:[%s26741_s6 + $0x228] sm:$0xff]   ;;  %v25202_v53 = vld [vmem:[%s26741_s6 + $0x340] sm:$0xff]  }
  0x3d   : > { %22631 = vmatpush3.bf16.msra.mxu0 %v25144_v16  ;;  %v25181_v16 = vld [vmem:[%s26741_s6 + $0x290] sm:$0xff]  }
  0x3e   : > { %22653 = vmatpush3.bf16.msra.mxu1 %v25145_v17  ;;  %22632 = vmatprep.subr.bf16.mxu0 %v25146_v21  ;;  %v3501_v8 = vsel %vm26821_vm2, %v1292_v2, %v2727_v3  ;;  %v25182_v17 = vld [vmem:[%s26741_s6 + $0x258] sm:$0xff]   ;;  %v25186_v21 = vld [vmem:[%s26741_s6 + $0x260] sm:$0xff]  }
  0x3f   : > { %22654 = vmatprep.subr.bf16.mxu1 %v25147_v22  ;;  %v25187_v22 = vld [vmem:[%s26741_s6 + $0x2e0] sm:$0xff]  }
  0x40   : > { %v25204_v3 = vld [vmem:[%s26741_s6 + $0x300] sm:$0xff]  }
  0x41   : > { %22633 = vmatpush3.bf16.msra.mxu0 %v25148_v26  ;;  %v25190_v26 = vld [vmem:[%s26741_s6 + $0x268] sm:$0xff]  }
  0x42   : > { %22655 = vmatpush3.bf16.msra.mxu1 %v25149_v27  ;;  %22634 = vmatprep.subr.bf16.mxu0 %v25150_v29  ;;  %v25191_v27 = vld [vmem:[%s26741_s6 + $0x2e8] sm:$0xff]  }
  0x43   : > { %22656 = vmatprep.subr.bf16.mxu1 %v25151_v31  ;;  %v25193_v29 = vld [vmem:[%s26741_s6 + $0x2a8] sm:$0xff]   ;;  %v25194_v31 = vld [vmem:[%s26741_s6 + $0x270] sm:$0xff]  }
  0x45   : > { %22635 = vmatpush3.bf16.msra.mxu0 %v25152_v33  ;;  %v25195_v33 = vld [vmem:[%s26741_s6 + $0x2f0] sm:$0xff]  }
  0x46   : > { %22657 = vmatpush3.bf16.msra.mxu1 %v25153_v35  ;;  %22636 = vmatprep.subr.bf16.mxu0 %v25154_v37  ;;  %v25196_v35 = vld [vmem:[%s26741_s6 + $0x230] sm:$0xff]  }
  0x47   : > { %22658 = vmatprep.subr.bf16.mxu1 %v25155_v39  ;;  %v25197_v37 = vld [vmem:[%s26741_s6 + $0x2b0] sm:$0xff]   ;;  %v25198_v39 = vld [vmem:[%s26741_s6 + $0x278] sm:$0xff]  }
  0x49   : > { %22637 = vmatpush3.bf16.msra.mxu0 %v25156_v43  ;;  %v25199_v43 = vld [vmem:[%s26741_s6 + $0x2f8] sm:$0xff]  }
  0x4a   : > { %22659 = vmatpush3.bf16.msra.mxu1 %v25157_v44  ;;  %22638 = vmatprep.subr.bf16.mxu0 %v25158_v46  ;;  %v25200_v44 = vld [vmem:[%s26741_s6 + $0x238] sm:$0xff]  }
  0x4b   : > { %22660 = vmatprep.subr.bf16.mxu1 %v25159_v48  ;;  %v25201_v46 = vld [vmem:[%s26741_s6 + $0x2b8] sm:$0xff]   ;;  %v26926_v48 = vld [vmem:[%s26731_s24 + $0x8] sm:$0xff] }
  0x4c   : > { %v349_v42 = vrot.slane %v26926_v48, %v26786_v36 }
  0x4d   : > { %22639 = vmatpush3.bf16.msra.mxu0 %v25160_v49  ;;  %v26929_v49 = vld [vmem:[%s26736_s27 + $0x8] sm:$0xff] }
  0x4e   : > { %22661 = vmatpush3.bf16.msra.mxu1 %v25161_v50  ;;  %22640 = vmatprep.subr.bf16.mxu0 %v25162_v52  ;;  %v345_v50 = vrot.slane %v26926_v48, %v26774_v30  ;;  %v1571_v51 = vrot.slane %v26929_v49, %v26774_v30  ;;  %v353_v52 = vrot.slane %v26926_v48, %v26778_v32 }
  0x4f   : > { %22662 = vmatprep.subr.bf16.mxu1 %v25163_v25  ;;  %v1579_v25 = vrot.slane %v26929_v49, %v26778_v32  ;;  %v1575_v0 = vrot.slane %v26929_v49, %v26786_v36  ;;  %v1296_v2 = vpack.c.bf16 %v349_v42, %v349_v42  ;;  %v25228_v42 = vld [vmem:[%s26741_s6 + $0x330] sm:$0xff]  }
  0x50   : > { %v2521_v59 = vpack.c.bf16 %v1571_v51, %v1571_v51  ;;  %v1297_v60 = vpack.c.bf16 %v353_v52, %v353_v52  ;;  %v25220_v51 = vld [vmem:[%s26741_s6 + $0x320] sm:$0xff]  }
  0x51   : > { %22641 = vmatpush3.bf16.msra.mxu0 %v25164_v54  ;;  %v341_v54 = vrot.slane %v26926_v48, %v26782_v34  ;;  %v25221_v52 = vld [vmem:[%s26741_s6 + $0x3a0] sm:$0xff]  }
  0x52   : > { %22663 = vmatpush3.bf16.msra.mxu1 %v25165_v56  ;;  %22642 = vmatprep.subr.bf16.mxu0 %v25166_v58  ;;  %v1567_v56 = vrot.slane %v26929_v49, %v26782_v34  ;;  %v1295_v58 = vpack.c.bf16 %v345_v50, %v345_v50  ;;  %v2736_v1 = vshll.u32 %v2521_v59, 16  ;;  %v25219_v50 = vld [vmem:[%s26741_s6 + $0x3e0] sm:$0xff]   ;;  %v25227_v59 = vld [vmem:[%s26741_s6 + $0x3f0] sm:$0xff]  }
  0x53   : > { %22664 = vmatprep.subr.bf16.mxu1 %v25167_v61  ;;  %v2523_v61 = vpack.c.bf16 %v1579_v25, %v1579_v25  ;;  %v25223_v25 = vld [vmem:[%s26741_s6 + $0x3e8] sm:$0xff]  }
  0x55   : > { %22643 = vmatpush3.bf16.msra.mxu0 %v25168_v62  ;;  %v1294_v62 = vpack.c.bf16 %v341_v54, %v341_v54  ;;  %v25224_v54 = vld [vmem:[%s26741_s6 + $0x328] sm:$0xff]  }
  0x56   : > { %22665 = vmatpush3.bf16.msra.mxu1 %v25169_v63  ;;  %22672 = vmatprep.subr.bf16.mxu0 %v25170_v4  ;;  %v2520_v63 = vpack.c.bf16 %v1567_v56, %v1567_v56  ;;  %v361_v4 = vrot.slane %v26926_v48, %v26790_v38  ;;  %v25225_v56 = vld [vmem:[%s26741_s6 + $0x3a8] sm:$0xff]  }
  0x57   : > { %22694 = vmatprep.subr.bf16.mxu1 %v25171_v41  ;;  %v1587_v41 = vrot.slane %v26929_v49, %v26790_v38 }
  0x58   : > { %16349 = vmatmul.mubr.bf16.vlgmr.msra.gmra.mrb[4].mxu0 %v3499_v7  ;;  %v2522_v7 = vpack.c.bf16 %v1575_v0, %v1575_v0  ;;  %v25230_v0 = vld [vmem:[%s26741_s6 + $0x378] sm:$0xff]  }
  0x59   : > { %16389 = vmatmul.mubr.bf16.vlgmr.msra.gmra.mrb[4].mxu1 %v3501_v8  ;;  %22673 = vmatpush3.bf16.msra.mxu0 %v25172_v5  ;;  %v2742_v5 = vshll.u32 %v2523_v61, 16  ;;  %v25205_v8 = vld [vmem:[%s26741_s6 + $0x380] sm:$0xff]   ;;  %v25229_v61 = vld [vmem:[%s26741_s6 + $0x3b0] sm:$0xff]  }
  0x5a   : > { %22695 = vmatpush3.bf16.msra.mxu1 %v25173_v6  ;;  %22674 = vmatprep.subr.bf16.mxu0 %v25174_v9  ;;  %v2733_v6 = vshll.u32 %v2520_v63, 16  ;;  %v369_v9 = vrot.slane %v26926_v48, %v26794_v40 }
  0x5b   : > { %22696 = vmatprep.subr.bf16.mxu1 %v25175_v10  ;;  %v3504_v10 = vsel %vm26821_vm2, %v1295_v58, %v2736_v1  ;;  %v25226_v58 = vld [vmem:[%s26741_s6 + $0x370] sm:$0xff]   ;;  %v25231_v1 = vld [vmem:[%s26741_s6 + $0x3f8] sm:$0xff]  }
  0x5c   : > { %16428 = vmatprep.mubr.bf16.mxu0 %v3504_v10 }
  0x5d   : > { %22675 = vmatpush3.bf16.msra.mxu0 %v25176_v11  ;;  %v25206_v11 = vld [vmem:[%s26741_s6 + $0x348] sm:$0xff]  }
  0x5e   : > { %22697 = vmatpush3.bf16.msra.mxu1 %v25177_v12  ;;  %22676 = vmatprep.subr.bf16.mxu0 %v25178_v13  ;;  %v1299_v12 = vpack.c.bf16 %v361_v4, %v361_v4  ;;  %v2525_v13 = vpack.c.bf16 %v1587_v41, %v1587_v41  ;;  %v25233_v4 = vld [vmem:[%s26741_s6 + $0x3b8] sm:$0xff]  }
  0x5f   : > { %22698 = vmatprep.subr.bf16.mxu1 %v25179_v14  ;;  %v1595_v14 = vrot.slane %v26929_v49, %v26794_v40 }
  0x61   : > { %22677 = vmatpush3.bf16.msra.mxu0 %v25180_v15  ;;  %v3506_v15 = vsel %vm26821_vm2, %v1297_v60, %v2742_v5  ;;  %v1591_v60 = vrot.slane %v26929_v49, %v26868_v47 }
  0x62   : > { %22699 = vmatpush3.bf16.msra.mxu1 %v25181_v16  ;;  %22678 = vmatprep.subr.bf16.mxu0 %v25182_v17  ;;  %v3503_v16 = vsel %vm26821_vm2, %v1294_v62, %v2733_v6  ;;  %v2739_v17 = vshll.u32 %v2522_v7, 16  ;;  %v357_v62 = vrot.slane %v26926_v48, %v26864_v45  ;;  %v25234_v6 = vld [vmem:[%s26741_s6 + $0x440] sm:$0xff]  }
  0x63   : > { %22700 = vmatprep.subr.bf16.mxu1 %v25183_v18  ;;  %v25207_v18 = vld [vmem:[%s26741_s6 + $0x3c8] sm:$0xff]   ;;  %16468 = vmatprep.mubr.bf16.mxu1 %v3506_v15 }
  0x64   : > { %v1298_v41 = vpack.c.bf16 %v357_v62, %v357_v62  ;;  %v25240_v15 = vld [vmem:[%s26741_s6 + $0x408] sm:$0xff]  }
  0x65   : > { %22679 = vmatpush3.bf16.msra.mxu0 %v25184_v19  ;;  %v25208_v19 = vld [vmem:[%s26741_s6 + $0x308] sm:$0xff]  }
  0x66   : > { %22701 = vmatpush3.bf16.msra.mxu1 %v25185_v20  ;;  %22680 = vmatprep.subr.bf16.mxu0 %v25186_v21  ;;  %v2748_v20 = vshll.u32 %v2525_v13, 16  ;;  %v1301_v21 = vpack.c.bf16 %v369_v9, %v369_v9  ;;  %v25235_v9 = vld [vmem:[%s26741_s6 + $0x4c0] sm:$0xff]  }
  0x67   : > { %22702 = vmatprep.subr.bf16.mxu1 %v25187_v22  ;;  %v2527_v22 = vpack.c.bf16 %v1595_v14, %v1595_v14  ;;  %v25239_v14 = vld [vmem:[%s26741_s6 + $0x4c8] sm:$0xff]  }
  0x69   : > { %22681 = vmatpush3.bf16.msra.mxu0 %v25188_v23  ;;  %v3505_v23 = vsel %vm26821_vm2, %v1296_v2, %v2739_v17  ;;  %v365_v2 = vrot.slane %v26926_v48, %v26868_v47  ;;  %v25236_v48 = vld [vmem:[%s26741_s6 + $0x400] sm:$0xff]   ;;  %v25242_v17 = vld [vmem:[%s26741_s6 + $0x450] sm:$0xff]  }
  0x6a   : > { %22703 = vmatpush3.bf16.msra.mxu1 %v25189_v24  ;;  %22682 = vmatprep.subr.bf16.mxu0 %v25190_v26  ;;  %v25209_v24 = vld [vmem:[%s26741_s6 + $0x388] sm:$0xff]   ;;  %v25210_v26 = vld [vmem:[%s26741_s6 + $0x350] sm:$0xff]  }
  0x6b   : > { %22704 = vmatprep.subr.bf16.mxu1 %v25191_v27  ;;  %v3508_v27 = vsel %vm26821_vm2, %v1299_v12, %v2748_v20  ;;  %v1300_v7 = vpack.c.bf16 %v365_v2, %v365_v2  ;;  %v25238_v12 = vld [vmem:[%s26741_s6 + $0x448] sm:$0xff]   ;;  %v25245_v20 = vld [vmem:[%s26741_s6 + $0x490] sm:$0xff]  }
  0x6d   : > { %22683 = vmatpush3.bf16.msra.mxu0 %v25192_v28  ;;  %v2754_v28 = vshll.u32 %v2527_v22, 16  ;;  %v25247_v22 = vld [vmem:[%s26741_s6 + $0x4d8] sm:$0xff]  }
  0x6e   : > { %22705 = vmatpush3.bf16.msra.mxu1 %v25193_v29  ;;  %22684 = vmatprep.subr.bf16.mxu0 %v25194_v31  ;;  %v25211_v29 = vld [vmem:[%s26741_s6 + $0x3d0] sm:$0xff]  }
  0x6f   : > { %22706 = vmatprep.subr.bf16.mxu1 %v25195_v33  ;;  %v25212_v31 = vld [vmem:[%s26741_s6 + $0x310] sm:$0xff]   ;;  %v3510_v33 = vsel %vm26821_vm2, %v1301_v21, %v2754_v28  ;;  %v25246_v21 = vld [vmem:[%s26741_s6 + $0x458] sm:$0xff]   ;;  %v25252_v28 = vld [vmem:[%s26741_s6 + $0x420] sm:$0xff]  }
  0x71   : > { %22685 = vmatpush3.bf16.msra.mxu0 %v25196_v35  ;;  %v25213_v35 = vld [vmem:[%s26741_s6 + $0x390] sm:$0xff]  }
  0x72   : > { %22707 = vmatpush3.bf16.msra.mxu1 %v25197_v37  ;;  %22686 = vmatprep.subr.bf16.mxu0 %v25198_v39  ;;  %v25214_v37 = vld [vmem:[%s26741_s6 + $0x358] sm:$0xff]  }
  0x73   : > { %22708 = vmatprep.subr.bf16.mxu1 %v25199_v43  ;;  %v25215_v39 = vld [vmem:[%s26741_s6 + $0x3d8] sm:$0xff]  }
  0x74   : > { %v25216_v43 = vld [vmem:[%s26741_s6 + $0x318] sm:$0xff]  }
  0x75   : > { %22687 = vmatpush3.bf16.msra.mxu0 %v25200_v44  ;;  %v25217_v44 = vld [vmem:[%s26741_s6 + $0x398] sm:$0xff]  }
  0x76   : > { %22709 = vmatpush3.bf16.msra.mxu1 %v25201_v46  ;;  %22716 = vmatprep.subr.bf16.mxu0 %v25202_v53  ;;  %v25218_v46 = vld [vmem:[%s26741_s6 + $0x360] sm:$0xff]   ;;  %v25222_v53 = vld [vmem:[%s26741_s6 + $0x368] sm:$0xff]  }
  0x77   : > { %22738 = vmatprep.subr.bf16.mxu1 %v25203_v57  ;;  %v1583_v57 = vrot.slane %v26929_v49, %v26864_v45  ;;  %v2526_v49 = vpack.c.bf16 %v1591_v60, %v1591_v60 }
  0x78   : > { %16429 = vmatmul.mubr.bf16.vlgmr.msra.gmra.mrb[8].mxu0 %v3503_v16  ;;  %v25241_v16 = vld [vmem:[%s26741_s6 + $0x488] sm:$0xff]  }
  0x79   : > { %22717 = vmatpush3.bf16.msra.mxu0 %v25204_v3  ;;  %16469 = vmatmul.mubr.bf16.vlgmr.msra.gmra.mrb[8].mxu1 %v3505_v23  ;;  %v2524_v63 = vpack.c.bf16 %v1583_v57, %v1583_v57  ;;  %v25232_v3 = vld [vmem:[%s26741_s6 + $0x338] sm:$0xff]  }
  0x7a   : > { %22718 = vmatprep.subr.bf16.mxu0 %v25206_v11  ;;  %22739 = vmatpush3.bf16.msra.mxu1 %v25205_v8  ;;  %v2751_v8 = vshll.u32 %v2526_v49, 16  ;;  %v25237_v11 = vld [vmem:[%s26741_s6 + $0x480] sm:$0xff]   ;;  %v25248_v23 = vld [vmem:[%s26741_s6 + $0x418] sm:$0xff]  }
  0x7b   : > { %16508 = vmatprep.mubr.bf16.mxu0 %v3508_v27  ;;  %22740 = vmatprep.subr.bf16.mxu1 %v25207_v18  ;;  %v2745_v5 = vshll.u32 %v2524_v63, 16  ;;  %v25243_v18 = vld [vmem:[%s26741_s6 + $0x4d0] sm:$0xff]   ;;  %v25251_v27 = vld [vmem:[%s26741_s6 + $0x4e0] sm:$0xff]  }
  0x7c   : > { %16548 = vmatprep.mubr.bf16.mxu1 %v3510_v33  ;;  %v3509_v13 = vsel %vm26821_vm2, %v1300_v7, %v2751_v8  ;;  %v25255_v33 = vld [vmem:[%s26741_s6 + $0x4e8] sm:$0xff]   ;;  %v25266_v63 = vld [vmem:[%s26741_s6 + $0x540] sm:$0xff]  }
  0x7d   : > { %22719 = vmatpush3.bf16.msra.mxu0 %v25208_v19  ;;  %v3507_v10 = vsel %vm26821_vm2, %v1298_v41, %v2745_v5  ;;  %v25244_v19 = vld [vmem:[%s26741_s6 + $0x410] sm:$0xff]   ;;  %v25268_v7 = vld [vmem:[%s26741_s6 + $0x500] sm:$0xff]  }
  0x7e   : > { %22720 = vmatprep.subr.bf16.mxu0 %v25210_v26  ;;  %22741 = vmatpush3.bf16.msra.mxu1 %v25209_v24  ;;  %v25249_v24 = vld [vmem:[%s26741_s6 + $0x498] sm:$0xff]   ;;  %v25250_v26 = vld [vmem:[%s26741_s6 + $0x460] sm:$0xff]  }
  0x7f   : > { %22742 = vmatprep.subr.bf16.mxu1 %v25211_v29  ;;  %v25253_v29 = vld [vmem:[%s26741_s6 + $0x4a0] sm:$0xff]  }
  0x81   : > { %22721 = vmatpush3.bf16.msra.mxu0 %v25212_v31  ;;  %v25254_v31 = vld [vmem:[%s26741_s6 + $0x468] sm:$0xff]  }
  0x82   : > { %22722 = vmatprep.subr.bf16.mxu0 %v25214_v37  ;;  %22743 = vmatpush3.bf16.msra.mxu1 %v25213_v35  ;;  %v25256_v35 = vld [vmem:[%s26741_s6 + $0x428] sm:$0xff]  }
  0x83   : > { %22744 = vmatprep.subr.bf16.mxu1 %v25215_v39  ;;  %v25257_v37 = vld [vmem:[%s26741_s6 + $0x4a8] sm:$0xff]   ;;  %v25258_v39 = vld [vmem:[%s26741_s6 + $0x470] sm:$0xff]  }
  0x85   : > { %22723 = vmatpush3.bf16.msra.mxu0 %v25216_v43  ;;  %v25259_v43 = vld [vmem:[%s26741_s6 + $0x4f0] sm:$0xff]  }
  0x86   : > { %22724 = vmatprep.subr.bf16.mxu0 %v25218_v46  ;;  %22745 = vmatpush3.bf16.msra.mxu1 %v25217_v44  ;;  %v25260_v44 = vld [vmem:[%s26741_s6 + $0x430] sm:$0xff]  }
  0x87   : > { %22746 = vmatprep.subr.bf16.mxu1 %v25219_v50  ;;  %v25261_v46 = vld [vmem:[%s26741_s6 + $0x4b0] sm:$0xff]   ;;  %v25262_v50 = vld [vmem:[%s26741_s6 + $0x478] sm:$0xff]  }
  0x89   : > { %22725 = vmatpush3.bf16.msra.mxu0 %v25220_v51  ;;  %v25263_v51 = vld [vmem:[%s26741_s6 + $0x4f8] sm:$0xff]  }
  0x8a   : > { %22726 = vmatprep.subr.bf16.mxu0 %v25222_v53  ;;  %22747 = vmatpush3.bf16.msra.mxu1 %v25221_v52  ;;  %v25264_v52 = vld [vmem:[%s26741_s6 + $0x438] sm:$0xff]   ;;  %v27043_v53 = vld [vmem:[%s26731_s24 + $0x10] sm:$0xff] }
  0x8b   : > { %22748 = vmatprep.subr.bf16.mxu1 %v25223_v25  ;;  %v27046_v25 = vld [vmem:[%s26736_s27 + $0x10] sm:$0xff]  ;;  %v373_v60 = vrot.slane %v27043_v53, %v26782_v34 }
  0x8c   : > { %v1603_v57 = vrot.slane %v27046_v25, %v26774_v30  ;;  %v1607_v62 = vrot.slane %v27046_v25, %v26786_v36 }
  0x8d   : > { %22727 = vmatpush3.bf16.msra.mxu0 %v25224_v54  ;;  %v25265_v54 = vld [vmem:[%s26741_s6 + $0x4b8] sm:$0xff]  }
  0x8e   : > { %22728 = vmatprep.subr.bf16.mxu0 %v25226_v58  ;;  %22749 = vmatpush3.bf16.msra.mxu1 %v25225_v56  ;;  %v377_v56 = vrot.slane %v27043_v53, %v26774_v30  ;;  %v385_v58 = vrot.slane %v27043_v53, %v26778_v32 }
  0x8f   : > { %22750 = vmatprep.subr.bf16.mxu1 %v25227_v59  ;;  %v1611_v59 = vrot.slane %v27046_v25, %v26778_v32 }
  0x90   : > { %v1305_v2 = vpack.c.bf16 %v385_v58, %v385_v58  ;;  %v25285_v58 = vld [vmem:[%s26741_s6 + $0x5a0] sm:$0xff]  }
  0x91   : > { %22729 = vmatpush3.bf16.msra.mxu0 %v25228_v42  ;;  %v1599_v42 = vrot.slane %v27046_v25, %v26782_v34  ;;  %v2531_v49 = vpack.c.bf16 %v1611_v59, %v1611_v59  ;;  %v25286_v59 = vld [vmem:[%s26741_s6 + $0x568] sm:$0xff]  }
  0x92   : > { %22730 = vmatprep.subr.bf16.mxu0 %v25230_v0  ;;  %22751 = vmatpush3.bf16.msra.mxu1 %v25229_v61  ;;  %v381_v61 = vrot.slane %v27043_v53, %v26786_v36  ;;  %v1303_v0 = vpack.c.bf16 %v377_v56, %v377_v56  ;;  %v25283_v56 = vld [vmem:[%s26741_s6 + $0x5e0] sm:$0xff]  }
  0x93   : > { %22752 = vmatprep.subr.bf16.mxu1 %v25231_v1  ;;  %v2529_v1 = vpack.c.bf16 %v1603_v57, %v1603_v57  ;;  %v2528_v41 = vpack.c.bf16 %v1599_v42, %v1599_v42  ;;  %v25284_v57 = vld [vmem:[%s26741_s6 + $0x520] sm:$0xff]   ;;  %v25288_v42 = vld [vmem:[%s26741_s6 + $0x528] sm:$0xff]  }
  0x94   : > { %v1304_v5 = vpack.c.bf16 %v381_v61, %v381_v61  ;;  %v25289_v61 = vld [vmem:[%s26741_s6 + $0x5a8] sm:$0xff]  }
  0x95   : > { %22731 = vmatpush3.bf16.msra.mxu0 %v25232_v3  ;;  %v25267_v3 = vld [vmem:[%s26741_s6 + $0x5c0] sm:$0xff]   ;;  %v2760_v8 = vshll.u32 %v2529_v1, 16  ;;  %v25291_v1 = vld [vmem:[%s26741_s6 + $0x5f0] sm:$0xff]  }
  0x96   : > { %22760 = vmatprep.subr.bf16.mxu0 %v25234_v6  ;;  %22753 = vmatpush3.bf16.msra.mxu1 %v25233_v4  ;;  %v1302_v4 = vpack.c.bf16 %v373_v60, %v373_v60  ;;  %v2530_v6 = vpack.c.bf16 %v1607_v62, %v1607_v62  ;;  %v25287_v60 = vld [vmem:[%s26741_s6 + $0x5e8] sm:$0xff]   ;;  %v1615_v62 = vrot.slane %v27046_v25, %v26864_v45 }
  0x97   : > { %22782 = vmatprep.subr.bf16.mxu1 %v25235_v9  ;;  %v2766_v9 = vshll.u32 %v2531_v49, 16  ;;  %v25293_v49 = vld [vmem:[%s26741_s6 + $0x5b0] sm:$0xff]  }
  0x98   : > { %16509 = vmatmul.mubr.bf16.vlgmr.msra.gmra.mrb[12].mxu0 %v3507_v10  ;;  %v1619_v10 = vrot.slane %v27046_v25, %v26790_v38 }
  0x99   : > { %22761 = vmatpush3.bf16.msra.mxu0 %v25236_v48  ;;  %16549 = vmatmul.mubr.bf16.vlgmr.msra.gmra.mrb[12].mxu1 %v3509_v13  ;;  %v393_v48 = vrot.slane %v27043_v53, %v26790_v38  ;;  %v25269_v13 = vld [vmem:[%s26741_s6 + $0x580] sm:$0xff]  }
  0x9a   : > { %22762 = vmatprep.subr.bf16.mxu0 %v25238_v12  ;;  %22783 = vmatpush3.bf16.msra.mxu1 %v25237_v11  ;;  %v2757_v11 = vshll.u32 %v2528_v41, 16  ;;  %v2763_v12 = vshll.u32 %v2530_v6, 16  ;;  %v25294_v41 = vld [vmem:[%s26741_s6 + $0x578] sm:$0xff]  }
  0x9b   : > { %22784 = vmatprep.subr.bf16.mxu1 %v25239_v14  ;;  %v25270_v14 = vld [vmem:[%s26741_s6 + $0x548] sm:$0xff]   ;;  %v25295_v6 = vld [vmem:[%s26741_s6 + $0x5f8] sm:$0xff]  }
  0x9d   : > { %22763 = vmatpush3.bf16.msra.mxu0 %v25240_v15  ;;  %v401_v15 = vrot.slane %v27043_v53, %v26794_v40 }
  0x9e   : > { %22764 = vmatprep.subr.bf16.mxu0 %v25242_v17  ;;  %22785 = vmatpush3.bf16.msra.mxu1 %v25241_v16  ;;  %v1627_v16 = vrot.slane %v27046_v25, %v26794_v40  ;;  %v3512_v17 = vsel %vm26821_vm2, %v1303_v0, %v2760_v8  ;;  %v1623_v0 = vrot.slane %v27046_v25, %v26868_v47  ;;  %v25297_v8 = vld [vmem:[%s26741_s6 + $0x5b8] sm:$0xff]  }
  0x9f   : > { %22786 = vmatprep.subr.bf16.mxu1 %v25243_v18  ;;  %v3514_v18 = vsel %vm26821_vm2, %v1305_v2, %v2766_v9  ;;  %16588 = vmatprep.mubr.bf16.mxu0 %v3512_v17  ;;  %v25292_v2 = vld [vmem:[%s26741_s6 + $0x530] sm:$0xff]   ;;  %v25302_v17 = vld [vmem:[%s26741_s6 + $0x648] sm:$0xff]  }
  0xa0   : > { %16628 = vmatprep.mubr.bf16.mxu1 %v3514_v18  ;;  %v2534_v25 = vpack.c.bf16 %v1623_v0, %v1623_v0  ;;  %v25303_v18 = vld [vmem:[%s26741_s6 + $0x6c8] sm:$0xff]  }
  0xa1   : > { %22765 = vmatpush3.bf16.msra.mxu0 %v25244_v19  ;;  %v1307_v19 = vpack.c.bf16 %v393_v48, %v393_v48 }
  0xa2   : > { %22766 = vmatprep.subr.bf16.mxu0 %v25246_v21  ;;  %22787 = vmatpush3.bf16.msra.mxu1 %v25245_v20  ;;  %v2533_v20 = vpack.c.bf16 %v1619_v10, %v1619_v10  ;;  %v3511_v21 = vsel %vm26821_vm2, %v1302_v4, %v2757_v11  ;;  %v2532_v4 = vpack.c.bf16 %v1615_v62, %v1615_v62  ;;  %v2775_v11 = vshll.u32 %v2534_v25, 16 }
  0xa3   : > { %22788 = vmatprep.subr.bf16.mxu1 %v25247_v22  ;;  %v3513_v22 = vsel %vm26821_vm2, %v1304_v5, %v2763_v12  ;;  %v397_v5 = vrot.slane %v27043_v53, %v26868_v47  ;;  %v25298_v12 = vld [vmem:[%s26741_s6 + $0x640] sm:$0xff]  }
  0xa4   : > { %v2769_v48 = vshll.u32 %v2532_v4, 16 }
  0xa5   : > { %22767 = vmatpush3.bf16.msra.mxu0 %v25248_v23  ;;  %v25271_v23 = vld [vmem:[%s26741_s6 + $0x5c8] sm:$0xff]   ;;  %v1308_v10 = vpack.c.bf16 %v397_v5, %v397_v5 }
  0xa6   : > { %22768 = vmatprep.subr.bf16.mxu0 %v25250_v26  ;;  %22789 = vmatpush3.bf16.msra.mxu1 %v25249_v24  ;;  %v25272_v24 = vld [vmem:[%s26741_s6 + $0x508] sm:$0xff]   ;;  %v2772_v26 = vshll.u32 %v2533_v20, 16 }
  0xa7   : > { %22790 = vmatprep.subr.bf16.mxu1 %v25251_v27  ;;  %v1309_v27 = vpack.c.bf16 %v401_v15, %v401_v15  ;;  %v25301_v15 = vld [vmem:[%s26741_s6 + $0x680] sm:$0xff]   ;;  %v25305_v20 = vld [vmem:[%s26741_s6 + $0x688] sm:$0xff]  }
  0xa9   : > { %22769 = vmatpush3.bf16.msra.mxu0 %v25252_v28  ;;  %v2535_v28 = vpack.c.bf16 %v1627_v16, %v1627_v16  ;;  %v3517_v16 = vsel %vm26821_vm2, %v1308_v10, %v2775_v11 }
  0xaa   : > { %22770 = vmatprep.subr.bf16.mxu0 %v25254_v31  ;;  %22791 = vmatpush3.bf16.msra.mxu1 %v25253_v29  ;;  %v25273_v29 = vld [vmem:[%s26741_s6 + $0x588] sm:$0xff]   ;;  %v25274_v31 = vld [vmem:[%s26741_s6 + $0x550] sm:$0xff]  }
  0xab   : > { %22792 = vmatprep.subr.bf16.mxu1 %v25255_v33  ;;  %v3516_v33 = vsel %vm26821_vm2, %v1307_v19, %v2772_v26  ;;  %v25304_v19 = vld [vmem:[%s26741_s6 + $0x608] sm:$0xff]   ;;  %v25310_v26 = vld [vmem:[%s26741_s6 + $0x658] sm:$0xff]  }
  0xad   : > { %22771 = vmatpush3.bf16.msra.mxu0 %v25256_v35  ;;  %v2778_v35 = vshll.u32 %v2535_v28, 16  ;;  %v25312_v28 = vld [vmem:[%s26741_s6 + $0x618] sm:$0xff]  }
  0xae   : > { %22772 = vmatprep.subr.bf16.mxu0 %v25258_v39  ;;  %22793 = vmatpush3.bf16.msra.mxu1 %v25257_v37  ;;  %v25275_v37 = vld [vmem:[%s26741_s6 + $0x5d0] sm:$0xff]  }
  0xaf   : > { %22794 = vmatprep.subr.bf16.mxu1 %v25259_v43  ;;  %v25276_v39 = vld [vmem:[%s26741_s6 + $0x510] sm:$0xff]   ;;  %v3518_v43 = vsel %vm26821_vm2, %v1309_v27, %v2778_v35  ;;  %v25311_v27 = vld [vmem:[%s26741_s6 + $0x6d8] sm:$0xff]   ;;  %v25316_v35 = vld [vmem:[%s26741_s6 + $0x620] sm:$0xff]  }
  0xb1   : > { %22773 = vmatpush3.bf16.msra.mxu0 %v25260_v44  ;;  %v25277_v44 = vld [vmem:[%s26741_s6 + $0x590] sm:$0xff]  }
  0xb2   : > { %22774 = vmatprep.subr.bf16.mxu0 %v25262_v50  ;;  %22795 = vmatpush3.bf16.msra.mxu1 %v25261_v46  ;;  %v25278_v46 = vld [vmem:[%s26741_s6 + $0x558] sm:$0xff]  }
  0xb3   : > { %22796 = vmatprep.subr.bf16.mxu1 %v25263_v51  ;;  %v25279_v50 = vld [vmem:[%s26741_s6 + $0x5d8] sm:$0xff]  }
  0xb4   : > { %v25280_v51 = vld [vmem:[%s26741_s6 + $0x518] sm:$0xff]  }
  0xb5   : > { %22775 = vmatpush3.bf16.msra.mxu0 %v25264_v52  ;;  %v25281_v52 = vld [vmem:[%s26741_s6 + $0x598] sm:$0xff]  }
  0xb6   : > { %22804 = vmatprep.subr.bf16.mxu0 %v25266_v63  ;;  %22797 = vmatpush3.bf16.msra.mxu1 %v25265_v54  ;;  %v25282_v54 = vld [vmem:[%s26741_s6 + $0x560] sm:$0xff]   ;;  %v25290_v63 = vld [vmem:[%s26741_s6 + $0x570] sm:$0xff]  }
  0xb7   : > { %22826 = vmatprep.subr.bf16.mxu1 %v25267_v3  ;;  %v389_v3 = vrot.slane %v27043_v53, %v26864_v45  ;;  %v25299_v53 = vld [vmem:[%s26741_s6 + $0x6c0] sm:$0xff]  }
  0xb8   : > { %16589 = vmatmul.mubr.bf16.vlgmr.msra.gmra.mrb[16].mxu0 %v3511_v21  ;;  %v25306_v21 = vld [vmem:[%s26741_s6 + $0x650] sm:$0xff]  }
  0xb9   : > { %16629 = vmatmul.mubr.bf16.vlgmr.msra.gmra.mrb[16].mxu1 %v3513_v22  ;;  %22805 = vmatpush3.bf16.msra.mxu0 %v25268_v7  ;;  %v25296_v7 = vld [vmem:[%s26741_s6 + $0x538] sm:$0xff]   ;;  %v1306_v9 = vpack.c.bf16 %v389_v3, %v389_v3  ;;  %v25307_v22 = vld [vmem:[%s26741_s6 + $0x6d0] sm:$0xff]   ;;  %v25330_v3 = vld [vmem:[%s26741_s6 + $0x740] sm:$0xff]  }
  0xba   : > { %22827 = vmatpush3.bf16.msra.mxu1 %v25269_v13  ;;  %22806 = vmatprep.subr.bf16.mxu0 %v25270_v14  ;;  %v25300_v13 = vld [vmem:[%s26741_s6 + $0x600] sm:$0xff]  }
  0xbb   : > { %22828 = vmatprep.subr.bf16.mxu1 %v25271_v23  ;;  %16668 = vmatprep.mubr.bf16.mxu0 %v3516_v33  ;;  %v3515_v14 = vsel %vm26821_vm2, %v1306_v9, %v2769_v48  ;;  %v25308_v23 = vld [vmem:[%s26741_s6 + $0x610] sm:$0xff]   ;;  %v25315_v33 = vld [vmem:[%s26741_s6 + $0x6e0] sm:$0xff]  }
  0xbc   : > { %16708 = vmatprep.mubr.bf16.mxu1 %v3518_v43  ;;  %v25319_v43 = vld [vmem:[%s26741_s6 + $0x6e8] sm:$0xff]  }
  0xbd   : > { %22807 = vmatpush3.bf16.msra.mxu0 %v25272_v24  ;;  %v25309_v24 = vld [vmem:[%s26741_s6 + $0x690] sm:$0xff]  }
  0xbe   : > { %22829 = vmatpush3.bf16.msra.mxu1 %v25273_v29  ;;  %22808 = vmatprep.subr.bf16.mxu0 %v25274_v31  ;;  %v25313_v29 = vld [vmem:[%s26741_s6 + $0x698] sm:$0xff]   ;;  %v25314_v31 = vld [vmem:[%s26741_s6 + $0x660] sm:$0xff]  }
  0xbf   : > { %22830 = vmatprep.subr.bf16.mxu1 %v25275_v37  ;;  %v25317_v37 = vld [vmem:[%s26741_s6 + $0x6a0] sm:$0xff]  }
  0xc1   : > { %22809 = vmatpush3.bf16.msra.mxu0 %v25276_v39  ;;  %v25318_v39 = vld [vmem:[%s26741_s6 + $0x668] sm:$0xff]  }
  0xc2   : > { %22831 = vmatpush3.bf16.msra.mxu1 %v25277_v44  ;;  %22810 = vmatprep.subr.bf16.mxu0 %v25278_v46  ;;  %v25320_v44 = vld [vmem:[%s26741_s6 + $0x628] sm:$0xff]  }
  0xc3   : > { %22832 = vmatprep.subr.bf16.mxu1 %v25279_v50  ;;  %v25321_v46 = vld [vmem:[%s26741_s6 + $0x6a8] sm:$0xff]   ;;  %v25322_v50 = vld [vmem:[%s26741_s6 + $0x670] sm:$0xff]  }
  0xc5   : > { %22811 = vmatpush3.bf16.msra.mxu0 %v25280_v51  ;;  %v25323_v51 = vld [vmem:[%s26741_s6 + $0x6f0] sm:$0xff]  }
  0xc6   : > { %22833 = vmatpush3.bf16.msra.mxu1 %v25281_v52  ;;  %22812 = vmatprep.subr.bf16.mxu0 %v25282_v54  ;;  %v25324_v52 = vld [vmem:[%s26741_s6 + $0x630] sm:$0xff]  }
  0xc7   : > { %22834 = vmatprep.subr.bf16.mxu1 %v25283_v56  ;;  %v25325_v54 = vld [vmem:[%s26741_s6 + $0x6b0] sm:$0xff]   ;;  %v25326_v56 = vld [vmem:[%s26741_s6 + $0x678] sm:$0xff]  }
  0xc9   : > { %22813 = vmatpush3.bf16.msra.mxu0 %v25284_v57  ;;  %v25327_v57 = vld [vmem:[%s26741_s6 + $0x6f8] sm:$0xff]  }
  0xca   : > { %22835 = vmatpush3.bf16.msra.mxu1 %v25285_v58  ;;  %22814 = vmatprep.subr.bf16.mxu0 %v25286_v59  ;;  %v25328_v58 = vld [vmem:[%s26741_s6 + $0x638] sm:$0xff]  }
  0xcb   : > { %22836 = vmatprep.subr.bf16.mxu1 %v25287_v60  ;;  %v27161_v59 = vld [vmem:[%s26731_s24 + $0x18] sm:$0xff] }
  0xcc   : > { %v27164_v60 = vld [vmem:[%s26736_s27 + $0x18] sm:$0xff] }
  0xcd   : > { %22815 = vmatpush3.bf16.msra.mxu0 %v25288_v42  ;;  %v25329_v42 = vld [vmem:[%s26741_s6 + $0x6b8] sm:$0xff]   ;;  %v1635_v62 = vrot.slane %v27164_v60, %v26774_v30  ;;  %v1643_v0 = vrot.slane %v27164_v60, %v26778_v32  ;;  %v1639_v48 = vrot.slane %v27164_v60, %v26786_v36 }
  0xce   : > { %22837 = vmatpush3.bf16.msra.mxu1 %v25289_v61  ;;  %22816 = vmatprep.subr.bf16.mxu0 %v25290_v63  ;;  %v409_v61 = vrot.slane %v27161_v59, %v26774_v30  ;;  %v417_v63 = vrot.slane %v27161_v59, %v26778_v32 }
  0xcf   : > { %22838 = vmatprep.subr.bf16.mxu1 %v25291_v1  ;;  %v405_v1 = vrot.slane %v27161_v59, %v26782_v34  ;;  %v2539_v25 = vpack.c.bf16 %v1643_v0, %v1643_v0  ;;  %v25349_v0 = vld [vmem:[%s26741_s6 + $0x7a0] sm:$0xff]  }
  0xd0   : > { %v1311_v4 = vpack.c.bf16 %v409_v61, %v409_v61  ;;  %v1313_v5 = vpack.c.bf16 %v417_v63, %v417_v63  ;;  %v25347_v61 = vld [vmem:[%s26741_s6 + $0x7e0] sm:$0xff]   ;;  %v25350_v63 = vld [vmem:[%s26741_s6 + $0x768] sm:$0xff]  }
  0xd1   : > { %22817 = vmatpush3.bf16.msra.mxu0 %v25292_v2  ;;  %v1631_v2 = vrot.slane %v27164_v60, %v26782_v34  ;;  %v2790_v11 = vshll.u32 %v2539_v25, 16  ;;  %v1647_v25 = vrot.slane %v27164_v60, %v26864_v45 }
  0xd2   : > { %22839 = vmatpush3.bf16.msra.mxu1 %v25293_v49  ;;  %22818 = vmatprep.subr.bf16.mxu0 %v25294_v41  ;;  %v413_v49 = vrot.slane %v27161_v59, %v26786_v36  ;;  %v2537_v41 = vpack.c.bf16 %v1635_v62, %v1635_v62  ;;  %v25348_v62 = vld [vmem:[%s26741_s6 + $0x720] sm:$0xff]  }
  0xd3   : > { %22840 = vmatprep.subr.bf16.mxu1 %v25295_v6  ;;  %v25331_v6 = vld [vmem:[%s26741_s6 + $0x7c0] sm:$0xff]  }
  0xd4   : > { %v1312_v9 = vpack.c.bf16 %v413_v49, %v413_v49  ;;  %v2784_v10 = vshll.u32 %v2537_v41, 16  ;;  %v25351_v49 = vld [vmem:[%s26741_s6 + $0x7e8] sm:$0xff]  }
  0xd5   : > { %22819 = vmatpush3.bf16.msra.mxu0 %v25296_v7  ;;  %v1310_v7 = vpack.c.bf16 %v405_v1, %v405_v1 }
  0xd6   : > { %22841 = vmatpush3.bf16.msra.mxu1 %v25297_v8  ;;  %22848 = vmatprep.subr.bf16.mxu0 %v25298_v12  ;;  %v2536_v8 = vpack.c.bf16 %v1631_v2, %v1631_v2  ;;  %v425_v12 = vrot.slane %v27161_v59, %v26790_v38 }
  0xd7   : > { %22870 = vmatprep.subr.bf16.mxu1 %v25299_v53  ;;  %v1651_v53 = vrot.slane %v27164_v60, %v26790_v38 }
  0xd8   : > { %16669 = vmatmul.mubr.bf16.vlgmr.msra.gmra.mrb[20].mxu0 %v3515_v14  ;;  %v2538_v14 = vpack.c.bf16 %v1639_v48, %v1639_v48  ;;  %v25354_v48 = vld [vmem:[%s26741_s6 + $0x770] sm:$0xff]  }
  0xd9   : > { %16709 = vmatmul.mubr.bf16.vlgmr.msra.gmra.mrb[20].mxu1 %v3517_v16  ;;  %22849 = vmatpush3.bf16.msra.mxu0 %v25300_v13  ;;  %v2781_v13 = vshll.u32 %v2536_v8, 16  ;;  %v433_v16 = vrot.slane %v27161_v59, %v26794_v40 }
  0xda   : > { %22871 = vmatpush3.bf16.msra.mxu1 %v25301_v15  ;;  %22850 = vmatprep.subr.bf16.mxu0 %v25302_v17  ;;  %v25332_v15 = vld [vmem:[%s26741_s6 + $0x700] sm:$0xff]   ;;  %v1659_v17 = vrot.slane %v27164_v60, %v26794_v40 }
  0xdb   : > { %22872 = vmatprep.subr.bf16.mxu1 %v25303_v18  ;;  %v3520_v18 = vsel %vm26821_vm2, %v1311_v4, %v2784_v10  ;;  %v25355_v10 = vld [vmem:[%s26741_s6 + $0x7f0] sm:$0xff]  }
  0xdc   : > { %16748 = vmatprep.mubr.bf16.mxu0 %v3520_v18  ;;  %v25358_v18 = vld [vmem:[%s26741_s6 + $0x778] sm:$0xff]  }
  0xdd   : > { %22851 = vmatpush3.bf16.msra.mxu0 %v25304_v19  ;;  %v3522_v19 = vsel %vm26821_vm2, %v1313_v5, %v2790_v11  ;;  %v25353_v5 = vld [vmem:[%s26741_s6 + $0x7a8] sm:$0xff]  }
  0xde   : > { %22873 = vmatpush3.bf16.msra.mxu1 %v25305_v20  ;;  %22852 = vmatprep.subr.bf16.mxu0 %v25306_v21  ;;  %v25334_v20 = vld [vmem:[%s26741_s6 + $0x748] sm:$0xff]   ;;  %v1315_v21 = vpack.c.bf16 %v425_v12, %v425_v12 }
  0xdf   : > { %22874 = vmatprep.subr.bf16.mxu1 %v25307_v22  ;;  %v2541_v22 = vpack.c.bf16 %v1651_v53, %v1651_v53  ;;  %16788 = vmatprep.mubr.bf16.mxu1 %v3522_v19  ;;  %v1655_v53 = vrot.slane %v27164_v60, %v26868_v47  ;;  %v25359_v19 = vld [vmem:[%s26741_s6 + $0x7f8] sm:$0xff]   ;;  %v429_v60 = vrot.slane %v27161_v59, %v26868_v47 }
  0xe1   : > { %22853 = vmatpush3.bf16.msra.mxu0 %v25308_v23  ;;  %v3519_v23 = vsel %vm26821_vm2, %v1310_v7, %v2781_v13 }
  0xe2   : > { %22875 = vmatpush3.bf16.msra.mxu1 %v25309_v24  ;;  %22854 = vmatprep.subr.bf16.mxu0 %v25310_v26  ;;  %v2787_v24 = vshll.u32 %v2538_v14, 16  ;;  %v25333_v26 = vld [vmem:[%s26741_s6 + $0x780] sm:$0xff]   ;;  %v25356_v14 = vld [vmem:[%s26741_s6 + $0x730] sm:$0xff]  }
  0xe3   : > { %22876 = vmatprep.subr.bf16.mxu1 %v25311_v27  ;;  %v1317_v27 = vpack.c.bf16 %v433_v16, %v433_v16  ;;  %v421_v16 = vrot.slane %v27161_v59, %v26864_v45  ;;  %v25364_v59 = vld [vmem:[%s26741_s6 + $0x800] sm:$0xff]  }
  0xe5   : > { %22855 = vmatpush3.bf16.msra.mxu0 %v25312_v28  ;;  %v2543_v28 = vpack.c.bf16 %v1659_v17, %v1659_v17  ;;  %v2540_v17 = vpack.c.bf16 %v1647_v25, %v1647_v25  ;;  %v25386_v25 = vld [vmem:[%s26741_s6 + $0x870] sm:$0xff]  }
  0xe6   : > { %22877 = vmatpush3.bf16.msra.mxu1 %v25313_v29  ;;  %22856 = vmatprep.subr.bf16.mxu0 %v25314_v31  ;;  %v25335_v29 = vld [vmem:[%s26741_s6 + $0x7c8] sm:$0xff]   ;;  %v2796_v31 = vshll.u32 %v2541_v22, 16  ;;  %v25361_v22 = vld [vmem:[%s26741_s6 + $0x7b8] sm:$0xff]  }
  0xe7   : > { %22878 = vmatprep.subr.bf16.mxu1 %v25315_v33  ;;  %v3521_v33 = vsel %vm26821_vm2, %v1312_v9, %v2787_v24  ;;  %v2793_v24 = vshll.u32 %v2540_v17, 16  ;;  %v25391_v17 = vld [vmem:[%s26741_s6 + $0x8f8] sm:$0xff]  }
  0xe9   : > { %22857 = vmatpush3.bf16.msra.mxu0 %v25316_v35  ;;  %v25336_v35 = vld [vmem:[%s26741_s6 + $0x708] sm:$0xff]  }
  0xea   : > { %22879 = vmatpush3.bf16.msra.mxu1 %v25317_v37  ;;  %22858 = vmatprep.subr.bf16.mxu0 %v25318_v39  ;;  %v2802_v37 = vshll.u32 %v2543_v28, 16  ;;  %v25338_v39 = vld [vmem:[%s26741_s6 + $0x750] sm:$0xff]  }
  0xeb   : > { %22880 = vmatprep.subr.bf16.mxu1 %v25319_v43  ;;  %v3524_v43 = vsel %vm26821_vm2, %v1315_v21, %v2796_v31  ;;  %v25360_v21 = vld [vmem:[%s26741_s6 + $0x738] sm:$0xff]  }
  0xed   : > { %22859 = vmatpush3.bf16.msra.mxu0 %v25320_v44  ;;  %v25337_v44 = vld [vmem:[%s26741_s6 + $0x788] sm:$0xff]  }
  0xee   : > { %22881 = vmatpush3.bf16.msra.mxu1 %v25321_v46  ;;  %22860 = vmatprep.subr.bf16.mxu0 %v25322_v50  ;;  %v3526_v46 = vsel %vm26821_vm2, %v1317_v27, %v2802_v37  ;;  %v25339_v50 = vld [vmem:[%s26741_s6 + $0x7d0] sm:$0xff]   ;;  %v1316_v27 = vpack.c.bf16 %v429_v60, %v429_v60  ;;  %v27285_v60 = vld [vmem:[%s26731_s24 + $0x20] sm:$0xff] }
  0xef   : > { %22882 = vmatprep.subr.bf16.mxu1 %v25323_v51  ;;  %v25340_v51 = vld [vmem:[%s26741_s6 + $0x710] sm:$0xff]  }
  0xf1   : > { %22861 = vmatpush3.bf16.msra.mxu0 %v25324_v52  ;;  %v25342_v52 = vld [vmem:[%s26741_s6 + $0x758] sm:$0xff]  }
  0xf2   : > { %22883 = vmatpush3.bf16.msra.mxu1 %v25325_v54  ;;  %22862 = vmatprep.subr.bf16.mxu0 %v25326_v56  ;;  %v25341_v54 = vld [vmem:[%s26741_s6 + $0x790] sm:$0xff]   ;;  %v25343_v56 = vld [vmem:[%s26741_s6 + $0x7d8] sm:$0xff]  }
  0xf3   : > { %22884 = vmatprep.subr.bf16.mxu1 %v25327_v57  ;;  %v25344_v57 = vld [vmem:[%s26741_s6 + $0x718] sm:$0xff]  }
  0xf5   : > { %22863 = vmatpush3.bf16.msra.mxu0 %v25328_v58  ;;  %v25346_v58 = vld [vmem:[%s26741_s6 + $0x760] sm:$0xff]  }
  0xf6   : > { %22885 = vmatpush3.bf16.msra.mxu1 %v25329_v42  ;;  %22892 = vmatprep.subr.bf16.mxu0 %v25330_v3  ;;  %v25345_v42 = vld [vmem:[%s26741_s6 + $0x798] sm:$0xff]   ;;  %v25352_v3 = vld [vmem:[%s26741_s6 + $0x728] sm:$0xff]  }
  0xf7   : > { %22914 = vmatprep.subr.bf16.mxu1 %v25331_v6 }
  0xf8   : > { %16749 = vmatmul.mubr.bf16.vlgmr.msra.gmra.mrb[24].mxu0 %v3519_v23  ;;  %v1314_v23 = vpack.c.bf16 %v421_v16, %v421_v16  ;;  %v25390_v16 = vld [vmem:[%s26741_s6 + $0x878] sm:$0xff]  }
  0xf9   : > { %22893 = vmatpush3.bf16.msra.mxu0 %v25332_v15  ;;  %16789 = vmatmul.mubr.bf16.vlgmr.msra.gmra.mrb[24].mxu1 %v3521_v33  ;;  %v25357_v15 = vld [vmem:[%s26741_s6 + $0x7b0] sm:$0xff]   ;;  %v25365_v33 = vld [vmem:[%s26741_s6 + $0x880] sm:$0xff]  }
  0xfa   : > { %22894 = vmatprep.subr.bf16.mxu0 %v25334_v20  ;;  %22915 = vmatpush3.bf16.msra.mxu1 %v25333_v26  ;;  %v2542_v20 = vpack.c.bf16 %v1655_v53, %v1655_v53  ;;  %v25362_v26 = vld [vmem:[%s26741_s6 + $0x840] sm:$0xff]   ;;  %v3523_v31 = vsel %vm26821_vm2, %v1314_v23, %v2793_v24  ;;  %v445_v23 = vrot.slane %v27285_v60, %v26786_v36 }
  0xfb   : > { %16828 = vmatprep.mubr.bf16.mxu0 %v3524_v43  ;;  %22916 = vmatprep.subr.bf16.mxu1 %v25335_v29  ;;  %v25363_v29 = vld [vmem:[%s26741_s6 + $0x8c0] sm:$0xff]   ;;  %v25368_v43 = vld [vmem:[%s26741_s6 + $0x808] sm:$0xff]  }
  0xfc   : > { %16868 = vmatprep.mubr.bf16.mxu1 %v3526_v46  ;;  %v2799_v28 = vshll.u32 %v2542_v20, 16  ;;  %v25370_v46 = vld [vmem:[%s26741_s6 + $0x850] sm:$0xff]   ;;  %v27290_v20 = vld [vmem:[%s26736_s27 + $0x20] sm:$0xff] }
  0xfd   : > { %22895 = vmatpush3.bf16.msra.mxu0 %v25336_v35  ;;  %v25366_v35 = vld [vmem:[%s26741_s6 + $0x848] sm:$0xff]   ;;  %v1667_v24 = vrot.slane %v27290_v20, %v26774_v30 }
  0xfe   : > { %22896 = vmatprep.subr.bf16.mxu0 %v25338_v39  ;;  %22917 = vmatpush3.bf16.msra.mxu1 %v25337_v44  ;;  %v3525_v37 = vsel %vm26821_vm2, %v1316_v27, %v2799_v28  ;;  %v25367_v39 = vld [vmem:[%s26741_s6 + $0x8c8] sm:$0xff]   ;;  %v1663_v27 = vrot.slane %v27290_v20, %v26782_v34  ;;  %v1671_v28 = vrot.slane %v27290_v20, %v26786_v36 }
  0xff   : > { %22918 = vmatprep.subr.bf16.mxu1 %v25339_v50  ;;  %v25369_v44 = vld [vmem:[%s26741_s6 + $0x888] sm:$0xff]   ;;  %v25371_v50 = vld [vmem:[%s26741_s6 + $0x8d0] sm:$0xff]  }
 0x101   : > { %22897 = vmatpush3.bf16.msra.mxu0 %v25340_v51  ;;  %v25372_v51 = vld [vmem:[%s26741_s6 + $0x810] sm:$0xff]  }
 0x102   : > { %22898 = vmatprep.subr.bf16.mxu0 %v25342_v52  ;;  %22919 = vmatpush3.bf16.msra.mxu1 %v25341_v54  ;;  %v25373_v52 = vld [vmem:[%s26741_s6 + $0x890] sm:$0xff]   ;;  %v25374_v54 = vld [vmem:[%s26741_s6 + $0x858] sm:$0xff]  }
 0x103   : > { %22920 = vmatprep.subr.bf16.mxu1 %v25343_v56  ;;  %v25375_v56 = vld [vmem:[%s26741_s6 + $0x8d8] sm:$0xff]  }
 0x105   : > { %22899 = vmatpush3.bf16.msra.mxu0 %v25344_v57  ;;  %v25376_v57 = vld [vmem:[%s26741_s6 + $0x818] sm:$0xff]  }
 0x106   : > { %22900 = vmatprep.subr.bf16.mxu0 %v25346_v58  ;;  %22921 = vmatpush3.bf16.msra.mxu1 %v25345_v42  ;;  %v25377_v58 = vld [vmem:[%s26741_s6 + $0x898] sm:$0xff]   ;;  %v25378_v42 = vld [vmem:[%s26741_s6 + $0x860] sm:$0xff]  }
 0x107   : > { %22922 = vmatprep.subr.bf16.mxu1 %v25347_v61  ;;  %v25379_v61 = vld [vmem:[%s26741_s6 + $0x8e0] sm:$0xff]  }
 0x109   : > { %22901 = vmatpush3.bf16.msra.mxu0 %v25348_v62  ;;  %v25380_v62 = vld [vmem:[%s26741_s6 + $0x820] sm:$0xff]  }
 0x10a   : > { %22902 = vmatprep.subr.bf16.mxu0 %v25350_v63  ;;  %22923 = vmatpush3.bf16.msra.mxu1 %v25349_v0  ;;  %v25381_v63 = vld [vmem:[%s26741_s6 + $0x8a0] sm:$0xff]   ;;  %v25382_v0 = vld [vmem:[%s26741_s6 + $0x868] sm:$0xff]  }
 0x10b   : > { %v22600_v1 = vpop.f32.mrb[0].mxu0  ;;  %22924 = vmatprep.subr.bf16.mxu1 %v25351_v49 }
 0x10c   : > { %v22622_v2 = vpop.f32.mrb[0].mxu1  ;;  %v22601_v4 = vpop.f32.mrb[1].mxu0 }
 0x10d   : > { %v22623_v41 = vpop.f32.mrb[1].mxu1  ;;  %v22602_v6 = vadd.f32 %v22601_v4, %v22600_v1  ;;  %v22603_v8 = vpop.f32.mrb[2].mxu0  ;;  %22903 = vmatpush3.bf16.msra.mxu0 %v25352_v3  ;;  %v25383_v1 = vld [vmem:[%s26741_s6 + $0x8e8] sm:$0xff]  }
 0x10e   : > { %v22624_v7 = vadd.f32 %v22623_v41, %v22622_v2  ;;  %v22625_v9 = vpop.f32.mrb[2].mxu1  ;;  %v22604_v11 = vpop.f32.mrb[3].mxu0  ;;  %22904 = vmatprep.subr.bf16.mxu0 %v25354_v48  ;;  %22925 = vmatpush3.bf16.msra.mxu1 %v25353_v5  ;;  %v25384_v2 = vld [vmem:[%s26741_s6 + $0x828] sm:$0xff]  }
 0x10f   : > { %v22626_v12 = vpop.f32.mrb[3].mxu1  ;;  %22926 = vmatprep.subr.bf16.mxu1 %v25355_v10  ;;  %v25385_v5 = vld [vmem:[%s26741_s6 + $0x8a8] sm:$0xff]   ;;  %v25387_v11 = vld [vmem:[%s26741_s6 + $0x8f0] sm:$0xff]  }
 0x110   : > { %v27233_v13 = vadd.f32 %v22624_v7, %v22602_v6  ;;  %v25388_v12 = vld [vmem:[%s26741_s6 + $0x830] sm:$0xff]  }
 0x111   : > { %22905 = vmatpush3.bf16.msra.mxu0 %v25356_v14  ;;  %v25389_v14 = vld [vmem:[%s26741_s6 + $0x8b0] sm:$0xff]  }
 0x112   : > { %22906 = vmatprep.subr.bf16.mxu0 %v25358_v18  ;;  %22927 = vmatpush3.bf16.msra.mxu1 %v25357_v15  ;;  %v25392_v18 = vld [vmem:[%s26741_s6 + $0x838] sm:$0xff]  }
 0x113   : > { %22928 = vmatprep.subr.bf16.mxu1 %v25359_v19  ;;  %v25393_v19 = vld [vmem:[%s26741_s6 + $0x8b8] sm:$0xff]  }
 0x115   : > { %22907 = vmatpush3.bf16.msra.mxu0 %v25360_v21  ;;  %v449_v21 = vrot.slane %v27285_v60, %v26778_v32 }
 0x116   : > { %22936 = vmatprep.subr.bf16.mxu0 %v25362_v26  ;;  %22929 = vmatpush3.bf16.msra.mxu1 %v25361_v22  ;;  %v437_v22 = vrot.slane %v27285_v60, %v26782_v34  ;;  %v1675_v26 = vrot.slane %v27290_v20, %v26778_v32 }
 0x117   : > { %22958 = vmatprep.subr.bf16.mxu1 %v25363_v29  ;;  %v25394_v29 = vld [vmem:[%s26741_s6 + $0x940] sm:$0xff]  }
 0x118   : > { %16829 = vmatmul.mubr.bf16.vlgmr.msra.gmra.mrb[28].mxu0 %v3523_v31  ;;  %v1321_v31 = vpack.c.bf16 %v449_v21, %v449_v21  ;;  %v25411_v21 = vld [vmem:[%s26741_s6 + $0x9e0] sm:$0xff]  }
 0x119   : > { %22937 = vmatpush3.bf16.msra.mxu0 %v25364_v59  ;;  %16869 = vmatmul.mubr.bf16.vlgmr.msra.gmra.mrb[28].mxu1 %v3525_v37  ;;  %v25395_v37 = vld [vmem:[%s26741_s6 + $0x9c0] sm:$0xff]  }
 0x11a   : > { %22938 = vmatprep.subr.bf16.mxu0 %v25366_v35  ;;  %22959 = vmatpush3.bf16.msra.mxu1 %v25365_v33  ;;  %v1318_v33 = vpack.c.bf16 %v437_v22, %v437_v22  ;;  %v1320_v35 = vpack.c.bf16 %v445_v23, %v445_v23  ;;  %v25412_v22 = vld [vmem:[%s26741_s6 + $0x920] sm:$0xff]  }
 0x11b   : > { %22960 = vmatprep.subr.bf16.mxu1 %v25367_v39  ;;  %v2545_v39 = vpack.c.bf16 %v1667_v24, %v1667_v24  ;;  %v25413_v23 = vld [vmem:[%s26741_s6 + $0x9a0] sm:$0xff]   ;;  %v25414_v24 = vld [vmem:[%s26741_s6 + $0x968] sm:$0xff]  }
 0x11d   : > { %22939 = vmatpush3.bf16.msra.mxu0 %v25368_v43  ;;  %v2547_v43 = vpack.c.bf16 %v1675_v26, %v1675_v26 }
 0x11e   : > { %22940 = vmatprep.subr.bf16.mxu0 %v25370_v46  ;;  %22961 = vmatpush3.bf16.msra.mxu1 %v25369_v44  ;;  %v2544_v44 = vpack.c.bf16 %v1663_v27, %v1663_v27  ;;  %v2546_v46 = vpack.c.bf16 %v1671_v28, %v1671_v28  ;;  %v25415_v27 = vld [vmem:[%s26741_s6 + $0x9e8] sm:$0xff]  }
 0x11f   : > { %22962 = vmatprep.subr.bf16.mxu1 %v25371_v50  ;;  %v25396_v50 = vld [vmem:[%s26741_s6 + $0x900] sm:$0xff]  }
 0x121   : > { %22941 = vmatpush3.bf16.msra.mxu0 %v25372_v51  ;;  %v457_v51 = vrot.slane %v27285_v60, %v26790_v38 }
 0x122   : > { %22942 = vmatprep.subr.bf16.mxu0 %v25374_v54  ;;  %22963 = vmatpush3.bf16.msra.mxu1 %v25373_v52  ;;  %v1683_v52 = vrot.slane %v27290_v20, %v26790_v38  ;;  %v465_v54 = vrot.slane %v27285_v60, %v26794_v40 }
 0x123   : > { %22964 = vmatprep.subr.bf16.mxu1 %v25375_v56  ;;  %v1691_v56 = vrot.slane %v27290_v20, %v26794_v40 }
 0x125   : > { %22943 = vmatpush3.bf16.msra.mxu0 %v25376_v57  ;;  %v2808_v57 = vshll.u32 %v2545_v39, 16  ;;  %v1679_v39 = vrot.slane %v27290_v20, %v26864_v45 }
 0x126   : > { %22944 = vmatprep.subr.bf16.mxu0 %v25378_v42  ;;  %22965 = vmatpush3.bf16.msra.mxu1 %v25377_v58  ;;  %v2814_v58 = vshll.u32 %v2547_v43, 16  ;;  %v2805_v42 = vshll.u32 %v2544_v44, 16 }
 0x127   : > { %22966 = vmatprep.subr.bf16.mxu1 %v25379_v61  ;;  %v2811_v61 = vshll.u32 %v2546_v46, 16  ;;  %v1687_v46 = vrot.slane %v27290_v20, %v26868_v47  ;;  %v25422_v20 = vld [vmem:[%s26741_s6 + $0x978] sm:$0xff]  }
 0x129   : > { %22945 = vmatpush3.bf16.msra.mxu0 %v25380_v62  ;;  %v25397_v62 = vld [vmem:[%s26741_s6 + $0x980] sm:$0xff]  }
 0x12a   : > { %22946 = vmatprep.subr.bf16.mxu0 %v25382_v0  ;;  %22967 = vmatpush3.bf16.msra.mxu1 %v25381_v63  ;;  %v25398_v63 = vld [vmem:[%s26741_s6 + $0x948] sm:$0xff]   ;;  %v1323_v0 = vpack.c.bf16 %v457_v51, %v457_v51 }
 0x12b   : > { %v22644_v49 = vpop.f32.mrb[4].mxu0  ;;  %22968 = vmatprep.subr.bf16.mxu1 %v25383_v1  ;;  %v2549_v1 = vpack.c.bf16 %v1683_v52, %v1683_v52 }
 0x12c   : > { %v22666_v3 = vpop.f32.mrb[4].mxu1  ;;  %v22645_v4 = vpop.f32.mrb[5].mxu0 }
 0x12d   : > { %v22667_v41 = vpop.f32.mrb[5].mxu1  ;;  %v22646_v6 = vadd.f32 %v22645_v4, %v22644_v49  ;;  %v22647_v8 = vpop.f32.mrb[6].mxu0  ;;  %22947 = vmatpush3.bf16.msra.mxu0 %v25384_v2  ;;  %v1325_v2 = vpack.c.bf16 %v465_v54, %v465_v54  ;;  %v2551_v49 = vpack.c.bf16 %v1691_v56, %v1691_v56  ;;  %v3530_v4 = vsel %vm26821_vm2, %v1321_v31, %v2814_v58  ;;  %v25419_v54 = vld [vmem:[%s26741_s6 + $0x9f0] sm:$0xff]  }
 0x12e   : > { %v22668_v7 = vadd.f32 %v22667_v41, %v22666_v3  ;;  %v22669_v9 = vpop.f32.mrb[6].mxu1  ;;  %v22648_v48 = vpop.f32.mrb[7].mxu0  ;;  %22948 = vmatprep.subr.bf16.mxu0 %v25386_v25  ;;  %22969 = vmatpush3.bf16.msra.mxu1 %v25385_v5  ;;  %v3527_v41 = vsel %vm26821_vm2, %v1318_v33, %v2805_v42  ;;  %v3529_v5 = vsel %vm26821_vm2, %v1320_v35, %v2811_v61  ;;  %v25399_v25 = vld [vmem:[%s26741_s6 + $0x9c8] sm:$0xff]   ;;  %v25421_v42 = vld [vmem:[%s26741_s6 + $0x9b0] sm:$0xff]  }
 0x12f   : > { %v22670_v10 = vpop.f32.mrb[7].mxu1  ;;  %v16351_v53 = vadd.f32 %v22646_v6, %v27233_v13  ;;  %22970 = vmatprep.subr.bf16.mxu1 %v25387_v11  ;;  %v441_v13 = vrot.slane %v27285_v60, %v26774_v30  ;;  %16948 = vmatprep.mubr.bf16.mxu1 %v3530_v4  ;;  %v25400_v6 = vld [vmem:[%s26741_s6 + $0x908] sm:$0xff]   ;;  %v2826_v9 = vshll.u32 %v2551_v49, 16  ;;  %v25402_v48 = vld [vmem:[%s26741_s6 + $0x950] sm:$0xff]   ;;  %v2548_v61 = vpack.c.bf16 %v1679_v39, %v1679_v39 }
 0x130   : > { %v25401_v8 = vld [vmem:[%s26741_s6 + $0x988] sm:$0xff]   ;;  %v25403_v11 = vld [vmem:[%s26741_s6 + $0x9d0] sm:$0xff]  }
 0x131   : > { %v27278_v15 = vadd.f32 %v22668_v7, %v16351_v53  ;;  %22949 = vmatpush3.bf16.msra.mxu0 %v25388_v12  ;;  %v1319_v59 = vpack.c.bf16 %v441_v13, %v441_v13  ;;  %v2820_v7 = vshll.u32 %v2549_v1, 16  ;;  %v3534_v12 = vsel %vm26821_vm2, %v1325_v2, %v2826_v9  ;;  %v25404_v53 = vld [vmem:[%s26741_s6 + $0x910] sm:$0xff]   ;;  %v25410_v13 = vld [vmem:[%s26741_s6 + $0x960] sm:$0xff]   ;;  %v25417_v35 = vld [vmem:[%s26741_s6 + $0x9a8] sm:$0xff]  }
 0x132   : > { %22950 = vmatprep.subr.bf16.mxu0 %v25390_v16  ;;  %22971 = vmatpush3.bf16.msra.mxu1 %v25389_v14  ;;  %v25405_v14 = vld [vmem:[%s26741_s6 + $0x990] sm:$0xff]   ;;  %v25406_v16 = vld [vmem:[%s26741_s6 + $0x958] sm:$0xff]   ;;  %v2817_v49 = vshll.u32 %v2548_v61, 16  ;;  %v25430_v9 = vld [vmem:[%s26741_s6 + $0xa48] sm:$0xff]  }
 0x133   : > { %22972 = vmatprep.subr.bf16.mxu1 %v25391_v17  ;;  %v3528_v3 = vsel %vm26821_vm2, %v1319_v59, %v2808_v57  ;;  %v3532_v10 = vsel %vm26821_vm2, %v1323_v0, %v2820_v7  ;;  %v25407_v17 = vld [vmem:[%s26741_s6 + $0x9d8] sm:$0xff]   ;;  %v25420_v57 = vld [vmem:[%s26741_s6 + $0x930] sm:$0xff]   ;;  %v25449_v39 = vld [vmem:[%s26741_s6 + $0xaa8] sm:$0xff]  }
 0x134   : > { %16908 = vmatprep.mubr.bf16.mxu0 %v3528_v3  ;;  %v25423_v0 = vld [vmem:[%s26741_s6 + $0x9f8] sm:$0xff]  }
 0x135   : > { %22951 = vmatpush3.bf16.msra.mxu0 %v25392_v18  ;;  %v25408_v18 = vld [vmem:[%s26741_s6 + $0x918] sm:$0xff]  }
 0x136   : > { %22980 = vmatprep.subr.bf16.mxu0 %v25394_v29  ;;  %22973 = vmatpush3.bf16.msra.mxu1 %v25393_v19  ;;  %v25409_v19 = vld [vmem:[%s26741_s6 + $0x998] sm:$0xff]   ;;  %v25416_v29 = vld [vmem:[%s26741_s6 + $0x928] sm:$0xff]  }
 0x137   : > { %23002 = vmatprep.subr.bf16.mxu1 %v25395_v37  ;;  %v25418_v37 = vld [vmem:[%s26741_s6 + $0x970] sm:$0xff]   ;;  %v25424_v1 = vld [vmem:[%s26741_s6 + $0x938] sm:$0xff]  }
 0x138   : > { %16909 = vmatmul.mubr.bf16.vlgmr.msra.gmra.mrb[32].mxu0 %v3527_v41  ;;  %v25425_v2 = vld [vmem:[%s26741_s6 + $0x9b8] sm:$0xff]  }
 0x139   : > { %16949 = vmatmul.mubr.bf16.vlgmr.msra.gmra.mrb[32].mxu1 %v3529_v5  ;;  %22981 = vmatpush3.bf16.msra.mxu0 %v25396_v50  ;;  %v25426_v5 = vld [vmem:[%s26741_s6 + $0xa40] sm:$0xff]   ;;  %v25454_v61 = vld [vmem:[%s26741_s6 + $0xa78] sm:$0xff]  }
 0x13a   : > { %23003 = vmatpush3.bf16.msra.mxu1 %v25397_v62  ;;  %22982 = vmatprep.subr.bf16.mxu0 %v25398_v63  ;;  %v461_v62 = vrot.slane %v27285_v60, %v26868_v47  ;;  %v2550_v63 = vpack.c.bf16 %v1687_v46, %v1687_v46 }
 0x13b   : > { %23004 = vmatprep.subr.bf16.mxu1 %v25399_v25  ;;  %16988 = vmatprep.mubr.bf16.mxu0 %v3532_v10  ;;  %v25428_v25 = vld [vmem:[%s26741_s6 + $0xa00] sm:$0xff]   ;;  %v25432_v10 = vld [vmem:[%s26741_s6 + $0xa08] sm:$0xff]  }
 0x13c   : > { %17028 = vmatprep.mubr.bf16.mxu1 %v3534_v12  ;;  %v1324_v4 = vpack.c.bf16 %v461_v62, %v461_v62  ;;  %v2823_v41 = vshll.u32 %v2550_v63, 16  ;;  %v25434_v12 = vld [vmem:[%s26741_s6 + $0xa50] sm:$0xff]   ;;  %v27409_v62 = vld [vmem:[%s26731_s24 + $0x28] sm:$0xff] }
 0x13d   : > { %22983 = vmatpush3.bf16.msra.mxu0 %v25400_v6  ;;  %v25429_v6 = vld [vmem:[%s26741_s6 + $0xa80] sm:$0xff]   ;;  %v27412_v63 = vld [vmem:[%s26736_s27 + $0x28] sm:$0xff] }
 0x13e   : > { %23005 = vmatpush3.bf16.msra.mxu1 %v25401_v8  ;;  %22984 = vmatprep.subr.bf16.mxu0 %v25402_v48  ;;  %v3533_v8 = vsel %vm26821_vm2, %v1324_v4, %v2823_v41  ;;  %v25431_v48 = vld [vmem:[%s26741_s6 + $0xac8] sm:$0xff]   ;;  %v469_v4 = vrot.slane %v27409_v62, %v26782_v34  ;;  %v1695_v41 = vrot.slane %v27412_v63, %v26782_v34 }
 0x13f   : > { %23006 = vmatprep.subr.bf16.mxu1 %v25403_v11  ;;  %v25433_v11 = vld [vmem:[%s26741_s6 + $0xa88] sm:$0xff]  }
 0x141   : > { %22985 = vmatpush3.bf16.msra.mxu0 %v25404_v53  ;;  %v25435_v53 = vld [vmem:[%s26741_s6 + $0xad0] sm:$0xff]  }
 0x142   : > { %23007 = vmatpush3.bf16.msra.mxu1 %v25405_v14  ;;  %22986 = vmatprep.subr.bf16.mxu0 %v25406_v16  ;;  %v25436_v14 = vld [vmem:[%s26741_s6 + $0xa10] sm:$0xff]  }
 0x143   : > { %23008 = vmatprep.subr.bf16.mxu1 %v25407_v17  ;;  %v25437_v16 = vld [vmem:[%s26741_s6 + $0xa90] sm:$0xff]   ;;  %v25438_v17 = vld [vmem:[%s26741_s6 + $0xa58] sm:$0xff]  }
 0x145   : > { %22987 = vmatpush3.bf16.msra.mxu0 %v25408_v18  ;;  %v25439_v18 = vld [vmem:[%s26741_s6 + $0xad8] sm:$0xff]  }
 0x146   : > { %23009 = vmatpush3.bf16.msra.mxu1 %v25409_v19  ;;  %22988 = vmatprep.subr.bf16.mxu0 %v25410_v13  ;;  %v25440_v19 = vld [vmem:[%s26741_s6 + $0xa18] sm:$0xff]  }
 0x147   : > { %23010 = vmatprep.subr.bf16.mxu1 %v25411_v21  ;;  %v25441_v13 = vld [vmem:[%s26741_s6 + $0xa98] sm:$0xff]   ;;  %v25442_v21 = vld [vmem:[%s26741_s6 + $0xa60] sm:$0xff]  }
 0x149   : > { %22989 = vmatpush3.bf16.msra.mxu0 %v25412_v22  ;;  %v25443_v22 = vld [vmem:[%s26741_s6 + $0xae0] sm:$0xff]  }
 0x14a   : > { %23011 = vmatpush3.bf16.msra.mxu1 %v25413_v23  ;;  %22990 = vmatprep.subr.bf16.mxu0 %v25414_v24  ;;  %v25444_v23 = vld [vmem:[%s26741_s6 + $0xa20] sm:$0xff]  }
 0x14b   : > { %v22688_v26 = vpop.f32.mrb[8].mxu0  ;;  %23012 = vmatprep.subr.bf16.mxu1 %v25415_v27  ;;  %v25445_v24 = vld [vmem:[%s26741_s6 + $0xaa0] sm:$0xff]  }
 0x14c   : > { %v22689_v28 = vpop.f32.mrb[9].mxu0  ;;  %v22710_v59 = vpop.f32.mrb[8].mxu1 }
 0x14d   : > { %v22690_v31 = vadd.f32 %v22689_v28, %v22688_v26  ;;  %v22691_v33 = vpop.f32.mrb[10].mxu0  ;;  %v22711_v43 = vpop.f32.mrb[9].mxu1  ;;  %22991 = vmatpush3.bf16.msra.mxu0 %v25416_v29  ;;  %v25446_v26 = vld [vmem:[%s26741_s6 + $0xa68] sm:$0xff]  }
 0x14e   : > { %v22692_v44 = vpop.f32.mrb[11].mxu0  ;;  %v22712_v51 = vadd.f32 %v22711_v43, %v22710_v59  ;;  %v22713_v52 = vpop.f32.mrb[10].mxu1  ;;  %23013 = vmatpush3.bf16.msra.mxu1 %v25417_v35  ;;  %22992 = vmatprep.subr.bf16.mxu0 %v25418_v37  ;;  %v25447_v28 = vld [vmem:[%s26741_s6 + $0xae8] sm:$0xff]  }
 0x14f   : > { %v16431_v50 = vadd.f32 %v22690_v31, %v27278_v15  ;;  %v22714_v56 = vpop.f32.mrb[11].mxu1  ;;  %v453_v15 = vrot.slane %v27285_v60, %v26864_v45  ;;  %23014 = vmatprep.subr.bf16.mxu1 %v25419_v54  ;;  %v25427_v60 = vld [vmem:[%s26741_s6 + $0xac0] sm:$0xff]   ;;  %v25448_v59 = vld [vmem:[%s26741_s6 + $0xa28] sm:$0xff]   ;;  %v25450_v44 = vld [vmem:[%s26741_s6 + $0xa70] sm:$0xff]  }
 0x150   : > { %v25451_v52 = vld [vmem:[%s26741_s6 + $0xaf0] sm:$0xff]  }
 0x151   : > { %v27358_v58 = vadd.f32 %v22712_v51, %v16431_v50  ;;  %22993 = vmatpush3.bf16.msra.mxu0 %v25420_v57  ;;  %v1322_v3 = vpack.c.bf16 %v453_v15, %v453_v15  ;;  %v25452_v56 = vld [vmem:[%s26741_s6 + $0xa30] sm:$0xff]   ;;  %v25457_v15 = vld [vmem:[%s26741_s6 + $0xab8] sm:$0xff]  }
 0x152   : > { %23015 = vmatpush3.bf16.msra.mxu1 %v25421_v42  ;;  %22994 = vmatprep.subr.bf16.mxu0 %v25422_v20  ;;  %v25453_v57 = vld [vmem:[%s26741_s6 + $0xab0] sm:$0xff]   ;;  %v25456_v20 = vld [vmem:[%s26741_s6 + $0xa38] sm:$0xff]  }
 0x153   : > { %23016 = vmatprep.subr.bf16.mxu1 %v25423_v0  ;;  %v3531_v7 = vsel %vm26821_vm2, %v1322_v3, %v2817_v49  ;;  %v473_v0 = vrot.slane %v27409_v62, %v26774_v30  ;;  %v25458_v49 = vld [vmem:[%s26741_s6 + $0xb40] sm:$0xff]   ;;  %v1707_v3 = vrot.slane %v27412_v63, %v26778_v32 }
 0x155   : > { %22995 = vmatpush3.bf16.msra.mxu0 %v25424_v1  ;;  %v1699_v1 = vrot.slane %v27412_v63, %v26774_v30 }
 0x156   : > { %23017 = vmatpush3.bf16.msra.mxu1 %v25425_v2  ;;  %23024 = vmatprep.subr.bf16.mxu0 %v25426_v5  ;;  %v481_v2 = vrot.slane %v27409_v62, %v26778_v32  ;;  %v25459_v5 = vld [vmem:[%s26741_s6 + $0xbc0] sm:$0xff]  }
 0x157   : > { %23046 = vmatprep.subr.bf16.mxu1 %v25427_v60  ;;  %v1327_v60 = vpack.c.bf16 %v473_v0, %v473_v0  ;;  %v25474_v0 = vld [vmem:[%s26741_s6 + $0xb60] sm:$0xff]  }
 0x158   : > { %16989 = vmatmul.mubr.bf16.vlgmr.msra.gmra.mrb[36].mxu0 %v3531_v7  ;;  %v477_v7 = vrot.slane %v27409_v62, %v26786_v36 }
 0x159   : > { %17029 = vmatmul.mubr.bf16.vlgmr.msra.gmra.mrb[36].mxu1 %v3533_v8  ;;  %23025 = vmatpush3.bf16.msra.mxu0 %v25428_v25  ;;  %v2553_v25 = vpack.c.bf16 %v1699_v1, %v1699_v1  ;;  %v2555_v8 = vpack.c.bf16 %v1707_v3, %v1707_v3  ;;  %v25475_v1 = vld [vmem:[%s26741_s6 + $0xbe0] sm:$0xff]  }
 0x15a   : > { %23047 = vmatpush3.bf16.msra.mxu1 %v25429_v6  ;;  %23026 = vmatprep.subr.bf16.mxu0 %v25430_v9  ;;  %v1329_v6 = vpack.c.bf16 %v481_v2, %v481_v2  ;;  %v1326_v9 = vpack.c.bf16 %v469_v4, %v469_v4  ;;  %v25476_v2 = vld [vmem:[%s26741_s6 + $0xb20] sm:$0xff]   ;;  %v25478_v4 = vld [vmem:[%s26741_s6 + $0xb68] sm:$0xff]  }
 0x15b   : > { %23048 = vmatprep.subr.bf16.mxu1 %v25431_v48  ;;  %v2552_v48 = vpack.c.bf16 %v1695_v41, %v1695_v41 }
 0x15d   : > { %23027 = vmatpush3.bf16.msra.mxu0 %v25432_v10  ;;  %v1703_v10 = vrot.slane %v27412_v63, %v26786_v36 }
 0x15e   : > { %23049 = vmatpush3.bf16.msra.mxu1 %v25433_v11  ;;  %23028 = vmatprep.subr.bf16.mxu0 %v25434_v12  ;;  %v2832_v11 = vshll.u32 %v2553_v25, 16  ;;  %v1328_v12 = vpack.c.bf16 %v477_v7, %v477_v7  ;;  %v25480_v25 = vld [vmem:[%s26741_s6 + $0xb28] sm:$0xff]  }
 0x15f   : > { %23050 = vmatprep.subr.bf16.mxu1 %v25435_v53  ;;  %v25460_v53 = vld [vmem:[%s26741_s6 + $0xb00] sm:$0xff]  }
 0x161   : > { %23029 = vmatpush3.bf16.msra.mxu0 %v25436_v14  ;;  %v489_v14 = vrot.slane %v27409_v62, %v26790_v38 }
 0x162   : > { %23051 = vmatpush3.bf16.msra.mxu1 %v25437_v16  ;;  %23030 = vmatprep.subr.bf16.mxu0 %v25438_v17  ;;  %v1715_v16 = vrot.slane %v27412_v63, %v26790_v38  ;;  %v2838_v17 = vshll.u32 %v2555_v8, 16 }
 0x163   : > { %23052 = vmatprep.subr.bf16.mxu1 %v25439_v18  ;;  %v2829_v18 = vshll.u32 %v2552_v48, 16 }
 0x165   : > { %23031 = vmatpush3.bf16.msra.mxu0 %v25440_v19  ;;  %v2554_v19 = vpack.c.bf16 %v1703_v10, %v1703_v10  ;;  %v25481_v10 = vld [vmem:[%s26741_s6 + $0xba8] sm:$0xff]  }
 0x166   : > { %23053 = vmatpush3.bf16.msra.mxu1 %v25441_v13  ;;  %23032 = vmatprep.subr.bf16.mxu0 %v25442_v21  ;;  %v25461_v13 = vld [vmem:[%s26741_s6 + $0xb80] sm:$0xff]   ;;  %v497_v21 = vrot.slane %v27409_v62, %v26794_v40 }
 0x167   : > { %23054 = vmatprep.subr.bf16.mxu1 %v25443_v22  ;;  %v3536_v22 = vsel %vm26821_vm2, %v1327_v60, %v2832_v11  ;;  %v25479_v60 = vld [vmem:[%s26741_s6 + $0xbe8] sm:$0xff]  }
 0x168   : > { %17068 = vmatprep.mubr.bf16.mxu0 %v3536_v22 }
 0x169   : > { %23033 = vmatpush3.bf16.msra.mxu0 %v25444_v23  ;;  %v25462_v23 = vld [vmem:[%s26741_s6 + $0xb48] sm:$0xff]  }
 0x16a   : > { %23055 = vmatpush3.bf16.msra.mxu1 %v25445_v24  ;;  %23034 = vmatprep.subr.bf16.mxu0 %v25446_v26  ;;  %v1331_v24 = vpack.c.bf16 %v489_v14, %v489_v14  ;;  %v2557_v26 = vpack.c.bf16 %v1715_v16, %v1715_v16 }
 0x16b   : > { %v22732_v27 = vpop.f32.mrb[12].mxu0  ;;  %23056 = vmatprep.subr.bf16.mxu1 %v25447_v28  ;;  %v3538_v28 = vsel %vm26821_vm2, %v1329_v6, %v2838_v17  ;;  %v25483_v17 = vld [vmem:[%s26741_s6 + $0xbf0] sm:$0xff]  }
 0x16c   : > { %v22733_v29 = vpop.f32.mrb[13].mxu0  ;;  %v22754_v31 = vpop.f32.mrb[12].mxu1  ;;  %17108 = vmatprep.mubr.bf16.mxu1 %v3538_v28  ;;  %v25489_v28 = vld [vmem:[%s26741_s6 + $0xbb8] sm:$0xff]  }
 0x16d   : > { %v22734_v33 = vadd.f32 %v22733_v29, %v22732_v27  ;;  %v22735_v35 = vpop.f32.mrb[14].mxu0  ;;  %v22755_v37 = vpop.f32.mrb[13].mxu1  ;;  %23035 = vmatpush3.bf16.msra.mxu0 %v25448_v59  ;;  %v1723_v27 = vrot.slane %v27412_v63, %v26794_v40  ;;  %v3535_v29 = vsel %vm26821_vm2, %v1326_v9, %v2829_v18  ;;  %v2835_v59 = vshll.u32 %v2554_v19, 16 }
 0x16e   : > { %v22736_v43 = vpop.f32.mrb[15].mxu0  ;;  %v22756_v50 = vadd.f32 %v22755_v37, %v22754_v31  ;;  %v22757_v51 = vpop.f32.mrb[14].mxu1  ;;  %23057 = vmatpush3.bf16.msra.mxu1 %v25449_v39  ;;  %23036 = vmatprep.subr.bf16.mxu0 %v25450_v44  ;;  %v25463_v31 = vld [vmem:[%s26741_s6 + $0xbc8] sm:$0xff]   ;;  %v2844_v35 = vshll.u32 %v2557_v26, 16  ;;  %v1333_v37 = vpack.c.bf16 %v497_v21, %v497_v21  ;;  %v1719_v18 = vrot.slane %v27412_v63, %v26868_v47  ;;  %v25485_v21 = vld [vmem:[%s26741_s6 + $0xbb0] sm:$0xff]  }
 0x16f   : > { %v16511_v46 = vadd.f32 %v22734_v33, %v27358_v58  ;;  %v22758_v54 = vpop.f32.mrb[15].mxu1  ;;  %23058 = vmatprep.subr.bf16.mxu1 %v25451_v52  ;;  %v25455_v58 = vld [vmem:[%s26741_s6 + $0xaf8] sm:$0xff]   ;;  %v25464_v33 = vld [vmem:[%s26741_s6 + $0xb08] sm:$0xff]   ;;  %v2559_v39 = vpack.c.bf16 %v1723_v27, %v1723_v27  ;;  %v3537_v43 = vsel %vm26821_vm2, %v1328_v12, %v2835_v59  ;;  %v25467_v52 = vld [vmem:[%s26741_s6 + $0xbd0] sm:$0xff]  }
 0x170   : > { %v25465_v44 = vld [vmem:[%s26741_s6 + $0xb88] sm:$0xff]   ;;  %v25468_v54 = vld [vmem:[%s26741_s6 + $0xb10] sm:$0xff]   ;;  %v2558_v26 = vpack.c.bf16 %v1719_v18, %v1719_v18  ;;  %v25488_v27 = vld [vmem:[%s26741_s6 + $0xb38] sm:$0xff]  }
 0x171   : > { %v27402_v42 = vadd.f32 %v22756_v50, %v16511_v46  ;;  %23037 = vmatpush3.bf16.msra.mxu0 %v25452_v56  ;;  %v25466_v46 = vld [vmem:[%s26741_s6 + $0xb50] sm:$0xff]   ;;  %v3540_v50 = vsel %vm26821_vm2, %v1331_v24, %v2844_v35  ;;  %v2850_v51 = vshll.u32 %v2559_v39, 16  ;;  %v25487_v24 = vld [vmem:[%s26741_s6 + $0xbf8] sm:$0xff]  }
 0x172   : > { %23059 = vmatpush3.bf16.msra.mxu1 %v25453_v57  ;;  %23038 = vmatprep.subr.bf16.mxu0 %v25454_v61  ;;  %v25469_v57 = vld [vmem:[%s26741_s6 + $0xb90] sm:$0xff]   ;;  %v25470_v61 = vld [vmem:[%s26741_s6 + $0xb58] sm:$0xff]   ;;  %v2847_v35 = vshll.u32 %v2558_v26, 16 }
 0x173   : > { %23060 = vmatprep.subr.bf16.mxu1 %v25455_v58  ;;  %v3542_v56 = vsel %vm26821_vm2, %v1333_v37, %v2850_v51  ;;  %v25471_v58 = vld [vmem:[%s26741_s6 + $0xbd8] sm:$0xff]   ;;  %v25482_v12 = vld [vmem:[%s26741_s6 + $0xb70] sm:$0xff]   ;;  %v25491_v37 = vld [vmem:[%s26741_s6 + $0xcc0] sm:$0xff]  }
 0x174   : > { %v25496_v51 = vld [vmem:[%s26741_s6 + $0xc08] sm:$0xff]   ;;  %v25515_v18 = vld [vmem:[%s26741_s6 + $0xcf0] sm:$0xff]  }
 0x175   : > { %23039 = vmatpush3.bf16.msra.mxu0 %v25456_v20  ;;  %v25472_v20 = vld [vmem:[%s26741_s6 + $0xb18] sm:$0xff]  }
 0x176   : > { %23061 = vmatpush3.bf16.msra.mxu1 %v25457_v15  ;;  %23068 = vmatprep.subr.bf16.mxu0 %v25458_v49  ;;  %v25473_v15 = vld [vmem:[%s26741_s6 + $0xb98] sm:$0xff]   ;;  %v25477_v49 = vld [vmem:[%s26741_s6 + $0xba0] sm:$0xff]  }
 0x177   : > { %23090 = vmatprep.subr.bf16.mxu1 %v25459_v5 }
 0x178   : > { %17069 = vmatmul.mubr.bf16.vlgmr.msra.gmra.mrb[40].mxu0 %v3535_v29 }
 0x179   : > { %23069 = vmatpush3.bf16.msra.mxu0 %v25460_v53  ;;  %17109 = vmatmul.mubr.bf16.vlgmr.msra.gmra.mrb[40].mxu1 %v3537_v43  ;;  %v1711_v53 = vrot.slane %v27412_v63, %v26864_v45  ;;  %v493_v63 = vrot.slane %v27409_v62, %v26868_v47  ;;  %v25493_v43 = vld [vmem:[%s26741_s6 + $0xc80] sm:$0xff]  }
 0x17a   : > { %23070 = vmatprep.subr.bf16.mxu0 %v25462_v23  ;;  %23091 = vmatpush3.bf16.msra.mxu1 %v25461_v13  ;;  %v25484_v13 = vld [vmem:[%s26741_s6 + $0xb30] sm:$0xff]   ;;  %v25486_v23 = vld [vmem:[%s26741_s6 + $0xb78] sm:$0xff]  }
 0x17b   : > { %17148 = vmatprep.mubr.bf16.mxu0 %v3540_v50  ;;  %23092 = vmatprep.subr.bf16.mxu1 %v25463_v31  ;;  %v2556_v22 = vpack.c.bf16 %v1711_v53, %v1711_v53  ;;  %v25490_v31 = vld [vmem:[%s26741_s6 + $0xc40] sm:$0xff]   ;;  %v25495_v50 = vld [vmem:[%s26741_s6 + $0xcc8] sm:$0xff]  }
 0x17c   : > { %17188 = vmatprep.mubr.bf16.mxu1 %v3542_v56  ;;  %v25499_v56 = vld [vmem:[%s26741_s6 + $0xcd0] sm:$0xff]  }
 0x17d   : > { %23071 = vmatpush3.bf16.msra.mxu0 %v25464_v33  ;;  %v2841_v59 = vshll.u32 %v2556_v22, 16  ;;  %v1332_v33 = vpack.c.bf16 %v493_v63, %v493_v63  ;;  %v25520_v22 = vld [vmem:[%s26741_s6 + $0xc38] sm:$0xff]  }
 0x17e   : > { %23072 = vmatprep.subr.bf16.mxu0 %v25466_v46  ;;  %23093 = vmatpush3.bf16.msra.mxu1 %v25465_v44  ;;  %v25494_v44 = vld [vmem:[%s26741_s6 + $0xc48] sm:$0xff]  }
 0x17f   : > { %23094 = vmatprep.subr.bf16.mxu1 %v25467_v52  ;;  %v3541_v46 = vsel %vm26821_vm2, %v1332_v33, %v2847_v35  ;;  %v25497_v52 = vld [vmem:[%s26741_s6 + $0xc88] sm:$0xff]  }
 0x181   : > { %23073 = vmatpush3.bf16.msra.mxu0 %v25468_v54  ;;  %v25498_v54 = vld [vmem:[%s26741_s6 + $0xc50] sm:$0xff]  }
 0x182   : > { %23074 = vmatprep.subr.bf16.mxu0 %v25470_v61  ;;  %23095 = vmatpush3.bf16.msra.mxu1 %v25469_v57  ;;  %v25500_v57 = vld [vmem:[%s26741_s6 + $0xc10] sm:$0xff]  }
 0x183   : > { %23096 = vmatprep.subr.bf16.mxu1 %v25471_v58  ;;  %v25501_v61 = vld [vmem:[%s26741_s6 + $0xc90] sm:$0xff]   ;;  %v25502_v58 = vld [vmem:[%s26741_s6 + $0xc58] sm:$0xff]  }
 0x185   : > { %23075 = vmatpush3.bf16.msra.mxu0 %v25472_v20  ;;  %v25503_v20 = vld [vmem:[%s26741_s6 + $0xcd8] sm:$0xff]  }
 0x186   : > { %23076 = vmatprep.subr.bf16.mxu0 %v25474_v0  ;;  %23097 = vmatpush3.bf16.msra.mxu1 %v25473_v15  ;;  %v25504_v15 = vld [vmem:[%s26741_s6 + $0xc18] sm:$0xff]  }
 0x187   : > { %23098 = vmatprep.subr.bf16.mxu1 %v25475_v1  ;;  %v25505_v0 = vld [vmem:[%s26741_s6 + $0xc98] sm:$0xff]   ;;  %v25506_v1 = vld [vmem:[%s26741_s6 + $0xc60] sm:$0xff]  }
 0x189   : > { %23077 = vmatpush3.bf16.msra.mxu0 %v25476_v2  ;;  %v25507_v2 = vld [vmem:[%s26741_s6 + $0xce0] sm:$0xff]  }
 0x18a   : > { %23078 = vmatprep.subr.bf16.mxu0 %v25478_v4  ;;  %23099 = vmatpush3.bf16.msra.mxu1 %v25477_v49  ;;  %v25508_v49 = vld [vmem:[%s26741_s6 + $0xc20] sm:$0xff]  }
 0x18b   : > { %v22776_v3 = vpop.f32.mrb[16].mxu0  ;;  %23100 = vmatprep.subr.bf16.mxu1 %v25479_v60 }
 0x18c   : > { %v22798_v41 = vpop.f32.mrb[16].mxu1  ;;  %v22777_v5 = vpop.f32.mrb[17].mxu0 }
 0x18d   : > { %v22778_v6 = vadd.f32 %v22777_v5, %v22776_v3  ;;  %v22799_v7 = vpop.f32.mrb[17].mxu1  ;;  %v22779_v8 = vpop.f32.mrb[18].mxu0  ;;  %23079 = vmatpush3.bf16.msra.mxu0 %v25480_v25  ;;  %v25509_v3 = vld [vmem:[%s26741_s6 + $0xca0] sm:$0xff]   ;;  %v25511_v25 = vld [vmem:[%s26741_s6 + $0xce8] sm:$0xff]  }
 0x18e   : > { %v22800_v9 = vadd.f32 %v22799_v7, %v22798_v41  ;;  %v22801_v48 = vpop.f32.mrb[18].mxu1  ;;  %v22780_v11 = vpop.f32.mrb[19].mxu0  ;;  %23080 = vmatprep.subr.bf16.mxu0 %v25482_v12  ;;  %23101 = vmatpush3.bf16.msra.mxu1 %v25481_v10  ;;  %v25510_v41 = vld [vmem:[%s26741_s6 + $0xc68] sm:$0xff]  }
 0x18f   : > { %v16591_v14 = vadd.f32 %v22778_v6, %v27402_v42  ;;  %v22802_v16 = vpop.f32.mrb[19].mxu1  ;;  %v485_v42 = vrot.slane %v27409_v62, %v26864_v45  ;;  %23102 = vmatprep.subr.bf16.mxu1 %v25483_v17  ;;  %v25492_v62 = vld [vmem:[%s26741_s6 + $0xc00] sm:$0xff]   ;;  %v25512_v6 = vld [vmem:[%s26741_s6 + $0xc28] sm:$0xff]  }
 0x190   : > { %v25513_v16 = vld [vmem:[%s26741_s6 + $0xca8] sm:$0xff]  }
 0x191   : > { %v27481_v19 = vadd.f32 %v22800_v9, %v16591_v14  ;;  %23081 = vmatpush3.bf16.msra.mxu0 %v25484_v13  ;;  %v1330_v29 = vpack.c.bf16 %v485_v42, %v485_v42  ;;  %v25514_v14 = vld [vmem:[%s26741_s6 + $0xc70] sm:$0xff]   ;;  %v25519_v42 = vld [vmem:[%s26741_s6 + $0xcf8] sm:$0xff]  }
 0x192   : > { %23082 = vmatprep.subr.bf16.mxu0 %v25486_v23  ;;  %23103 = vmatpush3.bf16.msra.mxu1 %v25485_v21  ;;  %v25516_v13 = vld [vmem:[%s26741_s6 + $0xc30] sm:$0xff]   ;;  %v25518_v21 = vld [vmem:[%s26741_s6 + $0xc78] sm:$0xff]  }
 0x193   : > { %23104 = vmatprep.subr.bf16.mxu1 %v25487_v24  ;;  %v3539_v39 = vsel %vm26821_vm2, %v1330_v29, %v2841_v59  ;;  %v27532_v23 = vld [vmem:[%s26731_s24 + $0x30] sm:$0xff]  ;;  %v25522_v29 = vld [vmem:[%s26741_s6 + $0xd40] sm:$0xff]   ;;  %v25521_v59 = vld [vmem:[%s26741_s6 + $0xcb8] sm:$0xff]  }
 0x194   : > { %v27535_v24 = vld [vmem:[%s26736_s27 + $0x30] sm:$0xff]  ;;  %v505_v63 = vrot.slane %v27532_v23, %v26774_v30  ;;  %v509_v35 = vrot.slane %v27532_v23, %v26786_v36 }
 0x195   : > { %23083 = vmatpush3.bf16.msra.mxu0 %v25488_v27  ;;  %v1731_v26 = vrot.slane %v27535_v24, %v26774_v30  ;;  %v513_v27 = vrot.slane %v27532_v23, %v26778_v32  ;;  %v1727_v33 = vrot.slane %v27535_v24, %v26782_v34 }
 0x196   : > { %23112 = vmatprep.subr.bf16.mxu0 %v25490_v31  ;;  %23105 = vmatpush3.bf16.msra.mxu1 %v25489_v28  ;;  %v1739_v28 = vrot.slane %v27535_v24, %v26778_v32  ;;  %v501_v31 = vrot.slane %v27532_v23, %v26782_v34 }
 0x197   : > { %23134 = vmatprep.subr.bf16.mxu1 %v25491_v37  ;;  %v1735_v37 = vrot.slane %v27535_v24, %v26786_v36 }
 0x198   : > { %17149 = vmatmul.mubr.bf16.vlgmr.msra.gmra.mrb[44].mxu0 %v3539_v39  ;;  %v2561_v39 = vpack.c.bf16 %v1731_v26, %v1731_v26  ;;  %v25538_v26 = vld [vmem:[%s26741_s6 + $0xd60] sm:$0xff]  }
 0x199   : > { %23113 = vmatpush3.bf16.msra.mxu0 %v25492_v62  ;;  %17189 = vmatmul.mubr.bf16.vlgmr.msra.gmra.mrb[44].mxu1 %v3541_v46  ;;  %v1335_v62 = vpack.c.bf16 %v505_v63, %v505_v63  ;;  %v25523_v46 = vld [vmem:[%s26741_s6 + $0xdc0] sm:$0xff]   ;;  %v25537_v63 = vld [vmem:[%s26741_s6 + $0xd98] sm:$0xff]  }
 0x19a   : > { %23114 = vmatprep.subr.bf16.mxu0 %v25494_v44  ;;  %23135 = vmatpush3.bf16.msra.mxu1 %v25493_v43  ;;  %v1337_v43 = vpack.c.bf16 %v513_v27, %v513_v27  ;;  %v2563_v44 = vpack.c.bf16 %v1739_v28, %v1739_v28  ;;  %v25539_v27 = vld [vmem:[%s26741_s6 + $0xde0] sm:$0xff]  }
 0x19b   : > { %23136 = vmatprep.subr.bf16.mxu1 %v25495_v50  ;;  %v1334_v50 = vpack.c.bf16 %v501_v31, %v501_v31  ;;  %v25540_v28 = vld [vmem:[%s26741_s6 + $0xd20] sm:$0xff]   ;;  %v25542_v31 = vld [vmem:[%s26741_s6 + $0xd68] sm:$0xff]  }
 0x19d   : > { %23115 = vmatpush3.bf16.msra.mxu0 %v25496_v51  ;;  %v2560_v51 = vpack.c.bf16 %v1727_v33, %v1727_v33 }
 0x19e   : > { %23116 = vmatprep.subr.bf16.mxu0 %v25498_v54  ;;  %23137 = vmatpush3.bf16.msra.mxu1 %v25497_v52  ;;  %v1336_v52 = vpack.c.bf16 %v509_v35, %v509_v35  ;;  %v2562_v54 = vpack.c.bf16 %v1735_v37, %v1735_v37  ;;  %v25543_v35 = vld [vmem:[%s26741_s6 + $0xde8] sm:$0xff]  }
 0x19f   : > { %23138 = vmatprep.subr.bf16.mxu1 %v25499_v56  ;;  %v25524_v56 = vld [vmem:[%s26741_s6 + $0xd00] sm:$0xff]  }
 0x1a1   : > { %23117 = vmatpush3.bf16.msra.mxu0 %v25500_v57  ;;  %v25525_v57 = vld [vmem:[%s26741_s6 + $0xd80] sm:$0xff]  }
 0x1a2   : > { %23118 = vmatprep.subr.bf16.mxu0 %v25502_v58  ;;  %23139 = vmatpush3.bf16.msra.mxu1 %v25501_v61  ;;  %v2856_v61 = vshll.u32 %v2561_v39, 16  ;;  %v2862_v58 = vshll.u32 %v2563_v44, 16  ;;  %v25545_v44 = vld [vmem:[%s26741_s6 + $0xda8] sm:$0xff]  }
 0x1a3   : > { %23140 = vmatprep.subr.bf16.mxu1 %v25503_v20  ;;  %v521_v20 = vrot.slane %v27532_v23, %v26790_v38 }
 0x1a5   : > { %23119 = vmatpush3.bf16.msra.mxu0 %v25504_v15  ;;  %v1747_v15 = vrot.slane %v27535_v24, %v26790_v38 }
 0x1a6   : > { %23120 = vmatprep.subr.bf16.mxu0 %v25506_v1  ;;  %23141 = vmatpush3.bf16.msra.mxu1 %v25505_v0  ;;  %v2853_v0 = vshll.u32 %v2560_v51, 16  ;;  %v2859_v1 = vshll.u32 %v2562_v54, 16  ;;  %v1743_v51 = vrot.slane %v27535_v24, %v26864_v45 }
 0x1a7   : > { %23142 = vmatprep.subr.bf16.mxu1 %v25507_v2  ;;  %v25526_v2 = vld [vmem:[%s26741_s6 + $0xd48] sm:$0xff]  }
 0x1a9   : > { %23121 = vmatpush3.bf16.msra.mxu0 %v25508_v49  ;;  %v25527_v49 = vld [vmem:[%s26741_s6 + $0xdc8] sm:$0xff]  }
 0x1aa   : > { %23122 = vmatprep.subr.bf16.mxu0 %v25510_v41  ;;  %23143 = vmatpush3.bf16.msra.mxu1 %v25509_v3  ;;  %v529_v3 = vrot.slane %v27532_v23, %v26794_v40  ;;  %v3544_v41 = vsel %vm26821_vm2, %v1335_v62, %v2856_v61  ;;  %v1751_v61 = vrot.slane %v27535_v24, %v26868_v47 }
 0x1ab   : > { %v22820_v4 = vpop.f32.mrb[20].mxu0  ;;  %23144 = vmatprep.subr.bf16.mxu1 %v25511_v25  ;;  %v2565_v25 = vpack.c.bf16 %v1747_v15, %v1747_v15  ;;  %17228 = vmatprep.mubr.bf16.mxu0 %v3544_v41  ;;  %v25552_v41 = vld [vmem:[%s26741_s6 + $0xd38] sm:$0xff]  }
 0x1ac   : > { %v22842_v5 = vpop.f32.mrb[20].mxu1  ;;  %v22821_v60 = vpop.f32.mrb[21].mxu0 }
 0x1ad   : > { %v22822_v7 = vadd.f32 %v22821_v60, %v22820_v4  ;;  %v22843_v8 = vpop.f32.mrb[21].mxu1  ;;  %v22823_v9 = vpop.f32.mrb[22].mxu0  ;;  %23123 = vmatpush3.bf16.msra.mxu0 %v25512_v6  ;;  %v1755_v4 = vrot.slane %v27535_v24, %v26794_v40  ;;  %v1339_v60 = vpack.c.bf16 %v521_v20, %v521_v20  ;;  %v3543_v6 = vsel %vm26821_vm2, %v1334_v50, %v2853_v0  ;;  %v25547_v20 = vld [vmem:[%s26741_s6 + $0xdf0] sm:$0xff]  }
 0x1ae   : > { %v22844_v48 = vadd.f32 %v22843_v8, %v22842_v5  ;;  %v22845_v10 = vpop.f32.mrb[22].mxu1  ;;  %v22824_v11 = vpop.f32.mrb[23].mxu0  ;;  %23124 = vmatprep.subr.bf16.mxu0 %v25514_v14  ;;  %23145 = vmatpush3.bf16.msra.mxu1 %v25513_v16  ;;  %v3546_v5 = vsel %vm26821_vm2, %v1337_v43, %v2862_v58  ;;  %v25528_v8 = vld [vmem:[%s26741_s6 + $0xd08] sm:$0xff]   ;;  %v25548_v0 = vld [vmem:[%s26741_s6 + $0xd30] sm:$0xff]   ;;  %v525_v24 = vrot.slane %v27532_v23, %v26868_v47 }
 0x1af   : > { %v16671_v12 = vadd.f32 %v22822_v7, %v27481_v19  ;;  %v22846_v53 = vpop.f32.mrb[23].mxu1  ;;  %v25517_v19 = vld [vmem:[%s26741_s6 + $0xcb0] sm:$0xff]   ;;  %23146 = vmatprep.subr.bf16.mxu1 %v25515_v18  ;;  %17268 = vmatprep.mubr.bf16.mxu1 %v3546_v5  ;;  %v3545_v7 = vsel %vm26821_vm2, %v1336_v52, %v2859_v1  ;;  %v25529_v9 = vld [vmem:[%s26741_s6 + $0xd88] sm:$0xff]   ;;  %v1341_v10 = vpack.c.bf16 %v529_v3, %v529_v3  ;;  %v25553_v5 = vld [vmem:[%s26741_s6 + $0xdb8] sm:$0xff]  }
 0x1b0   : > { %v2567_v11 = vpack.c.bf16 %v1755_v4, %v1755_v4  ;;  %v25531_v53 = vld [vmem:[%s26741_s6 + $0xdd0] sm:$0xff]   ;;  %v25544_v43 = vld [vmem:[%s26741_s6 + $0xd28] sm:$0xff]   ;;  %v2566_v3 = vpack.c.bf16 %v1751_v61, %v1751_v61  ;;  %v25551_v4 = vld [vmem:[%s26741_s6 + $0xdf8] sm:$0xff]  }
 0x1b1   : > { %v27523_v17 = vadd.f32 %v22844_v48, %v16671_v12  ;;  %23125 = vmatpush3.bf16.msra.mxu0 %v25516_v13  ;;  %v2868_v48 = vshll.u32 %v2565_v25, 16  ;;  %v25530_v12 = vld [vmem:[%s26741_s6 + $0xd50] sm:$0xff]  }
 0x1b2   : > { %23126 = vmatprep.subr.bf16.mxu0 %v25518_v21  ;;  %23147 = vmatpush3.bf16.msra.mxu1 %v25517_v19  ;;  %v2874_v16 = vshll.u32 %v2567_v11, 16  ;;  %v25532_v18 = vld [vmem:[%s26741_s6 + $0xd10] sm:$0xff]   ;;  %v25534_v19 = vld [vmem:[%s26741_s6 + $0xd58] sm:$0xff]  }
 0x1b3   : > { %23148 = vmatprep.subr.bf16.mxu1 %v25519_v42  ;;  %v3548_v14 = vsel %vm26821_vm2, %v1339_v60, %v2868_v48  ;;  %v25533_v13 = vld [vmem:[%s26741_s6 + $0xd90] sm:$0xff]   ;;  %v25535_v42 = vld [vmem:[%s26741_s6 + $0xdd8] sm:$0xff]   ;;  %v25557_v48 = vld [vmem:[%s26741_s6 + $0xe80] sm:$0xff]  }
 0x1b4   : > { %v3550_v21 = vsel %vm26821_vm2, %v1341_v10, %v2874_v16  ;;  %v25549_v1 = vld [vmem:[%s26741_s6 + $0xdb0] sm:$0xff]   ;;  %v25561_v16 = vld [vmem:[%s26741_s6 + $0xe88] sm:$0xff]  }
 0x1b5   : > { %23127 = vmatpush3.bf16.msra.mxu0 %v25520_v22  ;;  %v25536_v22 = vld [vmem:[%s26741_s6 + $0xd18] sm:$0xff]  }
 0x1b6   : > { %23156 = vmatprep.subr.bf16.mxu0 %v25522_v29  ;;  %23149 = vmatpush3.bf16.msra.mxu1 %v25521_v59  ;;  %v25541_v29 = vld [vmem:[%s26741_s6 + $0xda0] sm:$0xff]  }
 0x1b7   : > { %23178 = vmatprep.subr.bf16.mxu1 %v25523_v46 }
 0x1b8   : > { %17229 = vmatmul.mubr.bf16.vlgmr.msra.gmra.mrb[48].mxu0 %v3543_v6  ;;  %v1340_v6 = vpack.c.bf16 %v525_v24, %v525_v24  ;;  %v27657_v24 = vld [vmem:[%s26731_s24 + $0x38] sm:$0xff] }
 0x1b9   : > { %17269 = vmatmul.mubr.bf16.vlgmr.msra.gmra.mrb[48].mxu1 %v3545_v7  ;;  %23157 = vmatpush3.bf16.msra.mxu0 %v25524_v56  ;;  %v2871_v7 = vshll.u32 %v2566_v3, 16  ;;  %v27660_v3 = vld [vmem:[%s26736_s27 + $0x38] sm:$0xff] }
 0x1ba   : > { %23179 = vmatpush3.bf16.msra.mxu1 %v25525_v57  ;;  %23158 = vmatprep.subr.bf16.mxu0 %v25526_v2  ;;  %v25546_v57 = vld [vmem:[%s26741_s6 + $0xd70] sm:$0xff]   ;;  %v2564_v2 = vpack.c.bf16 %v1743_v51, %v1743_v51 }
 0x1bb   : > { %23180 = vmatprep.subr.bf16.mxu1 %v25527_v49  ;;  %17308 = vmatprep.mubr.bf16.mxu0 %v3548_v14  ;;  %v517_v49 = vrot.slane %v27532_v23, %v26864_v45  ;;  %v25555_v23 = vld [vmem:[%s26741_s6 + $0xec0] sm:$0xff]   ;;  %v3549_v11 = vsel %vm26821_vm2, %v1340_v6, %v2871_v7  ;;  %v25560_v14 = vld [vmem:[%s26741_s6 + $0xe08] sm:$0xff]   ;;  %v533_v6 = vrot.slane %v27657_v24, %v26782_v34 }
 0x1bc   : > { %17348 = vmatprep.mubr.bf16.mxu1 %v3550_v21  ;;  %v2865_v60 = vshll.u32 %v2564_v2, 16  ;;  %v25564_v21 = vld [vmem:[%s26741_s6 + $0xe10] sm:$0xff]   ;;  %v25583_v2 = vld [vmem:[%s26741_s6 + $0xef8] sm:$0xff]   ;;  %v1759_v7 = vrot.slane %v27660_v3, %v26782_v34 }
 0x1bd   : > { %23159 = vmatpush3.bf16.msra.mxu0 %v25528_v8  ;;  %v1338_v25 = vpack.c.bf16 %v517_v49, %v517_v49  ;;  %v25554_v8 = vld [vmem:[%s26741_s6 + $0xe40] sm:$0xff]   ;;  %v25585_v49 = vld [vmem:[%s26741_s6 + $0xeb8] sm:$0xff]  }
 0x1be   : > { %23181 = vmatpush3.bf16.msra.mxu1 %v25529_v9  ;;  %23160 = vmatprep.subr.bf16.mxu0 %v25530_v12  ;;  %v25556_v9 = vld [vmem:[%s26741_s6 + $0xe00] sm:$0xff]   ;;  %v25558_v12 = vld [vmem:[%s26741_s6 + $0xe48] sm:$0xff]  }
 0x1bf   : > { %23182 = vmatprep.subr.bf16.mxu1 %v25531_v53  ;;  %v3547_v10 = vsel %vm26821_vm2, %v1338_v25, %v2865_v60  ;;  %v25559_v53 = vld [vmem:[%s26741_s6 + $0xec8] sm:$0xff]   ;;  %v25586_v60 = vld [vmem:[%s26741_s6 + $0xf40] sm:$0xff]   ;;  %v1771_v25 = vrot.slane %v27660_v3, %v26778_v32 }
 0x1c1   : > { %23161 = vmatpush3.bf16.msra.mxu0 %v25532_v18  ;;  %v25562_v18 = vld [vmem:[%s26741_s6 + $0xe50] sm:$0xff]  }
 0x1c2   : > { %23183 = vmatpush3.bf16.msra.mxu1 %v25533_v13  ;;  %23162 = vmatprep.subr.bf16.mxu0 %v25534_v19  ;;  %v25563_v13 = vld [vmem:[%s26741_s6 + $0xed0] sm:$0xff]  }
 0x1c3   : > { %23184 = vmatprep.subr.bf16.mxu1 %v25535_v42  ;;  %v25565_v19 = vld [vmem:[%s26741_s6 + $0xe90] sm:$0xff]   ;;  %v25566_v42 = vld [vmem:[%s26741_s6 + $0xe58] sm:$0xff]  }
 0x1c5   : > { %23163 = vmatpush3.bf16.msra.mxu0 %v25536_v22  ;;  %v25567_v22 = vld [vmem:[%s26741_s6 + $0xed8] sm:$0xff]  }
 0x1c6   : > { %23185 = vmatpush3.bf16.msra.mxu1 %v25537_v63  ;;  %23164 = vmatprep.subr.bf16.mxu0 %v25538_v26  ;;  %v25568_v63 = vld [vmem:[%s26741_s6 + $0xe18] sm:$0xff]  }
 0x1c7   : > { %23186 = vmatprep.subr.bf16.mxu1 %v25539_v27  ;;  %v25569_v26 = vld [vmem:[%s26741_s6 + $0xe98] sm:$0xff]   ;;  %v25570_v27 = vld [vmem:[%s26741_s6 + $0xe60] sm:$0xff]  }
 0x1c9   : > { %23165 = vmatpush3.bf16.msra.mxu0 %v25540_v28  ;;  %v25571_v28 = vld [vmem:[%s26741_s6 + $0xee0] sm:$0xff]  }
 0x1ca   : > { %23187 = vmatpush3.bf16.msra.mxu1 %v25541_v29  ;;  %23166 = vmatprep.subr.bf16.mxu0 %v25542_v31  ;;  %v25572_v29 = vld [vmem:[%s26741_s6 + $0xe20] sm:$0xff]  }
 0x1cb   : > { %v22864_v59 = vpop.f32.mrb[24].mxu0  ;;  %23188 = vmatprep.subr.bf16.mxu1 %v25543_v35 }
 0x1cc   : > { %v22865_v33 = vpop.f32.mrb[25].mxu0  ;;  %v22886_v37 = vpop.f32.mrb[24].mxu1 }
 0x1cd   : > { %v22866_v62 = vadd.f32 %v22865_v33, %v22864_v59  ;;  %v22867_v39 = vpop.f32.mrb[26].mxu0  ;;  %v22887_v46 = vpop.f32.mrb[25].mxu1  ;;  %23167 = vmatpush3.bf16.msra.mxu0 %v25544_v43  ;;  %v25573_v59 = vld [vmem:[%s26741_s6 + $0xea0] sm:$0xff]   ;;  %v25574_v33 = vld [vmem:[%s26741_s6 + $0xe68] sm:$0xff]  }
 0x1ce   : > { %v22868_v50 = vpop.f32.mrb[27].mxu0  ;;  %v22888_v54 = vadd.f32 %v22887_v46, %v22886_v37  ;;  %v22889_v56 = vpop.f32.mrb[26].mxu1  ;;  %23189 = vmatpush3.bf16.msra.mxu1 %v25545_v44  ;;  %23168 = vmatprep.subr.bf16.mxu0 %v25546_v57  ;;  %v25575_v37 = vld [vmem:[%s26741_s6 + $0xee8] sm:$0xff]   ;;  %v25578_v57 = vld [vmem:[%s26741_s6 + $0xe70] sm:$0xff]  }
 0x1cf   : > { %v16751_v52 = vadd.f32 %v22866_v62, %v27523_v17  ;;  %v22890_v58 = vpop.f32.mrb[27].mxu1  ;;  %v25550_v17 = vld [vmem:[%s26741_s6 + $0xd78] sm:$0xff]   ;;  %23190 = vmatprep.subr.bf16.mxu1 %v25547_v20  ;;  %v25576_v44 = vld [vmem:[%s26741_s6 + $0xe28] sm:$0xff]  }
 0x1d0   : > { %v25577_v46 = vld [vmem:[%s26741_s6 + $0xea8] sm:$0xff]   ;;  %v25579_v58 = vld [vmem:[%s26741_s6 + $0xef0] sm:$0xff]  }
 0x1d1   : > { %v27605_v15 = vadd.f32 %v22888_v54, %v16751_v52  ;;  %23169 = vmatpush3.bf16.msra.mxu0 %v25548_v0  ;;  %v25580_v0 = vld [vmem:[%s26741_s6 + $0xe30] sm:$0xff]  }
 0x1d2   : > { %23191 = vmatpush3.bf16.msra.mxu1 %v25549_v1  ;;  %23170 = vmatprep.subr.bf16.mxu0 %v25550_v17  ;;  %v25581_v1 = vld [vmem:[%s26741_s6 + $0xeb0] sm:$0xff]   ;;  %v25584_v17 = vld [vmem:[%s26741_s6 + $0xe38] sm:$0xff]  }
 0x1d3   : > { %23192 = vmatprep.subr.bf16.mxu1 %v25551_v4  ;;  %v537_v4 = vrot.slane %v27657_v24, %v26774_v30 }
 0x1d5   : > { %23171 = vmatpush3.bf16.msra.mxu0 %v25552_v41  ;;  %v1763_v41 = vrot.slane %v27660_v3, %v26774_v30 }
 0x1d6   : > { %23193 = vmatpush3.bf16.msra.mxu1 %v25553_v5  ;;  %23200 = vmatprep.subr.bf16.mxu0 %v25554_v8  ;;  %v545_v5 = vrot.slane %v27657_v24, %v26778_v32  ;;  %v541_v8 = vrot.slane %v27657_v24, %v26786_v36 }
 0x1d7   : > { %23222 = vmatprep.subr.bf16.mxu1 %v25555_v23  ;;  %v25587_v23 = vld [vmem:[%s26741_s6 + $0xfc0] sm:$0xff]  }
 0x1d8   : > { %17309 = vmatmul.mubr.bf16.vlgmr.msra.gmra.mrb[52].mxu0 %v3547_v10  ;;  %v1345_v10 = vpack.c.bf16 %v545_v5, %v545_v5  ;;  %v25604_v5 = vld [vmem:[%s26741_s6 + $0xf20] sm:$0xff]  }
 0x1d9   : > { %17349 = vmatmul.mubr.bf16.vlgmr.msra.gmra.mrb[52].mxu1 %v3549_v11  ;;  %23201 = vmatpush3.bf16.msra.mxu0 %v25556_v9  ;;  %v1343_v9 = vpack.c.bf16 %v537_v4, %v537_v4  ;;  %v1767_v11 = vrot.slane %v27660_v3, %v26786_v36  ;;  %v25602_v4 = vld [vmem:[%s26741_s6 + $0xf60] sm:$0xff]  }
 0x1da   : > { %23223 = vmatpush3.bf16.msra.mxu1 %v25557_v48  ;;  %23202 = vmatprep.subr.bf16.mxu0 %v25558_v12  ;;  %v2569_v48 = vpack.c.bf16 %v1763_v41, %v1763_v41  ;;  %v2571_v12 = vpack.c.bf16 %v1771_v25, %v1771_v25  ;;  %v25603_v41 = vld [vmem:[%s26741_s6 + $0xfe0] sm:$0xff]  }
 0x1db   : > { %23224 = vmatprep.subr.bf16.mxu1 %v25559_v53  ;;  %v1342_v53 = vpack.c.bf16 %v533_v6, %v533_v6 }
 0x1dd   : > { %23203 = vmatpush3.bf16.msra.mxu0 %v25560_v14  ;;  %v2568_v14 = vpack.c.bf16 %v1759_v7, %v1759_v7  ;;  %v25606_v7 = vld [vmem:[%s26741_s6 + $0xf68] sm:$0xff]  }
 0x1de   : > { %23225 = vmatpush3.bf16.msra.mxu1 %v25561_v16  ;;  %23204 = vmatprep.subr.bf16.mxu0 %v25562_v18  ;;  %v2880_v16 = vshll.u32 %v2569_v48, 16  ;;  %v1344_v18 = vpack.c.bf16 %v541_v8, %v541_v8  ;;  %v25607_v8 = vld [vmem:[%s26741_s6 + $0xfe8] sm:$0xff]  }
 0x1df   : > { %23226 = vmatprep.subr.bf16.mxu1 %v25563_v13  ;;  %v2570_v13 = vpack.c.bf16 %v1767_v11, %v1767_v11  ;;  %v25608_v48 = vld [vmem:[%s26741_s6 + $0xf28] sm:$0xff]  }
 0x1e1   : > { %23205 = vmatpush3.bf16.msra.mxu0 %v25564_v21  ;;  %v25588_v21 = vld [vmem:[%s26741_s6 + $0xf00] sm:$0xff]  }
 0x1e2   : > { %23227 = vmatpush3.bf16.msra.mxu1 %v25565_v19  ;;  %23206 = vmatprep.subr.bf16.mxu0 %v25566_v42  ;;  %v553_v19 = vrot.slane %v27657_v24, %v26790_v38  ;;  %v2886_v42 = vshll.u32 %v2571_v12, 16 }
 0x1e3   : > { %23228 = vmatprep.subr.bf16.mxu1 %v25567_v22  ;;  %v2877_v22 = vshll.u32 %v2568_v14, 16  ;;  %v25609_v14 = vld [vmem:[%s26741_s6 + $0xfa8] sm:$0xff]  }
 0x1e5   : > { %23207 = vmatpush3.bf16.msra.mxu0 %v25568_v63  ;;  %v25589_v63 = vld [vmem:[%s26741_s6 + $0xf80] sm:$0xff]  }
 0x1e6   : > { %23229 = vmatpush3.bf16.msra.mxu1 %v25569_v26  ;;  %23208 = vmatprep.subr.bf16.mxu0 %v25570_v27  ;;  %v25590_v26 = vld [vmem:[%s26741_s6 + $0xf48] sm:$0xff]   ;;  %v1779_v27 = vrot.slane %v27660_v3, %v26790_v38 }
 0x1e7   : > { %23230 = vmatprep.subr.bf16.mxu1 %v25571_v28  ;;  %v561_v28 = vrot.slane %v27657_v24, %v26794_v40 }
 0x1e9   : > { %23209 = vmatpush3.bf16.msra.mxu0 %v25572_v29  ;;  %v3552_v29 = vsel %vm26821_vm2, %v1343_v9, %v2880_v16 }
 0x1ea   : > { %23231 = vmatpush3.bf16.msra.mxu1 %v25573_v59  ;;  %23210 = vmatprep.subr.bf16.mxu0 %v25574_v33  ;;  %v2883_v59 = vshll.u32 %v2570_v13, 16  ;;  %v1787_v33 = vrot.slane %v27660_v3, %v26794_v40  ;;  %v25610_v13 = vld [vmem:[%s26741_s6 + $0xf70] sm:$0xff]  }
 0x1eb   : > { %v22908_v31 = vpop.f32.mrb[28].mxu0  ;;  %23232 = vmatprep.subr.bf16.mxu1 %v25575_v37  ;;  %17388 = vmatprep.mubr.bf16.mxu0 %v3552_v29  ;;  %v3551_v37 = vsel %vm26821_vm2, %v1342_v53, %v2877_v22  ;;  %v25611_v22 = vld [vmem:[%s26741_s6 + $0xff0] sm:$0xff]  }
 0x1ec   : > { %v22909_v35 = vpop.f32.mrb[29].mxu0  ;;  %v22930_v62 = vpop.f32.mrb[28].mxu1 }
 0x1ed   : > { %v22910_v39 = vadd.f32 %v22909_v35, %v22908_v31  ;;  %v22911_v43 = vpop.f32.mrb[30].mxu0  ;;  %v22931_v50 = vpop.f32.mrb[29].mxu1  ;;  %23211 = vmatpush3.bf16.msra.mxu0 %v25576_v44  ;;  %v25591_v31 = vld [vmem:[%s26741_s6 + $0xfc8] sm:$0xff]   ;;  %v3554_v35 = vsel %vm26821_vm2, %v1345_v10, %v2886_v42  ;;  %v1783_v42 = vrot.slane %v27660_v3, %v26868_v47 }
 0x1ee   : > { %v22912_v51 = vpop.f32.mrb[31].mxu0  ;;  %v22932_v54 = vadd.f32 %v22931_v50, %v22930_v62  ;;  %v22933_v56 = vpop.f32.mrb[30].mxu1  ;;  %23233 = vmatpush3.bf16.msra.mxu1 %v25577_v46  ;;  %23212 = vmatprep.subr.bf16.mxu0 %v25578_v57  ;;  %v1347_v62 = vpack.c.bf16 %v553_v19, %v553_v19  ;;  %v3553_v43 = vsel %vm26821_vm2, %v1344_v18, %v2883_v59  ;;  %v25592_v44 = vld [vmem:[%s26741_s6 + $0xf08] sm:$0xff]   ;;  %v25595_v57 = vld [vmem:[%s26741_s6 + $0xfd0] sm:$0xff]  }
 0x1ef   : > { %v16831_v52 = vadd.f32 %v22910_v39, %v27605_v15  ;;  %v22934_v61 = vpop.f32.mrb[31].mxu1  ;;  %v25582_v15 = vld [vmem:[%s26741_s6 + $0xe78] sm:$0xff]   ;;  %23234 = vmatprep.subr.bf16.mxu1 %v25579_v58  ;;  %v2573_v39 = vpack.c.bf16 %v1779_v27, %v1779_v27  ;;  %17428 = vmatprep.mubr.bf16.mxu1 %v3554_v35  ;;  %v1349_v46 = vpack.c.bf16 %v561_v28, %v561_v28  ;;  %v25593_v51 = vld [vmem:[%s26741_s6 + $0xf88] sm:$0xff]   ;;  %v25596_v58 = vld [vmem:[%s26741_s6 + $0xf10] sm:$0xff]  }
 0x1f0   : > { %v2575_v50 = vpack.c.bf16 %v1787_v33, %v1787_v33  ;;  %v25613_v27 = vld [vmem:[%s26741_s6 + $0xfb0] sm:$0xff]   ;;  %v549_v28 = vrot.slane %v27657_v24, %v26864_v45  ;;  %v2574_v59 = vpack.c.bf16 %v1783_v42, %v1783_v42  ;;  %v25616_v33 = vld [vmem:[%s26741_s6 + $0xf38] sm:$0xff]  }
 0x1f1   : > { %v27648_v20 = vadd.f32 %v22932_v54, %v16831_v52  ;;  %23213 = vmatpush3.bf16.msra.mxu0 %v25580_v0  ;;  %v2892_v52 = vshll.u32 %v2573_v39, 16  ;;  %v25594_v54 = vld [vmem:[%s26741_s6 + $0xf50] sm:$0xff]   ;;  %v25617_v35 = vld [vmem:[%s26741_s6 + $0xfb8] sm:$0xff]  }
 0x1f2   : > { %23235 = vmatpush3.bf16.msra.mxu1 %v25581_v1  ;;  %23214 = vmatprep.subr.bf16.mxu0 %v25582_v15  ;;  %v2898_v56 = vshll.u32 %v2575_v50, 16  ;;  %v25597_v1 = vld [vmem:[%s26741_s6 + $0xf90] sm:$0xff]   ;;  %v25598_v15 = vld [vmem:[%s26741_s6 + $0xf58] sm:$0xff]  }
 0x1f3   : > { %23236 = vmatprep.subr.bf16.mxu1 %v25583_v2  ;;  %v3556_v61 = vsel %vm26821_vm2, %v1347_v62, %v2892_v52  ;;  %v25599_v2 = vld [vmem:[%s26741_s6 + $0xfd8] sm:$0xff]   ;;  %v25643_v42 = vld [vmem:[%s26741_s6 + $0x10f0] sm:$0xff]  }
 0x1f4   : > { %v3558_v0 = vsel %vm26821_vm2, %v1349_v46, %v2898_v56  ;;  %v25620_v46 = vld [vmem:[%s26741_s6 + $0x1000] sm:$0xff]   ;;  %v25623_v56 = vld [vmem:[%s26741_s6 + $0x10c8] sm:$0xff]  }
 0x1f5   : > { %23215 = vmatpush3.bf16.msra.mxu0 %v25584_v17  ;;  %v25600_v17 = vld [vmem:[%s26741_s6 + $0xf18] sm:$0xff]  }
 0x1f6   : > { %23237 = vmatpush3.bf16.msra.mxu1 %v25585_v49  ;;  %23244 = vmatprep.subr.bf16.mxu0 %v25586_v60  ;;  %v25601_v49 = vld [vmem:[%s26741_s6 + $0xf98] sm:$0xff]   ;;  %v25605_v60 = vld [vmem:[%s26741_s6 + $0xfa0] sm:$0xff]  }
 0x1f7   : > { %23266 = vmatprep.subr.bf16.mxu1 %v25587_v23 }
 0x1f8   : > { %17389 = vmatmul.mubr.bf16.vlgmr.msra.gmra.mrb[56].mxu0 %v3551_v37  ;;  %v1346_v37 = vpack.c.bf16 %v549_v28, %v549_v28  ;;  %v25646_v28 = vld [vmem:[%s26741_s6 + $0x1078] sm:$0xff]  }
 0x1f9   : > { %17429 = vmatmul.mubr.bf16.vlgmr.msra.gmra.mrb[56].mxu1 %v3553_v43  ;;  %23245 = vmatpush3.bf16.msra.mxu0 %v25588_v21  ;;  %v1775_v21 = vrot.slane %v27660_v3, %v26864_v45  ;;  %v557_v3 = vrot.slane %v27657_v24, %v26868_v47  ;;  %v2895_v43 = vshll.u32 %v2574_v59, 16  ;;  %v25619_v24 = vld [vmem:[%s26741_s6 + $0x10c0] sm:$0xff]  }
 0x1fa   : > { %23267 = vmatpush3.bf16.msra.mxu1 %v25589_v63  ;;  %23246 = vmatprep.subr.bf16.mxu0 %v25590_v26  ;;  %v25612_v26 = vld [vmem:[%s26741_s6 + $0xf30] sm:$0xff]   ;;  %v27784_v59 = vld [vmem:[%s26736_s27 + $0x40] sm:$0xff] }
 0x1fb   : > { %23268 = vmatprep.subr.bf16.mxu1 %v25591_v31  ;;  %17468 = vmatprep.mubr.bf16.mxu0 %v3556_v61  ;;  %v2572_v29 = vpack.c.bf16 %v1775_v21, %v1775_v21  ;;  %v25615_v31 = vld [vmem:[%s26741_s6 + $0xff8] sm:$0xff]   ;;  %v1348_v39 = vpack.c.bf16 %v557_v3, %v557_v3  ;;  %v25625_v61 = vld [vmem:[%s26741_s6 + $0x1088] sm:$0xff]  }
 0x1fc   : > { %17508 = vmatprep.mubr.bf16.mxu1 %v3558_v0  ;;  %v25627_v0 = vld [vmem:[%s26741_s6 + $0x10d0] sm:$0xff]   ;;  %v25649_v3 = vld [vmem:[%s26741_s6 + $0x10b8] sm:$0xff]  }
 0x1fd   : > { %23247 = vmatpush3.bf16.msra.mxu0 %v25592_v44  ;;  %v2889_v62 = vshll.u32 %v2572_v29, 16  ;;  %v25618_v44 = vld [vmem:[%s26741_s6 + $0x1040] sm:$0xff]   ;;  %v3557_v52 = vsel %vm26821_vm2, %v1348_v39, %v2895_v43  ;;  %v25647_v29 = vld [vmem:[%s26741_s6 + $0x10f8] sm:$0xff]   ;;  %v1791_v43 = vrot.slane %v27784_v59, %v26782_v34 }
 0x1fe   : > { %23269 = vmatpush3.bf16.msra.mxu1 %v25593_v51  ;;  %23248 = vmatprep.subr.bf16.mxu0 %v25594_v54  ;;  %v25621_v51 = vld [vmem:[%s26741_s6 + $0x1080] sm:$0xff]   ;;  %v25622_v54 = vld [vmem:[%s26741_s6 + $0x1048] sm:$0xff]  }
 0x1ff   : > { %23270 = vmatprep.subr.bf16.mxu1 %v25595_v57  ;;  %v3555_v50 = vsel %vm26821_vm2, %v1346_v37, %v2889_v62  ;;  %v25624_v57 = vld [vmem:[%s26741_s6 + $0x1008] sm:$0xff]   ;;  %v25650_v37 = vld [vmem:[%s26741_s6 + $0x1140] sm:$0xff]   ;;  %v1803_v62 = vrot.slane %v27784_v59, %v26778_v32 }
 0x201   : > { %23249 = vmatpush3.bf16.msra.mxu0 %v25596_v58  ;;  %v25626_v58 = vld [vmem:[%s26741_s6 + $0x1050] sm:$0xff]  }
 0x202   : > { %23271 = vmatpush3.bf16.msra.mxu1 %v25597_v1  ;;  %23250 = vmatprep.subr.bf16.mxu0 %v25598_v15  ;;  %v25628_v1 = vld [vmem:[%s26741_s6 + $0x1010] sm:$0xff]  }
 0x203   : > { %23272 = vmatprep.subr.bf16.mxu1 %v25599_v2  ;;  %v25629_v15 = vld [vmem:[%s26741_s6 + $0x1090] sm:$0xff]   ;;  %v25630_v2 = vld [vmem:[%s26741_s6 + $0x1058] sm:$0xff]  }
 0x205   : > { %23251 = vmatpush3.bf16.msra.mxu0 %v25600_v17  ;;  %v25631_v17 = vld [vmem:[%s26741_s6 + $0x10d8] sm:$0xff]  }
 0x206   : > { %23273 = vmatpush3.bf16.msra.mxu1 %v25601_v49  ;;  %23252 = vmatprep.subr.bf16.mxu0 %v25602_v4  ;;  %v25632_v49 = vld [vmem:[%s26741_s6 + $0x1018] sm:$0xff]  }
 0x207   : > { %23274 = vmatprep.subr.bf16.mxu1 %v25603_v41  ;;  %v25633_v4 = vld [vmem:[%s26741_s6 + $0x1098] sm:$0xff]   ;;  %v25634_v41 = vld [vmem:[%s26741_s6 + $0x1060] sm:$0xff]  }
 0x209   : > { %23253 = vmatpush3.bf16.msra.mxu0 %v25604_v5  ;;  %v25635_v5 = vld [vmem:[%s26741_s6 + $0x10e0] sm:$0xff]  }
 0x20a   : > { %23275 = vmatpush3.bf16.msra.mxu1 %v25605_v60  ;;  %23254 = vmatprep.subr.bf16.mxu0 %v25606_v7  ;;  %v25636_v60 = vld [vmem:[%s26741_s6 + $0x1020] sm:$0xff]  }
 0x20b   : > { %v22952_v25 = vpop.f32.mrb[32].mxu0  ;;  %23276 = vmatprep.subr.bf16.mxu1 %v25607_v8  ;;  %v25638_v8 = vld [vmem:[%s26741_s6 + $0x1068] sm:$0xff]  }
 0x20c   : > { %v22974_v6 = vpop.f32.mrb[32].mxu1  ;;  %v22953_v23 = vpop.f32.mrb[33].mxu0 }
 0x20d   : > { %v22975_v9 = vpop.f32.mrb[33].mxu1  ;;  %v22954_v10 = vadd.f32 %v22953_v23, %v22952_v25  ;;  %v22955_v12 = vpop.f32.mrb[34].mxu0  ;;  %23255 = vmatpush3.bf16.msra.mxu0 %v25608_v48  ;;  %v25637_v25 = vld [vmem:[%s26741_s6 + $0x10a0] sm:$0xff]   ;;  %v25639_v23 = vld [vmem:[%s26741_s6 + $0x10e8] sm:$0xff]  }
 0x20e   : > { %v22976_v11 = vadd.f32 %v22975_v9, %v22974_v6  ;;  %v22977_v53 = vpop.f32.mrb[34].mxu1  ;;  %v22956_v16 = vpop.f32.mrb[35].mxu0  ;;  %23277 = vmatpush3.bf16.msra.mxu1 %v25609_v14  ;;  %23256 = vmatprep.subr.bf16.mxu0 %v25610_v13 }
 0x20f   : > { %v22978_v18 = vpop.f32.mrb[35].mxu1  ;;  %v16911_v19 = vadd.f32 %v22954_v10, %v27648_v20  ;;  %v25614_v20 = vld [vmem:[%s26741_s6 + $0xf78] sm:$0xff]   ;;  %23278 = vmatprep.subr.bf16.mxu1 %v25611_v22  ;;  %v25640_v10 = vld [vmem:[%s26741_s6 + $0x1028] sm:$0xff]   ;;  %v25644_v22 = vld [vmem:[%s26741_s6 + $0x1030] sm:$0xff]  }
 0x210   : > { %v25641_v16 = vld [vmem:[%s26741_s6 + $0x10a8] sm:$0xff]   ;;  %v25642_v18 = vld [vmem:[%s26741_s6 + $0x1070] sm:$0xff]  }
 0x211   : > { %v27729_v63 = vadd.f32 %v22976_v11, %v16911_v19  ;;  %23257 = vmatpush3.bf16.msra.mxu0 %v25612_v26 }
 0x212   : > { %23279 = vmatpush3.bf16.msra.mxu1 %v25613_v27  ;;  %23258 = vmatprep.subr.bf16.mxu0 %v25614_v20  ;;  %v25645_v27 = vld [vmem:[%s26741_s6 + $0x10b0] sm:$0xff]   ;;  %v25648_v20 = vld [vmem:[%s26741_s6 + $0x1038] sm:$0xff]  }
 0x213   : > { %23280 = vmatprep.subr.bf16.mxu1 %v25615_v31 }
 0x215   : > { %23259 = vmatpush3.bf16.msra.mxu0 %v25616_v33  ;;  %v1795_v33 = vrot.slane %v27784_v59, %v26774_v30 }
 0x216   : > { %23281 = vmatpush3.bf16.msra.mxu1 %v25617_v35  ;;  %23288 = vmatprep.subr.bf16.mxu0 %v25618_v44 }
 0x217   : > { %23310 = vmatprep.subr.bf16.mxu1 %v25619_v24  ;;  %v25651_v24 = vld [vmem:[%s26741_s6 + $0x11c0] sm:$0xff]  }
 0x218   : > { %17469 = vmatmul.mubr.bf16.vlgmr.msra.gmra.mrb[60].mxu0 %v3555_v50  ;;  %v2577_v50 = vpack.c.bf16 %v1795_v33, %v1795_v33  ;;  %v25667_v33 = vld [vmem:[%s26741_s6 + $0x11e0] sm:$0xff]  }
 0x219   : > { %17509 = vmatmul.mubr.bf16.vlgmr.msra.gmra.mrb[60].mxu1 %v3557_v52  ;;  %23289 = vmatpush3.bf16.msra.mxu0 %v25620_v46  ;;  %v1799_v52 = vrot.slane %v27784_v59, %v26786_v36 }
 0x21a   : > { %23311 = vmatpush3.bf16.msra.mxu1 %v25621_v51  ;;  %23290 = vmatprep.subr.bf16.mxu0 %v25622_v54  ;;  %v2579_v54 = vpack.c.bf16 %v1803_v62, %v1803_v62 }
 0x21b   : > { %23312 = vmatprep.subr.bf16.mxu1 %v25623_v56 }
 0x21d   : > { %23291 = vmatpush3.bf16.msra.mxu0 %v25624_v57  ;;  %v2576_v57 = vpack.c.bf16 %v1791_v43, %v1791_v43  ;;  %v25670_v43 = vld [vmem:[%s26741_s6 + $0x1168] sm:$0xff]  }
 0x21e   : > { %23313 = vmatpush3.bf16.msra.mxu1 %v25625_v61  ;;  %23292 = vmatprep.subr.bf16.mxu0 %v25626_v58  ;;  %v2904_v58 = vshll.u32 %v2577_v50, 16 }
 0x21f   : > { %23314 = vmatprep.subr.bf16.mxu1 %v25627_v0  ;;  %v2578_v0 = vpack.c.bf16 %v1799_v52, %v1799_v52 }
 0x221   : > { %23293 = vmatpush3.bf16.msra.mxu0 %v25628_v1  ;;  %v25652_v1 = vld [vmem:[%s26741_s6 + $0x1100] sm:$0xff]  }
 0x222   : > { %23315 = vmatpush3.bf16.msra.mxu1 %v25629_v15  ;;  %23294 = vmatprep.subr.bf16.mxu0 %v25630_v2  ;;  %v1811_v2 = vrot.slane %v27784_v59, %v26790_v38 }
 0x223   : > { %23316 = vmatprep.subr.bf16.mxu1 %v25631_v17  ;;  %v2910_v17 = vshll.u32 %v2579_v54, 16  ;;  %v25673_v54 = vld [vmem:[%s26741_s6 + $0x11a8] sm:$0xff]  }
 0x225   : > { %23295 = vmatpush3.bf16.msra.mxu0 %v25632_v49  ;;  %v2901_v49 = vshll.u32 %v2576_v57, 16 }
 0x226   : > { %23317 = vmatpush3.bf16.msra.mxu1 %v25633_v4  ;;  %23296 = vmatprep.subr.bf16.mxu0 %v25634_v41  ;;  %v25653_v4 = vld [vmem:[%s26741_s6 + $0x1180] sm:$0xff]   ;;  %v25654_v41 = vld [vmem:[%s26741_s6 + $0x1148] sm:$0xff]  }
 0x227   : > { %23318 = vmatprep.subr.bf16.mxu1 %v25635_v5 }
 0x229   : > { %23297 = vmatpush3.bf16.msra.mxu0 %v25636_v60  ;;  %v1819_v60 = vrot.slane %v27784_v59, %v26794_v40 }
 0x22a   : > { %23319 = vmatpush3.bf16.msra.mxu1 %v25637_v25  ;;  %23298 = vmatprep.subr.bf16.mxu0 %v25638_v8 }
 0x22b   : > { %v22996_v6 = vpop.f32.mrb[36].mxu0  ;;  %23320 = vmatprep.subr.bf16.mxu1 %v25639_v23  ;;  %v2581_v23 = vpack.c.bf16 %v1811_v2, %v1811_v2  ;;  %v25675_v2 = vld [vmem:[%s26741_s6 + $0x11f0] sm:$0xff]  }
 0x22c   : > { %v23018_v7 = vpop.f32.mrb[36].mxu1  ;;  %v22997_v9 = vpop.f32.mrb[37].mxu0 }
 0x22d   : > { %v23019_v48 = vpop.f32.mrb[37].mxu1  ;;  %v22998_v11 = vadd.f32 %v22997_v9, %v22996_v6  ;;  %v22999_v53 = vpop.f32.mrb[38].mxu0  ;;  %23299 = vmatpush3.bf16.msra.mxu0 %v25640_v10  ;;  %v2907_v6 = vshll.u32 %v2578_v0, 16  ;;  %v25674_v0 = vld [vmem:[%s26741_s6 + $0x1170] sm:$0xff]  }
 0x22e   : > { %v23020_v12 = vadd.f32 %v23019_v48, %v23018_v7  ;;  %v23021_v14 = vpop.f32.mrb[38].mxu1  ;;  %v23000_v13 = vpop.f32.mrb[39].mxu0  ;;  %23321 = vmatpush3.bf16.msra.mxu1 %v25641_v16  ;;  %23300 = vmatprep.subr.bf16.mxu0 %v25642_v18  ;;  %v25655_v7 = vld [vmem:[%s26741_s6 + $0x11c8] sm:$0xff]  }
 0x22f   : > { %v23022_v21 = vpop.f32.mrb[39].mxu1  ;;  %v16991_v19 = vadd.f32 %v22998_v11, %v27729_v63  ;;  %23322 = vmatprep.subr.bf16.mxu1 %v25643_v42  ;;  %v27781_v63 = vld [vmem:[%s26731_s24 + $0x40] sm:$0xff]  ;;  %v2583_v11 = vpack.c.bf16 %v1819_v60, %v1819_v60  ;;  %v25656_v53 = vld [vmem:[%s26741_s6 + $0x1108] sm:$0xff]   ;;  %v2916_v14 = vshll.u32 %v2581_v23, 16  ;;  %v25658_v13 = vld [vmem:[%s26741_s6 + $0x1150] sm:$0xff]  }
 0x230   : > { %v569_v31 = vrot.slane %v27781_v63, %v26774_v30  ;;  %v577_v35 = vrot.slane %v27781_v63, %v26778_v32  ;;  %v565_v39 = vrot.slane %v27781_v63, %v26782_v34  ;;  %v573_v44 = vrot.slane %v27781_v63, %v26786_v36  ;;  %v25657_v16 = vld [vmem:[%s26741_s6 + $0x1188] sm:$0xff]  }
 0x231   : > { %v27773_v26 = vadd.f32 %v23020_v12, %v16991_v19  ;;  %23301 = vmatpush3.bf16.msra.mxu0 %v25644_v22  ;;  %v585_v15 = vrot.slane %v27781_v63, %v26790_v38  ;;  %v593_v5 = vrot.slane %v27781_v63, %v26794_v40  ;;  %v2922_v18 = vshll.u32 %v2583_v11, 16  ;;  %v25659_v19 = vld [vmem:[%s26741_s6 + $0x11d0] sm:$0xff]  }
 0x232   : > { %23323 = vmatpush3.bf16.msra.mxu1 %v25645_v27  ;;  %23302 = vmatprep.subr.bf16.mxu0 %v25646_v28  ;;  %v1351_v46 = vpack.c.bf16 %v569_v31, %v569_v31  ;;  %v1353_v51 = vpack.c.bf16 %v577_v35, %v577_v35  ;;  %v1350_v56 = vpack.c.bf16 %v565_v39, %v565_v39  ;;  %v25660_v22 = vld [vmem:[%s26741_s6 + $0x1110] sm:$0xff]   ;;  %v25662_v28 = vld [vmem:[%s26741_s6 + $0x1158] sm:$0xff]   ;;  %v25666_v31 = vld [vmem:[%s26741_s6 + $0x1160] sm:$0xff]  }
 0x233   : > { %23324 = vmatprep.subr.bf16.mxu1 %v25647_v29  ;;  %v1352_v61 = vpack.c.bf16 %v573_v44, %v573_v44  ;;  %v1355_v8 = vpack.c.bf16 %v585_v15, %v585_v15  ;;  %v1357_v10 = vpack.c.bf16 %v593_v5, %v593_v5  ;;  %v25661_v27 = vld [vmem:[%s26741_s6 + $0x1190] sm:$0xff]   ;;  %v25663_v29 = vld [vmem:[%s26741_s6 + $0x11d8] sm:$0xff]   ;;  %v25668_v35 = vld [vmem:[%s26741_s6 + $0x1120] sm:$0xff]   ;;  %v581_v5 = vrot.slane %v27781_v63, %v26864_v45 }
 0x234   : > { %v3560_v25 = vsel %vm26821_vm2, %v1351_v46, %v2904_v58  ;;  %v3562_v9 = vsel %vm26821_vm2, %v1353_v51, %v2910_v17  ;;  %v3559_v48 = vsel %vm26821_vm2, %v1350_v56, %v2901_v49  ;;  %v25671_v46 = vld [vmem:[%s26741_s6 + $0x11e8] sm:$0xff]   ;;  %v1815_v17 = vrot.slane %v27784_v59, %v26868_v47 }
 0x235   : > { %23303 = vmatpush3.bf16.msra.mxu0 %v25648_v20  ;;  %17548 = vmatprep.mubr.bf16.mxu0 %v3560_v25  ;;  %v3561_v12 = vsel %vm26821_vm2, %v1352_v61, %v2907_v6  ;;  %v3564_v21 = vsel %vm26821_vm2, %v1355_v8, %v2916_v14  ;;  %v3566_v42 = vsel %vm26821_vm2, %v1357_v10, %v2922_v18  ;;  %v25664_v20 = vld [vmem:[%s26741_s6 + $0x1118] sm:$0xff]   ;;  %v25672_v51 = vld [vmem:[%s26741_s6 + $0x1128] sm:$0xff]  }
 0x236   : > { %23325 = vmatpush3.bf16.msra.mxu1 %v25649_v3  ;;  %23332 = vmatprep.subr.bf16.mxu0 %v25650_v37  ;;  %v25665_v3 = vld [vmem:[%s26741_s6 + $0x1198] sm:$0xff]   ;;  %v25669_v37 = vld [vmem:[%s26741_s6 + $0x11a0] sm:$0xff]   ;;  %v2582_v6 = vpack.c.bf16 %v1815_v17, %v1815_v17  ;;  %v1354_v23 = vpack.c.bf16 %v581_v5, %v581_v5 }
 0x237   : > { %23354 = vmatprep.subr.bf16.mxu1 %v25651_v24  ;;  %17588 = vmatprep.mubr.bf16.mxu1 %v3562_v9  ;;  %v25679_v25 = vld [vmem:[%s26741_s6 + $0x11f8] sm:$0xff]  }
 0x238   : > { %17549 = vmatmul.mubr.bf16.vlgmr.msra.gmra.mrb[64].mxu0 %v3559_v48  ;;  %v25681_v8 = vld [vmem:[%s26741_s6 + $0x11b8] sm:$0xff]   ;;  %v25682_v48 = vld [vmem:[%s26741_s6 + $0x1240] sm:$0xff]   ;;  %v2919_v11 = vshll.u32 %v2582_v6, 16 }
 0x239   : > { %17589 = vmatmul.mubr.bf16.vlgmr.msra.gmra.mrb[64].mxu1 %v3561_v12  ;;  %23333 = vmatpush3.bf16.msra.mxu0 %v25652_v1  ;;  %v1807_v1 = vrot.slane %v27784_v59, %v26864_v45  ;;  %v589_v59 = vrot.slane %v27781_v63, %v26868_v47  ;;  %v25683_v12 = vld [vmem:[%s26741_s6 + $0x12c0] sm:$0xff]   ;;  %v25712_v5 = vld [vmem:[%s26741_s6 + $0x1238] sm:$0xff]  }
 0x23a   : > { %23355 = vmatpush3.bf16.msra.mxu1 %v25653_v4  ;;  %23334 = vmatprep.subr.bf16.mxu0 %v25654_v41  ;;  %v25677_v4 = vld [vmem:[%s26741_s6 + $0x11b0] sm:$0xff]   ;;  %v25678_v41 = vld [vmem:[%s26741_s6 + $0x1178] sm:$0xff]   ;;  %v25684_v63 = vld [vmem:[%s26741_s6 + $0x1200] sm:$0xff]  }
 0x23b   : > { %23356 = vmatprep.subr.bf16.mxu1 %v25655_v7  ;;  %17628 = vmatprep.mubr.bf16.mxu0 %v3564_v21  ;;  %v2580_v60 = vpack.c.bf16 %v1807_v1, %v1807_v1  ;;  %v25680_v7 = vld [vmem:[%s26741_s6 + $0x1138] sm:$0xff]   ;;  %v1356_v10 = vpack.c.bf16 %v589_v59, %v589_v59  ;;  %v25688_v21 = vld [vmem:[%s26741_s6 + $0x1208] sm:$0xff]   ;;  %v25706_v1 = vld [vmem:[%s26741_s6 + $0x1270] sm:$0xff]  }
 0x23c   : > { %17668 = vmatprep.mubr.bf16.mxu1 %v3566_v42  ;;  %v25690_v42 = vld [vmem:[%s26741_s6 + $0x1250] sm:$0xff]   ;;  %v25713_v59 = vld [vmem:[%s26741_s6 + $0x12b8] sm:$0xff]  }
 0x23d   : > { %23335 = vmatpush3.bf16.msra.mxu0 %v25656_v53  ;;  %v2913_v9 = vshll.u32 %v2580_v60, 16  ;;  %v25685_v53 = vld [vmem:[%s26741_s6 + $0x1280] sm:$0xff]   ;;  %v3565_v18 = vsel %vm26821_vm2, %v1356_v10, %v2919_v11  ;;  %v27904_v60 = vld [vmem:[%s26731_s24 + $0x48] sm:$0xff] }
 0x23e   : > { %23357 = vmatpush3.bf16.msra.mxu1 %v25657_v16  ;;  %23336 = vmatprep.subr.bf16.mxu0 %v25658_v13  ;;  %v25686_v16 = vld [vmem:[%s26741_s6 + $0x1248] sm:$0xff]   ;;  %v601_v6 = vrot.slane %v27904_v60, %v26774_v30  ;;  %v605_v10 = vrot.slane %v27904_v60, %v26786_v36  ;;  %v25714_v11 = vld [vmem:[%s26741_s6 + $0x1340] sm:$0xff]  }
 0x23f   : > { %23358 = vmatprep.subr.bf16.mxu1 %v25659_v19  ;;  %v3563_v14 = vsel %vm26821_vm2, %v1354_v23, %v2913_v9  ;;  %v25687_v13 = vld [vmem:[%s26741_s6 + $0x12c8] sm:$0xff]   ;;  %v597_v9 = vrot.slane %v27904_v60, %v26782_v34 }
 0x240   : > { %v25689_v19 = vld [vmem:[%s26741_s6 + $0x1288] sm:$0xff]  }
 0x241   : > { %23337 = vmatpush3.bf16.msra.mxu0 %v25660_v22  ;;  %v25691_v22 = vld [vmem:[%s26741_s6 + $0x12d0] sm:$0xff]  }
 0x242   : > { %23359 = vmatpush3.bf16.msra.mxu1 %v25661_v27  ;;  %23338 = vmatprep.subr.bf16.mxu0 %v25662_v28  ;;  %v25692_v27 = vld [vmem:[%s26741_s6 + $0x1210] sm:$0xff]  }
 0x243   : > { %23360 = vmatprep.subr.bf16.mxu1 %v25663_v29  ;;  %v25693_v28 = vld [vmem:[%s26741_s6 + $0x1290] sm:$0xff]   ;;  %v25694_v29 = vld [vmem:[%s26741_s6 + $0x1258] sm:$0xff]  }
 0x245   : > { %23339 = vmatpush3.bf16.msra.mxu0 %v25664_v20  ;;  %v25695_v20 = vld [vmem:[%s26741_s6 + $0x12d8] sm:$0xff]  }
 0x246   : > { %23361 = vmatpush3.bf16.msra.mxu1 %v25665_v3  ;;  %23340 = vmatprep.subr.bf16.mxu0 %v25666_v31  ;;  %v25696_v3 = vld [vmem:[%s26741_s6 + $0x1218] sm:$0xff]  }
 0x247   : > { %23362 = vmatprep.subr.bf16.mxu1 %v25667_v33  ;;  %v25697_v31 = vld [vmem:[%s26741_s6 + $0x1298] sm:$0xff]   ;;  %v25698_v33 = vld [vmem:[%s26741_s6 + $0x1260] sm:$0xff]  }
 0x249   : > { %23341 = vmatpush3.bf16.msra.mxu0 %v25668_v35  ;;  %v25699_v35 = vld [vmem:[%s26741_s6 + $0x12e0] sm:$0xff]  }
 0x24a   : > { %23363 = vmatpush3.bf16.msra.mxu1 %v25669_v37  ;;  %23342 = vmatprep.subr.bf16.mxu0 %v25670_v43  ;;  %v25700_v37 = vld [vmem:[%s26741_s6 + $0x1220] sm:$0xff]   ;;  %v25702_v43 = vld [vmem:[%s26741_s6 + $0x1268] sm:$0xff]  }
 0x24b   : > { %v23040_v62 = vpop.f32.mrb[40].mxu0  ;;  %23364 = vmatprep.subr.bf16.mxu1 %v25671_v46 }
 0x24c   : > { %v23041_v39 = vpop.f32.mrb[41].mxu0  ;;  %v23062_v44 = vpop.f32.mrb[40].mxu1 }
 0x24d   : > { %v23042_v24 = vadd.f32 %v23041_v39, %v23040_v62  ;;  %v23043_v50 = vpop.f32.mrb[42].mxu0  ;;  %v23063_v52 = vpop.f32.mrb[41].mxu1  ;;  %23343 = vmatpush3.bf16.msra.mxu0 %v25672_v51  ;;  %v25701_v62 = vld [vmem:[%s26741_s6 + $0x12a0] sm:$0xff]  }
 0x24e   : > { %v23044_v56 = vpop.f32.mrb[43].mxu0  ;;  %v23064_v61 = vadd.f32 %v23063_v52, %v23062_v44  ;;  %v23065_v58 = vpop.f32.mrb[42].mxu1  ;;  %23365 = vmatpush3.bf16.msra.mxu1 %v25673_v54  ;;  %23344 = vmatprep.subr.bf16.mxu0 %v25674_v0  ;;  %v25704_v54 = vld [vmem:[%s26741_s6 + $0x1228] sm:$0xff]  }
 0x24f   : > { %v17071_v57 = vadd.f32 %v23042_v24, %v27773_v26  ;;  %v23066_v15 = vpop.f32.mrb[43].mxu1  ;;  %v25676_v26 = vld [vmem:[%s26741_s6 + $0x1130] sm:$0xff]   ;;  %23366 = vmatprep.subr.bf16.mxu1 %v25675_v2  ;;  %v25703_v24 = vld [vmem:[%s26741_s6 + $0x12e8] sm:$0xff]  }
 0x250   : > { %v25705_v56 = vld [vmem:[%s26741_s6 + $0x12a8] sm:$0xff]   ;;  %v25707_v2 = vld [vmem:[%s26741_s6 + $0x12f0] sm:$0xff]  }
 0x251   : > { %v27853_v49 = vadd.f32 %v23064_v61, %v17071_v57  ;;  %23345 = vmatpush3.bf16.msra.mxu0 %v25676_v26  ;;  %v25708_v26 = vld [vmem:[%s26741_s6 + $0x1230] sm:$0xff]  }
 0x252   : > { %23367 = vmatpush3.bf16.msra.mxu1 %v25677_v4  ;;  %23346 = vmatprep.subr.bf16.mxu0 %v25678_v41  ;;  %v25709_v4 = vld [vmem:[%s26741_s6 + $0x12b0] sm:$0xff]   ;;  %v25711_v41 = vld [vmem:[%s26741_s6 + $0x12f8] sm:$0xff]  }
 0x253   : > { %23368 = vmatprep.subr.bf16.mxu1 %v25679_v25  ;;  %v27907_v25 = vld [vmem:[%s26736_s27 + $0x48] sm:$0xff] }
 0x254   : > { %v1835_v23 = vrot.slane %v27907_v25, %v26778_v32 }
 0x255   : > { %23347 = vmatpush3.bf16.msra.mxu0 %v25680_v7  ;;  %v1827_v7 = vrot.slane %v27907_v25, %v26774_v30 }
 0x256   : > { %23369 = vmatpush3.bf16.msra.mxu1 %v25681_v8  ;;  %23376 = vmatprep.subr.bf16.mxu0 %v25682_v48  ;;  %v609_v8 = vrot.slane %v27904_v60, %v26778_v32  ;;  %v1823_v48 = vrot.slane %v27907_v25, %v26782_v34 }
 0x257   : > { %23398 = vmatprep.subr.bf16.mxu1 %v25683_v12  ;;  %v1359_v12 = vpack.c.bf16 %v601_v6, %v601_v6  ;;  %v25729_v6 = vld [vmem:[%s26741_s6 + $0x1398] sm:$0xff]  }
 0x258   : > { %17629 = vmatmul.mubr.bf16.vlgmr.msra.gmra.mrb[68].mxu0 %v3563_v14  ;;  %v2587_v14 = vpack.c.bf16 %v1835_v23, %v1835_v23  ;;  %v25733_v23 = vld [vmem:[%s26741_s6 + $0x13a0] sm:$0xff]  }
 0x259   : > { %17669 = vmatmul.mubr.bf16.vlgmr.msra.gmra.mrb[68].mxu1 %v3565_v18  ;;  %23377 = vmatpush3.bf16.msra.mxu0 %v25684_v63  ;;  %v2585_v63 = vpack.c.bf16 %v1827_v7, %v1827_v7  ;;  %v1358_v18 = vpack.c.bf16 %v597_v9, %v597_v9  ;;  %v25731_v7 = vld [vmem:[%s26741_s6 + $0x13e0] sm:$0xff]  }
 0x25a   : > { %23399 = vmatpush3.bf16.msra.mxu1 %v25685_v53  ;;  %23378 = vmatprep.subr.bf16.mxu0 %v25686_v16  ;;  %v1361_v53 = vpack.c.bf16 %v609_v8, %v609_v8  ;;  %v25715_v16 = vld [vmem:[%s26741_s6 + $0x13c0] sm:$0xff]  }
 0x25b   : > { %23400 = vmatprep.subr.bf16.mxu1 %v25687_v13  ;;  %v2584_v13 = vpack.c.bf16 %v1823_v48, %v1823_v48  ;;  %v25732_v8 = vld [vmem:[%s26741_s6 + $0x1320] sm:$0xff]  }
 0x25d   : > { %23379 = vmatpush3.bf16.msra.mxu0 %v25688_v21  ;;  %v1360_v21 = vpack.c.bf16 %v605_v10, %v605_v10  ;;  %v25734_v10 = vld [vmem:[%s26741_s6 + $0x1368] sm:$0xff]  }
 0x25e   : > { %23401 = vmatpush3.bf16.msra.mxu1 %v25689_v19  ;;  %23380 = vmatprep.subr.bf16.mxu0 %v25690_v42  ;;  %v1831_v19 = vrot.slane %v27907_v25, %v26786_v36  ;;  %v2928_v42 = vshll.u32 %v2585_v63, 16 }
 0x25f   : > { %23402 = vmatprep.subr.bf16.mxu1 %v25691_v22  ;;  %v2934_v22 = vshll.u32 %v2587_v14, 16  ;;  %v25735_v14 = vld [vmem:[%s26741_s6 + $0x13e8] sm:$0xff]  }
 0x261   : > { %23381 = vmatpush3.bf16.msra.mxu0 %v25692_v27  ;;  %v617_v27 = vrot.slane %v27904_v60, %v26790_v38 }
 0x262   : > { %23403 = vmatpush3.bf16.msra.mxu1 %v25693_v28  ;;  %23382 = vmatprep.subr.bf16.mxu0 %v25694_v29  ;;  %v1843_v28 = vrot.slane %v27907_v25, %v26790_v38  ;;  %v2925_v29 = vshll.u32 %v2584_v13, 16  ;;  %v25736_v13 = vld [vmem:[%s26741_s6 + $0x1328] sm:$0xff]  }
 0x263   : > { %23404 = vmatprep.subr.bf16.mxu1 %v25695_v20  ;;  %v2586_v20 = vpack.c.bf16 %v1831_v19, %v1831_v19 }
 0x265   : > { %23383 = vmatpush3.bf16.msra.mxu0 %v25696_v3  ;;  %v25716_v3 = vld [vmem:[%s26741_s6 + $0x1300] sm:$0xff]  }
 0x266   : > { %23405 = vmatpush3.bf16.msra.mxu1 %v25697_v31  ;;  %23384 = vmatprep.subr.bf16.mxu0 %v25698_v33  ;;  %v625_v31 = vrot.slane %v27904_v60, %v26794_v40  ;;  %v1851_v33 = vrot.slane %v27907_v25, %v26794_v40 }
 0x267   : > { %23406 = vmatprep.subr.bf16.mxu1 %v25699_v35  ;;  %v3568_v35 = vsel %vm26821_vm2, %v1359_v12, %v2928_v42 }
 0x268   : > { %17708 = vmatprep.mubr.bf16.mxu0 %v3568_v35 }
 0x269   : > { %23385 = vmatpush3.bf16.msra.mxu0 %v25700_v37  ;;  %v3570_v37 = vsel %vm26821_vm2, %v1361_v53, %v2934_v22  ;;  %v1839_v22 = vrot.slane %v27907_v25, %v26864_v45 }
 0x26a   : > { %23407 = vmatpush3.bf16.msra.mxu1 %v25701_v62  ;;  %23386 = vmatprep.subr.bf16.mxu0 %v25702_v43  ;;  %v25718_v62 = vld [vmem:[%s26741_s6 + $0x1348] sm:$0xff]   ;;  %v2589_v43 = vpack.c.bf16 %v1843_v28, %v1843_v28  ;;  %v25738_v28 = vld [vmem:[%s26741_s6 + $0x1370] sm:$0xff]  }
 0x26b   : > { %v23084_v39 = vpop.f32.mrb[44].mxu0  ;;  %23408 = vmatprep.subr.bf16.mxu1 %v25703_v24  ;;  %17748 = vmatprep.mubr.bf16.mxu1 %v3570_v37  ;;  %v2931_v24 = vshll.u32 %v2586_v20, 16  ;;  %v1847_v20 = vrot.slane %v27907_v25, %v26868_v47  ;;  %v2588_v35 = vpack.c.bf16 %v1839_v22, %v1839_v22  ;;  %v25742_v37 = vld [vmem:[%s26741_s6 + $0x1378] sm:$0xff]   ;;  %v621_v25 = vrot.slane %v27904_v60, %v26868_v47 }
 0x26c   : > { %v23085_v44 = vpop.f32.mrb[45].mxu0  ;;  %v23106_v46 = vpop.f32.mrb[44].mxu1 }
 0x26d   : > { %v23086_v50 = vadd.f32 %v23085_v44, %v23084_v39  ;;  %v23087_v51 = vpop.f32.mrb[46].mxu0  ;;  %v23107_v52 = vpop.f32.mrb[45].mxu1  ;;  %23387 = vmatpush3.bf16.msra.mxu0 %v25704_v54  ;;  %v1363_v39 = vpack.c.bf16 %v617_v27, %v617_v27  ;;  %v3567_v44 = vsel %vm26821_vm2, %v1358_v18, %v2925_v29  ;;  %v2940_v54 = vshll.u32 %v2589_v43, 16  ;;  %v25739_v29 = vld [vmem:[%s26741_s6 + $0x13f0] sm:$0xff]   ;;  %v25744_v43 = vld [vmem:[%s26741_s6 + $0x1338] sm:$0xff]  }
 0x26e   : > { %v23088_v57 = vpop.f32.mrb[47].mxu0  ;;  %v23108_v58 = vadd.f32 %v23107_v52, %v23106_v46  ;;  %v23109_v0 = vpop.f32.mrb[46].mxu1  ;;  %23409 = vmatpush3.bf16.msra.mxu1 %v25705_v56  ;;  %23388 = vmatprep.subr.bf16.mxu0 %v25706_v1  ;;  %v25717_v46 = vld [vmem:[%s26741_s6 + $0x1380] sm:$0xff]   ;;  %v2591_v51 = vpack.c.bf16 %v1851_v33, %v1851_v33  ;;  %v25719_v52 = vld [vmem:[%s26741_s6 + $0x13c8] sm:$0xff]   ;;  %v3569_v56 = vsel %vm26821_vm2, %v1360_v21, %v2931_v24  ;;  %v25741_v33 = vld [vmem:[%s26741_s6 + $0x13b0] sm:$0xff]  }
 0x26f   : > { %v17151_v61 = vadd.f32 %v23086_v50, %v27853_v49  ;;  %v23110_v15 = vpop.f32.mrb[47].mxu1  ;;  %v25710_v49 = vld [vmem:[%s26741_s6 + $0x1278] sm:$0xff]   ;;  %23410 = vmatprep.subr.bf16.mxu1 %v25707_v2  ;;  %v1365_v50 = vpack.c.bf16 %v625_v31, %v625_v31  ;;  %v25720_v57 = vld [vmem:[%s26741_s6 + $0x1308] sm:$0xff]   ;;  %v3572_v0 = vsel %vm26821_vm2, %v1363_v39, %v2940_v54  ;;  %v25723_v2 = vld [vmem:[%s26741_s6 + $0x13d0] sm:$0xff]   ;;  %v2590_v39 = vpack.c.bf16 %v1847_v20, %v1847_v20 }
 0x270   : > { %v25721_v1 = vld [vmem:[%s26741_s6 + $0x1388] sm:$0xff]   ;;  %v25740_v31 = vld [vmem:[%s26741_s6 + $0x1330] sm:$0xff]   ;;  %v25747_v54 = vld [vmem:[%s26741_s6 + $0x14c0] sm:$0xff]  }
 0x271   : > { %v27896_v17 = vadd.f32 %v23108_v58, %v17151_v61  ;;  %23389 = vmatpush3.bf16.msra.mxu0 %v25708_v26  ;;  %v2946_v61 = vshll.u32 %v2591_v51, 16  ;;  %v25722_v58 = vld [vmem:[%s26741_s6 + $0x1350] sm:$0xff]   ;;  %v25737_v21 = vld [vmem:[%s26741_s6 + $0x13a8] sm:$0xff]   ;;  %v1364_v51 = vpack.c.bf16 %v621_v25, %v621_v25 }
 0x272   : > { %23411 = vmatpush3.bf16.msra.mxu1 %v25709_v4  ;;  %23390 = vmatprep.subr.bf16.mxu0 %v25710_v49  ;;  %v25724_v26 = vld [vmem:[%s26741_s6 + $0x1310] sm:$0xff]   ;;  %v25726_v4 = vld [vmem:[%s26741_s6 + $0x1358] sm:$0xff]  }
 0x273   : > { %23412 = vmatprep.subr.bf16.mxu1 %v25711_v41  ;;  %v3574_v15 = vsel %vm26821_vm2, %v1365_v50, %v2946_v61  ;;  %v25725_v49 = vld [vmem:[%s26741_s6 + $0x1390] sm:$0xff]   ;;  %v25727_v41 = vld [vmem:[%s26741_s6 + $0x13d8] sm:$0xff]   ;;  %v25746_v50 = vld [vmem:[%s26741_s6 + $0x1440] sm:$0xff]  }
 0x274   : > { %v25750_v61 = vld [vmem:[%s26741_s6 + $0x1448] sm:$0xff]  }
 0x275   : > { %23391 = vmatpush3.bf16.msra.mxu0 %v25712_v5  ;;  %v25728_v5 = vld [vmem:[%s26741_s6 + $0x1318] sm:$0xff]  }
 0x276   : > { %23413 = vmatpush3.bf16.msra.mxu1 %v25713_v59  ;;  %23420 = vmatprep.subr.bf16.mxu0 %v25714_v11  ;;  %v25730_v59 = vld [vmem:[%s26741_s6 + $0x1360] sm:$0xff]  }
 0x277   : > { %23442 = vmatprep.subr.bf16.mxu1 %v25715_v16 }
 0x278   : > { %17709 = vmatmul.mubr.bf16.vlgmr.msra.gmra.mrb[72].mxu0 %v3567_v44  ;;  %v25745_v44 = vld [vmem:[%s26741_s6 + $0x13b8] sm:$0xff]  }
 0x279   : > { %23421 = vmatpush3.bf16.msra.mxu0 %v25716_v3  ;;  %17749 = vmatmul.mubr.bf16.vlgmr.msra.gmra.mrb[72].mxu1 %v3569_v56 }
 0x27a   : > { %23422 = vmatprep.subr.bf16.mxu0 %v25718_v62  ;;  %23443 = vmatpush3.bf16.msra.mxu1 %v25717_v46  ;;  %v25743_v62 = vld [vmem:[%s26741_s6 + $0x13f8] sm:$0xff]   ;;  %v2937_v46 = vshll.u32 %v2588_v35, 16 }
 0x27b   : > { %17788 = vmatprep.mubr.bf16.mxu0 %v3572_v0  ;;  %23444 = vmatprep.subr.bf16.mxu1 %v25719_v52  ;;  %v2943_v52 = vshll.u32 %v2590_v39, 16  ;;  %v25751_v0 = vld [vmem:[%s26741_s6 + $0x14c8] sm:$0xff]   ;;  %v25775_v35 = vld [vmem:[%s26741_s6 + $0x14f8] sm:$0xff]   ;;  %v28034_v39 = vld [vmem:[%s26736_s27 + $0x50] sm:$0xff] }
 0x27c   : > { %17828 = vmatprep.mubr.bf16.mxu1 %v3574_v15  ;;  %v25753_v15 = vld [vmem:[%s26741_s6 + $0x1488] sm:$0xff]  }
 0x27d   : > { %23423 = vmatpush3.bf16.msra.mxu0 %v25720_v57  ;;  %v25749_v57 = vld [vmem:[%s26741_s6 + $0x1480] sm:$0xff]  }
 0x27e   : > { %23424 = vmatprep.subr.bf16.mxu0 %v25722_v58  ;;  %23445 = vmatpush3.bf16.msra.mxu1 %v25721_v1  ;;  %v3573_v58 = vsel %vm26821_vm2, %v1364_v51, %v2943_v52  ;;  %v25752_v1 = vld [vmem:[%s26741_s6 + $0x1408] sm:$0xff]   ;;  %v1855_v51 = vrot.slane %v28034_v39, %v26782_v34  ;;  %v1863_v52 = vrot.slane %v28034_v39, %v26786_v36 }
 0x27f   : > { %23446 = vmatprep.subr.bf16.mxu1 %v25723_v2  ;;  %v25754_v2 = vld [vmem:[%s26741_s6 + $0x1450] sm:$0xff]  }
 0x281   : > { %23425 = vmatpush3.bf16.msra.mxu0 %v25724_v26  ;;  %v25755_v26 = vld [vmem:[%s26741_s6 + $0x14d0] sm:$0xff]  }
 0x282   : > { %23426 = vmatprep.subr.bf16.mxu0 %v25726_v4  ;;  %23447 = vmatpush3.bf16.msra.mxu1 %v25725_v49  ;;  %v25756_v4 = vld [vmem:[%s26741_s6 + $0x1410] sm:$0xff]  }
 0x283   : > { %23448 = vmatprep.subr.bf16.mxu1 %v25727_v41  ;;  %v25757_v49 = vld [vmem:[%s26741_s6 + $0x1490] sm:$0xff]   ;;  %v25758_v41 = vld [vmem:[%s26741_s6 + $0x1458] sm:$0xff]  }
 0x285   : > { %23427 = vmatpush3.bf16.msra.mxu0 %v25728_v5  ;;  %v25759_v5 = vld [vmem:[%s26741_s6 + $0x14d8] sm:$0xff]  }
 0x286   : > { %23428 = vmatprep.subr.bf16.mxu0 %v25730_v59  ;;  %23449 = vmatpush3.bf16.msra.mxu1 %v25729_v6  ;;  %v25760_v59 = vld [vmem:[%s26741_s6 + $0x1418] sm:$0xff]  }
 0x287   : > { %23450 = vmatprep.subr.bf16.mxu1 %v25731_v7  ;;  %v25761_v6 = vld [vmem:[%s26741_s6 + $0x1498] sm:$0xff]   ;;  %v25762_v7 = vld [vmem:[%s26741_s6 + $0x1460] sm:$0xff]  }
 0x289   : > { %23429 = vmatpush3.bf16.msra.mxu0 %v25732_v8  ;;  %v25763_v8 = vld [vmem:[%s26741_s6 + $0x14e0] sm:$0xff]  }
 0x28a   : > { %23430 = vmatprep.subr.bf16.mxu0 %v25734_v10  ;;  %23451 = vmatpush3.bf16.msra.mxu1 %v25733_v23  ;;  %v25764_v23 = vld [vmem:[%s26741_s6 + $0x1420] sm:$0xff]  }
 0x28b   : > { %v23128_v9 = vpop.f32.mrb[48].mxu0  ;;  %23452 = vmatprep.subr.bf16.mxu1 %v25735_v14  ;;  %v25768_v14 = vld [vmem:[%s26741_s6 + $0x1428] sm:$0xff]  }
 0x28c   : > { %v23150_v48 = vpop.f32.mrb[48].mxu1  ;;  %v23129_v11 = vpop.f32.mrb[49].mxu0 }
 0x28d   : > { %v23151_v12 = vpop.f32.mrb[49].mxu1  ;;  %v23130_v63 = vadd.f32 %v23129_v11, %v23128_v9  ;;  %v23131_v16 = vpop.f32.mrb[50].mxu0  ;;  %23431 = vmatpush3.bf16.msra.mxu0 %v25736_v13  ;;  %v25765_v9 = vld [vmem:[%s26741_s6 + $0x14a0] sm:$0xff]  }
 0x28e   : > { %v23152_v53 = vadd.f32 %v23151_v12, %v23150_v48  ;;  %v23153_v18 = vpop.f32.mrb[50].mxu1  ;;  %v23132_v19 = vpop.f32.mrb[51].mxu0  ;;  %23432 = vmatprep.subr.bf16.mxu0 %v25738_v28  ;;  %23453 = vmatpush3.bf16.msra.mxu1 %v25737_v21  ;;  %v25766_v48 = vld [vmem:[%s26741_s6 + $0x1468] sm:$0xff]  }
 0x28f   : > { %v23154_v42 = vpop.f32.mrb[51].mxu1  ;;  %v17231_v27 = vadd.f32 %v23130_v63, %v27896_v17  ;;  %v613_v17 = vrot.slane %v27904_v60, %v26864_v45  ;;  %23454 = vmatprep.subr.bf16.mxu1 %v25739_v29  ;;  %v25748_v60 = vld [vmem:[%s26741_s6 + $0x1400] sm:$0xff]   ;;  %v25769_v19 = vld [vmem:[%s26741_s6 + $0x14a8] sm:$0xff]   ;;  %v25771_v29 = vld [vmem:[%s26741_s6 + $0x14f0] sm:$0xff]  }
 0x291   : > { %v27977_v3 = vadd.f32 %v23152_v53, %v17231_v27  ;;  %23433 = vmatpush3.bf16.msra.mxu0 %v25740_v31  ;;  %v1362_v24 = vpack.c.bf16 %v613_v17, %v613_v17  ;;  %v25767_v53 = vld [vmem:[%s26741_s6 + $0x14e8] sm:$0xff]   ;;  %v25770_v27 = vld [vmem:[%s26741_s6 + $0x1470] sm:$0xff]   ;;  %v25774_v17 = vld [vmem:[%s26741_s6 + $0x1478] sm:$0xff]  }
 0x292   : > { %23434 = vmatprep.subr.bf16.mxu0 %v25742_v37  ;;  %23455 = vmatpush3.bf16.msra.mxu1 %v25741_v33  ;;  %v25772_v31 = vld [vmem:[%s26741_s6 + $0x1430] sm:$0xff]   ;;  %v25776_v37 = vld [vmem:[%s26741_s6 + $0x1438] sm:$0xff]  }
 0x293   : > { %23456 = vmatprep.subr.bf16.mxu1 %v25743_v62  ;;  %v3571_v56 = vsel %vm26821_vm2, %v1362_v24, %v2937_v46  ;;  %v25773_v33 = vld [vmem:[%s26741_s6 + $0x14b0] sm:$0xff]   ;;  %v1859_v46 = vrot.slane %v28034_v39, %v26774_v30 }
 0x294   : > { %v28029_v62 = vld [vmem:[%s26731_s24 + $0x50] sm:$0xff] }
 0x295   : > { %23435 = vmatpush3.bf16.msra.mxu0 %v25744_v43  ;;  %v633_v25 = vrot.slane %v28029_v62, %v26774_v30  ;;  %v641_v43 = vrot.slane %v28029_v62, %v26778_v32  ;;  %v637_v24 = vrot.slane %v28029_v62, %v26786_v36 }
 0x296   : > { %23464 = vmatprep.subr.bf16.mxu0 %v25746_v50  ;;  %23457 = vmatpush3.bf16.msra.mxu1 %v25745_v44  ;;  %v629_v44 = vrot.slane %v28029_v62, %v26782_v34  ;;  %v1867_v50 = vrot.slane %v28034_v39, %v26778_v32 }
 0x297   : > { %23486 = vmatprep.subr.bf16.mxu1 %v25747_v54  ;;  %v25778_v54 = vld [vmem:[%s26741_s6 + $0x1540] sm:$0xff]  }
 0x298   : > { %17789 = vmatmul.mubr.bf16.vlgmr.msra.gmra.mrb[76].mxu0 %v3571_v56  ;;  %v1369_v56 = vpack.c.bf16 %v641_v43, %v641_v43  ;;  %v25795_v43 = vld [vmem:[%s26741_s6 + $0x15e0] sm:$0xff]  }
 0x299   : > { %23465 = vmatpush3.bf16.msra.mxu0 %v25748_v60  ;;  %17829 = vmatmul.mubr.bf16.vlgmr.msra.gmra.mrb[76].mxu1 %v3573_v58  ;;  %v1367_v60 = vpack.c.bf16 %v633_v25, %v633_v25  ;;  %v25779_v58 = vld [vmem:[%s26741_s6 + $0x15c0] sm:$0xff]  }
 0x29a   : > { %23466 = vmatprep.subr.bf16.mxu0 %v25750_v61  ;;  %23487 = vmatpush3.bf16.msra.mxu1 %v25749_v57  ;;  %v1366_v57 = vpack.c.bf16 %v629_v44, %v629_v44  ;;  %v1368_v61 = vpack.c.bf16 %v637_v24, %v637_v24  ;;  %v25794_v25 = vld [vmem:[%s26741_s6 + $0x1560] sm:$0xff]  }
 0x29b   : > { %23488 = vmatprep.subr.bf16.mxu1 %v25751_v0  ;;  %v2593_v0 = vpack.c.bf16 %v1859_v46, %v1859_v46  ;;  %v25796_v44 = vld [vmem:[%s26741_s6 + $0x1520] sm:$0xff]  }
 0x29c   : > { %v25797_v24 = vld [vmem:[%s26741_s6 + $0x15a0] sm:$0xff]  }
 0x29d   : > { %23467 = vmatpush3.bf16.msra.mxu0 %v25752_v1  ;;  %v2595_v1 = vpack.c.bf16 %v1867_v50, %v1867_v50 }
 0x29e   : > { %23468 = vmatprep.subr.bf16.mxu0 %v25754_v2  ;;  %23489 = vmatpush3.bf16.msra.mxu1 %v25753_v15  ;;  %v2592_v15 = vpack.c.bf16 %v1855_v51, %v1855_v51  ;;  %v2594_v2 = vpack.c.bf16 %v1863_v52, %v1863_v52  ;;  %v25798_v52 = vld [vmem:[%s26741_s6 + $0x1568] sm:$0xff]  }
 0x29f   : > { %23490 = vmatprep.subr.bf16.mxu1 %v25755_v26  ;;  %v25780_v26 = vld [vmem:[%s26741_s6 + $0x1500] sm:$0xff]  }
 0x2a1   : > { %23469 = vmatpush3.bf16.msra.mxu0 %v25756_v4  ;;  %v649_v4 = vrot.slane %v28029_v62, %v26790_v38 }
 0x2a2   : > { %23470 = vmatprep.subr.bf16.mxu0 %v25758_v41  ;;  %23491 = vmatpush3.bf16.msra.mxu1 %v25757_v49  ;;  %v1875_v49 = vrot.slane %v28034_v39, %v26790_v38  ;;  %v657_v41 = vrot.slane %v28029_v62, %v26794_v40 }
 0x2a3   : > { %23492 = vmatprep.subr.bf16.mxu1 %v25759_v5  ;;  %v1883_v5 = vrot.slane %v28034_v39, %v26794_v40 }
 0x2a5   : > { %23471 = vmatpush3.bf16.msra.mxu0 %v25760_v59  ;;  %v2952_v59 = vshll.u32 %v2593_v0, 16 }
 0x2a6   : > { %23472 = vmatprep.subr.bf16.mxu0 %v25762_v7  ;;  %23493 = vmatpush3.bf16.msra.mxu1 %v25761_v6  ;;  %v2958_v6 = vshll.u32 %v2595_v1, 16  ;;  %v2949_v7 = vshll.u32 %v2592_v15, 16 }
 0x2a7   : > { %23494 = vmatprep.subr.bf16.mxu1 %v25763_v8  ;;  %v2955_v8 = vshll.u32 %v2594_v2, 16  ;;  %v1871_v2 = vrot.slane %v28034_v39, %v26864_v45 }
 0x2a9   : > { %23473 = vmatpush3.bf16.msra.mxu0 %v25764_v23  ;;  %v25781_v23 = vld [vmem:[%s26741_s6 + $0x1580] sm:$0xff]  }
 0x2aa   : > { %23474 = vmatprep.subr.bf16.mxu0 %v25766_v48  ;;  %23495 = vmatpush3.bf16.msra.mxu1 %v25765_v9  ;;  %v25782_v9 = vld [vmem:[%s26741_s6 + $0x1548] sm:$0xff]   ;;  %v1371_v48 = vpack.c.bf16 %v649_v4, %v649_v4 }
 0x2ab   : > { %v23172_v10 = vpop.f32.mrb[52].mxu0  ;;  %23496 = vmatprep.subr.bf16.mxu1 %v25767_v53  ;;  %v3578_v53 = vsel %vm26821_vm2, %v1369_v56, %v2958_v6  ;;  %v25804_v6 = vld [vmem:[%s26741_s6 + $0x1530] sm:$0xff]  }
 0x2ac   : > { %v23194_v11 = vpop.f32.mrb[52].mxu1  ;;  %v23173_v12 = vpop.f32.mrb[53].mxu0  ;;  %17908 = vmatprep.mubr.bf16.mxu1 %v3578_v53 }
 0x2ad   : > { %v23195_v63 = vpop.f32.mrb[53].mxu1  ;;  %v23174_v16 = vadd.f32 %v23173_v12, %v23172_v10  ;;  %v23175_v13 = vpop.f32.mrb[54].mxu0  ;;  %23475 = vmatpush3.bf16.msra.mxu0 %v25768_v14  ;;  %v2597_v10 = vpack.c.bf16 %v1875_v49, %v1875_v49  ;;  %v2599_v12 = vpack.c.bf16 %v1883_v5, %v1883_v5  ;;  %v3575_v14 = vsel %vm26821_vm2, %v1366_v57, %v2949_v7  ;;  %v25802_v49 = vld [vmem:[%s26741_s6 + $0x1570] sm:$0xff]  }
 0x2ae   : > { %v23196_v18 = vadd.f32 %v23195_v63, %v23194_v11  ;;  %v23197_v21 = vpop.f32.mrb[54].mxu1  ;;  %v23176_v42 = vpop.f32.mrb[55].mxu0  ;;  %23476 = vmatprep.subr.bf16.mxu0 %v25770_v27  ;;  %23497 = vmatpush3.bf16.msra.mxu1 %v25769_v19  ;;  %v1373_v11 = vpack.c.bf16 %v657_v41, %v657_v41  ;;  %v3576_v63 = vsel %vm26821_vm2, %v1367_v60, %v2952_v59  ;;  %v25784_v13 = vld [vmem:[%s26741_s6 + $0x1508] sm:$0xff]   ;;  %v25803_v5 = vld [vmem:[%s26741_s6 + $0x15f0] sm:$0xff]  }
 0x2af   : > { %v23198_v22 = vpop.f32.mrb[55].mxu1  ;;  %v17311_v28 = vadd.f32 %v23174_v16, %v27977_v3  ;;  %23498 = vmatprep.subr.bf16.mxu1 %v25771_v29  ;;  %v25777_v3 = vld [vmem:[%s26741_s6 + $0x14b8] sm:$0xff]   ;;  %v3577_v16 = vsel %vm26821_vm2, %v1368_v61, %v2955_v8  ;;  %17868 = vmatprep.mubr.bf16.mxu0 %v3576_v63  ;;  %v2964_v21 = vshll.u32 %v2597_v10, 16  ;;  %v25785_v19 = vld [vmem:[%s26741_s6 + $0x1588] sm:$0xff]   ;;  %v2970_v42 = vshll.u32 %v2599_v12, 16  ;;  %v25805_v7 = vld [vmem:[%s26741_s6 + $0x15b0] sm:$0xff]  }
 0x2b0   : > { %v25786_v22 = vld [vmem:[%s26741_s6 + $0x1550] sm:$0xff]   ;;  %v25800_v61 = vld [vmem:[%s26741_s6 + $0x1528] sm:$0xff]   ;;  %v1879_v41 = vrot.slane %v28034_v39, %v26868_v47  ;;  %v2596_v8 = vpack.c.bf16 %v1871_v2, %v1871_v2  ;;  %v653_v39 = vrot.slane %v28029_v62, %v26868_v47  ;;  %v25808_v10 = vld [vmem:[%s26741_s6 + $0x1538] sm:$0xff]  }
 0x2b1   : > { %v28020_v20 = vadd.f32 %v23196_v18, %v17311_v28  ;;  %23477 = vmatpush3.bf16.msra.mxu0 %v25772_v31  ;;  %v25783_v18 = vld [vmem:[%s26741_s6 + $0x15c8] sm:$0xff]   ;;  %v3580_v27 = vsel %vm26821_vm2, %v1371_v48, %v2964_v21  ;;  %v25787_v28 = vld [vmem:[%s26741_s6 + $0x15d0] sm:$0xff]   ;;  %v3582_v29 = vsel %vm26821_vm2, %v1373_v11, %v2970_v42  ;;  %v25807_v48 = vld [vmem:[%s26741_s6 + $0x15f8] sm:$0xff]  }
 0x2b2   : > { %23478 = vmatprep.subr.bf16.mxu0 %v25774_v17  ;;  %23499 = vmatpush3.bf16.msra.mxu1 %v25773_v33  ;;  %v25788_v31 = vld [vmem:[%s26741_s6 + $0x1510] sm:$0xff]   ;;  %v25790_v17 = vld [vmem:[%s26741_s6 + $0x1558] sm:$0xff]   ;;  %v2961_v12 = vshll.u32 %v2596_v8, 16  ;;  %v1372_v53 = vpack.c.bf16 %v653_v39, %v653_v39  ;;  %v25814_v42 = vld [vmem:[%s26741_s6 + $0x1648] sm:$0xff]  }
 0x2b3   : > { %23500 = vmatprep.subr.bf16.mxu1 %v25775_v35  ;;  %v25789_v33 = vld [vmem:[%s26741_s6 + $0x1590] sm:$0xff]   ;;  %v25791_v35 = vld [vmem:[%s26741_s6 + $0x15d8] sm:$0xff]  }
 0x2b4   : > { %v25809_v11 = vld [vmem:[%s26741_s6 + $0x15b8] sm:$0xff]  }
 0x2b5   : > { %23479 = vmatpush3.bf16.msra.mxu0 %v25776_v37  ;;  %v25792_v37 = vld [vmem:[%s26741_s6 + $0x1518] sm:$0xff]  }
 0x2b6   : > { %23508 = vmatprep.subr.bf16.mxu0 %v25778_v54  ;;  %23501 = vmatpush3.bf16.msra.mxu1 %v25777_v3  ;;  %v25793_v3 = vld [vmem:[%s26741_s6 + $0x1598] sm:$0xff]   ;;  %v25799_v54 = vld [vmem:[%s26741_s6 + $0x15e8] sm:$0xff]  }
 0x2b7   : > { %23530 = vmatprep.subr.bf16.mxu1 %v25779_v58  ;;  %v25801_v58 = vld [vmem:[%s26741_s6 + $0x15a8] sm:$0xff]   ;;  %v25838_v8 = vld [vmem:[%s26741_s6 + $0x1678] sm:$0xff]  }
 0x2b8   : > { %17869 = vmatmul.mubr.bf16.vlgmr.msra.gmra.mrb[80].mxu0 %v3575_v14  ;;  %v25841_v39 = vld [vmem:[%s26741_s6 + $0x16b8] sm:$0xff]  }
 0x2b9   : > { %17909 = vmatmul.mubr.bf16.vlgmr.msra.gmra.mrb[80].mxu1 %v3577_v16  ;;  %23509 = vmatpush3.bf16.msra.mxu0 %v25780_v26  ;;  %v25810_v16 = vld [vmem:[%s26741_s6 + $0x1640] sm:$0xff]  }
 0x2ba   : > { %23531 = vmatpush3.bf16.msra.mxu1 %v25781_v23  ;;  %23510 = vmatprep.subr.bf16.mxu0 %v25782_v9  ;;  %v645_v23 = vrot.slane %v28029_v62, %v26864_v45  ;;  %v2598_v9 = vpack.c.bf16 %v1879_v41, %v1879_v41  ;;  %v25811_v62 = vld [vmem:[%s26741_s6 + $0x16c0] sm:$0xff]   ;;  %v25835_v41 = vld [vmem:[%s26741_s6 + $0x16f0] sm:$0xff]  }
 0x2bb   : > { %23532 = vmatprep.subr.bf16.mxu1 %v25783_v18  ;;  %17948 = vmatprep.mubr.bf16.mxu0 %v3580_v27  ;;  %v25812_v18 = vld [vmem:[%s26741_s6 + $0x1600] sm:$0xff]   ;;  %v25816_v27 = vld [vmem:[%s26741_s6 + $0x1608] sm:$0xff]  }
 0x2bc   : > { %17988 = vmatprep.mubr.bf16.mxu1 %v3582_v29  ;;  %v1370_v63 = vpack.c.bf16 %v645_v23, %v645_v23  ;;  %v2967_v14 = vshll.u32 %v2598_v9, 16  ;;  %v25818_v29 = vld [vmem:[%s26741_s6 + $0x1650] sm:$0xff]   ;;  %v25840_v23 = vld [vmem:[%s26741_s6 + $0x1638] sm:$0xff]  }
 0x2bd   : > { %23511 = vmatpush3.bf16.msra.mxu0 %v25784_v13  ;;  %v25813_v13 = vld [vmem:[%s26741_s6 + $0x1680] sm:$0xff]  }
 0x2be   : > { %23533 = vmatpush3.bf16.msra.mxu1 %v25785_v19  ;;  %23512 = vmatprep.subr.bf16.mxu0 %v25786_v22  ;;  %v3579_v21 = vsel %vm26821_vm2, %v1370_v63, %v2961_v12  ;;  %v3581_v19 = vsel %vm26821_vm2, %v1372_v53, %v2967_v14  ;;  %v25815_v22 = vld [vmem:[%s26741_s6 + $0x16c8] sm:$0xff]   ;;  %v25842_v14 = vld [vmem:[%s26741_s6 + $0x1740] sm:$0xff]  }
 0x2bf   : > { %23534 = vmatprep.subr.bf16.mxu1 %v25787_v28  ;;  %v25817_v28 = vld [vmem:[%s26741_s6 + $0x1688] sm:$0xff]  }
 0x2c1   : > { %23513 = vmatpush3.bf16.msra.mxu0 %v25788_v31  ;;  %v25819_v31 = vld [vmem:[%s26741_s6 + $0x16d0] sm:$0xff]  }
 0x2c2   : > { %23535 = vmatpush3.bf16.msra.mxu1 %v25789_v33  ;;  %23514 = vmatprep.subr.bf16.mxu0 %v25790_v17  ;;  %v25820_v33 = vld [vmem:[%s26741_s6 + $0x1610] sm:$0xff]  }
 0x2c3   : > { %23536 = vmatprep.subr.bf16.mxu1 %v25791_v35  ;;  %v25821_v17 = vld [vmem:[%s26741_s6 + $0x1690] sm:$0xff]   ;;  %v25822_v35 = vld [vmem:[%s26741_s6 + $0x1658] sm:$0xff]  }
 0x2c5   : > { %23515 = vmatpush3.bf16.msra.mxu0 %v25792_v37  ;;  %v25823_v37 = vld [vmem:[%s26741_s6 + $0x16d8] sm:$0xff]  }
 0x2c6   : > { %23537 = vmatpush3.bf16.msra.mxu1 %v25793_v3  ;;  %23516 = vmatprep.subr.bf16.mxu0 %v25794_v25  ;;  %v25824_v3 = vld [vmem:[%s26741_s6 + $0x1618] sm:$0xff]  }
 0x2c7   : > { %23538 = vmatprep.subr.bf16.mxu1 %v25795_v43  ;;  %v25825_v25 = vld [vmem:[%s26741_s6 + $0x1698] sm:$0xff]   ;;  %v25826_v43 = vld [vmem:[%s26741_s6 + $0x1660] sm:$0xff]  }
 0x2c9   : > { %23517 = vmatpush3.bf16.msra.mxu0 %v25796_v44  ;;  %v25827_v44 = vld [vmem:[%s26741_s6 + $0x16e0] sm:$0xff]  }
 0x2ca   : > { %23539 = vmatpush3.bf16.msra.mxu1 %v25797_v24  ;;  %23518 = vmatprep.subr.bf16.mxu0 %v25798_v52  ;;  %v25828_v24 = vld [vmem:[%s26741_s6 + $0x1620] sm:$0xff]  }
 0x2cb   : > { %v23216_v46 = vpop.f32.mrb[56].mxu0  ;;  %23540 = vmatprep.subr.bf16.mxu1 %v25799_v54  ;;  %v25830_v54 = vld [vmem:[%s26741_s6 + $0x1668] sm:$0xff]  }
 0x2cc   : > { %v23238_v50 = vpop.f32.mrb[56].mxu1  ;;  %v23217_v51 = vpop.f32.mrb[57].mxu0 }
 0x2cd   : > { %v23218_v60 = vadd.f32 %v23217_v51, %v23216_v46  ;;  %v23239_v56 = vpop.f32.mrb[57].mxu1  ;;  %v23219_v57 = vpop.f32.mrb[58].mxu0  ;;  %23519 = vmatpush3.bf16.msra.mxu0 %v25800_v61  ;;  %v25829_v46 = vld [vmem:[%s26741_s6 + $0x16a0] sm:$0xff]  }
 0x2ce   : > { %v23240_v0 = vadd.f32 %v23239_v56, %v23238_v50  ;;  %v23241_v1 = vpop.f32.mrb[58].mxu1  ;;  %v23220_v15 = vpop.f32.mrb[59].mxu0  ;;  %23541 = vmatpush3.bf16.msra.mxu1 %v25801_v58  ;;  %23520 = vmatprep.subr.bf16.mxu0 %v25802_v49  ;;  %v25832_v58 = vld [vmem:[%s26741_s6 + $0x1628] sm:$0xff]  }
 0x2cf   : > { %v17391_v26 = vadd.f32 %v23218_v60, %v28020_v20  ;;  %v23242_v4 = vpop.f32.mrb[59].mxu1  ;;  %v25806_v20 = vld [vmem:[%s26741_s6 + $0x1578] sm:$0xff]   ;;  %23542 = vmatprep.subr.bf16.mxu1 %v25803_v5  ;;  %v25831_v60 = vld [vmem:[%s26741_s6 + $0x16e8] sm:$0xff]  }
 0x2d0   : > { %v25833_v15 = vld [vmem:[%s26741_s6 + $0x16a8] sm:$0xff]  }
 0x2d1   : > { %v28101_v59 = vadd.f32 %v23240_v0, %v17391_v26  ;;  %23521 = vmatpush3.bf16.msra.mxu0 %v25804_v6  ;;  %v25834_v26 = vld [vmem:[%s26741_s6 + $0x1670] sm:$0xff]  }
 0x2d2   : > { %23543 = vmatpush3.bf16.msra.mxu1 %v25805_v7  ;;  %23522 = vmatprep.subr.bf16.mxu0 %v25806_v20  ;;  %v25836_v6 = vld [vmem:[%s26741_s6 + $0x1630] sm:$0xff]   ;;  %v25839_v20 = vld [vmem:[%s26741_s6 + $0x16f8] sm:$0xff]  }
 0x2d3   : > { %23544 = vmatprep.subr.bf16.mxu1 %v25807_v48  ;;  %v25837_v7 = vld [vmem:[%s26741_s6 + $0x16b0] sm:$0xff]   ;;  %v28158_v48 = vld [vmem:[%s26736_s27 + $0x58] sm:$0xff] }
 0x2d4   : > { %v1891_v12 = vrot.slane %v28158_v48, %v26774_v30  ;;  %v1899_v63 = vrot.slane %v28158_v48, %v26778_v32  ;;  %v1887_v53 = vrot.slane %v28158_v48, %v26782_v34 }
 0x2d5   : > { %23523 = vmatpush3.bf16.msra.mxu0 %v25808_v10 }
 0x2d6   : > { %23545 = vmatpush3.bf16.msra.mxu1 %v25809_v11  ;;  %23552 = vmatprep.subr.bf16.mxu0 %v25810_v16 }
 0x2d7   : > { %23574 = vmatprep.subr.bf16.mxu1 %v25811_v62 }
 0x2d8   : > { %17949 = vmatmul.mubr.bf16.vlgmr.msra.gmra.mrb[84].mxu0 %v3579_v21  ;;  %v25843_v21 = vld [vmem:[%s26741_s6 + $0x17c0] sm:$0xff]  }
 0x2d9   : > { %17989 = vmatmul.mubr.bf16.vlgmr.msra.gmra.mrb[84].mxu1 %v3581_v19  ;;  %23553 = vmatpush3.bf16.msra.mxu0 %v25812_v18  ;;  %v2601_v19 = vpack.c.bf16 %v1891_v12, %v1891_v12  ;;  %v25861_v12 = vld [vmem:[%s26741_s6 + $0x17a0] sm:$0xff]  }
 0x2da   : > { %23575 = vmatpush3.bf16.msra.mxu1 %v25813_v13  ;;  %23554 = vmatprep.subr.bf16.mxu0 %v25814_v42  ;;  %v2603_v42 = vpack.c.bf16 %v1899_v63, %v1899_v63 }
 0x2db   : > { %23576 = vmatprep.subr.bf16.mxu1 %v25815_v22  ;;  %v2600_v22 = vpack.c.bf16 %v1887_v53, %v1887_v53 }
 0x2dd   : > { %23555 = vmatpush3.bf16.msra.mxu0 %v25816_v27  ;;  %v1895_v27 = vrot.slane %v28158_v48, %v26786_v36 }
 0x2de   : > { %23577 = vmatpush3.bf16.msra.mxu1 %v25817_v28  ;;  %23556 = vmatprep.subr.bf16.mxu0 %v25818_v29 }
 0x2df   : > { %23578 = vmatprep.subr.bf16.mxu1 %v25819_v31  ;;  %v1907_v31 = vrot.slane %v28158_v48, %v26790_v38 }
 0x2e1   : > { %23557 = vmatpush3.bf16.msra.mxu0 %v25820_v33  ;;  %v2976_v33 = vshll.u32 %v2601_v19, 16  ;;  %v25864_v19 = vld [vmem:[%s26741_s6 + $0x1728] sm:$0xff]  }
 0x2e2   : > { %23579 = vmatpush3.bf16.msra.mxu1 %v25821_v17  ;;  %23558 = vmatprep.subr.bf16.mxu0 %v25822_v35  ;;  %v2982_v17 = vshll.u32 %v2603_v42, 16  ;;  %v2973_v35 = vshll.u32 %v2600_v22, 16 }
 0x2e3   : > { %23580 = vmatprep.subr.bf16.mxu1 %v25823_v37  ;;  %v2602_v37 = vpack.c.bf16 %v1895_v27, %v1895_v27 }
 0x2e5   : > { %23559 = vmatpush3.bf16.msra.mxu0 %v25824_v3  ;;  %v25844_v3 = vld [vmem:[%s26741_s6 + $0x1700] sm:$0xff]  }
 0x2e6   : > { %23581 = vmatpush3.bf16.msra.mxu1 %v25825_v25  ;;  %23560 = vmatprep.subr.bf16.mxu0 %v25826_v43  ;;  %v25845_v25 = vld [vmem:[%s26741_s6 + $0x1780] sm:$0xff]  }
 0x2e7   : > { %23582 = vmatprep.subr.bf16.mxu1 %v25827_v44  ;;  %v2605_v44 = vpack.c.bf16 %v1907_v31, %v1907_v31 }
 0x2e9   : > { %23561 = vmatpush3.bf16.msra.mxu0 %v25828_v24 }
 0x2ea   : > { %23583 = vmatpush3.bf16.msra.mxu1 %v25829_v46  ;;  %23562 = vmatprep.subr.bf16.mxu0 %v25830_v54  ;;  %v1915_v46 = vrot.slane %v28158_v48, %v26794_v40  ;;  %v2979_v54 = vshll.u32 %v2602_v37, 16 }
 0x2eb   : > { %v23260_v50 = vpop.f32.mrb[60].mxu0  ;;  %23584 = vmatprep.subr.bf16.mxu1 %v25831_v60  ;;  %v25846_v60 = vld [vmem:[%s26741_s6 + $0x1748] sm:$0xff]  }
 0x2ec   : > { %v23282_v51 = vpop.f32.mrb[60].mxu1  ;;  %v23261_v52 = vpop.f32.mrb[61].mxu0 }
 0x2ed   : > { %v23262_v56 = vadd.f32 %v23261_v52, %v23260_v50  ;;  %v23283_v57 = vpop.f32.mrb[61].mxu1  ;;  %v23263_v61 = vpop.f32.mrb[62].mxu0  ;;  %23563 = vmatpush3.bf16.msra.mxu0 %v25832_v58  ;;  %v2607_v58 = vpack.c.bf16 %v1915_v46, %v1915_v46 }
 0x2ee   : > { %v23284_v0 = vadd.f32 %v23283_v57, %v23282_v51  ;;  %v23285_v1 = vpop.f32.mrb[62].mxu1  ;;  %v23264_v2 = vpop.f32.mrb[63].mxu0  ;;  %23585 = vmatpush3.bf16.msra.mxu1 %v25833_v15  ;;  %23564 = vmatprep.subr.bf16.mxu0 %v25834_v26  ;;  %v2988_v57 = vshll.u32 %v2605_v44, 16  ;;  %v25849_v15 = vld [vmem:[%s26741_s6 + $0x1788] sm:$0xff]  }
 0x2ef   : > { %v17471_v4 = vadd.f32 %v23262_v56, %v28101_v59  ;;  %v23286_v49 = vpop.f32.mrb[63].mxu1  ;;  %23586 = vmatprep.subr.bf16.mxu1 %v25835_v41  ;;  %v28153_v59 = vld [vmem:[%s26731_s24 + $0x58] sm:$0xff]  ;;  %v25847_v56 = vld [vmem:[%s26741_s6 + $0x17c8] sm:$0xff]   ;;  %v2994_v26 = vshll.u32 %v2607_v58, 16  ;;  %v25876_v58 = vld [vmem:[%s26741_s6 + $0x1800] sm:$0xff]  }
 0x2f0   : > { %v665_v9 = vrot.slane %v28153_v59, %v26774_v30  ;;  %v673_v10 = vrot.slane %v28153_v59, %v26778_v32  ;;  %v661_v11 = vrot.slane %v28153_v59, %v26782_v34  ;;  %v669_v13 = vrot.slane %v28153_v59, %v26786_v36  ;;  %v25848_v1 = vld [vmem:[%s26741_s6 + $0x1708] sm:$0xff]   ;;  %v25851_v49 = vld [vmem:[%s26741_s6 + $0x17d0] sm:$0xff]  }
 0x2f1   : > { %v28144_v5 = vadd.f32 %v23284_v0, %v17471_v4  ;;  %23565 = vmatpush3.bf16.msra.mxu0 %v25836_v6  ;;  %v681_v29 = vrot.slane %v28153_v59, %v26790_v38  ;;  %v689_v24 = vrot.slane %v28153_v59, %v26794_v40  ;;  %v25850_v4 = vld [vmem:[%s26741_s6 + $0x1750] sm:$0xff]  }
 0x2f2   : > { %23587 = vmatpush3.bf16.msra.mxu1 %v25837_v7  ;;  %23566 = vmatprep.subr.bf16.mxu0 %v25838_v8  ;;  %v1375_v16 = vpack.c.bf16 %v665_v9, %v665_v9  ;;  %v1377_v62 = vpack.c.bf16 %v673_v10, %v673_v10  ;;  %v1374_v18 = vpack.c.bf16 %v661_v11, %v661_v11  ;;  %v25852_v6 = vld [vmem:[%s26741_s6 + $0x1710] sm:$0xff]   ;;  %v25854_v8 = vld [vmem:[%s26741_s6 + $0x1758] sm:$0xff]   ;;  %v25858_v9 = vld [vmem:[%s26741_s6 + $0x1760] sm:$0xff]  }
 0x2f3   : > { %23588 = vmatprep.subr.bf16.mxu1 %v25839_v20  ;;  %v1376_v28 = vpack.c.bf16 %v669_v13, %v669_v13  ;;  %v1379_v43 = vpack.c.bf16 %v681_v29, %v681_v29  ;;  %v1381_v61 = vpack.c.bf16 %v689_v24, %v689_v24  ;;  %v25853_v7 = vld [vmem:[%s26741_s6 + $0x1790] sm:$0xff]   ;;  %v25855_v20 = vld [vmem:[%s26741_s6 + $0x17d8] sm:$0xff]   ;;  %v25859_v10 = vld [vmem:[%s26741_s6 + $0x17e0] sm:$0xff]  }
 0x2f4   : > { %v3584_v50 = vsel %vm26821_vm2, %v1375_v16, %v2976_v33  ;;  %v3586_v51 = vsel %vm26821_vm2, %v1377_v62, %v2982_v17  ;;  %v3583_v52 = vsel %vm26821_vm2, %v1374_v18, %v2973_v35  ;;  %v25860_v11 = vld [vmem:[%s26741_s6 + $0x1720] sm:$0xff]   ;;  %v25862_v16 = vld [vmem:[%s26741_s6 + $0x1768] sm:$0xff]   ;;  %v1903_v33 = vrot.slane %v28158_v48, %v26864_v45  ;;  %v25866_v17 = vld [vmem:[%s26741_s6 + $0x1770] sm:$0xff]  }
 0x2f5   : > { %23567 = vmatpush3.bf16.msra.mxu0 %v25840_v23  ;;  %18028 = vmatprep.mubr.bf16.mxu0 %v3584_v50  ;;  %v3585_v0 = vsel %vm26821_vm2, %v1376_v28, %v2979_v54  ;;  %v3588_v2 = vsel %vm26821_vm2, %v1379_v43, %v2988_v57  ;;  %v3590_v41 = vsel %vm26821_vm2, %v1381_v61, %v2994_v26  ;;  %v25856_v23 = vld [vmem:[%s26741_s6 + $0x1718] sm:$0xff]   ;;  %v25863_v62 = vld [vmem:[%s26741_s6 + $0x17e8] sm:$0xff]   ;;  %v25874_v61 = vld [vmem:[%s26741_s6 + $0x1840] sm:$0xff]  }
 0x2f6   : > { %23589 = vmatpush3.bf16.msra.mxu1 %v25841_v39  ;;  %23596 = vmatprep.subr.bf16.mxu0 %v25842_v14  ;;  %v25857_v39 = vld [vmem:[%s26741_s6 + $0x1798] sm:$0xff]   ;;  %v25865_v29 = vld [vmem:[%s26741_s6 + $0x17a8] sm:$0xff]   ;;  %v1911_v35 = vrot.slane %v28158_v48, %v26868_v47  ;;  %v677_v43 = vrot.slane %v28153_v59, %v26864_v45  ;;  %v2604_v44 = vpack.c.bf16 %v1903_v33, %v1903_v33 }
 0x2f7   : > { %23618 = vmatprep.subr.bf16.mxu1 %v25843_v21  ;;  %18068 = vmatprep.mubr.bf16.mxu1 %v3586_v51  ;;  %v25870_v24 = vld [vmem:[%s26741_s6 + $0x1778] sm:$0xff]   ;;  %v685_v48 = vrot.slane %v28153_v59, %v26868_v47  ;;  %v25875_v59 = vld [vmem:[%s26741_s6 + $0x18c0] sm:$0xff]   ;;  %v25879_v26 = vld [vmem:[%s26741_s6 + $0x18c8] sm:$0xff]  }
 0x2f8   : > { %18029 = vmatmul.mubr.bf16.vlgmr.msra.gmra.mrb[88].mxu0 %v3583_v52  ;;  %v2606_v46 = vpack.c.bf16 %v1911_v35, %v1911_v35  ;;  %v25871_v50 = vld [vmem:[%s26741_s6 + $0x17f8] sm:$0xff]   ;;  %v1378_v54 = vpack.c.bf16 %v677_v43, %v677_v43  ;;  %v25899_v35 = vld [vmem:[%s26741_s6 + $0x18f0] sm:$0xff]  }
 0x2f9   : > { %18069 = vmatmul.mubr.bf16.vlgmr.msra.gmra.mrb[88].mxu1 %v3585_v0  ;;  %23597 = vmatpush3.bf16.msra.mxu0 %v25844_v3  ;;  %v25867_v3 = vld [vmem:[%s26741_s6 + $0x17f0] sm:$0xff]   ;;  %v25872_v51 = vld [vmem:[%s26741_s6 + $0x1738] sm:$0xff]  }
 0x2fa   : > { %23619 = vmatpush3.bf16.msra.mxu1 %v25845_v25  ;;  %23598 = vmatprep.subr.bf16.mxu0 %v25846_v60  ;;  %v25869_v25 = vld [vmem:[%s26741_s6 + $0x17b0] sm:$0xff]   ;;  %v25873_v52 = vld [vmem:[%s26741_s6 + $0x17b8] sm:$0xff]   ;;  %v2985_v60 = vshll.u32 %v2604_v44, 16  ;;  %v2991_v57 = vshll.u32 %v2606_v46, 16 }
 0x2fb   : > { %23620 = vmatprep.subr.bf16.mxu1 %v25847_v56  ;;  %18108 = vmatprep.mubr.bf16.mxu0 %v3588_v2  ;;  %v1380_v56 = vpack.c.bf16 %v685_v48, %v685_v48  ;;  %v25878_v2 = vld [vmem:[%s26741_s6 + $0x1848] sm:$0xff]   ;;  %v25902_v43 = vld [vmem:[%s26741_s6 + $0x1878] sm:$0xff]   ;;  %v28277_v48 = vld [vmem:[%s26731_s24 + $0x60] sm:$0xff] }
 0x2fc   : > { %18148 = vmatprep.mubr.bf16.mxu1 %v3590_v41  ;;  %v3587_v0 = vsel %vm26821_vm2, %v1378_v54, %v2985_v60  ;;  %v25882_v41 = vld [vmem:[%s26741_s6 + $0x1850] sm:$0xff]   ;;  %v25903_v44 = vld [vmem:[%s26741_s6 + $0x18f8] sm:$0xff]   ;;  %v697_v46 = vrot.slane %v28277_v48, %v26774_v30  ;;  %v701_v54 = vrot.slane %v28277_v48, %v26786_v36 }
 0x2fd   : > { %23599 = vmatpush3.bf16.msra.mxu0 %v25848_v1  ;;  %v25877_v1 = vld [vmem:[%s26741_s6 + $0x1880] sm:$0xff]  }
 0x2fe   : > { %23621 = vmatpush3.bf16.msra.mxu1 %v25849_v15  ;;  %23600 = vmatprep.subr.bf16.mxu0 %v25850_v4  ;;  %v3589_v15 = vsel %vm26821_vm2, %v1380_v56, %v2991_v57  ;;  %v25880_v4 = vld [vmem:[%s26741_s6 + $0x1808] sm:$0xff]  }
 0x2ff   : > { %23622 = vmatprep.subr.bf16.mxu1 %v25851_v49  ;;  %v25881_v49 = vld [vmem:[%s26741_s6 + $0x1888] sm:$0xff]  }
 0x301   : > { %23601 = vmatpush3.bf16.msra.mxu0 %v25852_v6  ;;  %v25883_v6 = vld [vmem:[%s26741_s6 + $0x18d0] sm:$0xff]  }
 0x302   : > { %23623 = vmatpush3.bf16.msra.mxu1 %v25853_v7  ;;  %23602 = vmatprep.subr.bf16.mxu0 %v25854_v8  ;;  %v25884_v7 = vld [vmem:[%s26741_s6 + $0x1810] sm:$0xff]  }
 0x303   : > { %23624 = vmatprep.subr.bf16.mxu1 %v25855_v20  ;;  %v25885_v8 = vld [vmem:[%s26741_s6 + $0x1890] sm:$0xff]   ;;  %v25886_v20 = vld [vmem:[%s26741_s6 + $0x1858] sm:$0xff]  }
 0x305   : > { %23603 = vmatpush3.bf16.msra.mxu0 %v25856_v23  ;;  %v25887_v23 = vld [vmem:[%s26741_s6 + $0x18d8] sm:$0xff]  }
 0x306   : > { %23625 = vmatpush3.bf16.msra.mxu1 %v25857_v39  ;;  %23604 = vmatprep.subr.bf16.mxu0 %v25858_v9  ;;  %v25888_v39 = vld [vmem:[%s26741_s6 + $0x1818] sm:$0xff]  }
 0x307   : > { %23626 = vmatprep.subr.bf16.mxu1 %v25859_v10  ;;  %v25889_v9 = vld [vmem:[%s26741_s6 + $0x1898] sm:$0xff]   ;;  %v25890_v10 = vld [vmem:[%s26741_s6 + $0x1860] sm:$0xff]  }
 0x309   : > { %23605 = vmatpush3.bf16.msra.mxu0 %v25860_v11  ;;  %v25891_v11 = vld [vmem:[%s26741_s6 + $0x18e0] sm:$0xff]  }
 0x30a   : > { %23627 = vmatpush3.bf16.msra.mxu1 %v25861_v12  ;;  %23606 = vmatprep.subr.bf16.mxu0 %v25862_v16  ;;  %v25892_v12 = vld [vmem:[%s26741_s6 + $0x1820] sm:$0xff]  }
 0x30b   : > { %v23304_v63 = vpop.f32.mrb[64].mxu0  ;;  %23628 = vmatprep.subr.bf16.mxu1 %v25863_v62  ;;  %v25894_v62 = vld [vmem:[%s26741_s6 + $0x1868] sm:$0xff]  }
 0x30c   : > { %v23326_v53 = vpop.f32.mrb[64].mxu1  ;;  %v23305_v14 = vpop.f32.mrb[65].mxu0 }
 0x30d   : > { %v23306_v18 = vadd.f32 %v23305_v14, %v23304_v63  ;;  %v23327_v13 = vpop.f32.mrb[65].mxu1  ;;  %v23307_v21 = vpop.f32.mrb[66].mxu0  ;;  %23607 = vmatpush3.bf16.msra.mxu0 %v25864_v19  ;;  %v25893_v63 = vld [vmem:[%s26741_s6 + $0x18a0] sm:$0xff]  }
 0x30e   : > { %v23328_v42 = vadd.f32 %v23327_v13, %v23326_v53  ;;  %v23329_v22 = vpop.f32.mrb[66].mxu1  ;;  %v23308_v27 = vpop.f32.mrb[67].mxu0  ;;  %23629 = vmatpush3.bf16.msra.mxu1 %v25865_v29  ;;  %23608 = vmatprep.subr.bf16.mxu0 %v25866_v17 }
 0x30f   : > { %v17551_v28 = vadd.f32 %v23306_v18, %v28144_v5  ;;  %v23330_v31 = vpop.f32.mrb[67].mxu1  ;;  %v25868_v5 = vld [vmem:[%s26741_s6 + $0x1730] sm:$0xff]   ;;  %23630 = vmatprep.subr.bf16.mxu1 %v25867_v3  ;;  %v25895_v18 = vld [vmem:[%s26741_s6 + $0x18e8] sm:$0xff]  }
 0x310   : > { %v25898_v31 = vld [vmem:[%s26741_s6 + $0x1870] sm:$0xff]  }
 0x311   : > { %v28224_v37 = vadd.f32 %v23328_v42, %v17551_v28  ;;  %23609 = vmatpush3.bf16.msra.mxu0 %v25868_v5  ;;  %v25896_v42 = vld [vmem:[%s26741_s6 + $0x1828] sm:$0xff]   ;;  %v25900_v5 = vld [vmem:[%s26741_s6 + $0x1830] sm:$0xff]  }
 0x312   : > { %23631 = vmatpush3.bf16.msra.mxu1 %v25869_v25  ;;  %23610 = vmatprep.subr.bf16.mxu0 %v25870_v24  ;;  %v25897_v28 = vld [vmem:[%s26741_s6 + $0x18a8] sm:$0xff]   ;;  %v25901_v25 = vld [vmem:[%s26741_s6 + $0x18b0] sm:$0xff]   ;;  %v25905_v24 = vld [vmem:[%s26741_s6 + $0x18b8] sm:$0xff]  }
 0x313   : > { %23632 = vmatprep.subr.bf16.mxu1 %v25871_v50  ;;  %v28282_v50 = vld [vmem:[%s26736_s27 + $0x60] sm:$0xff] }
 0x314   : > { %v1923_v60 = vrot.slane %v28282_v50, %v26774_v30  ;;  %v1931_v56 = vrot.slane %v28282_v50, %v26778_v32  ;;  %v1919_v57 = vrot.slane %v28282_v50, %v26782_v34 }
 0x315   : > { %23611 = vmatpush3.bf16.msra.mxu0 %v25872_v51  ;;  %v705_v51 = vrot.slane %v28277_v48, %v26778_v32 }
 0x316   : > { %23633 = vmatpush3.bf16.msra.mxu1 %v25873_v52  ;;  %23640 = vmatprep.subr.bf16.mxu0 %v25874_v61  ;;  %v693_v52 = vrot.slane %v28277_v48, %v26782_v34  ;;  %v25906_v61 = vld [vmem:[%s26741_s6 + $0x1940] sm:$0xff]  }
 0x317   : > { %23662 = vmatprep.subr.bf16.mxu1 %v25875_v59  ;;  %v1383_v59 = vpack.c.bf16 %v697_v46, %v697_v46  ;;  %v25922_v46 = vld [vmem:[%s26741_s6 + $0x1960] sm:$0xff]  }
 0x318   : > { %18109 = vmatmul.mubr.bf16.vlgmr.msra.gmra.mrb[92].mxu0 %v3587_v0  ;;  %v1382_v0 = vpack.c.bf16 %v693_v52, %v693_v52  ;;  %v25924_v52 = vld [vmem:[%s26741_s6 + $0x1920] sm:$0xff]  }
 0x319   : > { %18149 = vmatmul.mubr.bf16.vlgmr.msra.gmra.mrb[92].mxu1 %v3589_v15  ;;  %23641 = vmatpush3.bf16.msra.mxu0 %v25876_v58  ;;  %v1385_v58 = vpack.c.bf16 %v705_v51, %v705_v51  ;;  %v25907_v15 = vld [vmem:[%s26741_s6 + $0x19c0] sm:$0xff]  }
 0x31a   : > { %23663 = vmatpush3.bf16.msra.mxu1 %v25877_v1  ;;  %23642 = vmatprep.subr.bf16.mxu0 %v25878_v2  ;;  %v1384_v1 = vpack.c.bf16 %v701_v54, %v701_v54  ;;  %v2609_v2 = vpack.c.bf16 %v1923_v60, %v1923_v60  ;;  %v25923_v51 = vld [vmem:[%s26741_s6 + $0x19e0] sm:$0xff]  }
 0x31b   : > { %23664 = vmatprep.subr.bf16.mxu1 %v25879_v26  ;;  %v2611_v26 = vpack.c.bf16 %v1931_v56, %v1931_v56  ;;  %v25925_v60 = vld [vmem:[%s26741_s6 + $0x19a0] sm:$0xff]  }
 0x31d   : > { %23643 = vmatpush3.bf16.msra.mxu0 %v25880_v4  ;;  %v2608_v4 = vpack.c.bf16 %v1919_v57, %v1919_v57 }
 0x31e   : > { %23665 = vmatpush3.bf16.msra.mxu1 %v25881_v49  ;;  %23644 = vmatprep.subr.bf16.mxu0 %v25882_v41  ;;  %v1927_v49 = vrot.slane %v28282_v50, %v26786_v36  ;;  %v713_v41 = vrot.slane %v28277_v48, %v26790_v38 }
 0x31f   : > { %23666 = vmatprep.subr.bf16.mxu1 %v25883_v6  ;;  %v1939_v6 = vrot.slane %v28282_v50, %v26790_v38 }
 0x321   : > { %23645 = vmatpush3.bf16.msra.mxu0 %v25884_v7  ;;  %v721_v7 = vrot.slane %v28277_v48, %v26794_v40 }
 0x322   : > { %23667 = vmatpush3.bf16.msra.mxu1 %v25885_v8  ;;  %23646 = vmatprep.subr.bf16.mxu0 %v25886_v20  ;;  %v1947_v8 = vrot.slane %v28282_v50, %v26794_v40  ;;  %v3000_v20 = vshll.u32 %v2609_v2, 16 }
 0x323   : > { %23668 = vmatprep.subr.bf16.mxu1 %v25887_v23  ;;  %v3006_v23 = vshll.u32 %v2611_v26, 16 }
 0x325   : > { %23647 = vmatpush3.bf16.msra.mxu0 %v25888_v39  ;;  %v2997_v39 = vshll.u32 %v2608_v4, 16 }
 0x326   : > { %23669 = vmatpush3.bf16.msra.mxu1 %v25889_v9  ;;  %23648 = vmatprep.subr.bf16.mxu0 %v25890_v10  ;;  %v2610_v9 = vpack.c.bf16 %v1927_v49, %v1927_v49  ;;  %v25908_v10 = vld [vmem:[%s26741_s6 + $0x1900] sm:$0xff]  }
 0x327   : > { %23670 = vmatprep.subr.bf16.mxu1 %v25891_v11  ;;  %v25909_v11 = vld [vmem:[%s26741_s6 + $0x1980] sm:$0xff]  }
 0x329   : > { %23649 = vmatpush3.bf16.msra.mxu0 %v25892_v12  ;;  %v1387_v12 = vpack.c.bf16 %v713_v41, %v713_v41  ;;  %v25929_v41 = vld [vmem:[%s26741_s6 + $0x19a8] sm:$0xff]  }
 0x32a   : > { %23671 = vmatpush3.bf16.msra.mxu1 %v25893_v63  ;;  %23650 = vmatprep.subr.bf16.mxu0 %v25894_v62  ;;  %v2613_v63 = vpack.c.bf16 %v1939_v6, %v1939_v6  ;;  %v3594_v62 = vsel %vm26821_vm2, %v1385_v58, %v3006_v23  ;;  %v25927_v58 = vld [vmem:[%s26741_s6 + $0x19e8] sm:$0xff]   ;;  %v25931_v23 = vld [vmem:[%s26741_s6 + $0x19f0] sm:$0xff]  }
 0x32b   : > { %v23348_v53 = vpop.f32.mrb[68].mxu0  ;;  %23672 = vmatprep.subr.bf16.mxu1 %v25895_v18  ;;  %v3591_v18 = vsel %vm26821_vm2, %v1382_v0, %v2997_v39  ;;  %18228 = vmatprep.mubr.bf16.mxu1 %v3594_v62  ;;  %v25932_v39 = vld [vmem:[%s26741_s6 + $0x1930] sm:$0xff]  }
 0x32c   : > { %v23370_v14 = vpop.f32.mrb[68].mxu1  ;;  %v23349_v16 = vpop.f32.mrb[69].mxu0 }
 0x32d   : > { %v23350_v13 = vadd.f32 %v23349_v16, %v23348_v53  ;;  %v23371_v21 = vpop.f32.mrb[69].mxu1  ;;  %v23351_v19 = vpop.f32.mrb[70].mxu0  ;;  %23651 = vmatpush3.bf16.msra.mxu0 %v25896_v42  ;;  %v1389_v53 = vpack.c.bf16 %v721_v7, %v721_v7  ;;  %v3592_v16 = vsel %vm26821_vm2, %v1383_v59, %v3000_v20  ;;  %v3012_v42 = vshll.u32 %v2613_v63, 16  ;;  %v25926_v59 = vld [vmem:[%s26741_s6 + $0x1968] sm:$0xff]   ;;  %v25930_v7 = vld [vmem:[%s26741_s6 + $0x1970] sm:$0xff]   ;;  %v25935_v63 = vld [vmem:[%s26741_s6 + $0x19f8] sm:$0xff]  }
 0x32e   : > { %v23372_v22 = vadd.f32 %v23371_v21, %v23370_v14  ;;  %v23373_v27 = vpop.f32.mrb[70].mxu1  ;;  %v23352_v29 = vpop.f32.mrb[71].mxu0  ;;  %23673 = vmatpush3.bf16.msra.mxu1 %v25897_v28  ;;  %23652 = vmatprep.subr.bf16.mxu0 %v25898_v31  ;;  %v2615_v14 = vpack.c.bf16 %v1947_v8, %v1947_v8  ;;  %v25910_v21 = vld [vmem:[%s26741_s6 + $0x1948] sm:$0xff]   ;;  %v1935_v8 = vrot.slane %v28282_v50, %v26864_v45 }
 0x32f   : > { %v17631_v33 = vadd.f32 %v23350_v13, %v28224_v37  ;;  %v23374_v17 = vpop.f32.mrb[71].mxu1  ;;  %23674 = vmatprep.subr.bf16.mxu1 %v25899_v35  ;;  %v25904_v37 = vld [vmem:[%s26741_s6 + $0x1838] sm:$0xff]   ;;  %v3003_v13 = vshll.u32 %v2610_v9, 16  ;;  %18188 = vmatprep.mubr.bf16.mxu0 %v3592_v16  ;;  %v25911_v19 = vld [vmem:[%s26741_s6 + $0x19c8] sm:$0xff]   ;;  %v3596_v31 = vsel %vm26821_vm2, %v1387_v12, %v3012_v42  ;;  %v25915_v35 = vld [vmem:[%s26741_s6 + $0x19d0] sm:$0xff]  }
 0x330   : > { %v25912_v27 = vld [vmem:[%s26741_s6 + $0x1908] sm:$0xff]   ;;  %v3018_v28 = vshll.u32 %v2615_v14, 16  ;;  %v25933_v9 = vld [vmem:[%s26741_s6 + $0x19b0] sm:$0xff]   ;;  %v2612_v12 = vpack.c.bf16 %v1935_v8, %v1935_v8  ;;  %v25936_v14 = vld [vmem:[%s26741_s6 + $0x1938] sm:$0xff]  }
 0x331   : > { %v28268_v3 = vadd.f32 %v23372_v22, %v17631_v33  ;;  %23653 = vmatpush3.bf16.msra.mxu0 %v25900_v5  ;;  %v3593_v22 = vsel %vm26821_vm2, %v1384_v1, %v3003_v13  ;;  %v25913_v29 = vld [vmem:[%s26741_s6 + $0x1988] sm:$0xff]   ;;  %v25914_v33 = vld [vmem:[%s26741_s6 + $0x1950] sm:$0xff]   ;;  %v25937_v16 = vld [vmem:[%s26741_s6 + $0x19b8] sm:$0xff]  }
 0x332   : > { %23675 = vmatpush3.bf16.msra.mxu1 %v25901_v25  ;;  %23654 = vmatprep.subr.bf16.mxu0 %v25902_v43  ;;  %v3598_v17 = vsel %vm26821_vm2, %v1389_v53, %v3018_v28  ;;  %v25916_v5 = vld [vmem:[%s26741_s6 + $0x1910] sm:$0xff]   ;;  %v25918_v43 = vld [vmem:[%s26741_s6 + $0x1958] sm:$0xff]   ;;  %v717_v53 = vrot.slane %v28277_v48, %v26868_v47  ;;  %v25938_v13 = vld [vmem:[%s26741_s6 + $0x1a40] sm:$0xff]  }
 0x333   : > { %23676 = vmatprep.subr.bf16.mxu1 %v25903_v44  ;;  %v25917_v25 = vld [vmem:[%s26741_s6 + $0x1990] sm:$0xff]   ;;  %v25919_v44 = vld [vmem:[%s26741_s6 + $0x19d8] sm:$0xff]   ;;  %v25939_v42 = vld [vmem:[%s26741_s6 + $0x1ac0] sm:$0xff]  }
 0x334   : > { %v25942_v28 = vld [vmem:[%s26741_s6 + $0x1a48] sm:$0xff]   ;;  %v25962_v8 = vld [vmem:[%s26741_s6 + $0x1a70] sm:$0xff]  }
 0x335   : > { %23655 = vmatpush3.bf16.msra.mxu0 %v25904_v37  ;;  %v25920_v37 = vld [vmem:[%s26741_s6 + $0x1918] sm:$0xff]  }
 0x336   : > { %23677 = vmatpush3.bf16.msra.mxu1 %v25905_v24  ;;  %23684 = vmatprep.subr.bf16.mxu0 %v25906_v61  ;;  %v25921_v24 = vld [vmem:[%s26741_s6 + $0x1998] sm:$0xff]  }
 0x337   : > { %23706 = vmatprep.subr.bf16.mxu1 %v25907_v15  ;;  %v25928_v15 = vld [vmem:[%s26741_s6 + $0x1928] sm:$0xff]  }
 0x338   : > { %18189 = vmatmul.mubr.bf16.vlgmr.msra.gmra.mrb[96].mxu0 %v3591_v18  ;;  %v3009_v18 = vshll.u32 %v2612_v12, 16  ;;  %v28400_v12 = vld [vmem:[%s26731_s24 + $0x68] sm:$0xff] }
 0x339   : > { %18229 = vmatmul.mubr.bf16.vlgmr.msra.gmra.mrb[96].mxu1 %v3593_v22  ;;  %23685 = vmatpush3.bf16.msra.mxu0 %v25908_v10  ;;  %v25934_v10 = vld [vmem:[%s26741_s6 + $0x1978] sm:$0xff]   ;;  %v25941_v22 = vld [vmem:[%s26741_s6 + $0x1a80] sm:$0xff]  }
 0x33a   : > { %23707 = vmatpush3.bf16.msra.mxu1 %v25909_v11  ;;  %23686 = vmatprep.subr.bf16.mxu0 %v25910_v21  ;;  %v709_v11 = vrot.slane %v28277_v48, %v26864_v45  ;;  %v1388_v21 = vpack.c.bf16 %v717_v53, %v717_v53  ;;  %v25940_v48 = vld [vmem:[%s26741_s6 + $0x1a00] sm:$0xff]   ;;  %v25969_v53 = vld [vmem:[%s26741_s6 + $0x1ab8] sm:$0xff]  }
 0x33b   : > { %23708 = vmatprep.subr.bf16.mxu1 %v25911_v19  ;;  %18268 = vmatprep.mubr.bf16.mxu0 %v3596_v31  ;;  %v25943_v31 = vld [vmem:[%s26741_s6 + $0x1ac8] sm:$0xff]  }
 0x33c   : > { %18308 = vmatprep.mubr.bf16.mxu1 %v3598_v17  ;;  %v1386_v62 = vpack.c.bf16 %v709_v11, %v709_v11  ;;  %v25945_v17 = vld [vmem:[%s26741_s6 + $0x1a88] sm:$0xff]   ;;  %v25968_v11 = vld [vmem:[%s26741_s6 + $0x1a38] sm:$0xff]  }
 0x33d   : > { %23687 = vmatpush3.bf16.msra.mxu0 %v25912_v27 }
 0x33e   : > { %23709 = vmatpush3.bf16.msra.mxu1 %v25913_v29  ;;  %23688 = vmatprep.subr.bf16.mxu0 %v25914_v33  ;;  %v3595_v27 = vsel %vm26821_vm2, %v1386_v62, %v3009_v18  ;;  %v25944_v33 = vld [vmem:[%s26741_s6 + $0x1a08] sm:$0xff]   ;;  %v725_v18 = vrot.slane %v28400_v12, %v26782_v34 }
 0x33f   : > { %23710 = vmatprep.subr.bf16.mxu1 %v25915_v35  ;;  %v25946_v35 = vld [vmem:[%s26741_s6 + $0x1a50] sm:$0xff]  }
 0x341   : > { %23689 = vmatpush3.bf16.msra.mxu0 %v25916_v5  ;;  %v25947_v5 = vld [vmem:[%s26741_s6 + $0x1ad0] sm:$0xff]  }
 0x342   : > { %23711 = vmatpush3.bf16.msra.mxu1 %v25917_v25  ;;  %23690 = vmatprep.subr.bf16.mxu0 %v25918_v43  ;;  %v25948_v25 = vld [vmem:[%s26741_s6 + $0x1a10] sm:$0xff]  }
 0x343   : > { %23712 = vmatprep.subr.bf16.mxu1 %v25919_v44  ;;  %v25949_v43 = vld [vmem:[%s26741_s6 + $0x1a90] sm:$0xff]   ;;  %v25950_v44 = vld [vmem:[%s26741_s6 + $0x1a58] sm:$0xff]  }
 0x345   : > { %23691 = vmatpush3.bf16.msra.mxu0 %v25920_v37  ;;  %v25951_v37 = vld [vmem:[%s26741_s6 + $0x1ad8] sm:$0xff]  }
 0x346   : > { %23713 = vmatpush3.bf16.msra.mxu1 %v25921_v24  ;;  %23692 = vmatprep.subr.bf16.mxu0 %v25922_v46  ;;  %v25952_v24 = vld [vmem:[%s26741_s6 + $0x1a18] sm:$0xff]  }
 0x347   : > { %23714 = vmatprep.subr.bf16.mxu1 %v25923_v51  ;;  %v25953_v46 = vld [vmem:[%s26741_s6 + $0x1a98] sm:$0xff]   ;;  %v25954_v51 = vld [vmem:[%s26741_s6 + $0x1a60] sm:$0xff]  }
 0x349   : > { %23693 = vmatpush3.bf16.msra.mxu0 %v25924_v52  ;;  %v25955_v52 = vld [vmem:[%s26741_s6 + $0x1ae0] sm:$0xff]  }
 0x34a   : > { %23715 = vmatpush3.bf16.msra.mxu1 %v25925_v60  ;;  %23694 = vmatprep.subr.bf16.mxu0 %v25926_v59  ;;  %v25957_v60 = vld [vmem:[%s26741_s6 + $0x1aa0] sm:$0xff]  }
 0x34b   : > { %v23392_v54 = vpop.f32.mrb[72].mxu0  ;;  %23716 = vmatprep.subr.bf16.mxu1 %v25927_v58 }
 0x34c   : > { %v23393_v56 = vpop.f32.mrb[73].mxu0  ;;  %v23414_v57 = vpop.f32.mrb[72].mxu1 }
 0x34d   : > { %v23394_v61 = vadd.f32 %v23393_v56, %v23392_v54  ;;  %v23395_v0 = vpop.f32.mrb[74].mxu0  ;;  %v23415_v1 = vpop.f32.mrb[73].mxu1  ;;  %23695 = vmatpush3.bf16.msra.mxu0 %v25928_v15  ;;  %v25956_v54 = vld [vmem:[%s26741_s6 + $0x1a20] sm:$0xff]   ;;  %v25959_v15 = vld [vmem:[%s26741_s6 + $0x1ae8] sm:$0xff]  }
 0x34e   : > { %v23396_v2 = vpop.f32.mrb[75].mxu0  ;;  %v23416_v4 = vadd.f32 %v23415_v1, %v23414_v57  ;;  %v23417_v49 = vpop.f32.mrb[74].mxu1  ;;  %23717 = vmatpush3.bf16.msra.mxu1 %v25929_v41  ;;  %23696 = vmatprep.subr.bf16.mxu0 %v25930_v7  ;;  %v25961_v41 = vld [vmem:[%s26741_s6 + $0x1aa8] sm:$0xff]  }
 0x34f   : > { %v17711_v26 = vadd.f32 %v23394_v61, %v28268_v3  ;;  %v23418_v6 = vpop.f32.mrb[75].mxu1  ;;  %v1943_v3 = vrot.slane %v28282_v50, %v26868_v47  ;;  %23718 = vmatprep.subr.bf16.mxu1 %v25931_v23  ;;  %v25958_v61 = vld [vmem:[%s26741_s6 + $0x1a68] sm:$0xff]  }
 0x350   : > { %v25960_v49 = vld [vmem:[%s26741_s6 + $0x1a28] sm:$0xff]  }
 0x351   : > { %v28346_v20 = vadd.f32 %v23416_v4, %v17711_v26  ;;  %v2614_v50 = vpack.c.bf16 %v1943_v3, %v1943_v3  ;;  %23697 = vmatpush3.bf16.msra.mxu0 %v25932_v39  ;;  %v25964_v3 = vld [vmem:[%s26741_s6 + $0x1a30] sm:$0xff]  }
 0x352   : > { %23719 = vmatpush3.bf16.msra.mxu1 %v25933_v9  ;;  %23698 = vmatprep.subr.bf16.mxu0 %v25934_v10  ;;  %v25965_v39 = vld [vmem:[%s26741_s6 + $0x1ab0] sm:$0xff]   ;;  %v25966_v9 = vld [vmem:[%s26741_s6 + $0x1a78] sm:$0xff]  }
 0x353   : > { %v3015_v19 = vshll.u32 %v2614_v50, 16  ;;  %23720 = vmatprep.subr.bf16.mxu1 %v25935_v63  ;;  %v25967_v10 = vld [vmem:[%s26741_s6 + $0x1af8] sm:$0xff]   ;;  %v28403_v63 = vld [vmem:[%s26736_s27 + $0x68] sm:$0xff]  ;;  %v729_v50 = vrot.slane %v28400_v12, %v26774_v30 }
 0x354   : > { %v1963_v62 = vrot.slane %v28403_v63, %v26778_v32 }
 0x355   : > { %23699 = vmatpush3.bf16.msra.mxu0 %v25936_v14  ;;  %v3597_v29 = vsel %vm26821_vm2, %v1388_v21, %v3015_v19  ;;  %v1955_v14 = vrot.slane %v28403_v63, %v26774_v30  ;;  %v733_v21 = vrot.slane %v28400_v12, %v26786_v36  ;;  %v25970_v19 = vld [vmem:[%s26741_s6 + $0x1b40] sm:$0xff]  }
 0x356   : > { %23721 = vmatpush3.bf16.msra.mxu1 %v25937_v16  ;;  %23728 = vmatprep.subr.bf16.mxu0 %v25938_v13  ;;  %v737_v16 = vrot.slane %v28400_v12, %v26778_v32  ;;  %v1951_v13 = vrot.slane %v28403_v63, %v26782_v34 }
 0x357   : > { %23750 = vmatprep.subr.bf16.mxu1 %v25939_v42  ;;  %v1391_v42 = vpack.c.bf16 %v729_v50, %v729_v50  ;;  %v25985_v50 = vld [vmem:[%s26741_s6 + $0x1b98] sm:$0xff]  }
 0x358   : > { %18269 = vmatmul.mubr.bf16.vlgmr.msra.gmra.mrb[100].mxu0 %v3595_v27  ;;  %v2619_v27 = vpack.c.bf16 %v1963_v62, %v1963_v62  ;;  %v25989_v62 = vld [vmem:[%s26741_s6 + $0x1ba0] sm:$0xff]  }
 0x359   : > { %18309 = vmatmul.mubr.bf16.vlgmr.msra.gmra.mrb[100].mxu1 %v3597_v29  ;;  %23729 = vmatpush3.bf16.msra.mxu0 %v25940_v48  ;;  %v2617_v48 = vpack.c.bf16 %v1955_v14, %v1955_v14  ;;  %v1390_v29 = vpack.c.bf16 %v725_v18, %v725_v18  ;;  %v25987_v14 = vld [vmem:[%s26741_s6 + $0x1be0] sm:$0xff]  }
 0x35a   : > { %23751 = vmatpush3.bf16.msra.mxu1 %v25941_v22  ;;  %23730 = vmatprep.subr.bf16.mxu0 %v25942_v28  ;;  %v1393_v22 = vpack.c.bf16 %v737_v16, %v737_v16  ;;  %v25971_v28 = vld [vmem:[%s26741_s6 + $0x1bc0] sm:$0xff]  }
 0x35b   : > { %23752 = vmatprep.subr.bf16.mxu1 %v25943_v31  ;;  %v2616_v31 = vpack.c.bf16 %v1951_v13, %v1951_v13  ;;  %v25988_v16 = vld [vmem:[%s26741_s6 + $0x1b20] sm:$0xff]  }
 0x35d   : > { %23731 = vmatpush3.bf16.msra.mxu0 %v25944_v33  ;;  %v1392_v33 = vpack.c.bf16 %v733_v21, %v733_v21  ;;  %v25990_v21 = vld [vmem:[%s26741_s6 + $0x1b68] sm:$0xff]  }
 0x35e   : > { %23753 = vmatpush3.bf16.msra.mxu1 %v25945_v17  ;;  %23732 = vmatprep.subr.bf16.mxu0 %v25946_v35  ;;  %v1959_v17 = vrot.slane %v28403_v63, %v26786_v36  ;;  %v3024_v35 = vshll.u32 %v2617_v48, 16 }
 0x35f   : > { %23754 = vmatprep.subr.bf16.mxu1 %v25947_v5  ;;  %v3030_v5 = vshll.u32 %v2619_v27, 16  ;;  %v25991_v27 = vld [vmem:[%s26741_s6 + $0x1be8] sm:$0xff]  }
 0x361   : > { %23733 = vmatpush3.bf16.msra.mxu0 %v25948_v25  ;;  %v745_v25 = vrot.slane %v28400_v12, %v26790_v38 }
 0x362   : > { %23755 = vmatpush3.bf16.msra.mxu1 %v25949_v43  ;;  %23734 = vmatprep.subr.bf16.mxu0 %v25950_v44  ;;  %v1971_v43 = vrot.slane %v28403_v63, %v26790_v38  ;;  %v3021_v44 = vshll.u32 %v2616_v31, 16  ;;  %v25992_v31 = vld [vmem:[%s26741_s6 + $0x1b28] sm:$0xff]  }
 0x363   : > { %23756 = vmatprep.subr.bf16.mxu1 %v25951_v37  ;;  %v2618_v37 = vpack.c.bf16 %v1959_v17, %v1959_v17 }
 0x365   : > { %23735 = vmatpush3.bf16.msra.mxu0 %v25952_v24  ;;  %v25972_v24 = vld [vmem:[%s26741_s6 + $0x1b00] sm:$0xff]  }
 0x366   : > { %23757 = vmatpush3.bf16.msra.mxu1 %v25953_v46  ;;  %23736 = vmatprep.subr.bf16.mxu0 %v25954_v51  ;;  %v753_v46 = vrot.slane %v28400_v12, %v26794_v40  ;;  %v1979_v51 = vrot.slane %v28403_v63, %v26794_v40 }
 0x367   : > { %23758 = vmatprep.subr.bf16.mxu1 %v25955_v52  ;;  %v3600_v52 = vsel %vm26821_vm2, %v1391_v42, %v3024_v35 }
 0x368   : > { %18348 = vmatprep.mubr.bf16.mxu0 %v3600_v52 }
 0x369   : > { %23737 = vmatpush3.bf16.msra.mxu0 %v25956_v54  ;;  %v3602_v54 = vsel %vm26821_vm2, %v1393_v22, %v3030_v5  ;;  %v1967_v5 = vrot.slane %v28403_v63, %v26864_v45 }
 0x36a   : > { %23759 = vmatpush3.bf16.msra.mxu1 %v25957_v60  ;;  %23738 = vmatprep.subr.bf16.mxu0 %v25958_v61  ;;  %v25974_v60 = vld [vmem:[%s26741_s6 + $0x1b48] sm:$0xff]   ;;  %v3599_v61 = vsel %vm26821_vm2, %v1390_v29, %v3021_v44  ;;  %v25995_v44 = vld [vmem:[%s26741_s6 + $0x1bf0] sm:$0xff]  }
 0x36b   : > { %v23436_v56 = vpop.f32.mrb[76].mxu0  ;;  %23760 = vmatprep.subr.bf16.mxu1 %v25959_v15  ;;  %18388 = vmatprep.mubr.bf16.mxu1 %v3602_v54  ;;  %v25975_v15 = vld [vmem:[%s26741_s6 + $0x1bc8] sm:$0xff]   ;;  %v2620_v52 = vpack.c.bf16 %v1967_v5, %v1967_v5  ;;  %v25998_v54 = vld [vmem:[%s26741_s6 + $0x1b78] sm:$0xff]  }
 0x36c   : > { %v23437_v57 = vpop.f32.mrb[77].mxu0  ;;  %v23458_v59 = vpop.f32.mrb[76].mxu1 }
 0x36d   : > { %v23438_v58 = vadd.f32 %v23437_v57, %v23436_v56  ;;  %v23439_v0 = vpop.f32.mrb[78].mxu0  ;;  %v23459_v1 = vpop.f32.mrb[77].mxu1  ;;  %23739 = vmatpush3.bf16.msra.mxu0 %v25960_v49  ;;  %v1395_v56 = vpack.c.bf16 %v745_v25, %v745_v25  ;;  %v2621_v57 = vpack.c.bf16 %v1971_v43, %v1971_v43  ;;  %v25994_v43 = vld [vmem:[%s26741_s6 + $0x1b70] sm:$0xff]  }
 0x36e   : > { %v23460_v26 = vadd.f32 %v23459_v1, %v23458_v59  ;;  %v23461_v4 = vpop.f32.mrb[78].mxu1  ;;  %v23440_v6 = vpop.f32.mrb[79].mxu0  ;;  %23761 = vmatpush3.bf16.msra.mxu1 %v25961_v41  ;;  %23740 = vmatprep.subr.bf16.mxu0 %v25962_v8  ;;  %v3027_v59 = vshll.u32 %v2618_v37, 16  ;;  %v1397_v0 = vpack.c.bf16 %v753_v46, %v753_v46  ;;  %v2623_v1 = vpack.c.bf16 %v1979_v51, %v1979_v51  ;;  %v25978_v41 = vld [vmem:[%s26741_s6 + $0x1b50] sm:$0xff]  }
 0x36f   : > { %v17791_v2 = vadd.f32 %v23438_v58, %v28346_v20  ;;  %v23462_v7 = vpop.f32.mrb[79].mxu1  ;;  %v25963_v20 = vld [vmem:[%s26741_s6 + $0x1af0] sm:$0xff]   ;;  %v25973_v58 = vld [vmem:[%s26741_s6 + $0x1b80] sm:$0xff]   ;;  %v25976_v4 = vld [vmem:[%s26741_s6 + $0x1b08] sm:$0xff]   ;;  %v1975_v37 = vrot.slane %v28403_v63, %v26868_v47  ;;  %v749_v63 = vrot.slane %v28400_v12, %v26868_v47 }
 0x370   : > { %23762 = vmatprep.subr.bf16.mxu1 %v25963_v20  ;;  %v3042_v49 = vshll.u32 %v2623_v1, 16  ;;  %v25977_v7 = vld [vmem:[%s26741_s6 + $0x1b88] sm:$0xff]   ;;  %v25979_v20 = vld [vmem:[%s26741_s6 + $0x1bd0] sm:$0xff]  }
 0x371   : > { %v28391_v23 = vadd.f32 %v23460_v26, %v17791_v2  ;;  %23741 = vmatpush3.bf16.msra.mxu0 %v25964_v3  ;;  %v3036_v2 = vshll.u32 %v2621_v57, 16  ;;  %v3601_v26 = vsel %vm26821_vm2, %v1392_v33, %v3027_v59  ;;  %v25980_v3 = vld [vmem:[%s26741_s6 + $0x1b10] sm:$0xff]   ;;  %v25993_v33 = vld [vmem:[%s26741_s6 + $0x1ba8] sm:$0xff]   ;;  %v26000_v57 = vld [vmem:[%s26741_s6 + $0x1b38] sm:$0xff]   ;;  %v1396_v1 = vpack.c.bf16 %v749_v63, %v749_v63 }
 0x372   : > { %23763 = vmatpush3.bf16.msra.mxu1 %v25965_v39  ;;  %23742 = vmatprep.subr.bf16.mxu0 %v25966_v9  ;;  %v3606_v8 = vsel %vm26821_vm2, %v1397_v0, %v3042_v49  ;;  %v25982_v39 = vld [vmem:[%s26741_s6 + $0x1b58] sm:$0xff]   ;;  %v25981_v9 = vld [vmem:[%s26741_s6 + $0x1b90] sm:$0xff]   ;;  %v26002_v0 = vld [vmem:[%s26741_s6 + $0x1c40] sm:$0xff]  }
 0x373   : > { %23764 = vmatprep.subr.bf16.mxu1 %v25967_v10  ;;  %v3604_v6 = vsel %vm26821_vm2, %v1395_v56, %v3036_v2  ;;  %v25983_v10 = vld [vmem:[%s26741_s6 + $0x1bd8] sm:$0xff]   ;;  %v25996_v46 = vld [vmem:[%s26741_s6 + $0x1b30] sm:$0xff]   ;;  %v2622_v56 = vpack.c.bf16 %v1975_v37, %v1975_v37  ;;  %v26003_v2 = vld [vmem:[%s26741_s6 + $0x1cc0] sm:$0xff]  }
 0x374   : > { %v25997_v51 = vld [vmem:[%s26741_s6 + $0x1bb0] sm:$0xff]   ;;  %v26006_v49 = vld [vmem:[%s26741_s6 + $0x1c48] sm:$0xff]  }
 0x375   : > { %23743 = vmatpush3.bf16.msra.mxu0 %v25968_v11  ;;  %v25984_v11 = vld [vmem:[%s26741_s6 + $0x1b18] sm:$0xff]  }
 0x376   : > { %23765 = vmatpush3.bf16.msra.mxu1 %v25969_v53  ;;  %23772 = vmatprep.subr.bf16.mxu0 %v25970_v19  ;;  %v25986_v53 = vld [vmem:[%s26741_s6 + $0x1b60] sm:$0xff]  }
 0x377   : > { %23794 = vmatprep.subr.bf16.mxu1 %v25971_v28 }
 0x378   : > { %18349 = vmatmul.mubr.bf16.vlgmr.msra.gmra.mrb[104].mxu0 %v3599_v61  ;;  %v26001_v61 = vld [vmem:[%s26741_s6 + $0x1bb8] sm:$0xff]  }
 0x379   : > { %23773 = vmatpush3.bf16.msra.mxu0 %v25972_v24  ;;  %18389 = vmatmul.mubr.bf16.vlgmr.msra.gmra.mrb[104].mxu1 %v3601_v26 }
 0x37a   : > { %23774 = vmatprep.subr.bf16.mxu0 %v25974_v60  ;;  %23795 = vmatpush3.bf16.msra.mxu1 %v25973_v58  ;;  %v25999_v60 = vld [vmem:[%s26741_s6 + $0x1bf8] sm:$0xff]   ;;  %v3033_v58 = vshll.u32 %v2620_v52, 16 }
 0x37b   : > { %18428 = vmatprep.mubr.bf16.mxu0 %v3604_v6  ;;  %23796 = vmatprep.subr.bf16.mxu1 %v25975_v15  ;;  %v3039_v15 = vshll.u32 %v2622_v56, 16  ;;  %v26007_v6 = vld [vmem:[%s26741_s6 + $0x1cc8] sm:$0xff]   ;;  %v26031_v52 = vld [vmem:[%s26741_s6 + $0x1cf8] sm:$0xff]   ;;  %v28530_v56 = vld [vmem:[%s26736_s27 + $0x70] sm:$0xff] }
 0x37c   : > { %18468 = vmatprep.mubr.bf16.mxu1 %v3606_v8  ;;  %v26009_v8 = vld [vmem:[%s26741_s6 + $0x1c88] sm:$0xff]  }
 0x37d   : > { %23775 = vmatpush3.bf16.msra.mxu0 %v25976_v4  ;;  %v26005_v4 = vld [vmem:[%s26741_s6 + $0x1c80] sm:$0xff]  }
 0x37e   : > { %23776 = vmatprep.subr.bf16.mxu0 %v25978_v41  ;;  %23797 = vmatpush3.bf16.msra.mxu1 %v25977_v7  ;;  %v3605_v41 = vsel %vm26821_vm2, %v1396_v1, %v3039_v15  ;;  %v26008_v7 = vld [vmem:[%s26741_s6 + $0x1c08] sm:$0xff]   ;;  %v1983_v1 = vrot.slane %v28530_v56, %v26782_v34  ;;  %v1991_v15 = vrot.slane %v28530_v56, %v26786_v36 }
 0x37f   : > { %23798 = vmatprep.subr.bf16.mxu1 %v25979_v20  ;;  %v26010_v20 = vld [vmem:[%s26741_s6 + $0x1c50] sm:$0xff]  }
 0x381   : > { %23777 = vmatpush3.bf16.msra.mxu0 %v25980_v3  ;;  %v26011_v3 = vld [vmem:[%s26741_s6 + $0x1cd0] sm:$0xff]  }
 0x382   : > { %23778 = vmatprep.subr.bf16.mxu0 %v25982_v39  ;;  %23799 = vmatpush3.bf16.msra.mxu1 %v25981_v9  ;;  %v26012_v39 = vld [vmem:[%s26741_s6 + $0x1c10] sm:$0xff]  }
 0x383   : > { %23800 = vmatprep.subr.bf16.mxu1 %v25983_v10  ;;  %v26013_v9 = vld [vmem:[%s26741_s6 + $0x1c90] sm:$0xff]   ;;  %v26014_v10 = vld [vmem:[%s26741_s6 + $0x1c58] sm:$0xff]  }
 0x385   : > { %23779 = vmatpush3.bf16.msra.mxu0 %v25984_v11  ;;  %v26015_v11 = vld [vmem:[%s26741_s6 + $0x1cd8] sm:$0xff]  }
 0x386   : > { %23780 = vmatprep.subr.bf16.mxu0 %v25986_v53  ;;  %23801 = vmatpush3.bf16.msra.mxu1 %v25985_v50  ;;  %v26016_v53 = vld [vmem:[%s26741_s6 + $0x1c18] sm:$0xff]  }
 0x387   : > { %23802 = vmatprep.subr.bf16.mxu1 %v25987_v14  ;;  %v26017_v50 = vld [vmem:[%s26741_s6 + $0x1c98] sm:$0xff]   ;;  %v26018_v14 = vld [vmem:[%s26741_s6 + $0x1c60] sm:$0xff]  }
 0x389   : > { %23781 = vmatpush3.bf16.msra.mxu0 %v25988_v16  ;;  %v26019_v16 = vld [vmem:[%s26741_s6 + $0x1ce0] sm:$0xff]  }
 0x38a   : > { %23782 = vmatprep.subr.bf16.mxu0 %v25990_v21  ;;  %23803 = vmatpush3.bf16.msra.mxu1 %v25989_v62  ;;  %v26020_v62 = vld [vmem:[%s26741_s6 + $0x1c20] sm:$0xff]  }
 0x38b   : > { %v23480_v18 = vpop.f32.mrb[80].mxu0  ;;  %23804 = vmatprep.subr.bf16.mxu1 %v25991_v27  ;;  %v26024_v27 = vld [vmem:[%s26741_s6 + $0x1c28] sm:$0xff]  }
 0x38c   : > { %v23502_v13 = vpop.f32.mrb[80].mxu1  ;;  %v23481_v19 = vpop.f32.mrb[81].mxu0 }
 0x38d   : > { %v23503_v42 = vpop.f32.mrb[81].mxu1  ;;  %v23482_v48 = vadd.f32 %v23481_v19, %v23480_v18  ;;  %v23483_v28 = vpop.f32.mrb[82].mxu0  ;;  %23783 = vmatpush3.bf16.msra.mxu0 %v25992_v31  ;;  %v26021_v18 = vld [vmem:[%s26741_s6 + $0x1ca0] sm:$0xff]  }
 0x38e   : > { %v23504_v22 = vadd.f32 %v23503_v42, %v23502_v13  ;;  %v23505_v29 = vpop.f32.mrb[82].mxu1  ;;  %v23484_v17 = vpop.f32.mrb[83].mxu0  ;;  %23784 = vmatprep.subr.bf16.mxu0 %v25994_v43  ;;  %23805 = vmatpush3.bf16.msra.mxu1 %v25993_v33  ;;  %v26022_v13 = vld [vmem:[%s26741_s6 + $0x1c68] sm:$0xff]  }
 0x38f   : > { %v23506_v35 = vpop.f32.mrb[83].mxu1  ;;  %v17871_v25 = vadd.f32 %v23482_v48, %v28391_v23  ;;  %v741_v23 = vrot.slane %v28400_v12, %v26864_v45  ;;  %23806 = vmatprep.subr.bf16.mxu1 %v25995_v44  ;;  %v26004_v12 = vld [vmem:[%s26741_s6 + $0x1c00] sm:$0xff]   ;;  %v26025_v17 = vld [vmem:[%s26741_s6 + $0x1ca8] sm:$0xff]   ;;  %v26027_v44 = vld [vmem:[%s26741_s6 + $0x1cf0] sm:$0xff]  }
 0x391   : > { %v28473_v24 = vadd.f32 %v23504_v22, %v17871_v25  ;;  %23785 = vmatpush3.bf16.msra.mxu0 %v25996_v46  ;;  %v1394_v59 = vpack.c.bf16 %v741_v23, %v741_v23  ;;  %v26023_v22 = vld [vmem:[%s26741_s6 + $0x1ce8] sm:$0xff]   ;;  %v26026_v25 = vld [vmem:[%s26741_s6 + $0x1c70] sm:$0xff]   ;;  %v26030_v23 = vld [vmem:[%s26741_s6 + $0x1c78] sm:$0xff]  }
 0x392   : > { %23786 = vmatprep.subr.bf16.mxu0 %v25998_v54  ;;  %23807 = vmatpush3.bf16.msra.mxu1 %v25997_v51  ;;  %v26028_v46 = vld [vmem:[%s26741_s6 + $0x1c30] sm:$0xff]   ;;  %v26032_v54 = vld [vmem:[%s26741_s6 + $0x1c38] sm:$0xff]  }
 0x393   : > { %23808 = vmatprep.subr.bf16.mxu1 %v25999_v60  ;;  %v3603_v26 = vsel %vm26821_vm2, %v1394_v59, %v3033_v58  ;;  %v26029_v51 = vld [vmem:[%s26741_s6 + $0x1cb0] sm:$0xff]   ;;  %v1987_v58 = vrot.slane %v28530_v56, %v26774_v30 }
 0x394   : > { %v28525_v60 = vld [vmem:[%s26731_s24 + $0x70] sm:$0xff] }
 0x395   : > { %23787 = vmatpush3.bf16.msra.mxu0 %v26000_v57  ;;  %v761_v63 = vrot.slane %v28525_v60, %v26774_v30  ;;  %v769_v57 = vrot.slane %v28525_v60, %v26778_v32  ;;  %v765_v59 = vrot.slane %v28525_v60, %v26786_v36 }
 0x396   : > { %23816 = vmatprep.subr.bf16.mxu0 %v26002_v0  ;;  %23809 = vmatpush3.bf16.msra.mxu1 %v26001_v61  ;;  %v757_v61 = vrot.slane %v28525_v60, %v26782_v34  ;;  %v1995_v0 = vrot.slane %v28530_v56, %v26778_v32 }
 0x397   : > { %23838 = vmatprep.subr.bf16.mxu1 %v26003_v2  ;;  %v26034_v2 = vld [vmem:[%s26741_s6 + $0x1d40] sm:$0xff]  }
 0x398   : > { %18429 = vmatmul.mubr.bf16.vlgmr.msra.gmra.mrb[108].mxu0 %v3603_v26  ;;  %v1401_v26 = vpack.c.bf16 %v769_v57, %v769_v57  ;;  %v26051_v57 = vld [vmem:[%s26741_s6 + $0x1de0] sm:$0xff]  }
 0x399   : > { %23817 = vmatpush3.bf16.msra.mxu0 %v26004_v12  ;;  %18469 = vmatmul.mubr.bf16.vlgmr.msra.gmra.mrb[108].mxu1 %v3605_v41  ;;  %v1399_v12 = vpack.c.bf16 %v761_v63, %v761_v63  ;;  %v26035_v41 = vld [vmem:[%s26741_s6 + $0x1dc0] sm:$0xff]  }
 0x39a   : > { %23818 = vmatprep.subr.bf16.mxu0 %v26006_v49  ;;  %23839 = vmatpush3.bf16.msra.mxu1 %v26005_v4  ;;  %v1398_v4 = vpack.c.bf16 %v757_v61, %v757_v61  ;;  %v1400_v49 = vpack.c.bf16 %v765_v59, %v765_v59  ;;  %v26050_v63 = vld [vmem:[%s26741_s6 + $0x1d60] sm:$0xff]  }
 0x39b   : > { %23840 = vmatprep.subr.bf16.mxu1 %v26007_v6  ;;  %v2625_v6 = vpack.c.bf16 %v1987_v58, %v1987_v58  ;;  %v26052_v61 = vld [vmem:[%s26741_s6 + $0x1d20] sm:$0xff]  }
 0x39c   : > { %v26053_v59 = vld [vmem:[%s26741_s6 + $0x1da0] sm:$0xff]  }
 0x39d   : > { %23819 = vmatpush3.bf16.msra.mxu0 %v26008_v7  ;;  %v2627_v7 = vpack.c.bf16 %v1995_v0, %v1995_v0 }
 0x39e   : > { %23820 = vmatprep.subr.bf16.mxu0 %v26010_v20  ;;  %23841 = vmatpush3.bf16.msra.mxu1 %v26009_v8  ;;  %v2624_v8 = vpack.c.bf16 %v1983_v1, %v1983_v1  ;;  %v2626_v20 = vpack.c.bf16 %v1991_v15, %v1991_v15  ;;  %v26054_v15 = vld [vmem:[%s26741_s6 + $0x1d68] sm:$0xff]  }
 0x39f   : > { %23842 = vmatprep.subr.bf16.mxu1 %v26011_v3  ;;  %v26036_v3 = vld [vmem:[%s26741_s6 + $0x1d00] sm:$0xff]  }
 0x3a1   : > { %23821 = vmatpush3.bf16.msra.mxu0 %v26012_v39  ;;  %v777_v39 = vrot.slane %v28525_v60, %v26790_v38 }
 0x3a2   : > { %23822 = vmatprep.subr.bf16.mxu0 %v26014_v10  ;;  %23843 = vmatpush3.bf16.msra.mxu1 %v26013_v9  ;;  %v2003_v9 = vrot.slane %v28530_v56, %v26790_v38  ;;  %v785_v10 = vrot.slane %v28525_v60, %v26794_v40 }
 0x3a3   : > { %23844 = vmatprep.subr.bf16.mxu1 %v26015_v11  ;;  %v2011_v11 = vrot.slane %v28530_v56, %v26794_v40 }
 0x3a5   : > { %23823 = vmatpush3.bf16.msra.mxu0 %v26016_v53  ;;  %v3048_v53 = vshll.u32 %v2625_v6, 16 }
 0x3a6   : > { %23824 = vmatprep.subr.bf16.mxu0 %v26018_v14  ;;  %23845 = vmatpush3.bf16.msra.mxu1 %v26017_v50  ;;  %v3054_v50 = vshll.u32 %v2627_v7, 16  ;;  %v3045_v14 = vshll.u32 %v2624_v8, 16 }
 0x3a7   : > { %23846 = vmatprep.subr.bf16.mxu1 %v26019_v16  ;;  %v3051_v16 = vshll.u32 %v2626_v20, 16  ;;  %v1999_v20 = vrot.slane %v28530_v56, %v26864_v45 }
 0x3a9   : > { %23825 = vmatpush3.bf16.msra.mxu0 %v26020_v62  ;;  %v26037_v62 = vld [vmem:[%s26741_s6 + $0x1d80] sm:$0xff]  }
 0x3aa   : > { %23826 = vmatprep.subr.bf16.mxu0 %v26022_v13  ;;  %23847 = vmatpush3.bf16.msra.mxu1 %v26021_v18  ;;  %v26038_v18 = vld [vmem:[%s26741_s6 + $0x1d48] sm:$0xff]   ;;  %v1403_v13 = vpack.c.bf16 %v777_v39, %v777_v39 }
 0x3ab   : > { %v23524_v21 = vpop.f32.mrb[84].mxu0  ;;  %23848 = vmatprep.subr.bf16.mxu1 %v26023_v22  ;;  %v3610_v22 = vsel %vm26821_vm2, %v1401_v26, %v3054_v50  ;;  %v26060_v50 = vld [vmem:[%s26741_s6 + $0x1d30] sm:$0xff]  }
 0x3ac   : > { %v23546_v19 = vpop.f32.mrb[84].mxu1  ;;  %v23525_v42 = vpop.f32.mrb[85].mxu0  ;;  %18548 = vmatprep.mubr.bf16.mxu1 %v3610_v22 }
 0x3ad   : > { %v23547_v48 = vpop.f32.mrb[85].mxu1  ;;  %v23526_v28 = vadd.f32 %v23525_v42, %v23524_v21  ;;  %v23527_v31 = vpop.f32.mrb[86].mxu0  ;;  %23827 = vmatpush3.bf16.msra.mxu0 %v26024_v27  ;;  %v2629_v21 = vpack.c.bf16 %v2003_v9, %v2003_v9  ;;  %v2631_v42 = vpack.c.bf16 %v2011_v11, %v2011_v11  ;;  %v3607_v27 = vsel %vm26821_vm2, %v1398_v4, %v3045_v14  ;;  %v26058_v9 = vld [vmem:[%s26741_s6 + $0x1d70] sm:$0xff]  }
 0x3ae   : > { %v23548_v29 = vadd.f32 %v23547_v48, %v23546_v19  ;;  %v23549_v33 = vpop.f32.mrb[86].mxu1  ;;  %v23528_v35 = vpop.f32.mrb[87].mxu0  ;;  %23828 = vmatprep.subr.bf16.mxu0 %v26026_v25  ;;  %23849 = vmatpush3.bf16.msra.mxu1 %v26025_v17  ;;  %v1405_v19 = vpack.c.bf16 %v785_v10, %v785_v10  ;;  %v3608_v48 = vsel %vm26821_vm2, %v1399_v12, %v3048_v53  ;;  %v26040_v31 = vld [vmem:[%s26741_s6 + $0x1d08] sm:$0xff]   ;;  %v26059_v11 = vld [vmem:[%s26741_s6 + $0x1df0] sm:$0xff]  }
 0x3af   : > { %v23550_v5 = vpop.f32.mrb[87].mxu1  ;;  %v17951_v43 = vadd.f32 %v23526_v28, %v28473_v24  ;;  %23850 = vmatprep.subr.bf16.mxu1 %v26027_v44  ;;  %v26033_v24 = vld [vmem:[%s26741_s6 + $0x1cb8] sm:$0xff]   ;;  %v3609_v28 = vsel %vm26821_vm2, %v1400_v49, %v3051_v16  ;;  %18508 = vmatprep.mubr.bf16.mxu0 %v3608_v48  ;;  %v3060_v33 = vshll.u32 %v2629_v21, 16  ;;  %v26041_v17 = vld [vmem:[%s26741_s6 + $0x1d88] sm:$0xff]   ;;  %v3066_v35 = vshll.u32 %v2631_v42, 16  ;;  %v26061_v14 = vld [vmem:[%s26741_s6 + $0x1db0] sm:$0xff]  }
 0x3b0   : > { %v26042_v5 = vld [vmem:[%s26741_s6 + $0x1d50] sm:$0xff]   ;;  %v26056_v49 = vld [vmem:[%s26741_s6 + $0x1d28] sm:$0xff]   ;;  %v2007_v10 = vrot.slane %v28530_v56, %v26868_v47  ;;  %v2628_v16 = vpack.c.bf16 %v1999_v20, %v1999_v20  ;;  %v781_v56 = vrot.slane %v28525_v60, %v26868_v47  ;;  %v26064_v21 = vld [vmem:[%s26741_s6 + $0x1d38] sm:$0xff]  }
 0x3b1   : > { %v28516_v37 = vadd.f32 %v23548_v29, %v17951_v43  ;;  %23829 = vmatpush3.bf16.msra.mxu0 %v26028_v46  ;;  %v26039_v29 = vld [vmem:[%s26741_s6 + $0x1dc8] sm:$0xff]   ;;  %v3612_v25 = vsel %vm26821_vm2, %v1403_v13, %v3060_v33  ;;  %v26043_v43 = vld [vmem:[%s26741_s6 + $0x1dd0] sm:$0xff]   ;;  %v3614_v44 = vsel %vm26821_vm2, %v1405_v19, %v3066_v35  ;;  %v26063_v13 = vld [vmem:[%s26741_s6 + $0x1df8] sm:$0xff]  }
 0x3b2   : > { %23830 = vmatprep.subr.bf16.mxu0 %v26030_v23  ;;  %23851 = vmatpush3.bf16.msra.mxu1 %v26029_v51  ;;  %v26044_v46 = vld [vmem:[%s26741_s6 + $0x1d10] sm:$0xff]   ;;  %v26046_v23 = vld [vmem:[%s26741_s6 + $0x1d58] sm:$0xff]   ;;  %v3057_v42 = vshll.u32 %v2628_v16, 16  ;;  %v1404_v22 = vpack.c.bf16 %v781_v56, %v781_v56  ;;  %v26070_v35 = vld [vmem:[%s26741_s6 + $0x1e48] sm:$0xff]  }
 0x3b3   : > { %23852 = vmatprep.subr.bf16.mxu1 %v26031_v52  ;;  %v26045_v51 = vld [vmem:[%s26741_s6 + $0x1d90] sm:$0xff]   ;;  %v26047_v52 = vld [vmem:[%s26741_s6 + $0x1dd8] sm:$0xff]  }
 0x3b4   : > { %v26065_v19 = vld [vmem:[%s26741_s6 + $0x1db8] sm:$0xff]  }
 0x3b5   : > { %23831 = vmatpush3.bf16.msra.mxu0 %v26032_v54  ;;  %v26048_v54 = vld [vmem:[%s26741_s6 + $0x1d18] sm:$0xff]  }
 0x3b6   : > { %23860 = vmatprep.subr.bf16.mxu0 %v26034_v2  ;;  %23853 = vmatpush3.bf16.msra.mxu1 %v26033_v24  ;;  %v26049_v24 = vld [vmem:[%s26741_s6 + $0x1d98] sm:$0xff]   ;;  %v26055_v2 = vld [vmem:[%s26741_s6 + $0x1de8] sm:$0xff]  }
 0x3b7   : > { %23882 = vmatprep.subr.bf16.mxu1 %v26035_v41  ;;  %v26057_v41 = vld [vmem:[%s26741_s6 + $0x1da8] sm:$0xff]   ;;  %v26094_v16 = vld [vmem:[%s26741_s6 + $0x1e78] sm:$0xff]  }
 0x3b8   : > { %18509 = vmatmul.mubr.bf16.vlgmr.msra.gmra.mrb[112].mxu0 %v3607_v27  ;;  %v26097_v56 = vld [vmem:[%s26741_s6 + $0x1eb8] sm:$0xff]  }
 0x3b9   : > { %18549 = vmatmul.mubr.bf16.vlgmr.msra.gmra.mrb[112].mxu1 %v3609_v28  ;;  %23861 = vmatpush3.bf16.msra.mxu0 %v26036_v3  ;;  %v26066_v28 = vld [vmem:[%s26741_s6 + $0x1e40] sm:$0xff]  }
 0x3ba   : > { %23883 = vmatpush3.bf16.msra.mxu1 %v26037_v62  ;;  %23862 = vmatprep.subr.bf16.mxu0 %v26038_v18  ;;  %v773_v62 = vrot.slane %v28525_v60, %v26864_v45  ;;  %v2630_v18 = vpack.c.bf16 %v2007_v10, %v2007_v10  ;;  %v26067_v60 = vld [vmem:[%s26741_s6 + $0x1ec0] sm:$0xff]   ;;  %v26091_v10 = vld [vmem:[%s26741_s6 + $0x1ef0] sm:$0xff]  }
 0x3bb   : > { %23884 = vmatprep.subr.bf16.mxu1 %v26039_v29  ;;  %18588 = vmatprep.mubr.bf16.mxu0 %v3612_v25  ;;  %v26068_v29 = vld [vmem:[%s26741_s6 + $0x1e00] sm:$0xff]   ;;  %v26072_v25 = vld [vmem:[%s26741_s6 + $0x1e08] sm:$0xff]  }
 0x3bc   : > { %18628 = vmatprep.mubr.bf16.mxu1 %v3614_v44  ;;  %v1402_v48 = vpack.c.bf16 %v773_v62, %v773_v62  ;;  %v3063_v27 = vshll.u32 %v2630_v18, 16  ;;  %v26074_v44 = vld [vmem:[%s26741_s6 + $0x1e50] sm:$0xff]   ;;  %v26096_v62 = vld [vmem:[%s26741_s6 + $0x1e38] sm:$0xff]  }
 0x3bd   : > { %23863 = vmatpush3.bf16.msra.mxu0 %v26040_v31  ;;  %v26069_v31 = vld [vmem:[%s26741_s6 + $0x1e80] sm:$0xff]  }
 0x3be   : > { %23885 = vmatpush3.bf16.msra.mxu1 %v26041_v17  ;;  %23864 = vmatprep.subr.bf16.mxu0 %v26042_v5  ;;  %v3611_v33 = vsel %vm26821_vm2, %v1402_v48, %v3057_v42  ;;  %v3613_v17 = vsel %vm26821_vm2, %v1404_v22, %v3063_v27  ;;  %v26071_v5 = vld [vmem:[%s26741_s6 + $0x1ec8] sm:$0xff]   ;;  %v26098_v27 = vld [vmem:[%s26741_s6 + $0x1f40] sm:$0xff]  }
 0x3bf   : > { %23886 = vmatprep.subr.bf16.mxu1 %v26043_v43  ;;  %v26073_v43 = vld [vmem:[%s26741_s6 + $0x1e88] sm:$0xff]  }
 0x3c1   : > { %23865 = vmatpush3.bf16.msra.mxu0 %v26044_v46  ;;  %v26075_v46 = vld [vmem:[%s26741_s6 + $0x1ed0] sm:$0xff]  }
 0x3c2   : > { %23887 = vmatpush3.bf16.msra.mxu1 %v26045_v51  ;;  %23866 = vmatprep.subr.bf16.mxu0 %v26046_v23  ;;  %v26076_v51 = vld [vmem:[%s26741_s6 + $0x1e10] sm:$0xff]  }
 0x3c3   : > { %23888 = vmatprep.subr.bf16.mxu1 %v26047_v52  ;;  %v26077_v23 = vld [vmem:[%s26741_s6 + $0x1e90] sm:$0xff]   ;;  %v26078_v52 = vld [vmem:[%s26741_s6 + $0x1e58] sm:$0xff]  }
 0x3c5   : > { %23867 = vmatpush3.bf16.msra.mxu0 %v26048_v54  ;;  %v26079_v54 = vld [vmem:[%s26741_s6 + $0x1ed8] sm:$0xff]  }
 0x3c6   : > { %23889 = vmatpush3.bf16.msra.mxu1 %v26049_v24  ;;  %23868 = vmatprep.subr.bf16.mxu0 %v26050_v63  ;;  %v26080_v24 = vld [vmem:[%s26741_s6 + $0x1e18] sm:$0xff]  }
 0x3c7   : > { %23890 = vmatprep.subr.bf16.mxu1 %v26051_v57  ;;  %v26081_v63 = vld [vmem:[%s26741_s6 + $0x1e98] sm:$0xff]   ;;  %v26082_v57 = vld [vmem:[%s26741_s6 + $0x1e60] sm:$0xff]  }
 0x3c9   : > { %23869 = vmatpush3.bf16.msra.mxu0 %v26052_v61  ;;  %v26083_v61 = vld [vmem:[%s26741_s6 + $0x1ee0] sm:$0xff]  }
 0x3ca   : > { %23891 = vmatpush3.bf16.msra.mxu1 %v26053_v59  ;;  %23870 = vmatprep.subr.bf16.mxu0 %v26054_v15  ;;  %v26084_v59 = vld [vmem:[%s26741_s6 + $0x1e20] sm:$0xff]  }
 0x3cb   : > { %v23568_v58 = vpop.f32.mrb[88].mxu0  ;;  %23892 = vmatprep.subr.bf16.mxu1 %v26055_v2  ;;  %v26086_v2 = vld [vmem:[%s26741_s6 + $0x1e68] sm:$0xff]  }
 0x3cc   : > { %v23590_v0 = vpop.f32.mrb[88].mxu1  ;;  %v23569_v1 = vpop.f32.mrb[89].mxu0 }
 0x3cd   : > { %v23570_v12 = vadd.f32 %v23569_v1, %v23568_v58  ;;  %v23591_v26 = vpop.f32.mrb[89].mxu1  ;;  %v23571_v4 = vpop.f32.mrb[90].mxu0  ;;  %23871 = vmatpush3.bf16.msra.mxu0 %v26056_v49  ;;  %v26085_v58 = vld [vmem:[%s26741_s6 + $0x1ea0] sm:$0xff]  }
 0x3ce   : > { %v23592_v6 = vadd.f32 %v23591_v26, %v23590_v0  ;;  %v23593_v7 = vpop.f32.mrb[90].mxu1  ;;  %v23572_v8 = vpop.f32.mrb[91].mxu0  ;;  %23893 = vmatpush3.bf16.msra.mxu1 %v26057_v41  ;;  %23872 = vmatprep.subr.bf16.mxu0 %v26058_v9  ;;  %v26088_v41 = vld [vmem:[%s26741_s6 + $0x1e28] sm:$0xff]  }
 0x3cf   : > { %v18031_v3 = vadd.f32 %v23570_v12, %v28516_v37  ;;  %v23594_v39 = vpop.f32.mrb[91].mxu1  ;;  %v26062_v37 = vld [vmem:[%s26741_s6 + $0x1d78] sm:$0xff]   ;;  %23894 = vmatprep.subr.bf16.mxu1 %v26059_v11  ;;  %v26087_v12 = vld [vmem:[%s26741_s6 + $0x1ee8] sm:$0xff]  }
 0x3d0   : > { %v26089_v8 = vld [vmem:[%s26741_s6 + $0x1ea8] sm:$0xff]  }
 0x3d1   : > { %v28597_v53 = vadd.f32 %v23592_v6, %v18031_v3  ;;  %23873 = vmatpush3.bf16.msra.mxu0 %v26060_v50  ;;  %v26090_v3 = vld [vmem:[%s26741_s6 + $0x1e70] sm:$0xff]  }
 0x3d2   : > { %23895 = vmatpush3.bf16.msra.mxu1 %v26061_v14  ;;  %23874 = vmatprep.subr.bf16.mxu0 %v26062_v37  ;;  %v26092_v50 = vld [vmem:[%s26741_s6 + $0x1e30] sm:$0xff]   ;;  %v26095_v37 = vld [vmem:[%s26741_s6 + $0x1ef8] sm:$0xff]  }
 0x3d3   : > { %23896 = vmatprep.subr.bf16.mxu1 %v26063_v13  ;;  %v26093_v14 = vld [vmem:[%s26741_s6 + $0x1eb0] sm:$0xff]   ;;  %v28654_v13 = vld [vmem:[%s26736_s27 + $0x78] sm:$0xff] }
 0x3d4   : > { %v2019_v42 = vrot.slane %v28654_v13, %v26774_v30  ;;  %v2027_v48 = vrot.slane %v28654_v13, %v26778_v32  ;;  %v2015_v22 = vrot.slane %v28654_v13, %v26782_v34 }
 0x3d5   : > { %23875 = vmatpush3.bf16.msra.mxu0 %v26064_v21 }
 0x3d6   : > { %23897 = vmatpush3.bf16.msra.mxu1 %v26065_v19  ;;  %23904 = vmatprep.subr.bf16.mxu0 %v26066_v28 }
 0x3d7   : > { %23926 = vmatprep.subr.bf16.mxu1 %v26067_v60 }
 0x3d8   : > { %18589 = vmatmul.mubr.bf16.vlgmr.msra.gmra.mrb[116].mxu0 %v3611_v33  ;;  %v26099_v33 = vld [vmem:[%s26741_s6 + $0x1fc0] sm:$0xff]  }
 0x3d9   : > { %18629 = vmatmul.mubr.bf16.vlgmr.msra.gmra.mrb[116].mxu1 %v3613_v17  ;;  %23905 = vmatpush3.bf16.msra.mxu0 %v26068_v29  ;;  %v2633_v17 = vpack.c.bf16 %v2019_v42, %v2019_v42  ;;  %v26117_v42 = vld [vmem:[%s26741_s6 + $0x1fa0] sm:$0xff]  }
 0x3da   : > { %23927 = vmatpush3.bf16.msra.mxu1 %v26069_v31  ;;  %23906 = vmatprep.subr.bf16.mxu0 %v26070_v35  ;;  %v2635_v35 = vpack.c.bf16 %v2027_v48, %v2027_v48 }
 0x3db   : > { %23928 = vmatprep.subr.bf16.mxu1 %v26071_v5  ;;  %v2632_v5 = vpack.c.bf16 %v2015_v22, %v2015_v22 }
 0x3dd   : > { %23907 = vmatpush3.bf16.msra.mxu0 %v26072_v25  ;;  %v2023_v25 = vrot.slane %v28654_v13, %v26786_v36 }
 0x3de   : > { %23929 = vmatpush3.bf16.msra.mxu1 %v26073_v43  ;;  %23908 = vmatprep.subr.bf16.mxu0 %v26074_v44 }
 0x3df   : > { %23930 = vmatprep.subr.bf16.mxu1 %v26075_v46  ;;  %v2035_v46 = vrot.slane %v28654_v13, %v26790_v38 }
 0x3e1   : > { %23909 = vmatpush3.bf16.msra.mxu0 %v26076_v51  ;;  %v3072_v51 = vshll.u32 %v2633_v17, 16  ;;  %v26120_v17 = vld [vmem:[%s26741_s6 + $0x1f28] sm:$0xff]  }
 0x3e2   : > { %23931 = vmatpush3.bf16.msra.mxu1 %v26077_v23  ;;  %23910 = vmatprep.subr.bf16.mxu0 %v26078_v52  ;;  %v3078_v23 = vshll.u32 %v2635_v35, 16  ;;  %v3069_v52 = vshll.u32 %v2632_v5, 16 }
 0x3e3   : > { %23932 = vmatprep.subr.bf16.mxu1 %v26079_v54  ;;  %v2634_v54 = vpack.c.bf16 %v2023_v25, %v2023_v25 }
 0x3e5   : > { %23911 = vmatpush3.bf16.msra.mxu0 %v26080_v24  ;;  %v26100_v24 = vld [vmem:[%s26741_s6 + $0x1f00] sm:$0xff]  }
 0x3e6   : > { %23933 = vmatpush3.bf16.msra.mxu1 %v26081_v63  ;;  %23912 = vmatprep.subr.bf16.mxu0 %v26082_v57  ;;  %v26101_v63 = vld [vmem:[%s26741_s6 + $0x1f80] sm:$0xff]  }
 0x3e7   : > { %23934 = vmatprep.subr.bf16.mxu1 %v26083_v61  ;;  %v2637_v61 = vpack.c.bf16 %v2035_v46, %v2035_v46 }
 0x3e9   : > { %23913 = vmatpush3.bf16.msra.mxu0 %v26084_v59 }
 0x3ea   : > { %23935 = vmatpush3.bf16.msra.mxu1 %v26085_v58  ;;  %23914 = vmatprep.subr.bf16.mxu0 %v26086_v2  ;;  %v2043_v58 = vrot.slane %v28654_v13, %v26794_v40  ;;  %v3075_v2 = vshll.u32 %v2634_v54, 16 }
 0x3eb   : > { %v23612_v0 = vpop.f32.mrb[92].mxu0  ;;  %23936 = vmatprep.subr.bf16.mxu1 %v26087_v12  ;;  %v26102_v12 = vld [vmem:[%s26741_s6 + $0x1f48] sm:$0xff]  }
 0x3ec   : > { %v23634_v1 = vpop.f32.mrb[92].mxu1  ;;  %v23613_v15 = vpop.f32.mrb[93].mxu0 }
 0x3ed   : > { %v23614_v26 = vadd.f32 %v23613_v15, %v23612_v0  ;;  %v23635_v4 = vpop.f32.mrb[93].mxu1  ;;  %v23615_v49 = vpop.f32.mrb[94].mxu0  ;;  %23915 = vmatpush3.bf16.msra.mxu0 %v26088_v41  ;;  %v2639_v41 = vpack.c.bf16 %v2043_v58, %v2043_v58 }
 0x3ee   : > { %v23636_v6 = vadd.f32 %v23635_v4, %v23634_v1  ;;  %v23637_v7 = vpop.f32.mrb[94].mxu1  ;;  %v23616_v20 = vpop.f32.mrb[95].mxu0  ;;  %23937 = vmatpush3.bf16.msra.mxu1 %v26089_v8  ;;  %23916 = vmatprep.subr.bf16.mxu0 %v26090_v3  ;;  %v3084_v4 = vshll.u32 %v2637_v61, 16  ;;  %v26105_v8 = vld [vmem:[%s26741_s6 + $0x1f88] sm:$0xff]  }
 0x3ef   : > { %v18111_v39 = vadd.f32 %v23614_v26, %v28597_v53  ;;  %v23638_v9 = vpop.f32.mrb[95].mxu1  ;;  %23938 = vmatprep.subr.bf16.mxu1 %v26091_v10  ;;  %v28649_v53 = vld [vmem:[%s26731_s24 + $0x78] sm:$0xff]  ;;  %v26103_v26 = vld [vmem:[%s26741_s6 + $0x1fc8] sm:$0xff]   ;;  %v3090_v3 = vshll.u32 %v2639_v41, 16  ;;  %v26132_v41 = vld [vmem:[%s26741_s6 + $0x2000] sm:$0xff]  }
 0x3f0   : > { %v793_v18 = vrot.slane %v28649_v53, %v26774_v30  ;;  %v801_v21 = vrot.slane %v28649_v53, %v26778_v32  ;;  %v789_v19 = vrot.slane %v28649_v53, %v26782_v34  ;;  %v797_v31 = vrot.slane %v28649_v53, %v26786_v36  ;;  %v26104_v7 = vld [vmem:[%s26741_s6 + $0x1f08] sm:$0xff]   ;;  %v26107_v9 = vld [vmem:[%s26741_s6 + $0x1fd0] sm:$0xff]  }
 0x3f1   : > { %v28640_v11 = vadd.f32 %v23636_v6, %v18111_v39  ;;  %23917 = vmatpush3.bf16.msra.mxu0 %v26092_v50  ;;  %v809_v44 = vrot.slane %v28649_v53, %v26790_v38  ;;  %v817_v59 = vrot.slane %v28649_v53, %v26794_v40  ;;  %v26106_v39 = vld [vmem:[%s26741_s6 + $0x1f50] sm:$0xff]  }
 0x3f2   : > { %23939 = vmatpush3.bf16.msra.mxu1 %v26093_v14  ;;  %23918 = vmatprep.subr.bf16.mxu0 %v26094_v16  ;;  %v1407_v28 = vpack.c.bf16 %v793_v18, %v793_v18  ;;  %v1409_v60 = vpack.c.bf16 %v801_v21, %v801_v21  ;;  %v1406_v29 = vpack.c.bf16 %v789_v19, %v789_v19  ;;  %v26108_v50 = vld [vmem:[%s26741_s6 + $0x1f10] sm:$0xff]   ;;  %v26110_v16 = vld [vmem:[%s26741_s6 + $0x1f58] sm:$0xff]   ;;  %v26114_v18 = vld [vmem:[%s26741_s6 + $0x1f60] sm:$0xff]  }
 0x3f3   : > { %23940 = vmatprep.subr.bf16.mxu1 %v26095_v37  ;;  %v1408_v43 = vpack.c.bf16 %v797_v31, %v797_v31  ;;  %v1411_v57 = vpack.c.bf16 %v809_v44, %v809_v44  ;;  %v1413_v49 = vpack.c.bf16 %v817_v59, %v817_v59  ;;  %v26109_v14 = vld [vmem:[%s26741_s6 + $0x1f90] sm:$0xff]   ;;  %v26111_v37 = vld [vmem:[%s26741_s6 + $0x1fd8] sm:$0xff]   ;;  %v26115_v21 = vld [vmem:[%s26741_s6 + $0x1fe0] sm:$0xff]  }
 0x3f4   : > { %v3616_v0 = vsel %vm26821_vm2, %v1407_v28, %v3072_v51  ;;  %v3618_v1 = vsel %vm26821_vm2, %v1409_v60, %v3078_v23  ;;  %v3615_v15 = vsel %vm26821_vm2, %v1406_v29, %v3069_v52  ;;  %v26116_v19 = vld [vmem:[%s26741_s6 + $0x1f20] sm:$0xff]   ;;  %v26118_v28 = vld [vmem:[%s26741_s6 + $0x1f68] sm:$0xff]   ;;  %v2031_v51 = vrot.slane %v28654_v13, %v26864_v45  ;;  %v26122_v23 = vld [vmem:[%s26741_s6 + $0x1f70] sm:$0xff]  }
 0x3f5   : > { %23919 = vmatpush3.bf16.msra.mxu0 %v26096_v62  ;;  %18668 = vmatprep.mubr.bf16.mxu0 %v3616_v0  ;;  %v3617_v6 = vsel %vm26821_vm2, %v1408_v43, %v3075_v2  ;;  %v3620_v20 = vsel %vm26821_vm2, %v1411_v57, %v3084_v4  ;;  %v3622_v10 = vsel %vm26821_vm2, %v1413_v49, %v3090_v3  ;;  %v26112_v62 = vld [vmem:[%s26741_s6 + $0x1f18] sm:$0xff]   ;;  %v26119_v60 = vld [vmem:[%s26741_s6 + $0x1fe8] sm:$0xff]   ;;  %v26130_v49 = vld [vmem:[%s26741_s6 + $0x2040] sm:$0xff]  }
 0x3f6   : > { %23941 = vmatpush3.bf16.msra.mxu1 %v26097_v56  ;;  %23948 = vmatprep.subr.bf16.mxu0 %v26098_v27  ;;  %v26113_v56 = vld [vmem:[%s26741_s6 + $0x1f98] sm:$0xff]   ;;  %v26121_v44 = vld [vmem:[%s26741_s6 + $0x1fa8] sm:$0xff]   ;;  %v2039_v52 = vrot.slane %v28654_v13, %v26868_v47  ;;  %v805_v57 = vrot.slane %v28649_v53, %v26864_v45  ;;  %v2636_v61 = vpack.c.bf16 %v2031_v51, %v2031_v51 }
 0x3f7   : > { %23970 = vmatprep.subr.bf16.mxu1 %v26099_v33  ;;  %18708 = vmatprep.mubr.bf16.mxu1 %v3618_v1  ;;  %v26126_v59 = vld [vmem:[%s26741_s6 + $0x1f78] sm:$0xff]   ;;  %v813_v13 = vrot.slane %v28649_v53, %v26868_v47  ;;  %v26131_v53 = vld [vmem:[%s26741_s6 + $0x20c0] sm:$0xff]   ;;  %v26135_v3 = vld [vmem:[%s26741_s6 + $0x20c8] sm:$0xff]  }
 0x3f8   : > { %18669 = vmatmul.mubr.bf16.vlgmr.msra.gmra.mrb[120].mxu0 %v3615_v15  ;;  %v2638_v58 = vpack.c.bf16 %v2039_v52, %v2039_v52  ;;  %v26127_v0 = vld [vmem:[%s26741_s6 + $0x1ff8] sm:$0xff]   ;;  %v1410_v2 = vpack.c.bf16 %v805_v57, %v805_v57  ;;  %v26155_v52 = vld [vmem:[%s26741_s6 + $0x20f0] sm:$0xff]  }
 0x3f9   : > { %18709 = vmatmul.mubr.bf16.vlgmr.msra.gmra.mrb[120].mxu1 %v3617_v6  ;;  %23949 = vmatpush3.bf16.msra.mxu0 %v26100_v24  ;;  %v26123_v24 = vld [vmem:[%s26741_s6 + $0x1ff0] sm:$0xff]   ;;  %v26128_v1 = vld [vmem:[%s26741_s6 + $0x1f38] sm:$0xff]  }
 0x3fa   : > { %23971 = vmatpush3.bf16.msra.mxu1 %v26101_v63  ;;  %23950 = vmatprep.subr.bf16.mxu0 %v26102_v12  ;;  %v26125_v63 = vld [vmem:[%s26741_s6 + $0x1fb0] sm:$0xff]   ;;  %v26129_v15 = vld [vmem:[%s26741_s6 + $0x1fb8] sm:$0xff]   ;;  %v3081_v12 = vshll.u32 %v2636_v61, 16  ;;  %v3087_v4 = vshll.u32 %v2638_v58, 16 }
 0x3fb   : > { %23972 = vmatprep.subr.bf16.mxu1 %v26103_v26  ;;  %18748 = vmatprep.mubr.bf16.mxu0 %v3620_v20  ;;  %v1412_v26 = vpack.c.bf16 %v813_v13, %v813_v13  ;;  %v26134_v20 = vld [vmem:[%s26741_s6 + $0x2048] sm:$0xff]   ;;  %v26158_v57 = vld [vmem:[%s26741_s6 + $0x2078] sm:$0xff]   ;;  %v28773_v13 = vld [vmem:[%s26731_s24 + $0x80] sm:$0xff] }
 0x3fc   : > { %18788 = vmatprep.mubr.bf16.mxu1 %v3622_v10  ;;  %v3619_v6 = vsel %vm26821_vm2, %v1410_v2, %v3081_v12  ;;  %v26138_v10 = vld [vmem:[%s26741_s6 + $0x2050] sm:$0xff]   ;;  %v26159_v61 = vld [vmem:[%s26741_s6 + $0x20f8] sm:$0xff]   ;;  %v825_v58 = vrot.slane %v28773_v13, %v26774_v30  ;;  %v829_v2 = vrot.slane %v28773_v13, %v26786_v36 }
 0x3fd   : > { %23951 = vmatpush3.bf16.msra.mxu0 %v26104_v7  ;;  %v26133_v7 = vld [vmem:[%s26741_s6 + $0x2080] sm:$0xff]  }
 0x3fe   : > { %23973 = vmatpush3.bf16.msra.mxu1 %v26105_v8  ;;  %23952 = vmatprep.subr.bf16.mxu0 %v26106_v39  ;;  %v3621_v8 = vsel %vm26821_vm2, %v1412_v26, %v3087_v4  ;;  %v26136_v39 = vld [vmem:[%s26741_s6 + $0x2008] sm:$0xff]  }
 0x3ff   : > { %23974 = vmatprep.subr.bf16.mxu1 %v26107_v9  ;;  %v26137_v9 = vld [vmem:[%s26741_s6 + $0x2088] sm:$0xff]  }
 0x401   : > { %23953 = vmatpush3.bf16.msra.mxu0 %v26108_v50  ;;  %v26139_v50 = vld [vmem:[%s26741_s6 + $0x20d0] sm:$0xff]  }
 0x402   : > { %23975 = vmatpush3.bf16.msra.mxu1 %v26109_v14  ;;  %23954 = vmatprep.subr.bf16.mxu0 %v26110_v16  ;;  %v26140_v14 = vld [vmem:[%s26741_s6 + $0x2010] sm:$0xff]  }
 0x403   : > { %23976 = vmatprep.subr.bf16.mxu1 %v26111_v37  ;;  %v26141_v16 = vld [vmem:[%s26741_s6 + $0x2090] sm:$0xff]   ;;  %v26142_v37 = vld [vmem:[%s26741_s6 + $0x2058] sm:$0xff]  }
 0x405   : > { %23955 = vmatpush3.bf16.msra.mxu0 %v26112_v62  ;;  %v26143_v62 = vld [vmem:[%s26741_s6 + $0x20d8] sm:$0xff]  }
 0x406   : > { %23977 = vmatpush3.bf16.msra.mxu1 %v26113_v56  ;;  %23956 = vmatprep.subr.bf16.mxu0 %v26114_v18  ;;  %v26144_v56 = vld [vmem:[%s26741_s6 + $0x2018] sm:$0xff]  }
 0x407   : > { %23978 = vmatprep.subr.bf16.mxu1 %v26115_v21  ;;  %v26145_v18 = vld [vmem:[%s26741_s6 + $0x2098] sm:$0xff]   ;;  %v26146_v21 = vld [vmem:[%s26741_s6 + $0x2060] sm:$0xff]  }
 0x409   : > { %23957 = vmatpush3.bf16.msra.mxu0 %v26116_v19  ;;  %v26147_v19 = vld [vmem:[%s26741_s6 + $0x20e0] sm:$0xff]  }
 0x40a   : > { %23979 = vmatpush3.bf16.msra.mxu1 %v26117_v42  ;;  %23958 = vmatprep.subr.bf16.mxu0 %v26118_v28  ;;  %v26148_v42 = vld [vmem:[%s26741_s6 + $0x2020] sm:$0xff]  }
 0x40b   : > { %v23656_v48 = vpop.f32.mrb[96].mxu0  ;;  %23980 = vmatprep.subr.bf16.mxu1 %v26119_v60  ;;  %v26150_v60 = vld [vmem:[%s26741_s6 + $0x2068] sm:$0xff]  }
 0x40c   : > { %v23678_v22 = vpop.f32.mrb[96].mxu1  ;;  %v23657_v27 = vpop.f32.mrb[97].mxu0 }
 0x40d   : > { %v23658_v29 = vadd.f32 %v23657_v27, %v23656_v48  ;;  %v23679_v31 = vpop.f32.mrb[97].mxu1  ;;  %v23659_v33 = vpop.f32.mrb[98].mxu0  ;;  %23959 = vmatpush3.bf16.msra.mxu0 %v26120_v17  ;;  %v26149_v48 = vld [vmem:[%s26741_s6 + $0x20a0] sm:$0xff]  }
 0x40e   : > { %v23680_v35 = vadd.f32 %v23679_v31, %v23678_v22  ;;  %v23681_v5 = vpop.f32.mrb[98].mxu1  ;;  %v23660_v25 = vpop.f32.mrb[99].mxu0  ;;  %23981 = vmatpush3.bf16.msra.mxu1 %v26121_v44  ;;  %23960 = vmatprep.subr.bf16.mxu0 %v26122_v23 }
 0x40f   : > { %v18191_v43 = vadd.f32 %v23658_v29, %v28640_v11  ;;  %v23682_v46 = vpop.f32.mrb[99].mxu1  ;;  %v26124_v11 = vld [vmem:[%s26741_s6 + $0x1f30] sm:$0xff]   ;;  %23982 = vmatprep.subr.bf16.mxu1 %v26123_v24  ;;  %v26151_v29 = vld [vmem:[%s26741_s6 + $0x20e8] sm:$0xff]  }
 0x410   : > { %v26154_v46 = vld [vmem:[%s26741_s6 + $0x2070] sm:$0xff]  }
 0x411   : > { %v28720_v54 = vadd.f32 %v23680_v35, %v18191_v43  ;;  %23961 = vmatpush3.bf16.msra.mxu0 %v26124_v11  ;;  %v26152_v35 = vld [vmem:[%s26741_s6 + $0x2028] sm:$0xff]   ;;  %v26156_v11 = vld [vmem:[%s26741_s6 + $0x2030] sm:$0xff]  }
 0x412   : > { %23983 = vmatpush3.bf16.msra.mxu1 %v26125_v63  ;;  %23962 = vmatprep.subr.bf16.mxu0 %v26126_v59  ;;  %v26153_v43 = vld [vmem:[%s26741_s6 + $0x20a8] sm:$0xff]   ;;  %v26157_v63 = vld [vmem:[%s26741_s6 + $0x20b0] sm:$0xff]   ;;  %v26161_v59 = vld [vmem:[%s26741_s6 + $0x20b8] sm:$0xff]  }
 0x413   : > { %23984 = vmatprep.subr.bf16.mxu1 %v26127_v0  ;;  %v28778_v0 = vld [vmem:[%s26736_s27 + $0x80] sm:$0xff] }
 0x414   : > { %v2051_v12 = vrot.slane %v28778_v0, %v26774_v30  ;;  %v2059_v26 = vrot.slane %v28778_v0, %v26778_v32  ;;  %v2047_v4 = vrot.slane %v28778_v0, %v26782_v34 }
 0x415   : > { %23963 = vmatpush3.bf16.msra.mxu0 %v26128_v1  ;;  %v833_v1 = vrot.slane %v28773_v13, %v26778_v32 }
 0x416   : > { %23985 = vmatpush3.bf16.msra.mxu1 %v26129_v15  ;;  %23992 = vmatprep.subr.bf16.mxu0 %v26130_v49  ;;  %v821_v15 = vrot.slane %v28773_v13, %v26782_v34  ;;  %v26162_v49 = vld [vmem:[%s26741_s6 + $0x2140] sm:$0xff]  }
 0x417   : > { %24014 = vmatprep.subr.bf16.mxu1 %v26131_v53  ;;  %v1415_v53 = vpack.c.bf16 %v825_v58, %v825_v58  ;;  %v26178_v58 = vld [vmem:[%s26741_s6 + $0x2160] sm:$0xff]  }
 0x418   : > { %18749 = vmatmul.mubr.bf16.vlgmr.msra.gmra.mrb[124].mxu0 %v3619_v6  ;;  %v1414_v6 = vpack.c.bf16 %v821_v15, %v821_v15  ;;  %v26180_v15 = vld [vmem:[%s26741_s6 + $0x2120] sm:$0xff]  }
 0x419   : > { %18789 = vmatmul.mubr.bf16.vlgmr.msra.gmra.mrb[124].mxu1 %v3621_v8  ;;  %23993 = vmatpush3.bf16.msra.mxu0 %v26132_v41  ;;  %v1417_v41 = vpack.c.bf16 %v833_v1, %v833_v1  ;;  %v26163_v8 = vld [vmem:[%s26741_s6 + $0x21c0] sm:$0xff]  }
 0x41a   : > { %24015 = vmatpush3.bf16.msra.mxu1 %v26133_v7  ;;  %23994 = vmatprep.subr.bf16.mxu0 %v26134_v20  ;;  %v1416_v7 = vpack.c.bf16 %v829_v2, %v829_v2  ;;  %v2641_v20 = vpack.c.bf16 %v2051_v12, %v2051_v12  ;;  %v26179_v1 = vld [vmem:[%s26741_s6 + $0x21e0] sm:$0xff]  }
 0x41b   : > { %24016 = vmatprep.subr.bf16.mxu1 %v26135_v3  ;;  %v2643_v3 = vpack.c.bf16 %v2059_v26, %v2059_v26  ;;  %v26181_v12 = vld [vmem:[%s26741_s6 + $0x21a0] sm:$0xff]  }
 0x41d   : > { %23995 = vmatpush3.bf16.msra.mxu0 %v26136_v39  ;;  %v2640_v39 = vpack.c.bf16 %v2047_v4, %v2047_v4 }
 0x41e   : > { %24017 = vmatpush3.bf16.msra.mxu1 %v26137_v9  ;;  %23996 = vmatprep.subr.bf16.mxu0 %v26138_v10  ;;  %v2055_v9 = vrot.slane %v28778_v0, %v26786_v36  ;;  %v841_v10 = vrot.slane %v28773_v13, %v26790_v38 }
 0x41f   : > { %24018 = vmatprep.subr.bf16.mxu1 %v26139_v50  ;;  %v2067_v50 = vrot.slane %v28778_v0, %v26790_v38 }
 0x421   : > { %23997 = vmatpush3.bf16.msra.mxu0 %v26140_v14  ;;  %v849_v14 = vrot.slane %v28773_v13, %v26794_v40 }
 0x422   : > { %24019 = vmatpush3.bf16.msra.mxu1 %v26141_v16  ;;  %23998 = vmatprep.subr.bf16.mxu0 %v26142_v37  ;;  %v2075_v16 = vrot.slane %v28778_v0, %v26794_v40  ;;  %v3096_v37 = vshll.u32 %v2641_v20, 16 }
 0x423   : > { %24020 = vmatprep.subr.bf16.mxu1 %v26143_v62  ;;  %v3102_v62 = vshll.u32 %v2643_v3, 16 }
 0x425   : > { %23999 = vmatpush3.bf16.msra.mxu0 %v26144_v56  ;;  %v3093_v56 = vshll.u32 %v2640_v39, 16 }
 0x426   : > { %24021 = vmatpush3.bf16.msra.mxu1 %v26145_v18  ;;  %24000 = vmatprep.subr.bf16.mxu0 %v26146_v21  ;;  %v2642_v18 = vpack.c.bf16 %v2055_v9, %v2055_v9  ;;  %v26164_v21 = vld [vmem:[%s26741_s6 + $0x2100] sm:$0xff]  }
 0x427   : > { %24022 = vmatprep.subr.bf16.mxu1 %v26147_v19  ;;  %v26165_v19 = vld [vmem:[%s26741_s6 + $0x2180] sm:$0xff]  }
 0x429   : > { %24001 = vmatpush3.bf16.msra.mxu0 %v26148_v42  ;;  %v1419_v42 = vpack.c.bf16 %v841_v10, %v841_v10  ;;  %v26185_v10 = vld [vmem:[%s26741_s6 + $0x21a8] sm:$0xff]  }
 0x42a   : > { %24023 = vmatpush3.bf16.msra.mxu1 %v26149_v48  ;;  %24002 = vmatprep.subr.bf16.mxu0 %v26150_v60  ;;  %v2645_v48 = vpack.c.bf16 %v2067_v50, %v2067_v50  ;;  %v3626_v60 = vsel %vm26821_vm2, %v1417_v41, %v3102_v62  ;;  %v26183_v41 = vld [vmem:[%s26741_s6 + $0x21e8] sm:$0xff]   ;;  %v26187_v62 = vld [vmem:[%s26741_s6 + $0x21f0] sm:$0xff]  }
 0x42b   : > { %v23700_v22 = vpop.f32.mrb[100].mxu0  ;;  %24024 = vmatprep.subr.bf16.mxu1 %v26151_v29  ;;  %v3623_v29 = vsel %vm26821_vm2, %v1414_v6, %v3093_v56  ;;  %18868 = vmatprep.mubr.bf16.mxu1 %v3626_v60  ;;  %v26188_v56 = vld [vmem:[%s26741_s6 + $0x2130] sm:$0xff]  }
 0x42c   : > { %v23722_v27 = vpop.f32.mrb[100].mxu1  ;;  %v23701_v28 = vpop.f32.mrb[101].mxu0 }
 0x42d   : > { %v23702_v31 = vadd.f32 %v23701_v28, %v23700_v22  ;;  %v23723_v33 = vpop.f32.mrb[101].mxu1  ;;  %v23703_v17 = vpop.f32.mrb[102].mxu0  ;;  %24003 = vmatpush3.bf16.msra.mxu0 %v26152_v35  ;;  %v1421_v22 = vpack.c.bf16 %v849_v14, %v849_v14  ;;  %v3624_v28 = vsel %vm26821_vm2, %v1415_v53, %v3096_v37  ;;  %v3108_v35 = vshll.u32 %v2645_v48, 16  ;;  %v26182_v53 = vld [vmem:[%s26741_s6 + $0x2168] sm:$0xff]   ;;  %v26186_v14 = vld [vmem:[%s26741_s6 + $0x2170] sm:$0xff]   ;;  %v26191_v48 = vld [vmem:[%s26741_s6 + $0x21f8] sm:$0xff]  }
 0x42e   : > { %v23724_v5 = vadd.f32 %v23723_v33, %v23722_v27  ;;  %v23725_v25 = vpop.f32.mrb[102].mxu1  ;;  %v23704_v44 = vpop.f32.mrb[103].mxu0  ;;  %24025 = vmatpush3.bf16.msra.mxu1 %v26153_v43  ;;  %24004 = vmatprep.subr.bf16.mxu0 %v26154_v46  ;;  %v2647_v27 = vpack.c.bf16 %v2075_v16, %v2075_v16  ;;  %v26166_v33 = vld [vmem:[%s26741_s6 + $0x2148] sm:$0xff]   ;;  %v2063_v16 = vrot.slane %v28778_v0, %v26864_v45 }
 0x42f   : > { %v18271_v51 = vadd.f32 %v23702_v31, %v28720_v54  ;;  %v23726_v23 = vpop.f32.mrb[103].mxu1  ;;  %24026 = vmatprep.subr.bf16.mxu1 %v26155_v52  ;;  %v26160_v54 = vld [vmem:[%s26741_s6 + $0x2038] sm:$0xff]   ;;  %v3099_v31 = vshll.u32 %v2642_v18, 16  ;;  %18828 = vmatprep.mubr.bf16.mxu0 %v3624_v28  ;;  %v26167_v17 = vld [vmem:[%s26741_s6 + $0x21c8] sm:$0xff]   ;;  %v3628_v46 = vsel %vm26821_vm2, %v1419_v42, %v3108_v35  ;;  %v26171_v52 = vld [vmem:[%s26741_s6 + $0x21d0] sm:$0xff]  }
 0x430   : > { %v26168_v25 = vld [vmem:[%s26741_s6 + $0x2108] sm:$0xff]   ;;  %v3114_v43 = vshll.u32 %v2647_v27, 16  ;;  %v26189_v18 = vld [vmem:[%s26741_s6 + $0x21b0] sm:$0xff]   ;;  %v2644_v42 = vpack.c.bf16 %v2063_v16, %v2063_v16  ;;  %v26192_v27 = vld [vmem:[%s26741_s6 + $0x2138] sm:$0xff]  }
 0x431   : > { %v28764_v24 = vadd.f32 %v23724_v5, %v18271_v51  ;;  %24005 = vmatpush3.bf16.msra.mxu0 %v26156_v11  ;;  %v3625_v5 = vsel %vm26821_vm2, %v1416_v7, %v3099_v31  ;;  %v26169_v44 = vld [vmem:[%s26741_s6 + $0x2188] sm:$0xff]   ;;  %v26170_v51 = vld [vmem:[%s26741_s6 + $0x2150] sm:$0xff]   ;;  %v26193_v28 = vld [vmem:[%s26741_s6 + $0x21b8] sm:$0xff]  }
 0x432   : > { %24027 = vmatpush3.bf16.msra.mxu1 %v26157_v63  ;;  %24006 = vmatprep.subr.bf16.mxu0 %v26158_v57  ;;  %v3630_v23 = vsel %vm26821_vm2, %v1421_v22, %v3114_v43  ;;  %v26172_v11 = vld [vmem:[%s26741_s6 + $0x2110] sm:$0xff]   ;;  %v26174_v57 = vld [vmem:[%s26741_s6 + $0x2158] sm:$0xff]   ;;  %v845_v22 = vrot.slane %v28773_v13, %v26868_v47  ;;  %v26194_v31 = vld [vmem:[%s26741_s6 + $0x2240] sm:$0xff]  }
 0x433   : > { %24028 = vmatprep.subr.bf16.mxu1 %v26159_v61  ;;  %v26173_v63 = vld [vmem:[%s26741_s6 + $0x2190] sm:$0xff]   ;;  %v26175_v61 = vld [vmem:[%s26741_s6 + $0x21d8] sm:$0xff]   ;;  %v26195_v35 = vld [vmem:[%s26741_s6 + $0x22c0] sm:$0xff]  }
 0x434   : > { %v26198_v43 = vld [vmem:[%s26741_s6 + $0x2248] sm:$0xff]   ;;  %v26218_v16 = vld [vmem:[%s26741_s6 + $0x2270] sm:$0xff]  }
 0x435   : > { %24007 = vmatpush3.bf16.msra.mxu0 %v26160_v54  ;;  %v26176_v54 = vld [vmem:[%s26741_s6 + $0x2118] sm:$0xff]  }
 0x436   : > { %24029 = vmatpush3.bf16.msra.mxu1 %v26161_v59  ;;  %24036 = vmatprep.subr.bf16.mxu0 %v26162_v49  ;;  %v26177_v59 = vld [vmem:[%s26741_s6 + $0x2198] sm:$0xff]  }
 0x437   : > { %24058 = vmatprep.subr.bf16.mxu1 %v26163_v8  ;;  %v26184_v8 = vld [vmem:[%s26741_s6 + $0x2128] sm:$0xff]  }
 0x438   : > { %18829 = vmatmul.mubr.bf16.vlgmr.msra.gmra.mrb[128].mxu0 %v3623_v29  ;;  %v3105_v29 = vshll.u32 %v2644_v42, 16  ;;  %v28896_v42 = vld [vmem:[%s26731_s24 + $0x88] sm:$0xff] }
 0x439   : > { %18869 = vmatmul.mubr.bf16.vlgmr.msra.gmra.mrb[128].mxu1 %v3625_v5  ;;  %24037 = vmatpush3.bf16.msra.mxu0 %v26164_v21  ;;  %v26190_v21 = vld [vmem:[%s26741_s6 + $0x2178] sm:$0xff]   ;;  %v26197_v5 = vld [vmem:[%s26741_s6 + $0x2280] sm:$0xff]  }
 0x43a   : > { %24059 = vmatpush3.bf16.msra.mxu1 %v26165_v19  ;;  %24038 = vmatprep.subr.bf16.mxu0 %v26166_v33  ;;  %v837_v19 = vrot.slane %v28773_v13, %v26864_v45  ;;  %v1420_v33 = vpack.c.bf16 %v845_v22, %v845_v22  ;;  %v26196_v13 = vld [vmem:[%s26741_s6 + $0x2200] sm:$0xff]   ;;  %v26225_v22 = vld [vmem:[%s26741_s6 + $0x22b8] sm:$0xff]  }
 0x43b   : > { %24060 = vmatprep.subr.bf16.mxu1 %v26167_v17  ;;  %18908 = vmatprep.mubr.bf16.mxu0 %v3628_v46  ;;  %v26199_v46 = vld [vmem:[%s26741_s6 + $0x22c8] sm:$0xff]  }
 0x43c   : > { %18948 = vmatprep.mubr.bf16.mxu1 %v3630_v23  ;;  %v1418_v60 = vpack.c.bf16 %v837_v19, %v837_v19  ;;  %v26201_v23 = vld [vmem:[%s26741_s6 + $0x2288] sm:$0xff]   ;;  %v26224_v19 = vld [vmem:[%s26741_s6 + $0x2238] sm:$0xff]  }
 0x43d   : > { %24039 = vmatpush3.bf16.msra.mxu0 %v26168_v25 }
 0x43e   : > { %24061 = vmatpush3.bf16.msra.mxu1 %v26169_v44  ;;  %24040 = vmatprep.subr.bf16.mxu0 %v26170_v51  ;;  %v3627_v25 = vsel %vm26821_vm2, %v1418_v60, %v3105_v29  ;;  %v26200_v51 = vld [vmem:[%s26741_s6 + $0x2208] sm:$0xff]   ;;  %v853_v29 = vrot.slane %v28896_v42, %v26782_v34 }
 0x43f   : > { %24062 = vmatprep.subr.bf16.mxu1 %v26171_v52  ;;  %v26202_v52 = vld [vmem:[%s26741_s6 + $0x2250] sm:$0xff]  }
 0x441   : > { %24041 = vmatpush3.bf16.msra.mxu0 %v26172_v11  ;;  %v26203_v11 = vld [vmem:[%s26741_s6 + $0x22d0] sm:$0xff]  }
 0x442   : > { %24063 = vmatpush3.bf16.msra.mxu1 %v26173_v63  ;;  %24042 = vmatprep.subr.bf16.mxu0 %v26174_v57  ;;  %v26204_v63 = vld [vmem:[%s26741_s6 + $0x2210] sm:$0xff]  }
 0x443   : > { %24064 = vmatprep.subr.bf16.mxu1 %v26175_v61  ;;  %v26205_v57 = vld [vmem:[%s26741_s6 + $0x2290] sm:$0xff]   ;;  %v26206_v61 = vld [vmem:[%s26741_s6 + $0x2258] sm:$0xff]  }
 0x445   : > { %24043 = vmatpush3.bf16.msra.mxu0 %v26176_v54  ;;  %v26207_v54 = vld [vmem:[%s26741_s6 + $0x22d8] sm:$0xff]  }
 0x446   : > { %24065 = vmatpush3.bf16.msra.mxu1 %v26177_v59  ;;  %24044 = vmatprep.subr.bf16.mxu0 %v26178_v58  ;;  %v26208_v59 = vld [vmem:[%s26741_s6 + $0x2218] sm:$0xff]  }
 0x447   : > { %24066 = vmatprep.subr.bf16.mxu1 %v26179_v1  ;;  %v26209_v58 = vld [vmem:[%s26741_s6 + $0x2298] sm:$0xff]   ;;  %v26210_v1 = vld [vmem:[%s26741_s6 + $0x2260] sm:$0xff]  }
 0x449   : > { %24045 = vmatpush3.bf16.msra.mxu0 %v26180_v15  ;;  %v26211_v15 = vld [vmem:[%s26741_s6 + $0x22e0] sm:$0xff]  }
 0x44a   : > { %24067 = vmatpush3.bf16.msra.mxu1 %v26181_v12  ;;  %24046 = vmatprep.subr.bf16.mxu0 %v26182_v53  ;;  %v26213_v12 = vld [vmem:[%s26741_s6 + $0x22a0] sm:$0xff]  }
 0x44b   : > { %v23744_v2 = vpop.f32.mrb[104].mxu0  ;;  %24068 = vmatprep.subr.bf16.mxu1 %v26183_v41 }
 0x44c   : > { %v23745_v26 = vpop.f32.mrb[105].mxu0  ;;  %v23766_v4 = vpop.f32.mrb[104].mxu1 }
 0x44d   : > { %v23746_v49 = vadd.f32 %v23745_v26, %v23744_v2  ;;  %v23747_v6 = vpop.f32.mrb[106].mxu0  ;;  %v23767_v7 = vpop.f32.mrb[105].mxu1  ;;  %24047 = vmatpush3.bf16.msra.mxu0 %v26184_v8  ;;  %v26212_v2 = vld [vmem:[%s26741_s6 + $0x2220] sm:$0xff]   ;;  %v26215_v8 = vld [vmem:[%s26741_s6 + $0x22e8] sm:$0xff]  }
 0x44e   : > { %v23748_v20 = vpop.f32.mrb[107].mxu0  ;;  %v23768_v39 = vadd.f32 %v23767_v7, %v23766_v4  ;;  %v23769_v9 = vpop.f32.mrb[106].mxu1  ;;  %24069 = vmatpush3.bf16.msra.mxu1 %v26185_v10  ;;  %24048 = vmatprep.subr.bf16.mxu0 %v26186_v14  ;;  %v26217_v10 = vld [vmem:[%s26741_s6 + $0x22a8] sm:$0xff]  }
 0x44f   : > { %v18351_v3 = vadd.f32 %v23746_v49, %v28764_v24  ;;  %v23770_v50 = vpop.f32.mrb[107].mxu1  ;;  %v2071_v24 = vrot.slane %v28778_v0, %v26868_v47  ;;  %24070 = vmatprep.subr.bf16.mxu1 %v26187_v62  ;;  %v26214_v49 = vld [vmem:[%s26741_s6 + $0x2268] sm:$0xff]  }
 0x450   : > { %v26216_v9 = vld [vmem:[%s26741_s6 + $0x2228] sm:$0xff]  }
 0x451   : > { %v28842_v37 = vadd.f32 %v23768_v39, %v18351_v3  ;;  %v2646_v0 = vpack.c.bf16 %v2071_v24, %v2071_v24  ;;  %24049 = vmatpush3.bf16.msra.mxu0 %v26188_v56  ;;  %v26220_v24 = vld [vmem:[%s26741_s6 + $0x2230] sm:$0xff]  }
 0x452   : > { %24071 = vmatpush3.bf16.msra.mxu1 %v26189_v18  ;;  %24050 = vmatprep.subr.bf16.mxu0 %v26190_v21  ;;  %v26221_v56 = vld [vmem:[%s26741_s6 + $0x22b0] sm:$0xff]   ;;  %v26222_v18 = vld [vmem:[%s26741_s6 + $0x2278] sm:$0xff]  }
 0x453   : > { %v3111_v17 = vshll.u32 %v2646_v0, 16  ;;  %24072 = vmatprep.subr.bf16.mxu1 %v26191_v48  ;;  %v26223_v21 = vld [vmem:[%s26741_s6 + $0x22f8] sm:$0xff]   ;;  %v28899_v48 = vld [vmem:[%s26736_s27 + $0x88] sm:$0xff]  ;;  %v857_v0 = vrot.slane %v28896_v42, %v26774_v30 }
 0x454   : > { %v2091_v60 = vrot.slane %v28899_v48, %v26778_v32 }
 0x455   : > { %24051 = vmatpush3.bf16.msra.mxu0 %v26192_v27  ;;  %v3629_v44 = vsel %vm26821_vm2, %v1420_v33, %v3111_v17  ;;  %v2083_v27 = vrot.slane %v28899_v48, %v26774_v30  ;;  %v861_v33 = vrot.slane %v28896_v42, %v26786_v36  ;;  %v26226_v17 = vld [vmem:[%s26741_s6 + $0x2340] sm:$0xff]  }
 0x456   : > { %24073 = vmatpush3.bf16.msra.mxu1 %v26193_v28  ;;  %24080 = vmatprep.subr.bf16.mxu0 %v26194_v31  ;;  %v865_v28 = vrot.slane %v28896_v42, %v26778_v32  ;;  %v2079_v31 = vrot.slane %v28899_v48, %v26782_v34 }
 0x457   : > { %24102 = vmatprep.subr.bf16.mxu1 %v26195_v35  ;;  %v1423_v35 = vpack.c.bf16 %v857_v0, %v857_v0  ;;  %v26241_v0 = vld [vmem:[%s26741_s6 + $0x2398] sm:$0xff]  }
 0x458   : > { %18909 = vmatmul.mubr.bf16.vlgmr.msra.gmra.mrb[132].mxu0 %v3627_v25  ;;  %v2651_v25 = vpack.c.bf16 %v2091_v60, %v2091_v60  ;;  %v26245_v60 = vld [vmem:[%s26741_s6 + $0x23a0] sm:$0xff]  }
 0x459   : > { %18949 = vmatmul.mubr.bf16.vlgmr.msra.gmra.mrb[132].mxu1 %v3629_v44  ;;  %24081 = vmatpush3.bf16.msra.mxu0 %v26196_v13  ;;  %v2649_v13 = vpack.c.bf16 %v2083_v27, %v2083_v27  ;;  %v1422_v44 = vpack.c.bf16 %v853_v29, %v853_v29  ;;  %v26243_v27 = vld [vmem:[%s26741_s6 + $0x23e0] sm:$0xff]  }
 0x45a   : > { %24103 = vmatpush3.bf16.msra.mxu1 %v26197_v5  ;;  %24082 = vmatprep.subr.bf16.mxu0 %v26198_v43  ;;  %v1425_v5 = vpack.c.bf16 %v865_v28, %v865_v28  ;;  %v26227_v43 = vld [vmem:[%s26741_s6 + $0x23c0] sm:$0xff]  }
 0x45b   : > { %24104 = vmatprep.subr.bf16.mxu1 %v26199_v46  ;;  %v2648_v46 = vpack.c.bf16 %v2079_v31, %v2079_v31  ;;  %v26244_v28 = vld [vmem:[%s26741_s6 + $0x2320] sm:$0xff]  }
 0x45d   : > { %24083 = vmatpush3.bf16.msra.mxu0 %v26200_v51  ;;  %v1424_v51 = vpack.c.bf16 %v861_v33, %v861_v33  ;;  %v26246_v33 = vld [vmem:[%s26741_s6 + $0x2368] sm:$0xff]  }
 0x45e   : > { %24105 = vmatpush3.bf16.msra.mxu1 %v26201_v23  ;;  %24084 = vmatprep.subr.bf16.mxu0 %v26202_v52  ;;  %v2087_v23 = vrot.slane %v28899_v48, %v26786_v36  ;;  %v3120_v52 = vshll.u32 %v2649_v13, 16 }
 0x45f   : > { %24106 = vmatprep.subr.bf16.mxu1 %v26203_v11  ;;  %v3126_v11 = vshll.u32 %v2651_v25, 16  ;;  %v26247_v25 = vld [vmem:[%s26741_s6 + $0x23e8] sm:$0xff]  }
 0x461   : > { %24085 = vmatpush3.bf16.msra.mxu0 %v26204_v63  ;;  %v873_v63 = vrot.slane %v28896_v42, %v26790_v38 }
 0x462   : > { %24107 = vmatpush3.bf16.msra.mxu1 %v26205_v57  ;;  %24086 = vmatprep.subr.bf16.mxu0 %v26206_v61  ;;  %v2099_v57 = vrot.slane %v28899_v48, %v26790_v38  ;;  %v3117_v61 = vshll.u32 %v2648_v46, 16  ;;  %v26248_v46 = vld [vmem:[%s26741_s6 + $0x2328] sm:$0xff]  }
 0x463   : > { %24108 = vmatprep.subr.bf16.mxu1 %v26207_v54  ;;  %v2650_v54 = vpack.c.bf16 %v2087_v23, %v2087_v23 }
 0x465   : > { %24087 = vmatpush3.bf16.msra.mxu0 %v26208_v59  ;;  %v26228_v59 = vld [vmem:[%s26741_s6 + $0x2300] sm:$0xff]  }
 0x466   : > { %24109 = vmatpush3.bf16.msra.mxu1 %v26209_v58  ;;  %24088 = vmatprep.subr.bf16.mxu0 %v26210_v1  ;;  %v881_v58 = vrot.slane %v28896_v42, %v26794_v40  ;;  %v2107_v1 = vrot.slane %v28899_v48, %v26794_v40 }
 0x467   : > { %24110 = vmatprep.subr.bf16.mxu1 %v26211_v15  ;;  %v3632_v15 = vsel %vm26821_vm2, %v1423_v35, %v3120_v52 }
 0x468   : > { %18988 = vmatprep.mubr.bf16.mxu0 %v3632_v15 }
 0x469   : > { %24089 = vmatpush3.bf16.msra.mxu0 %v26212_v2  ;;  %v3634_v2 = vsel %vm26821_vm2, %v1425_v5, %v3126_v11  ;;  %v2095_v11 = vrot.slane %v28899_v48, %v26864_v45 }
 0x46a   : > { %24111 = vmatpush3.bf16.msra.mxu1 %v26213_v12  ;;  %24090 = vmatprep.subr.bf16.mxu0 %v26214_v49  ;;  %v26230_v12 = vld [vmem:[%s26741_s6 + $0x2348] sm:$0xff]   ;;  %v3631_v49 = vsel %vm26821_vm2, %v1422_v44, %v3117_v61  ;;  %v26251_v61 = vld [vmem:[%s26741_s6 + $0x23f0] sm:$0xff]  }
 0x46b   : > { %v23788_v26 = vpop.f32.mrb[108].mxu0  ;;  %24112 = vmatprep.subr.bf16.mxu1 %v26215_v8  ;;  %19028 = vmatprep.mubr.bf16.mxu1 %v3634_v2  ;;  %v26231_v8 = vld [vmem:[%s26741_s6 + $0x23c8] sm:$0xff]   ;;  %v2652_v15 = vpack.c.bf16 %v2095_v11, %v2095_v11  ;;  %v26254_v2 = vld [vmem:[%s26741_s6 + $0x2378] sm:$0xff]  }
 0x46c   : > { %v23789_v4 = vpop.f32.mrb[109].mxu0  ;;  %v23810_v53 = vpop.f32.mrb[108].mxu1 }
 0x46d   : > { %v23790_v41 = vadd.f32 %v23789_v4, %v23788_v26  ;;  %v23791_v6 = vpop.f32.mrb[110].mxu0  ;;  %v23811_v7 = vpop.f32.mrb[109].mxu1  ;;  %24091 = vmatpush3.bf16.msra.mxu0 %v26216_v9  ;;  %v1427_v26 = vpack.c.bf16 %v873_v63, %v873_v63  ;;  %v2653_v4 = vpack.c.bf16 %v2099_v57, %v2099_v57  ;;  %v26250_v57 = vld [vmem:[%s26741_s6 + $0x2370] sm:$0xff]  }
 0x46e   : > { %v23812_v3 = vadd.f32 %v23811_v7, %v23810_v53  ;;  %v23813_v39 = vpop.f32.mrb[110].mxu1  ;;  %v23792_v50 = vpop.f32.mrb[111].mxu0  ;;  %24113 = vmatpush3.bf16.msra.mxu1 %v26217_v10  ;;  %24092 = vmatprep.subr.bf16.mxu0 %v26218_v16  ;;  %v3123_v53 = vshll.u32 %v2650_v54, 16  ;;  %v1429_v6 = vpack.c.bf16 %v881_v58, %v881_v58  ;;  %v2655_v7 = vpack.c.bf16 %v2107_v1, %v2107_v1  ;;  %v26234_v10 = vld [vmem:[%s26741_s6 + $0x2350] sm:$0xff]  }
 0x46f   : > { %v18431_v20 = vadd.f32 %v23790_v41, %v28842_v37  ;;  %v23814_v14 = vpop.f32.mrb[111].mxu1  ;;  %v26219_v37 = vld [vmem:[%s26741_s6 + $0x22f0] sm:$0xff]   ;;  %v26229_v41 = vld [vmem:[%s26741_s6 + $0x2380] sm:$0xff]   ;;  %v26232_v39 = vld [vmem:[%s26741_s6 + $0x2308] sm:$0xff]   ;;  %v2103_v54 = vrot.slane %v28899_v48, %v26868_v47  ;;  %v877_v48 = vrot.slane %v28896_v42, %v26868_v47 }
 0x470   : > { %24114 = vmatprep.subr.bf16.mxu1 %v26219_v37  ;;  %v3138_v9 = vshll.u32 %v2655_v7, 16  ;;  %v26233_v14 = vld [vmem:[%s26741_s6 + $0x2388] sm:$0xff]   ;;  %v26235_v37 = vld [vmem:[%s26741_s6 + $0x23d0] sm:$0xff]  }
 0x471   : > { %v28887_v62 = vadd.f32 %v23812_v3, %v18431_v20  ;;  %24093 = vmatpush3.bf16.msra.mxu0 %v26220_v24  ;;  %v3132_v20 = vshll.u32 %v2653_v4, 16  ;;  %v3633_v3 = vsel %vm26821_vm2, %v1424_v51, %v3123_v53  ;;  %v26236_v24 = vld [vmem:[%s26741_s6 + $0x2310] sm:$0xff]   ;;  %v26249_v51 = vld [vmem:[%s26741_s6 + $0x23a8] sm:$0xff]   ;;  %v26256_v4 = vld [vmem:[%s26741_s6 + $0x2338] sm:$0xff]   ;;  %v1428_v7 = vpack.c.bf16 %v877_v48, %v877_v48 }
 0x472   : > { %24115 = vmatpush3.bf16.msra.mxu1 %v26221_v56  ;;  %24094 = vmatprep.subr.bf16.mxu0 %v26222_v18  ;;  %v3638_v16 = vsel %vm26821_vm2, %v1429_v6, %v3138_v9  ;;  %v26238_v56 = vld [vmem:[%s26741_s6 + $0x2358] sm:$0xff]   ;;  %v26237_v18 = vld [vmem:[%s26741_s6 + $0x2390] sm:$0xff]   ;;  %v26258_v6 = vld [vmem:[%s26741_s6 + $0x2440] sm:$0xff]  }
 0x473   : > { %24116 = vmatprep.subr.bf16.mxu1 %v26223_v21  ;;  %v3636_v50 = vsel %vm26821_vm2, %v1427_v26, %v3132_v20  ;;  %v26239_v21 = vld [vmem:[%s26741_s6 + $0x23d8] sm:$0xff]   ;;  %v26252_v58 = vld [vmem:[%s26741_s6 + $0x2330] sm:$0xff]   ;;  %v2654_v26 = vpack.c.bf16 %v2103_v54, %v2103_v54  ;;  %v26259_v20 = vld [vmem:[%s26741_s6 + $0x24c0] sm:$0xff]  }
 0x474   : > { %v26253_v1 = vld [vmem:[%s26741_s6 + $0x23b0] sm:$0xff]   ;;  %v26262_v9 = vld [vmem:[%s26741_s6 + $0x2448] sm:$0xff]  }
 0x475   : > { %24095 = vmatpush3.bf16.msra.mxu0 %v26224_v19  ;;  %v26240_v19 = vld [vmem:[%s26741_s6 + $0x2318] sm:$0xff]  }
 0x476   : > { %24117 = vmatpush3.bf16.msra.mxu1 %v26225_v22  ;;  %24124 = vmatprep.subr.bf16.mxu0 %v26226_v17  ;;  %v26242_v22 = vld [vmem:[%s26741_s6 + $0x2360] sm:$0xff]  }
 0x477   : > { %24146 = vmatprep.subr.bf16.mxu1 %v26227_v43 }
 0x478   : > { %18989 = vmatmul.mubr.bf16.vlgmr.msra.gmra.mrb[136].mxu0 %v3631_v49  ;;  %v26257_v49 = vld [vmem:[%s26741_s6 + $0x23b8] sm:$0xff]  }
 0x479   : > { %24125 = vmatpush3.bf16.msra.mxu0 %v26228_v59  ;;  %19029 = vmatmul.mubr.bf16.vlgmr.msra.gmra.mrb[136].mxu1 %v3633_v3 }
 0x47a   : > { %24126 = vmatprep.subr.bf16.mxu0 %v26230_v12  ;;  %24147 = vmatpush3.bf16.msra.mxu1 %v26229_v41  ;;  %v26255_v12 = vld [vmem:[%s26741_s6 + $0x23f8] sm:$0xff]   ;;  %v3129_v41 = vshll.u32 %v2652_v15, 16 }
 0x47b   : > { %19068 = vmatprep.mubr.bf16.mxu0 %v3636_v50  ;;  %24148 = vmatprep.subr.bf16.mxu1 %v26231_v8  ;;  %v3135_v8 = vshll.u32 %v2654_v26, 16  ;;  %v26263_v50 = vld [vmem:[%s26741_s6 + $0x24c8] sm:$0xff]   ;;  %v26287_v15 = vld [vmem:[%s26741_s6 + $0x24f8] sm:$0xff]   ;;  %v29026_v26 = vld [vmem:[%s26736_s27 + $0x90] sm:$0xff] }
 0x47c   : > { %19108 = vmatprep.mubr.bf16.mxu1 %v3638_v16  ;;  %v26265_v16 = vld [vmem:[%s26741_s6 + $0x2488] sm:$0xff]  }
 0x47d   : > { %24127 = vmatpush3.bf16.msra.mxu0 %v26232_v39  ;;  %v26261_v39 = vld [vmem:[%s26741_s6 + $0x2480] sm:$0xff]  }
 0x47e   : > { %24128 = vmatprep.subr.bf16.mxu0 %v26234_v10  ;;  %24149 = vmatpush3.bf16.msra.mxu1 %v26233_v14  ;;  %v3637_v10 = vsel %vm26821_vm2, %v1428_v7, %v3135_v8  ;;  %v26264_v14 = vld [vmem:[%s26741_s6 + $0x2408] sm:$0xff]   ;;  %v2111_v7 = vrot.slane %v29026_v26, %v26782_v34  ;;  %v2119_v8 = vrot.slane %v29026_v26, %v26786_v36 }
 0x47f   : > { %24150 = vmatprep.subr.bf16.mxu1 %v26235_v37  ;;  %v26266_v37 = vld [vmem:[%s26741_s6 + $0x2450] sm:$0xff]  }
 0x481   : > { %24129 = vmatpush3.bf16.msra.mxu0 %v26236_v24  ;;  %v26267_v24 = vld [vmem:[%s26741_s6 + $0x24d0] sm:$0xff]  }
 0x482   : > { %24130 = vmatprep.subr.bf16.mxu0 %v26238_v56  ;;  %24151 = vmatpush3.bf16.msra.mxu1 %v26237_v18  ;;  %v26268_v56 = vld [vmem:[%s26741_s6 + $0x2410] sm:$0xff]  }
 0x483   : > { %24152 = vmatprep.subr.bf16.mxu1 %v26239_v21  ;;  %v26269_v18 = vld [vmem:[%s26741_s6 + $0x2490] sm:$0xff]   ;;  %v26270_v21 = vld [vmem:[%s26741_s6 + $0x2458] sm:$0xff]  }
 0x485   : > { %24131 = vmatpush3.bf16.msra.mxu0 %v26240_v19  ;;  %v26271_v19 = vld [vmem:[%s26741_s6 + $0x24d8] sm:$0xff]  }
 0x486   : > { %24132 = vmatprep.subr.bf16.mxu0 %v26242_v22  ;;  %24153 = vmatpush3.bf16.msra.mxu1 %v26241_v0  ;;  %v26272_v22 = vld [vmem:[%s26741_s6 + $0x2418] sm:$0xff]  }
 0x487   : > { %24154 = vmatprep.subr.bf16.mxu1 %v26243_v27  ;;  %v26273_v0 = vld [vmem:[%s26741_s6 + $0x2498] sm:$0xff]   ;;  %v26274_v27 = vld [vmem:[%s26741_s6 + $0x2460] sm:$0xff]  }
 0x489   : > { %24133 = vmatpush3.bf16.msra.mxu0 %v26244_v28  ;;  %v26275_v28 = vld [vmem:[%s26741_s6 + $0x24e0] sm:$0xff]  }
 0x48a   : > { %24134 = vmatprep.subr.bf16.mxu0 %v26246_v33  ;;  %24155 = vmatpush3.bf16.msra.mxu1 %v26245_v60  ;;  %v26276_v60 = vld [vmem:[%s26741_s6 + $0x2420] sm:$0xff]  }
 0x48b   : > { %v23832_v29 = vpop.f32.mrb[112].mxu0  ;;  %24156 = vmatprep.subr.bf16.mxu1 %v26247_v25  ;;  %v26280_v25 = vld [vmem:[%s26741_s6 + $0x2428] sm:$0xff]  }
 0x48c   : > { %v23854_v31 = vpop.f32.mrb[112].mxu1  ;;  %v23833_v17 = vpop.f32.mrb[113].mxu0 }
 0x48d   : > { %v23855_v35 = vpop.f32.mrb[113].mxu1  ;;  %v23834_v13 = vadd.f32 %v23833_v17, %v23832_v29  ;;  %v23835_v43 = vpop.f32.mrb[114].mxu0  ;;  %24135 = vmatpush3.bf16.msra.mxu0 %v26248_v46  ;;  %v26277_v29 = vld [vmem:[%s26741_s6 + $0x24a0] sm:$0xff]  }
 0x48e   : > { %v23856_v5 = vadd.f32 %v23855_v35, %v23854_v31  ;;  %v23857_v44 = vpop.f32.mrb[114].mxu1  ;;  %v23836_v23 = vpop.f32.mrb[115].mxu0  ;;  %24136 = vmatprep.subr.bf16.mxu0 %v26250_v57  ;;  %24157 = vmatpush3.bf16.msra.mxu1 %v26249_v51  ;;  %v26278_v31 = vld [vmem:[%s26741_s6 + $0x2468] sm:$0xff]  }
 0x48f   : > { %v23858_v52 = vpop.f32.mrb[115].mxu1  ;;  %v18511_v63 = vadd.f32 %v23834_v13, %v28887_v62  ;;  %v869_v62 = vrot.slane %v28896_v42, %v26864_v45  ;;  %24158 = vmatprep.subr.bf16.mxu1 %v26251_v61  ;;  %v26260_v42 = vld [vmem:[%s26741_s6 + $0x2400] sm:$0xff]   ;;  %v26281_v23 = vld [vmem:[%s26741_s6 + $0x24a8] sm:$0xff]   ;;  %v26283_v61 = vld [vmem:[%s26741_s6 + $0x24f0] sm:$0xff]  }
 0x491   : > { %v28969_v59 = vadd.f32 %v23856_v5, %v18511_v63  ;;  %24137 = vmatpush3.bf16.msra.mxu0 %v26252_v58  ;;  %v1426_v53 = vpack.c.bf16 %v869_v62, %v869_v62  ;;  %v26279_v5 = vld [vmem:[%s26741_s6 + $0x24e8] sm:$0xff]   ;;  %v26282_v63 = vld [vmem:[%s26741_s6 + $0x2470] sm:$0xff]   ;;  %v26286_v62 = vld [vmem:[%s26741_s6 + $0x2478] sm:$0xff]  }
 0x492   : > { %24138 = vmatprep.subr.bf16.mxu0 %v26254_v2  ;;  %24159 = vmatpush3.bf16.msra.mxu1 %v26253_v1  ;;  %v26284_v58 = vld [vmem:[%s26741_s6 + $0x2430] sm:$0xff]   ;;  %v26288_v2 = vld [vmem:[%s26741_s6 + $0x2438] sm:$0xff]  }
 0x493   : > { %24160 = vmatprep.subr.bf16.mxu1 %v26255_v12  ;;  %v3635_v3 = vsel %vm26821_vm2, %v1426_v53, %v3129_v41  ;;  %v26285_v1 = vld [vmem:[%s26741_s6 + $0x24b0] sm:$0xff]   ;;  %v2115_v41 = vrot.slane %v29026_v26, %v26774_v30 }
 0x494   : > { %v29021_v12 = vld [vmem:[%s26731_s24 + $0x90] sm:$0xff] }
 0x495   : > { %24139 = vmatpush3.bf16.msra.mxu0 %v26256_v4  ;;  %v889_v48 = vrot.slane %v29021_v12, %v26774_v30  ;;  %v897_v4 = vrot.slane %v29021_v12, %v26778_v32  ;;  %v893_v53 = vrot.slane %v29021_v12, %v26786_v36 }
 0x496   : > { %24168 = vmatprep.subr.bf16.mxu0 %v26258_v6  ;;  %24161 = vmatpush3.bf16.msra.mxu1 %v26257_v49  ;;  %v885_v49 = vrot.slane %v29021_v12, %v26782_v34  ;;  %v2123_v6 = vrot.slane %v29026_v26, %v26778_v32 }
 0x497   : > { %24190 = vmatprep.subr.bf16.mxu1 %v26259_v20  ;;  %v26290_v20 = vld [vmem:[%s26741_s6 + $0x2540] sm:$0xff]  }
 0x498   : > { %19069 = vmatmul.mubr.bf16.vlgmr.msra.gmra.mrb[140].mxu0 %v3635_v3  ;;  %v1433_v3 = vpack.c.bf16 %v897_v4, %v897_v4  ;;  %v26307_v4 = vld [vmem:[%s26741_s6 + $0x25e0] sm:$0xff]  }
 0x499   : > { %24169 = vmatpush3.bf16.msra.mxu0 %v26260_v42  ;;  %19109 = vmatmul.mubr.bf16.vlgmr.msra.gmra.mrb[140].mxu1 %v3637_v10  ;;  %v1431_v42 = vpack.c.bf16 %v889_v48, %v889_v48  ;;  %v26291_v10 = vld [vmem:[%s26741_s6 + $0x25c0] sm:$0xff]  }
 0x49a   : > { %24170 = vmatprep.subr.bf16.mxu0 %v26262_v9  ;;  %24191 = vmatpush3.bf16.msra.mxu1 %v26261_v39  ;;  %v1430_v39 = vpack.c.bf16 %v885_v49, %v885_v49  ;;  %v1432_v9 = vpack.c.bf16 %v893_v53, %v893_v53  ;;  %v26306_v48 = vld [vmem:[%s26741_s6 + $0x2560] sm:$0xff]  }
 0x49b   : > { %24192 = vmatprep.subr.bf16.mxu1 %v26263_v50  ;;  %v2657_v50 = vpack.c.bf16 %v2115_v41, %v2115_v41  ;;  %v26308_v49 = vld [vmem:[%s26741_s6 + $0x2520] sm:$0xff]  }
 0x49c   : > { %v26309_v53 = vld [vmem:[%s26741_s6 + $0x25a0] sm:$0xff]  }
 0x49d   : > { %24171 = vmatpush3.bf16.msra.mxu0 %v26264_v14  ;;  %v2659_v14 = vpack.c.bf16 %v2123_v6, %v2123_v6 }
 0x49e   : > { %24172 = vmatprep.subr.bf16.mxu0 %v26266_v37  ;;  %24193 = vmatpush3.bf16.msra.mxu1 %v26265_v16  ;;  %v2656_v16 = vpack.c.bf16 %v2111_v7, %v2111_v7  ;;  %v2658_v37 = vpack.c.bf16 %v2119_v8, %v2119_v8  ;;  %v26310_v8 = vld [vmem:[%s26741_s6 + $0x2568] sm:$0xff]  }
 0x49f   : > { %24194 = vmatprep.subr.bf16.mxu1 %v26267_v24  ;;  %v26292_v24 = vld [vmem:[%s26741_s6 + $0x2500] sm:$0xff]  }
 0x4a1   : > { %24173 = vmatpush3.bf16.msra.mxu0 %v26268_v56  ;;  %v905_v56 = vrot.slane %v29021_v12, %v26790_v38 }
 0x4a2   : > { %24174 = vmatprep.subr.bf16.mxu0 %v26270_v21  ;;  %24195 = vmatpush3.bf16.msra.mxu1 %v26269_v18  ;;  %v2131_v18 = vrot.slane %v29026_v26, %v26790_v38  ;;  %v913_v21 = vrot.slane %v29021_v12, %v26794_v40 }
 0x4a3   : > { %24196 = vmatprep.subr.bf16.mxu1 %v26271_v19  ;;  %v2139_v19 = vrot.slane %v29026_v26, %v26794_v40 }
 0x4a5   : > { %24175 = vmatpush3.bf16.msra.mxu0 %v26272_v22  ;;  %v3144_v22 = vshll.u32 %v2657_v50, 16 }
 0x4a6   : > { %24176 = vmatprep.subr.bf16.mxu0 %v26274_v27  ;;  %24197 = vmatpush3.bf16.msra.mxu1 %v26273_v0  ;;  %v3150_v0 = vshll.u32 %v2659_v14, 16  ;;  %v3141_v27 = vshll.u32 %v2656_v16, 16 }
 0x4a7   : > { %24198 = vmatprep.subr.bf16.mxu1 %v26275_v28  ;;  %v3147_v28 = vshll.u32 %v2658_v37, 16  ;;  %v2127_v37 = vrot.slane %v29026_v26, %v26864_v45 }
 0x4a9   : > { %24177 = vmatpush3.bf16.msra.mxu0 %v26276_v60  ;;  %v26293_v60 = vld [vmem:[%s26741_s6 + $0x2580] sm:$0xff]  }
 0x4aa   : > { %24178 = vmatprep.subr.bf16.mxu0 %v26278_v31  ;;  %24199 = vmatpush3.bf16.msra.mxu1 %v26277_v29  ;;  %v26294_v29 = vld [vmem:[%s26741_s6 + $0x2548] sm:$0xff]   ;;  %v1435_v31 = vpack.c.bf16 %v905_v56, %v905_v56 }
 0x4ab   : > { %v23876_v33 = vpop.f32.mrb[116].mxu0  ;;  %24200 = vmatprep.subr.bf16.mxu1 %v26279_v5  ;;  %v3642_v5 = vsel %vm26821_vm2, %v1433_v3, %v3150_v0  ;;  %v26316_v0 = vld [vmem:[%s26741_s6 + $0x2530] sm:$0xff]  }
 0x4ac   : > { %v23898_v17 = vpop.f32.mrb[116].mxu1  ;;  %v23877_v35 = vpop.f32.mrb[117].mxu0  ;;  %19188 = vmatprep.mubr.bf16.mxu1 %v3642_v5 }
 0x4ad   : > { %v23899_v13 = vpop.f32.mrb[117].mxu1  ;;  %v23878_v43 = vadd.f32 %v23877_v35, %v23876_v33  ;;  %v23879_v46 = vpop.f32.mrb[118].mxu0  ;;  %24179 = vmatpush3.bf16.msra.mxu0 %v26280_v25  ;;  %v2661_v33 = vpack.c.bf16 %v2131_v18, %v2131_v18  ;;  %v2663_v35 = vpack.c.bf16 %v2139_v19, %v2139_v19  ;;  %v3639_v25 = vsel %vm26821_vm2, %v1430_v39, %v3141_v27  ;;  %v26314_v18 = vld [vmem:[%s26741_s6 + $0x2570] sm:$0xff]  }
 0x4ae   : > { %v23900_v44 = vadd.f32 %v23899_v13, %v23898_v17  ;;  %v23901_v51 = vpop.f32.mrb[118].mxu1  ;;  %v23880_v52 = vpop.f32.mrb[119].mxu0  ;;  %24180 = vmatprep.subr.bf16.mxu0 %v26282_v63  ;;  %24201 = vmatpush3.bf16.msra.mxu1 %v26281_v23  ;;  %v1437_v17 = vpack.c.bf16 %v913_v21, %v913_v21  ;;  %v3640_v13 = vsel %vm26821_vm2, %v1431_v42, %v3144_v22  ;;  %v26296_v46 = vld [vmem:[%s26741_s6 + $0x2508] sm:$0xff]   ;;  %v26315_v19 = vld [vmem:[%s26741_s6 + $0x25f0] sm:$0xff]  }
 0x4af   : > { %v23902_v11 = vpop.f32.mrb[119].mxu1  ;;  %v18591_v57 = vadd.f32 %v23878_v43, %v28969_v59  ;;  %24202 = vmatprep.subr.bf16.mxu1 %v26283_v61  ;;  %v26289_v59 = vld [vmem:[%s26741_s6 + $0x24b8] sm:$0xff]   ;;  %v3641_v43 = vsel %vm26821_vm2, %v1432_v9, %v3147_v28  ;;  %19148 = vmatprep.mubr.bf16.mxu0 %v3640_v13  ;;  %v3156_v51 = vshll.u32 %v2661_v33, 16  ;;  %v26297_v23 = vld [vmem:[%s26741_s6 + $0x2588] sm:$0xff]   ;;  %v3162_v52 = vshll.u32 %v2663_v35, 16  ;;  %v26317_v27 = vld [vmem:[%s26741_s6 + $0x25b0] sm:$0xff]  }
 0x4b0   : > { %v26298_v11 = vld [vmem:[%s26741_s6 + $0x2550] sm:$0xff]   ;;  %v26312_v9 = vld [vmem:[%s26741_s6 + $0x2528] sm:$0xff]   ;;  %v2135_v21 = vrot.slane %v29026_v26, %v26868_v47  ;;  %v2660_v28 = vpack.c.bf16 %v2127_v37, %v2127_v37  ;;  %v909_v26 = vrot.slane %v29021_v12, %v26868_v47  ;;  %v26320_v33 = vld [vmem:[%s26741_s6 + $0x2538] sm:$0xff]  }
 0x4b1   : > { %v29012_v54 = vadd.f32 %v23900_v44, %v18591_v57  ;;  %24181 = vmatpush3.bf16.msra.mxu0 %v26284_v58  ;;  %v26295_v44 = vld [vmem:[%s26741_s6 + $0x25c8] sm:$0xff]   ;;  %v3644_v63 = vsel %vm26821_vm2, %v1435_v31, %v3156_v51  ;;  %v26299_v57 = vld [vmem:[%s26741_s6 + $0x25d0] sm:$0xff]   ;;  %v3646_v61 = vsel %vm26821_vm2, %v1437_v17, %v3162_v52  ;;  %v26319_v31 = vld [vmem:[%s26741_s6 + $0x25f8] sm:$0xff]  }
 0x4b2   : > { %24182 = vmatprep.subr.bf16.mxu0 %v26286_v62  ;;  %24203 = vmatpush3.bf16.msra.mxu1 %v26285_v1  ;;  %v26300_v58 = vld [vmem:[%s26741_s6 + $0x2510] sm:$0xff]   ;;  %v26302_v62 = vld [vmem:[%s26741_s6 + $0x2558] sm:$0xff]   ;;  %v3153_v35 = vshll.u32 %v2660_v28, 16  ;;  %v1436_v5 = vpack.c.bf16 %v909_v26, %v909_v26  ;;  %v26326_v52 = vld [vmem:[%s26741_s6 + $0x2648] sm:$0xff]  }
 0x4b3   : > { %24204 = vmatprep.subr.bf16.mxu1 %v26287_v15  ;;  %v26301_v1 = vld [vmem:[%s26741_s6 + $0x2590] sm:$0xff]   ;;  %v26303_v15 = vld [vmem:[%s26741_s6 + $0x25d8] sm:$0xff]  }
 0x4b4   : > { %v26321_v17 = vld [vmem:[%s26741_s6 + $0x25b8] sm:$0xff]  }
 0x4b5   : > { %24183 = vmatpush3.bf16.msra.mxu0 %v26288_v2  ;;  %v26304_v2 = vld [vmem:[%s26741_s6 + $0x2518] sm:$0xff]  }
 0x4b6   : > { %24212 = vmatprep.subr.bf16.mxu0 %v26290_v20  ;;  %24205 = vmatpush3.bf16.msra.mxu1 %v26289_v59  ;;  %v26305_v59 = vld [vmem:[%s26741_s6 + $0x2598] sm:$0xff]   ;;  %v26311_v20 = vld [vmem:[%s26741_s6 + $0x25e8] sm:$0xff]  }
 0x4b7   : > { %24234 = vmatprep.subr.bf16.mxu1 %v26291_v10  ;;  %v26313_v10 = vld [vmem:[%s26741_s6 + $0x25a8] sm:$0xff]   ;;  %v26350_v28 = vld [vmem:[%s26741_s6 + $0x2678] sm:$0xff]  }
 0x4b8   : > { %19149 = vmatmul.mubr.bf16.vlgmr.msra.gmra.mrb[144].mxu0 %v3639_v25  ;;  %v26353_v26 = vld [vmem:[%s26741_s6 + $0x26b8] sm:$0xff]  }
 0x4b9   : > { %19189 = vmatmul.mubr.bf16.vlgmr.msra.gmra.mrb[144].mxu1 %v3641_v43  ;;  %24213 = vmatpush3.bf16.msra.mxu0 %v26292_v24  ;;  %v26322_v43 = vld [vmem:[%s26741_s6 + $0x2640] sm:$0xff]  }
 0x4ba   : > { %24235 = vmatpush3.bf16.msra.mxu1 %v26293_v60  ;;  %24214 = vmatprep.subr.bf16.mxu0 %v26294_v29  ;;  %v901_v60 = vrot.slane %v29021_v12, %v26864_v45  ;;  %v2662_v29 = vpack.c.bf16 %v2135_v21, %v2135_v21  ;;  %v26323_v12 = vld [vmem:[%s26741_s6 + $0x26c0] sm:$0xff]   ;;  %v26347_v21 = vld [vmem:[%s26741_s6 + $0x26f0] sm:$0xff]  }
 0x4bb   : > { %24236 = vmatprep.subr.bf16.mxu1 %v26295_v44  ;;  %19228 = vmatprep.mubr.bf16.mxu0 %v3644_v63  ;;  %v26324_v44 = vld [vmem:[%s26741_s6 + $0x2600] sm:$0xff]   ;;  %v26328_v63 = vld [vmem:[%s26741_s6 + $0x2608] sm:$0xff]  }
 0x4bc   : > { %19268 = vmatprep.mubr.bf16.mxu1 %v3646_v61  ;;  %v1434_v13 = vpack.c.bf16 %v901_v60, %v901_v60  ;;  %v3159_v25 = vshll.u32 %v2662_v29, 16  ;;  %v26330_v61 = vld [vmem:[%s26741_s6 + $0x2650] sm:$0xff]   ;;  %v26352_v60 = vld [vmem:[%s26741_s6 + $0x2638] sm:$0xff]  }
 0x4bd   : > { %24215 = vmatpush3.bf16.msra.mxu0 %v26296_v46  ;;  %v26325_v46 = vld [vmem:[%s26741_s6 + $0x2680] sm:$0xff]  }
 0x4be   : > { %24237 = vmatpush3.bf16.msra.mxu1 %v26297_v23  ;;  %24216 = vmatprep.subr.bf16.mxu0 %v26298_v11  ;;  %v3643_v51 = vsel %vm26821_vm2, %v1434_v13, %v3153_v35  ;;  %v3645_v23 = vsel %vm26821_vm2, %v1436_v5, %v3159_v25  ;;  %v26327_v11 = vld [vmem:[%s26741_s6 + $0x26c8] sm:$0xff]   ;;  %v26354_v25 = vld [vmem:[%s26741_s6 + $0x2740] sm:$0xff]  }
 0x4bf   : > { %24238 = vmatprep.subr.bf16.mxu1 %v26299_v57  ;;  %v26329_v57 = vld [vmem:[%s26741_s6 + $0x2688] sm:$0xff]  }
 0x4c1   : > { %24217 = vmatpush3.bf16.msra.mxu0 %v26300_v58  ;;  %v26331_v58 = vld [vmem:[%s26741_s6 + $0x26d0] sm:$0xff]  }
 0x4c2   : > { %24239 = vmatpush3.bf16.msra.mxu1 %v26301_v1  ;;  %24218 = vmatprep.subr.bf16.mxu0 %v26302_v62  ;;  %v26332_v1 = vld [vmem:[%s26741_s6 + $0x2610] sm:$0xff]  }
 0x4c3   : > { %24240 = vmatprep.subr.bf16.mxu1 %v26303_v15  ;;  %v26333_v62 = vld [vmem:[%s26741_s6 + $0x2690] sm:$0xff]   ;;  %v26334_v15 = vld [vmem:[%s26741_s6 + $0x2658] sm:$0xff]  }
 0x4c5   : > { %24219 = vmatpush3.bf16.msra.mxu0 %v26304_v2  ;;  %v26335_v2 = vld [vmem:[%s26741_s6 + $0x26d8] sm:$0xff]  }
 0x4c6   : > { %24241 = vmatpush3.bf16.msra.mxu1 %v26305_v59  ;;  %24220 = vmatprep.subr.bf16.mxu0 %v26306_v48  ;;  %v26336_v59 = vld [vmem:[%s26741_s6 + $0x2618] sm:$0xff]  }
 0x4c7   : > { %24242 = vmatprep.subr.bf16.mxu1 %v26307_v4  ;;  %v26337_v48 = vld [vmem:[%s26741_s6 + $0x2698] sm:$0xff]   ;;  %v26338_v4 = vld [vmem:[%s26741_s6 + $0x2660] sm:$0xff]  }
 0x4c9   : > { %24221 = vmatpush3.bf16.msra.mxu0 %v26308_v49  ;;  %v26339_v49 = vld [vmem:[%s26741_s6 + $0x26e0] sm:$0xff]  }
 0x4ca   : > { %24243 = vmatpush3.bf16.msra.mxu1 %v26309_v53  ;;  %24222 = vmatprep.subr.bf16.mxu0 %v26310_v8  ;;  %v26340_v53 = vld [vmem:[%s26741_s6 + $0x2620] sm:$0xff]  }
 0x4cb   : > { %v23920_v41 = vpop.f32.mrb[120].mxu0  ;;  %24244 = vmatprep.subr.bf16.mxu1 %v26311_v20  ;;  %v26342_v20 = vld [vmem:[%s26741_s6 + $0x2668] sm:$0xff]  }
 0x4cc   : > { %v23942_v6 = vpop.f32.mrb[120].mxu1  ;;  %v23921_v7 = vpop.f32.mrb[121].mxu0 }
 0x4cd   : > { %v23922_v42 = vadd.f32 %v23921_v7, %v23920_v41  ;;  %v23943_v3 = vpop.f32.mrb[121].mxu1  ;;  %v23923_v39 = vpop.f32.mrb[122].mxu0  ;;  %24223 = vmatpush3.bf16.msra.mxu0 %v26312_v9  ;;  %v26341_v41 = vld [vmem:[%s26741_s6 + $0x26a0] sm:$0xff]  }
 0x4ce   : > { %v23944_v50 = vadd.f32 %v23943_v3, %v23942_v6  ;;  %v23945_v14 = vpop.f32.mrb[122].mxu1  ;;  %v23924_v16 = vpop.f32.mrb[123].mxu0  ;;  %24245 = vmatpush3.bf16.msra.mxu1 %v26313_v10  ;;  %24224 = vmatprep.subr.bf16.mxu0 %v26314_v18  ;;  %v26344_v10 = vld [vmem:[%s26741_s6 + $0x2628] sm:$0xff]  }
 0x4cf   : > { %v18671_v24 = vadd.f32 %v23922_v42, %v29012_v54  ;;  %v23946_v56 = vpop.f32.mrb[123].mxu1  ;;  %v26318_v54 = vld [vmem:[%s26741_s6 + $0x2578] sm:$0xff]   ;;  %24246 = vmatprep.subr.bf16.mxu1 %v26315_v19  ;;  %v26343_v42 = vld [vmem:[%s26741_s6 + $0x26e8] sm:$0xff]  }
 0x4d0   : > { %v26345_v16 = vld [vmem:[%s26741_s6 + $0x26a8] sm:$0xff]  }
 0x4d1   : > { %v29093_v22 = vadd.f32 %v23944_v50, %v18671_v24  ;;  %24225 = vmatpush3.bf16.msra.mxu0 %v26316_v0  ;;  %v26346_v24 = vld [vmem:[%s26741_s6 + $0x2670] sm:$0xff]  }
 0x4d2   : > { %24247 = vmatpush3.bf16.msra.mxu1 %v26317_v27  ;;  %24226 = vmatprep.subr.bf16.mxu0 %v26318_v54  ;;  %v26348_v0 = vld [vmem:[%s26741_s6 + $0x2630] sm:$0xff]   ;;  %v26351_v54 = vld [vmem:[%s26741_s6 + $0x26f8] sm:$0xff]  }
 0x4d3   : > { %24248 = vmatprep.subr.bf16.mxu1 %v26319_v31  ;;  %v26349_v27 = vld [vmem:[%s26741_s6 + $0x26b0] sm:$0xff]   ;;  %v29150_v31 = vld [vmem:[%s26736_s27 + $0x98] sm:$0xff] }
 0x4d4   : > { %v2147_v35 = vrot.slane %v29150_v31, %v26774_v30  ;;  %v2155_v13 = vrot.slane %v29150_v31, %v26778_v32  ;;  %v2143_v5 = vrot.slane %v29150_v31, %v26782_v34 }
 0x4d5   : > { %24227 = vmatpush3.bf16.msra.mxu0 %v26320_v33 }
 0x4d6   : > { %24249 = vmatpush3.bf16.msra.mxu1 %v26321_v17  ;;  %24256 = vmatprep.subr.bf16.mxu0 %v26322_v43 }
 0x4d7   : > { %24278 = vmatprep.subr.bf16.mxu1 %v26323_v12 }
 0x4d8   : > { %19229 = vmatmul.mubr.bf16.vlgmr.msra.gmra.mrb[148].mxu0 %v3643_v51  ;;  %v26355_v51 = vld [vmem:[%s26741_s6 + $0x27c0] sm:$0xff]  }
 0x4d9   : > { %19269 = vmatmul.mubr.bf16.vlgmr.msra.gmra.mrb[148].mxu1 %v3645_v23  ;;  %24257 = vmatpush3.bf16.msra.mxu0 %v26324_v44  ;;  %v2665_v23 = vpack.c.bf16 %v2147_v35, %v2147_v35  ;;  %v26373_v35 = vld [vmem:[%s26741_s6 + $0x27a0] sm:$0xff]  }
 0x4da   : > { %24279 = vmatpush3.bf16.msra.mxu1 %v26325_v46  ;;  %24258 = vmatprep.subr.bf16.mxu0 %v26326_v52  ;;  %v2667_v52 = vpack.c.bf16 %v2155_v13, %v2155_v13 }
 0x4db   : > { %24280 = vmatprep.subr.bf16.mxu1 %v26327_v11  ;;  %v2664_v11 = vpack.c.bf16 %v2143_v5, %v2143_v5 }
 0x4dd   : > { %24259 = vmatpush3.bf16.msra.mxu0 %v26328_v63  ;;  %v2151_v63 = vrot.slane %v29150_v31, %v26786_v36 }
 0x4de   : > { %24281 = vmatpush3.bf16.msra.mxu1 %v26329_v57  ;;  %24260 = vmatprep.subr.bf16.mxu0 %v26330_v61 }
 0x4df   : > { %24282 = vmatprep.subr.bf16.mxu1 %v26331_v58  ;;  %v2163_v58 = vrot.slane %v29150_v31, %v26790_v38 }
 0x4e1   : > { %24261 = vmatpush3.bf16.msra.mxu0 %v26332_v1  ;;  %v3168_v1 = vshll.u32 %v2665_v23, 16  ;;  %v26376_v23 = vld [vmem:[%s26741_s6 + $0x2728] sm:$0xff]  }
 0x4e2   : > { %24283 = vmatpush3.bf16.msra.mxu1 %v26333_v62  ;;  %24262 = vmatprep.subr.bf16.mxu0 %v26334_v15  ;;  %v3174_v62 = vshll.u32 %v2667_v52, 16  ;;  %v3165_v15 = vshll.u32 %v2664_v11, 16 }
 0x4e3   : > { %24284 = vmatprep.subr.bf16.mxu1 %v26335_v2  ;;  %v2666_v2 = vpack.c.bf16 %v2151_v63, %v2151_v63 }
 0x4e5   : > { %24263 = vmatpush3.bf16.msra.mxu0 %v26336_v59  ;;  %v26356_v59 = vld [vmem:[%s26741_s6 + $0x2700] sm:$0xff]  }
 0x4e6   : > { %24285 = vmatpush3.bf16.msra.mxu1 %v26337_v48  ;;  %24264 = vmatprep.subr.bf16.mxu0 %v26338_v4  ;;  %v26357_v48 = vld [vmem:[%s26741_s6 + $0x2780] sm:$0xff]  }
 0x4e7   : > { %24286 = vmatprep.subr.bf16.mxu1 %v26339_v49  ;;  %v2669_v49 = vpack.c.bf16 %v2163_v58, %v2163_v58 }
 0x4e9   : > { %24265 = vmatpush3.bf16.msra.mxu0 %v26340_v53 }
 0x4ea   : > { %24287 = vmatpush3.bf16.msra.mxu1 %v26341_v41  ;;  %24266 = vmatprep.subr.bf16.mxu0 %v26342_v20  ;;  %v2171_v41 = vrot.slane %v29150_v31, %v26794_v40  ;;  %v3171_v20 = vshll.u32 %v2666_v2, 16 }
 0x4eb   : > { %v23964_v6 = vpop.f32.mrb[124].mxu0  ;;  %24288 = vmatprep.subr.bf16.mxu1 %v26343_v42  ;;  %v26358_v42 = vld [vmem:[%s26741_s6 + $0x2748] sm:$0xff]  }
 0x4ec   : > { %v23986_v7 = vpop.f32.mrb[124].mxu1  ;;  %v23965_v8 = vpop.f32.mrb[125].mxu0 }
 0x4ed   : > { %v23966_v3 = vadd.f32 %v23965_v8, %v23964_v6  ;;  %v23987_v39 = vpop.f32.mrb[125].mxu1  ;;  %v23967_v9 = vpop.f32.mrb[126].mxu0  ;;  %24267 = vmatpush3.bf16.msra.mxu0 %v26344_v10  ;;  %v2671_v10 = vpack.c.bf16 %v2171_v41, %v2171_v41 }
 0x4ee   : > { %v23988_v50 = vadd.f32 %v23987_v39, %v23986_v7  ;;  %v23989_v14 = vpop.f32.mrb[126].mxu1  ;;  %v23968_v37 = vpop.f32.mrb[127].mxu0  ;;  %24289 = vmatpush3.bf16.msra.mxu1 %v26345_v16  ;;  %24268 = vmatprep.subr.bf16.mxu0 %v26346_v24  ;;  %v3180_v39 = vshll.u32 %v2669_v49, 16  ;;  %v26361_v16 = vld [vmem:[%s26741_s6 + $0x2788] sm:$0xff]  }
 0x4ef   : > { %v18751_v56 = vadd.f32 %v23966_v3, %v29093_v22  ;;  %v23990_v18 = vpop.f32.mrb[127].mxu1  ;;  %24290 = vmatprep.subr.bf16.mxu1 %v26347_v21  ;;  %v29145_v22 = vld [vmem:[%s26731_s24 + $0x98] sm:$0xff]  ;;  %v26359_v3 = vld [vmem:[%s26741_s6 + $0x27c8] sm:$0xff]   ;;  %v3186_v24 = vshll.u32 %v2671_v10, 16  ;;  %v26388_v10 = vld [vmem:[%s26741_s6 + $0x2800] sm:$0xff]  }
 0x4f0   : > { %v921_v29 = vrot.slane %v29145_v22, %v26774_v30  ;;  %v929_v33 = vrot.slane %v29145_v22, %v26778_v32  ;;  %v917_v17 = vrot.slane %v29145_v22, %v26782_v34  ;;  %v925_v46 = vrot.slane %v29145_v22, %v26786_v36  ;;  %v26360_v14 = vld [vmem:[%s26741_s6 + $0x2708] sm:$0xff]   ;;  %v26363_v18 = vld [vmem:[%s26741_s6 + $0x27d0] sm:$0xff]  }
 0x4f1   : > { %v29136_v19 = vadd.f32 %v23988_v50, %v18751_v56  ;;  %24269 = vmatpush3.bf16.msra.mxu0 %v26348_v0  ;;  %v937_v61 = vrot.slane %v29145_v22, %v26790_v38  ;;  %v945_v53 = vrot.slane %v29145_v22, %v26794_v40  ;;  %v26362_v56 = vld [vmem:[%s26741_s6 + $0x2750] sm:$0xff]  }
 0x4f2   : > { %24291 = vmatpush3.bf16.msra.mxu1 %v26349_v27  ;;  %24270 = vmatprep.subr.bf16.mxu0 %v26350_v28  ;;  %v1439_v43 = vpack.c.bf16 %v921_v29, %v921_v29  ;;  %v1441_v12 = vpack.c.bf16 %v929_v33, %v929_v33  ;;  %v1438_v44 = vpack.c.bf16 %v917_v17, %v917_v17  ;;  %v26364_v0 = vld [vmem:[%s26741_s6 + $0x2710] sm:$0xff]   ;;  %v26366_v28 = vld [vmem:[%s26741_s6 + $0x2758] sm:$0xff]   ;;  %v26370_v29 = vld [vmem:[%s26741_s6 + $0x2760] sm:$0xff]  }
 0x4f3   : > { %24292 = vmatprep.subr.bf16.mxu1 %v26351_v54  ;;  %v1440_v57 = vpack.c.bf16 %v925_v46, %v925_v46  ;;  %v1443_v4 = vpack.c.bf16 %v937_v61, %v937_v61  ;;  %v1445_v9 = vpack.c.bf16 %v945_v53, %v945_v53  ;;  %v26365_v27 = vld [vmem:[%s26741_s6 + $0x2790] sm:$0xff]   ;;  %v26367_v54 = vld [vmem:[%s26741_s6 + $0x27d8] sm:$0xff]   ;;  %v26371_v33 = vld [vmem:[%s26741_s6 + $0x27e0] sm:$0xff]  }
 0x4f4   : > { %v3648_v6 = vsel %vm26821_vm2, %v1439_v43, %v3168_v1  ;;  %v3650_v7 = vsel %vm26821_vm2, %v1441_v12, %v3174_v62  ;;  %v3647_v8 = vsel %vm26821_vm2, %v1438_v44, %v3165_v15  ;;  %v26372_v17 = vld [vmem:[%s26741_s6 + $0x2720] sm:$0xff]   ;;  %v26374_v43 = vld [vmem:[%s26741_s6 + $0x2768] sm:$0xff]   ;;  %v2159_v1 = vrot.slane %v29150_v31, %v26864_v45  ;;  %v26378_v62 = vld [vmem:[%s26741_s6 + $0x2770] sm:$0xff]  }
 0x4f5   : > { %24271 = vmatpush3.bf16.msra.mxu0 %v26352_v60  ;;  %19308 = vmatprep.mubr.bf16.mxu0 %v3648_v6  ;;  %v3649_v50 = vsel %vm26821_vm2, %v1440_v57, %v3171_v20  ;;  %v3652_v37 = vsel %vm26821_vm2, %v1443_v4, %v3180_v39  ;;  %v3654_v21 = vsel %vm26821_vm2, %v1445_v9, %v3186_v24  ;;  %v26368_v60 = vld [vmem:[%s26741_s6 + $0x2718] sm:$0xff]   ;;  %v26375_v12 = vld [vmem:[%s26741_s6 + $0x27e8] sm:$0xff]   ;;  %v26386_v9 = vld [vmem:[%s26741_s6 + $0x2840] sm:$0xff]  }
 0x4f6   : > { %24293 = vmatpush3.bf16.msra.mxu1 %v26353_v26  ;;  %24300 = vmatprep.subr.bf16.mxu0 %v26354_v25  ;;  %v26369_v26 = vld [vmem:[%s26741_s6 + $0x2798] sm:$0xff]   ;;  %v26377_v61 = vld [vmem:[%s26741_s6 + $0x27a8] sm:$0xff]   ;;  %v2167_v15 = vrot.slane %v29150_v31, %v26868_v47  ;;  %v933_v4 = vrot.slane %v29145_v22, %v26864_v45  ;;  %v2668_v49 = vpack.c.bf16 %v2159_v1, %v2159_v1 }
 0x4f7   : > { %24322 = vmatprep.subr.bf16.mxu1 %v26355_v51  ;;  %19348 = vmatprep.mubr.bf16.mxu1 %v3650_v7  ;;  %v26382_v53 = vld [vmem:[%s26741_s6 + $0x2778] sm:$0xff]   ;;  %v941_v31 = vrot.slane %v29145_v22, %v26868_v47  ;;  %v26387_v22 = vld [vmem:[%s26741_s6 + $0x28c0] sm:$0xff]   ;;  %v26391_v24 = vld [vmem:[%s26741_s6 + $0x28c8] sm:$0xff]  }
 0x4f8   : > { %19309 = vmatmul.mubr.bf16.vlgmr.msra.gmra.mrb[152].mxu0 %v3647_v8  ;;  %v2670_v41 = vpack.c.bf16 %v2167_v15, %v2167_v15  ;;  %v26383_v6 = vld [vmem:[%s26741_s6 + $0x27f8] sm:$0xff]   ;;  %v1442_v20 = vpack.c.bf16 %v933_v4, %v933_v4  ;;  %v26411_v15 = vld [vmem:[%s26741_s6 + $0x28f0] sm:$0xff]  }
 0x4f9   : > { %19349 = vmatmul.mubr.bf16.vlgmr.msra.gmra.mrb[152].mxu1 %v3649_v50  ;;  %24301 = vmatpush3.bf16.msra.mxu0 %v26356_v59  ;;  %v26379_v59 = vld [vmem:[%s26741_s6 + $0x27f0] sm:$0xff]   ;;  %v26384_v7 = vld [vmem:[%s26741_s6 + $0x2738] sm:$0xff]  }
 0x4fa   : > { %24323 = vmatpush3.bf16.msra.mxu1 %v26357_v48  ;;  %24302 = vmatprep.subr.bf16.mxu0 %v26358_v42  ;;  %v26381_v48 = vld [vmem:[%s26741_s6 + $0x27b0] sm:$0xff]   ;;  %v26385_v8 = vld [vmem:[%s26741_s6 + $0x27b8] sm:$0xff]   ;;  %v3177_v42 = vshll.u32 %v2668_v49, 16  ;;  %v3183_v39 = vshll.u32 %v2670_v41, 16 }
 0x4fb   : > { %24324 = vmatprep.subr.bf16.mxu1 %v26359_v3  ;;  %19388 = vmatprep.mubr.bf16.mxu0 %v3652_v37  ;;  %v1444_v3 = vpack.c.bf16 %v941_v31, %v941_v31  ;;  %v26390_v37 = vld [vmem:[%s26741_s6 + $0x2848] sm:$0xff]   ;;  %v26414_v4 = vld [vmem:[%s26741_s6 + $0x2878] sm:$0xff]   ;;  %v29269_v31 = vld [vmem:[%s26731_s24 + $0xa0] sm:$0xff] }
 0x4fc   : > { %19428 = vmatprep.mubr.bf16.mxu1 %v3654_v21  ;;  %v3651_v50 = vsel %vm26821_vm2, %v1442_v20, %v3177_v42  ;;  %v26394_v21 = vld [vmem:[%s26741_s6 + $0x2850] sm:$0xff]   ;;  %v26415_v49 = vld [vmem:[%s26741_s6 + $0x28f8] sm:$0xff]   ;;  %v953_v41 = vrot.slane %v29269_v31, %v26774_v30  ;;  %v957_v20 = vrot.slane %v29269_v31, %v26786_v36 }
 0x4fd   : > { %24303 = vmatpush3.bf16.msra.mxu0 %v26360_v14  ;;  %v26389_v14 = vld [vmem:[%s26741_s6 + $0x2880] sm:$0xff]  }
 0x4fe   : > { %24325 = vmatpush3.bf16.msra.mxu1 %v26361_v16  ;;  %24304 = vmatprep.subr.bf16.mxu0 %v26362_v56  ;;  %v3653_v16 = vsel %vm26821_vm2, %v1444_v3, %v3183_v39  ;;  %v26392_v56 = vld [vmem:[%s26741_s6 + $0x2808] sm:$0xff]  }
 0x4ff   : > { %24326 = vmatprep.subr.bf16.mxu1 %v26363_v18  ;;  %v26393_v18 = vld [vmem:[%s26741_s6 + $0x2888] sm:$0xff]  }
 0x501   : > { %24305 = vmatpush3.bf16.msra.mxu0 %v26364_v0  ;;  %v26395_v0 = vld [vmem:[%s26741_s6 + $0x28d0] sm:$0xff]  }
 0x502   : > { %24327 = vmatpush3.bf16.msra.mxu1 %v26365_v27  ;;  %24306 = vmatprep.subr.bf16.mxu0 %v26366_v28  ;;  %v26396_v27 = vld [vmem:[%s26741_s6 + $0x2810] sm:$0xff]  }
 0x503   : > { %24328 = vmatprep.subr.bf16.mxu1 %v26367_v54  ;;  %v26397_v28 = vld [vmem:[%s26741_s6 + $0x2890] sm:$0xff]   ;;  %v26398_v54 = vld [vmem:[%s26741_s6 + $0x2858] sm:$0xff]  }
 0x505   : > { %24307 = vmatpush3.bf16.msra.mxu0 %v26368_v60  ;;  %v26399_v60 = vld [vmem:[%s26741_s6 + $0x28d8] sm:$0xff]  }
 0x506   : > { %24329 = vmatpush3.bf16.msra.mxu1 %v26369_v26  ;;  %24308 = vmatprep.subr.bf16.mxu0 %v26370_v29  ;;  %v26400_v26 = vld [vmem:[%s26741_s6 + $0x2818] sm:$0xff]  }
 0x507   : > { %24330 = vmatprep.subr.bf16.mxu1 %v26371_v33  ;;  %v26401_v29 = vld [vmem:[%s26741_s6 + $0x2898] sm:$0xff]   ;;  %v26402_v33 = vld [vmem:[%s26741_s6 + $0x2860] sm:$0xff]  }
 0x509   : > { %24309 = vmatpush3.bf16.msra.mxu0 %v26372_v17  ;;  %v26403_v17 = vld [vmem:[%s26741_s6 + $0x28e0] sm:$0xff]  }
 0x50a   : > { %24331 = vmatpush3.bf16.msra.mxu1 %v26373_v35  ;;  %24310 = vmatprep.subr.bf16.mxu0 %v26374_v43  ;;  %v26404_v35 = vld [vmem:[%s26741_s6 + $0x2820] sm:$0xff]  }
 0x50b   : > { %v24008_v13 = vpop.f32.mrb[128].mxu0  ;;  %24332 = vmatprep.subr.bf16.mxu1 %v26375_v12  ;;  %v26406_v12 = vld [vmem:[%s26741_s6 + $0x2868] sm:$0xff]  }
 0x50c   : > { %v24030_v5 = vpop.f32.mrb[128].mxu1  ;;  %v24009_v25 = vpop.f32.mrb[129].mxu0 }
 0x50d   : > { %v24010_v44 = vadd.f32 %v24009_v25, %v24008_v13  ;;  %v24031_v46 = vpop.f32.mrb[129].mxu1  ;;  %v24011_v51 = vpop.f32.mrb[130].mxu0  ;;  %24311 = vmatpush3.bf16.msra.mxu0 %v26376_v23  ;;  %v26405_v13 = vld [vmem:[%s26741_s6 + $0x28a0] sm:$0xff]  }
 0x50e   : > { %v24032_v52 = vadd.f32 %v24031_v46, %v24030_v5  ;;  %v24033_v11 = vpop.f32.mrb[130].mxu1  ;;  %v24012_v63 = vpop.f32.mrb[131].mxu0  ;;  %24333 = vmatpush3.bf16.msra.mxu1 %v26377_v61  ;;  %24312 = vmatprep.subr.bf16.mxu0 %v26378_v62 }
 0x50f   : > { %v18831_v57 = vadd.f32 %v24010_v44, %v29136_v19  ;;  %v24034_v58 = vpop.f32.mrb[131].mxu1  ;;  %v26380_v19 = vld [vmem:[%s26741_s6 + $0x2730] sm:$0xff]   ;;  %24334 = vmatprep.subr.bf16.mxu1 %v26379_v59  ;;  %v26407_v44 = vld [vmem:[%s26741_s6 + $0x28e8] sm:$0xff]  }
 0x510   : > { %v26410_v58 = vld [vmem:[%s26741_s6 + $0x2870] sm:$0xff]  }
 0x511   : > { %v29216_v2 = vadd.f32 %v24032_v52, %v18831_v57  ;;  %24313 = vmatpush3.bf16.msra.mxu0 %v26380_v19  ;;  %v26408_v52 = vld [vmem:[%s26741_s6 + $0x2828] sm:$0xff]   ;;  %v26412_v19 = vld [vmem:[%s26741_s6 + $0x2830] sm:$0xff]  }
 0x512   : > { %24335 = vmatpush3.bf16.msra.mxu1 %v26381_v48  ;;  %24314 = vmatprep.subr.bf16.mxu0 %v26382_v53  ;;  %v26409_v57 = vld [vmem:[%s26741_s6 + $0x28a8] sm:$0xff]   ;;  %v26413_v48 = vld [vmem:[%s26741_s6 + $0x28b0] sm:$0xff]   ;;  %v26417_v53 = vld [vmem:[%s26741_s6 + $0x28b8] sm:$0xff]  }
 0x513   : > { %24336 = vmatprep.subr.bf16.mxu1 %v26383_v6  ;;  %v29274_v6 = vld [vmem:[%s26736_s27 + $0xa0] sm:$0xff] }
 0x514   : > { %v2179_v42 = vrot.slane %v29274_v6, %v26774_v30  ;;  %v2187_v3 = vrot.slane %v29274_v6, %v26778_v32  ;;  %v2175_v39 = vrot.slane %v29274_v6, %v26782_v34 }
 0x515   : > { %24315 = vmatpush3.bf16.msra.mxu0 %v26384_v7  ;;  %v961_v7 = vrot.slane %v29269_v31, %v26778_v32 }
 0x516   : > { %24337 = vmatpush3.bf16.msra.mxu1 %v26385_v8  ;;  %24344 = vmatprep.subr.bf16.mxu0 %v26386_v9  ;;  %v949_v8 = vrot.slane %v29269_v31, %v26782_v34  ;;  %v26418_v9 = vld [vmem:[%s26741_s6 + $0x2940] sm:$0xff]  }
 0x517   : > { %24366 = vmatprep.subr.bf16.mxu1 %v26387_v22  ;;  %v1447_v22 = vpack.c.bf16 %v953_v41, %v953_v41  ;;  %v26434_v41 = vld [vmem:[%s26741_s6 + $0x2960] sm:$0xff]  }
 0x518   : > { %19389 = vmatmul.mubr.bf16.vlgmr.msra.gmra.mrb[156].mxu0 %v3651_v50  ;;  %v1446_v50 = vpack.c.bf16 %v949_v8, %v949_v8  ;;  %v26436_v8 = vld [vmem:[%s26741_s6 + $0x2920] sm:$0xff]  }
 0x519   : > { %19429 = vmatmul.mubr.bf16.vlgmr.msra.gmra.mrb[156].mxu1 %v3653_v16  ;;  %24345 = vmatpush3.bf16.msra.mxu0 %v26388_v10  ;;  %v1449_v10 = vpack.c.bf16 %v961_v7, %v961_v7  ;;  %v26419_v16 = vld [vmem:[%s26741_s6 + $0x29c0] sm:$0xff]  }
 0x51a   : > { %24367 = vmatpush3.bf16.msra.mxu1 %v26389_v14  ;;  %24346 = vmatprep.subr.bf16.mxu0 %v26390_v37  ;;  %v1448_v14 = vpack.c.bf16 %v957_v20, %v957_v20  ;;  %v2673_v37 = vpack.c.bf16 %v2179_v42, %v2179_v42  ;;  %v26435_v7 = vld [vmem:[%s26741_s6 + $0x29e0] sm:$0xff]  }
 0x51b   : > { %24368 = vmatprep.subr.bf16.mxu1 %v26391_v24  ;;  %v2675_v24 = vpack.c.bf16 %v2187_v3, %v2187_v3  ;;  %v26437_v42 = vld [vmem:[%s26741_s6 + $0x29a0] sm:$0xff]  }
 0x51d   : > { %24347 = vmatpush3.bf16.msra.mxu0 %v26392_v56  ;;  %v2672_v56 = vpack.c.bf16 %v2175_v39, %v2175_v39 }
 0x51e   : > { %24369 = vmatpush3.bf16.msra.mxu1 %v26393_v18  ;;  %24348 = vmatprep.subr.bf16.mxu0 %v26394_v21  ;;  %v2183_v18 = vrot.slane %v29274_v6, %v26786_v36  ;;  %v969_v21 = vrot.slane %v29269_v31, %v26790_v38 }
 0x51f   : > { %24370 = vmatprep.subr.bf16.mxu1 %v26395_v0  ;;  %v2195_v0 = vrot.slane %v29274_v6, %v26790_v38 }
 0x521   : > { %24349 = vmatpush3.bf16.msra.mxu0 %v26396_v27  ;;  %v977_v27 = vrot.slane %v29269_v31, %v26794_v40 }
 0x522   : > { %24371 = vmatpush3.bf16.msra.mxu1 %v26397_v28  ;;  %24350 = vmatprep.subr.bf16.mxu0 %v26398_v54  ;;  %v2203_v28 = vrot.slane %v29274_v6, %v26794_v40  ;;  %v3192_v54 = vshll.u32 %v2673_v37, 16 }
 0x523   : > { %24372 = vmatprep.subr.bf16.mxu1 %v26399_v60  ;;  %v3198_v60 = vshll.u32 %v2675_v24, 16 }
 0x525   : > { %24351 = vmatpush3.bf16.msra.mxu0 %v26400_v26  ;;  %v3189_v26 = vshll.u32 %v2672_v56, 16 }
 0x526   : > { %24373 = vmatpush3.bf16.msra.mxu1 %v26401_v29  ;;  %24352 = vmatprep.subr.bf16.mxu0 %v26402_v33  ;;  %v2674_v29 = vpack.c.bf16 %v2183_v18, %v2183_v18  ;;  %v26420_v33 = vld [vmem:[%s26741_s6 + $0x2900] sm:$0xff]  }
 0x527   : > { %24374 = vmatprep.subr.bf16.mxu1 %v26403_v17  ;;  %v26421_v17 = vld [vmem:[%s26741_s6 + $0x2980] sm:$0xff]  }
 0x529   : > { %24353 = vmatpush3.bf16.msra.mxu0 %v26404_v35  ;;  %v1451_v35 = vpack.c.bf16 %v969_v21, %v969_v21  ;;  %v26441_v21 = vld [vmem:[%s26741_s6 + $0x29a8] sm:$0xff]  }
 0x52a   : > { %24375 = vmatpush3.bf16.msra.mxu1 %v26405_v13  ;;  %24354 = vmatprep.subr.bf16.mxu0 %v26406_v12  ;;  %v2677_v13 = vpack.c.bf16 %v2195_v0, %v2195_v0  ;;  %v3658_v12 = vsel %vm26821_vm2, %v1449_v10, %v3198_v60  ;;  %v26439_v10 = vld [vmem:[%s26741_s6 + $0x29e8] sm:$0xff]   ;;  %v26443_v60 = vld [vmem:[%s26741_s6 + $0x29f0] sm:$0xff]  }
 0x52b   : > { %v24052_v5 = vpop.f32.mrb[132].mxu0  ;;  %24376 = vmatprep.subr.bf16.mxu1 %v26407_v44  ;;  %v3655_v44 = vsel %vm26821_vm2, %v1446_v50, %v3189_v26  ;;  %19508 = vmatprep.mubr.bf16.mxu1 %v3658_v12  ;;  %v26444_v26 = vld [vmem:[%s26741_s6 + $0x2930] sm:$0xff]  }
 0x52c   : > { %v24074_v25 = vpop.f32.mrb[132].mxu1  ;;  %v24053_v43 = vpop.f32.mrb[133].mxu0 }
 0x52d   : > { %v24054_v46 = vadd.f32 %v24053_v43, %v24052_v5  ;;  %v24075_v51 = vpop.f32.mrb[133].mxu1  ;;  %v24055_v23 = vpop.f32.mrb[134].mxu0  ;;  %24355 = vmatpush3.bf16.msra.mxu0 %v26408_v52  ;;  %v1453_v5 = vpack.c.bf16 %v977_v27, %v977_v27  ;;  %v3656_v43 = vsel %vm26821_vm2, %v1447_v22, %v3192_v54  ;;  %v3204_v52 = vshll.u32 %v2677_v13, 16  ;;  %v26438_v22 = vld [vmem:[%s26741_s6 + $0x2968] sm:$0xff]   ;;  %v26442_v27 = vld [vmem:[%s26741_s6 + $0x2970] sm:$0xff]   ;;  %v26447_v13 = vld [vmem:[%s26741_s6 + $0x29f8] sm:$0xff]  }
 0x52e   : > { %v24076_v11 = vadd.f32 %v24075_v51, %v24074_v25  ;;  %v24077_v63 = vpop.f32.mrb[134].mxu1  ;;  %v24056_v61 = vpop.f32.mrb[135].mxu0  ;;  %24377 = vmatpush3.bf16.msra.mxu1 %v26409_v57  ;;  %24356 = vmatprep.subr.bf16.mxu0 %v26410_v58  ;;  %v2679_v25 = vpack.c.bf16 %v2203_v28, %v2203_v28  ;;  %v26422_v51 = vld [vmem:[%s26741_s6 + $0x2948] sm:$0xff]   ;;  %v2191_v28 = vrot.slane %v29274_v6, %v26864_v45 }
 0x52f   : > { %v18911_v1 = vadd.f32 %v24054_v46, %v29216_v2  ;;  %v24078_v62 = vpop.f32.mrb[135].mxu1  ;;  %24378 = vmatprep.subr.bf16.mxu1 %v26411_v15  ;;  %v26416_v2 = vld [vmem:[%s26741_s6 + $0x2838] sm:$0xff]   ;;  %v3195_v46 = vshll.u32 %v2674_v29, 16  ;;  %19468 = vmatprep.mubr.bf16.mxu0 %v3656_v43  ;;  %v26423_v23 = vld [vmem:[%s26741_s6 + $0x29c8] sm:$0xff]   ;;  %v3660_v58 = vsel %vm26821_vm2, %v1451_v35, %v3204_v52  ;;  %v26427_v15 = vld [vmem:[%s26741_s6 + $0x29d0] sm:$0xff]  }
 0x530   : > { %v26424_v63 = vld [vmem:[%s26741_s6 + $0x2908] sm:$0xff]   ;;  %v3210_v57 = vshll.u32 %v2679_v25, 16  ;;  %v26445_v29 = vld [vmem:[%s26741_s6 + $0x29b0] sm:$0xff]   ;;  %v2676_v35 = vpack.c.bf16 %v2191_v28, %v2191_v28  ;;  %v26448_v25 = vld [vmem:[%s26741_s6 + $0x2938] sm:$0xff]  }
 0x531   : > { %v29260_v59 = vadd.f32 %v24076_v11, %v18911_v1  ;;  %24357 = vmatpush3.bf16.msra.mxu0 %v26412_v19  ;;  %v3657_v11 = vsel %vm26821_vm2, %v1448_v14, %v3195_v46  ;;  %v26425_v61 = vld [vmem:[%s26741_s6 + $0x2988] sm:$0xff]   ;;  %v26426_v1 = vld [vmem:[%s26741_s6 + $0x2950] sm:$0xff]   ;;  %v26449_v43 = vld [vmem:[%s26741_s6 + $0x29b8] sm:$0xff]  }
 0x532   : > { %24379 = vmatpush3.bf16.msra.mxu1 %v26413_v48  ;;  %24358 = vmatprep.subr.bf16.mxu0 %v26414_v4  ;;  %v3662_v62 = vsel %vm26821_vm2, %v1453_v5, %v3210_v57  ;;  %v26428_v19 = vld [vmem:[%s26741_s6 + $0x2910] sm:$0xff]   ;;  %v26430_v4 = vld [vmem:[%s26741_s6 + $0x2958] sm:$0xff]   ;;  %v973_v5 = vrot.slane %v29269_v31, %v26868_v47  ;;  %v26450_v46 = vld [vmem:[%s26741_s6 + $0x2a40] sm:$0xff]  }
 0x533   : > { %24380 = vmatprep.subr.bf16.mxu1 %v26415_v49  ;;  %v26429_v48 = vld [vmem:[%s26741_s6 + $0x2990] sm:$0xff]   ;;  %v26431_v49 = vld [vmem:[%s26741_s6 + $0x29d8] sm:$0xff]   ;;  %v26451_v52 = vld [vmem:[%s26741_s6 + $0x2ac0] sm:$0xff]  }
 0x534   : > { %v26454_v57 = vld [vmem:[%s26741_s6 + $0x2a48] sm:$0xff]   ;;  %v26474_v28 = vld [vmem:[%s26741_s6 + $0x2a70] sm:$0xff]  }
 0x535   : > { %24359 = vmatpush3.bf16.msra.mxu0 %v26416_v2  ;;  %v26432_v2 = vld [vmem:[%s26741_s6 + $0x2918] sm:$0xff]  }
 0x536   : > { %24381 = vmatpush3.bf16.msra.mxu1 %v26417_v53  ;;  %24388 = vmatprep.subr.bf16.mxu0 %v26418_v9  ;;  %v26433_v53 = vld [vmem:[%s26741_s6 + $0x2998] sm:$0xff]  }
 0x537   : > { %24410 = vmatprep.subr.bf16.mxu1 %v26419_v16  ;;  %v26440_v16 = vld [vmem:[%s26741_s6 + $0x2928] sm:$0xff]  }
 0x538   : > { %19469 = vmatmul.mubr.bf16.vlgmr.msra.gmra.mrb[160].mxu0 %v3655_v44  ;;  %v3201_v44 = vshll.u32 %v2676_v35, 16  ;;  %v29392_v35 = vld [vmem:[%s26731_s24 + $0xa8] sm:$0xff] }
 0x539   : > { %19509 = vmatmul.mubr.bf16.vlgmr.msra.gmra.mrb[160].mxu1 %v3657_v11  ;;  %24389 = vmatpush3.bf16.msra.mxu0 %v26420_v33  ;;  %v26446_v33 = vld [vmem:[%s26741_s6 + $0x2978] sm:$0xff]   ;;  %v26453_v11 = vld [vmem:[%s26741_s6 + $0x2a80] sm:$0xff]  }
 0x53a   : > { %24411 = vmatpush3.bf16.msra.mxu1 %v26421_v17  ;;  %24390 = vmatprep.subr.bf16.mxu0 %v26422_v51  ;;  %v965_v17 = vrot.slane %v29269_v31, %v26864_v45  ;;  %v1452_v51 = vpack.c.bf16 %v973_v5, %v973_v5  ;;  %v26452_v31 = vld [vmem:[%s26741_s6 + $0x2a00] sm:$0xff]   ;;  %v26481_v5 = vld [vmem:[%s26741_s6 + $0x2ab8] sm:$0xff]  }
 0x53b   : > { %24412 = vmatprep.subr.bf16.mxu1 %v26423_v23  ;;  %19548 = vmatprep.mubr.bf16.mxu0 %v3660_v58  ;;  %v26455_v58 = vld [vmem:[%s26741_s6 + $0x2ac8] sm:$0xff]  }
 0x53c   : > { %19588 = vmatprep.mubr.bf16.mxu1 %v3662_v62  ;;  %v1450_v12 = vpack.c.bf16 %v965_v17, %v965_v17  ;;  %v26457_v62 = vld [vmem:[%s26741_s6 + $0x2a88] sm:$0xff]   ;;  %v26480_v17 = vld [vmem:[%s26741_s6 + $0x2a38] sm:$0xff]  }
 0x53d   : > { %24391 = vmatpush3.bf16.msra.mxu0 %v26424_v63 }
 0x53e   : > { %24413 = vmatpush3.bf16.msra.mxu1 %v26425_v61  ;;  %24392 = vmatprep.subr.bf16.mxu0 %v26426_v1  ;;  %v3659_v63 = vsel %vm26821_vm2, %v1450_v12, %v3201_v44  ;;  %v26456_v1 = vld [vmem:[%s26741_s6 + $0x2a08] sm:$0xff]   ;;  %v981_v44 = vrot.slane %v29392_v35, %v26782_v34 }
 0x53f   : > { %24414 = vmatprep.subr.bf16.mxu1 %v26427_v15  ;;  %v26458_v15 = vld [vmem:[%s26741_s6 + $0x2a50] sm:$0xff]  }
 0x541   : > { %24393 = vmatpush3.bf16.msra.mxu0 %v26428_v19  ;;  %v26459_v19 = vld [vmem:[%s26741_s6 + $0x2ad0] sm:$0xff]  }
 0x542   : > { %24415 = vmatpush3.bf16.msra.mxu1 %v26429_v48  ;;  %24394 = vmatprep.subr.bf16.mxu0 %v26430_v4  ;;  %v26460_v48 = vld [vmem:[%s26741_s6 + $0x2a10] sm:$0xff]  }
 0x543   : > { %24416 = vmatprep.subr.bf16.mxu1 %v26431_v49  ;;  %v26461_v4 = vld [vmem:[%s26741_s6 + $0x2a90] sm:$0xff]   ;;  %v26462_v49 = vld [vmem:[%s26741_s6 + $0x2a58] sm:$0xff]  }
 0x545   : > { %24395 = vmatpush3.bf16.msra.mxu0 %v26432_v2  ;;  %v26463_v2 = vld [vmem:[%s26741_s6 + $0x2ad8] sm:$0xff]  }
 0x546   : > { %24417 = vmatpush3.bf16.msra.mxu1 %v26433_v53  ;;  %24396 = vmatprep.subr.bf16.mxu0 %v26434_v41  ;;  %v26464_v53 = vld [vmem:[%s26741_s6 + $0x2a18] sm:$0xff]  }
 0x547   : > { %24418 = vmatprep.subr.bf16.mxu1 %v26435_v7  ;;  %v26465_v41 = vld [vmem:[%s26741_s6 + $0x2a98] sm:$0xff]   ;;  %v26466_v7 = vld [vmem:[%s26741_s6 + $0x2a60] sm:$0xff]  }
 0x549   : > { %24397 = vmatpush3.bf16.msra.mxu0 %v26436_v8  ;;  %v26467_v8 = vld [vmem:[%s26741_s6 + $0x2ae0] sm:$0xff]  }
 0x54a   : > { %24419 = vmatpush3.bf16.msra.mxu1 %v26437_v42  ;;  %24398 = vmatprep.subr.bf16.mxu0 %v26438_v22  ;;  %v26469_v42 = vld [vmem:[%s26741_s6 + $0x2aa0] sm:$0xff]  }
 0x54b   : > { %v24096_v20 = vpop.f32.mrb[136].mxu0  ;;  %24420 = vmatprep.subr.bf16.mxu1 %v26439_v10 }
 0x54c   : > { %v24097_v3 = vpop.f32.mrb[137].mxu0  ;;  %v24118_v39 = vpop.f32.mrb[136].mxu1 }
 0x54d   : > { %v24098_v9 = vadd.f32 %v24097_v3, %v24096_v20  ;;  %v24099_v50 = vpop.f32.mrb[138].mxu0  ;;  %v24119_v14 = vpop.f32.mrb[137].mxu1  ;;  %24399 = vmatpush3.bf16.msra.mxu0 %v26440_v16  ;;  %v26468_v20 = vld [vmem:[%s26741_s6 + $0x2a20] sm:$0xff]   ;;  %v26471_v16 = vld [vmem:[%s26741_s6 + $0x2ae8] sm:$0xff]  }
 0x54e   : > { %v24100_v37 = vpop.f32.mrb[139].mxu0  ;;  %v24120_v56 = vadd.f32 %v24119_v14, %v24118_v39  ;;  %v24121_v18 = vpop.f32.mrb[138].mxu1  ;;  %24421 = vmatpush3.bf16.msra.mxu1 %v26441_v21  ;;  %24400 = vmatprep.subr.bf16.mxu0 %v26442_v27  ;;  %v26473_v21 = vld [vmem:[%s26741_s6 + $0x2aa8] sm:$0xff]  }
 0x54f   : > { %v18991_v24 = vadd.f32 %v24098_v9, %v29260_v59  ;;  %v24122_v0 = vpop.f32.mrb[139].mxu1  ;;  %v2199_v59 = vrot.slane %v29274_v6, %v26868_v47  ;;  %24422 = vmatprep.subr.bf16.mxu1 %v26443_v60  ;;  %v26470_v9 = vld [vmem:[%s26741_s6 + $0x2a68] sm:$0xff]  }
 0x550   : > { %v26472_v18 = vld [vmem:[%s26741_s6 + $0x2a28] sm:$0xff]  }
 0x551   : > { %v29338_v54 = vadd.f32 %v24120_v56, %v18991_v24  ;;  %v2678_v6 = vpack.c.bf16 %v2199_v59, %v2199_v59  ;;  %24401 = vmatpush3.bf16.msra.mxu0 %v26444_v26  ;;  %v26476_v59 = vld [vmem:[%s26741_s6 + $0x2a30] sm:$0xff]  }
 0x552   : > { %24423 = vmatpush3.bf16.msra.mxu1 %v26445_v29  ;;  %24402 = vmatprep.subr.bf16.mxu0 %v26446_v33  ;;  %v26477_v26 = vld [vmem:[%s26741_s6 + $0x2ab0] sm:$0xff]   ;;  %v26478_v29 = vld [vmem:[%s26741_s6 + $0x2a78] sm:$0xff]  }
 0x553   : > { %v3207_v23 = vshll.u32 %v2678_v6, 16  ;;  %24424 = vmatprep.subr.bf16.mxu1 %v26447_v13  ;;  %v26479_v33 = vld [vmem:[%s26741_s6 + $0x2af8] sm:$0xff]   ;;  %v29395_v13 = vld [vmem:[%s26736_s27 + $0xa8] sm:$0xff]  ;;  %v985_v6 = vrot.slane %v29392_v35, %v26774_v30 }
 0x554   : > { %v2219_v12 = vrot.slane %v29395_v13, %v26778_v32 }
 0x555   : > { %24403 = vmatpush3.bf16.msra.mxu0 %v26448_v25  ;;  %v3661_v61 = vsel %vm26821_vm2, %v1452_v51, %v3207_v23  ;;  %v2211_v25 = vrot.slane %v29395_v13, %v26774_v30  ;;  %v989_v51 = vrot.slane %v29392_v35, %v26786_v36  ;;  %v26482_v23 = vld [vmem:[%s26741_s6 + $0x2b40] sm:$0xff]  }
 0x556   : > { %24425 = vmatpush3.bf16.msra.mxu1 %v26449_v43  ;;  %24432 = vmatprep.subr.bf16.mxu0 %v26450_v46  ;;  %v993_v43 = vrot.slane %v29392_v35, %v26778_v32  ;;  %v2207_v46 = vrot.slane %v29395_v13, %v26782_v34 }
 0x557   : > { %24454 = vmatprep.subr.bf16.mxu1 %v26451_v52  ;;  %v1455_v52 = vpack.c.bf16 %v985_v6, %v985_v6  ;;  %v26497_v6 = vld [vmem:[%s26741_s6 + $0x2b98] sm:$0xff]  }
 0x558   : > { %19549 = vmatmul.mubr.bf16.vlgmr.msra.gmra.mrb[164].mxu0 %v3659_v63  ;;  %v2683_v63 = vpack.c.bf16 %v2219_v12, %v2219_v12  ;;  %v26501_v12 = vld [vmem:[%s26741_s6 + $0x2ba0] sm:$0xff]  }
 0x559   : > { %19589 = vmatmul.mubr.bf16.vlgmr.msra.gmra.mrb[164].mxu1 %v3661_v61  ;;  %24433 = vmatpush3.bf16.msra.mxu0 %v26452_v31  ;;  %v2681_v31 = vpack.c.bf16 %v2211_v25, %v2211_v25  ;;  %v1454_v61 = vpack.c.bf16 %v981_v44, %v981_v44  ;;  %v26499_v25 = vld [vmem:[%s26741_s6 + $0x2be0] sm:$0xff]  }
 0x55a   : > { %24455 = vmatpush3.bf16.msra.mxu1 %v26453_v11  ;;  %24434 = vmatprep.subr.bf16.mxu0 %v26454_v57  ;;  %v1457_v11 = vpack.c.bf16 %v993_v43, %v993_v43  ;;  %v26483_v57 = vld [vmem:[%s26741_s6 + $0x2bc0] sm:$0xff]  }
 0x55b   : > { %24456 = vmatprep.subr.bf16.mxu1 %v26455_v58  ;;  %v2680_v58 = vpack.c.bf16 %v2207_v46, %v2207_v46  ;;  %v26500_v43 = vld [vmem:[%s26741_s6 + $0x2b20] sm:$0xff]  }
 0x55d   : > { %24435 = vmatpush3.bf16.msra.mxu0 %v26456_v1  ;;  %v1456_v1 = vpack.c.bf16 %v989_v51, %v989_v51  ;;  %v26502_v51 = vld [vmem:[%s26741_s6 + $0x2b68] sm:$0xff]  }
 0x55e   : > { %24457 = vmatpush3.bf16.msra.mxu1 %v26457_v62  ;;  %24436 = vmatprep.subr.bf16.mxu0 %v26458_v15  ;;  %v2215_v62 = vrot.slane %v29395_v13, %v26786_v36  ;;  %v3216_v15 = vshll.u32 %v2681_v31, 16 }
 0x55f   : > { %24458 = vmatprep.subr.bf16.mxu1 %v26459_v19  ;;  %v3222_v19 = vshll.u32 %v2683_v63, 16  ;;  %v26503_v63 = vld [vmem:[%s26741_s6 + $0x2be8] sm:$0xff]  }
 0x561   : > { %24437 = vmatpush3.bf16.msra.mxu0 %v26460_v48  ;;  %v1001_v48 = vrot.slane %v29392_v35, %v26790_v38 }
 0x562   : > { %24459 = vmatpush3.bf16.msra.mxu1 %v26461_v4  ;;  %24438 = vmatprep.subr.bf16.mxu0 %v26462_v49  ;;  %v2227_v4 = vrot.slane %v29395_v13, %v26790_v38  ;;  %v3213_v49 = vshll.u32 %v2680_v58, 16  ;;  %v26504_v58 = vld [vmem:[%s26741_s6 + $0x2b28] sm:$0xff]  }
 0x563   : > { %24460 = vmatprep.subr.bf16.mxu1 %v26463_v2  ;;  %v2682_v2 = vpack.c.bf16 %v2215_v62, %v2215_v62 }
 0x565   : > { %24439 = vmatpush3.bf16.msra.mxu0 %v26464_v53  ;;  %v26484_v53 = vld [vmem:[%s26741_s6 + $0x2b00] sm:$0xff]  }
 0x566   : > { %24461 = vmatpush3.bf16.msra.mxu1 %v26465_v41  ;;  %24440 = vmatprep.subr.bf16.mxu0 %v26466_v7  ;;  %v1009_v41 = vrot.slane %v29392_v35, %v26794_v40  ;;  %v2235_v7 = vrot.slane %v29395_v13, %v26794_v40 }
 0x567   : > { %24462 = vmatprep.subr.bf16.mxu1 %v26467_v8  ;;  %v3664_v8 = vsel %vm26821_vm2, %v1455_v52, %v3216_v15 }
 0x568   : > { %19628 = vmatprep.mubr.bf16.mxu0 %v3664_v8 }
 0x569   : > { %24441 = vmatpush3.bf16.msra.mxu0 %v26468_v20  ;;  %v3666_v20 = vsel %vm26821_vm2, %v1457_v11, %v3222_v19  ;;  %v2223_v19 = vrot.slane %v29395_v13, %v26864_v45 }
 0x56a   : > { %24463 = vmatpush3.bf16.msra.mxu1 %v26469_v42  ;;  %24442 = vmatprep.subr.bf16.mxu0 %v26470_v9  ;;  %v26486_v42 = vld [vmem:[%s26741_s6 + $0x2b48] sm:$0xff]   ;;  %v3663_v9 = vsel %vm26821_vm2, %v1454_v61, %v3213_v49  ;;  %v26507_v49 = vld [vmem:[%s26741_s6 + $0x2bf0] sm:$0xff]  }
 0x56b   : > { %v24140_v3 = vpop.f32.mrb[140].mxu0  ;;  %24464 = vmatprep.subr.bf16.mxu1 %v26471_v16  ;;  %19668 = vmatprep.mubr.bf16.mxu1 %v3666_v20  ;;  %v26487_v16 = vld [vmem:[%s26741_s6 + $0x2bc8] sm:$0xff]   ;;  %v2684_v8 = vpack.c.bf16 %v2223_v19, %v2223_v19  ;;  %v26510_v20 = vld [vmem:[%s26741_s6 + $0x2b78] sm:$0xff]  }
 0x56c   : > { %v24141_v39 = vpop.f32.mrb[141].mxu0  ;;  %v24162_v22 = vpop.f32.mrb[140].mxu1 }
 0x56d   : > { %v24142_v10 = vadd.f32 %v24141_v39, %v24140_v3  ;;  %v24143_v50 = vpop.f32.mrb[142].mxu0  ;;  %v24163_v14 = vpop.f32.mrb[141].mxu1  ;;  %24443 = vmatpush3.bf16.msra.mxu0 %v26472_v18  ;;  %v1459_v3 = vpack.c.bf16 %v1001_v48, %v1001_v48  ;;  %v2685_v39 = vpack.c.bf16 %v2227_v4, %v2227_v4  ;;  %v26506_v4 = vld [vmem:[%s26741_s6 + $0x2b70] sm:$0xff]  }
 0x56e   : > { %v24164_v24 = vadd.f32 %v24163_v14, %v24162_v22  ;;  %v24165_v56 = vpop.f32.mrb[142].mxu1  ;;  %v24144_v0 = vpop.f32.mrb[143].mxu0  ;;  %24465 = vmatpush3.bf16.msra.mxu1 %v26473_v21  ;;  %24444 = vmatprep.subr.bf16.mxu0 %v26474_v28  ;;  %v3219_v22 = vshll.u32 %v2682_v2, 16  ;;  %v1461_v50 = vpack.c.bf16 %v1009_v41, %v1009_v41  ;;  %v2687_v14 = vpack.c.bf16 %v2235_v7, %v2235_v7  ;;  %v26490_v21 = vld [vmem:[%s26741_s6 + $0x2b50] sm:$0xff]  }
 0x56f   : > { %v19071_v37 = vadd.f32 %v24142_v10, %v29338_v54  ;;  %v24166_v27 = vpop.f32.mrb[143].mxu1  ;;  %v26475_v54 = vld [vmem:[%s26741_s6 + $0x2af0] sm:$0xff]   ;;  %v26485_v10 = vld [vmem:[%s26741_s6 + $0x2b80] sm:$0xff]   ;;  %v26488_v56 = vld [vmem:[%s26741_s6 + $0x2b08] sm:$0xff]   ;;  %v2231_v2 = vrot.slane %v29395_v13, %v26868_v47  ;;  %v1005_v13 = vrot.slane %v29392_v35, %v26868_v47 }
 0x570   : > { %24466 = vmatprep.subr.bf16.mxu1 %v26475_v54  ;;  %v3234_v18 = vshll.u32 %v2687_v14, 16  ;;  %v26489_v27 = vld [vmem:[%s26741_s6 + $0x2b88] sm:$0xff]   ;;  %v26491_v54 = vld [vmem:[%s26741_s6 + $0x2bd0] sm:$0xff]  }
 0x571   : > { %v29383_v60 = vadd.f32 %v24164_v24, %v19071_v37  ;;  %24445 = vmatpush3.bf16.msra.mxu0 %v26476_v59  ;;  %v3228_v37 = vshll.u32 %v2685_v39, 16  ;;  %v3665_v24 = vsel %vm26821_vm2, %v1456_v1, %v3219_v22  ;;  %v26492_v59 = vld [vmem:[%s26741_s6 + $0x2b10] sm:$0xff]   ;;  %v26505_v1 = vld [vmem:[%s26741_s6 + $0x2ba8] sm:$0xff]   ;;  %v26512_v39 = vld [vmem:[%s26741_s6 + $0x2b38] sm:$0xff]   ;;  %v1460_v14 = vpack.c.bf16 %v1005_v13, %v1005_v13 }
 0x572   : > { %24467 = vmatpush3.bf16.msra.mxu1 %v26477_v26  ;;  %24446 = vmatprep.subr.bf16.mxu0 %v26478_v29  ;;  %v3670_v28 = vsel %vm26821_vm2, %v1461_v50, %v3234_v18  ;;  %v26494_v26 = vld [vmem:[%s26741_s6 + $0x2b58] sm:$0xff]   ;;  %v26493_v29 = vld [vmem:[%s26741_s6 + $0x2b90] sm:$0xff]   ;;  %v26514_v50 = vld [vmem:[%s26741_s6 + $0x2c40] sm:$0xff]  }
 0x573   : > { %24468 = vmatprep.subr.bf16.mxu1 %v26479_v33  ;;  %v3668_v0 = vsel %vm26821_vm2, %v1459_v3, %v3228_v37  ;;  %v26495_v33 = vld [vmem:[%s26741_s6 + $0x2bd8] sm:$0xff]   ;;  %v26508_v41 = vld [vmem:[%s26741_s6 + $0x2b30] sm:$0xff]   ;;  %v2686_v3 = vpack.c.bf16 %v2231_v2, %v2231_v2  ;;  %v26515_v37 = vld [vmem:[%s26741_s6 + $0x2cc0] sm:$0xff]  }
 0x574   : > { %v26509_v7 = vld [vmem:[%s26741_s6 + $0x2bb0] sm:$0xff]   ;;  %v26518_v18 = vld [vmem:[%s26741_s6 + $0x2c48] sm:$0xff]  }
 0x575   : > { %24447 = vmatpush3.bf16.msra.mxu0 %v26480_v17  ;;  %v26496_v17 = vld [vmem:[%s26741_s6 + $0x2b18] sm:$0xff]  }
 0x576   : > { %24469 = vmatpush3.bf16.msra.mxu1 %v26481_v5  ;;  %24476 = vmatprep.subr.bf16.mxu0 %v26482_v23  ;;  %v26498_v5 = vld [vmem:[%s26741_s6 + $0x2b60] sm:$0xff]  }
 0x577   : > { %24498 = vmatprep.subr.bf16.mxu1 %v26483_v57 }
 0x578   : > { %19629 = vmatmul.mubr.bf16.vlgmr.msra.gmra.mrb[168].mxu0 %v3663_v9  ;;  %v26513_v9 = vld [vmem:[%s26741_s6 + $0x2bb8] sm:$0xff]  }
 0x579   : > { %24477 = vmatpush3.bf16.msra.mxu0 %v26484_v53  ;;  %19669 = vmatmul.mubr.bf16.vlgmr.msra.gmra.mrb[168].mxu1 %v3665_v24 }
 0x57a   : > { %24478 = vmatprep.subr.bf16.mxu0 %v26486_v42  ;;  %24499 = vmatpush3.bf16.msra.mxu1 %v26485_v10  ;;  %v26511_v42 = vld [vmem:[%s26741_s6 + $0x2bf8] sm:$0xff]   ;;  %v3225_v10 = vshll.u32 %v2684_v8, 16 }
 0x57b   : > { %19708 = vmatprep.mubr.bf16.mxu0 %v3668_v0  ;;  %24500 = vmatprep.subr.bf16.mxu1 %v26487_v16  ;;  %v3231_v16 = vshll.u32 %v2686_v3, 16  ;;  %v26519_v0 = vld [vmem:[%s26741_s6 + $0x2cc8] sm:$0xff]   ;;  %v26543_v8 = vld [vmem:[%s26741_s6 + $0x2cf8] sm:$0xff]   ;;  %v29522_v3 = vld [vmem:[%s26736_s27 + $0xb0] sm:$0xff] }
 0x57c   : > { %19748 = vmatprep.mubr.bf16.mxu1 %v3670_v28  ;;  %v26521_v28 = vld [vmem:[%s26741_s6 + $0x2c88] sm:$0xff]  }
 0x57d   : > { %24479 = vmatpush3.bf16.msra.mxu0 %v26488_v56  ;;  %v26517_v56 = vld [vmem:[%s26741_s6 + $0x2c80] sm:$0xff]  }
 0x57e   : > { %24480 = vmatprep.subr.bf16.mxu0 %v26490_v21  ;;  %24501 = vmatpush3.bf16.msra.mxu1 %v26489_v27  ;;  %v3669_v21 = vsel %vm26821_vm2, %v1460_v14, %v3231_v16  ;;  %v26520_v27 = vld [vmem:[%s26741_s6 + $0x2c08] sm:$0xff]   ;;  %v2239_v14 = vrot.slane %v29522_v3, %v26782_v34  ;;  %v2247_v16 = vrot.slane %v29522_v3, %v26786_v36 }
 0x57f   : > { %24502 = vmatprep.subr.bf16.mxu1 %v26491_v54  ;;  %v26522_v54 = vld [vmem:[%s26741_s6 + $0x2c50] sm:$0xff]  }
 0x581   : > { %24481 = vmatpush3.bf16.msra.mxu0 %v26492_v59  ;;  %v26523_v59 = vld [vmem:[%s26741_s6 + $0x2cd0] sm:$0xff]  }
 0x582   : > { %24482 = vmatprep.subr.bf16.mxu0 %v26494_v26  ;;  %24503 = vmatpush3.bf16.msra.mxu1 %v26493_v29  ;;  %v26524_v26 = vld [vmem:[%s26741_s6 + $0x2c10] sm:$0xff]  }
 0x583   : > { %24504 = vmatprep.subr.bf16.mxu1 %v26495_v33  ;;  %v26525_v29 = vld [vmem:[%s26741_s6 + $0x2c90] sm:$0xff]   ;;  %v26526_v33 = vld [vmem:[%s26741_s6 + $0x2c58] sm:$0xff]  }
 0x585   : > { %24483 = vmatpush3.bf16.msra.mxu0 %v26496_v17  ;;  %v26527_v17 = vld [vmem:[%s26741_s6 + $0x2cd8] sm:$0xff]  }
 0x586   : > { %24484 = vmatprep.subr.bf16.mxu0 %v26498_v5  ;;  %24505 = vmatpush3.bf16.msra.mxu1 %v26497_v6  ;;  %v26528_v5 = vld [vmem:[%s26741_s6 + $0x2c18] sm:$0xff]  }
 0x587   : > { %24506 = vmatprep.subr.bf16.mxu1 %v26499_v25  ;;  %v26529_v6 = vld [vmem:[%s26741_s6 + $0x2c98] sm:$0xff]   ;;  %v26530_v25 = vld [vmem:[%s26741_s6 + $0x2c60] sm:$0xff]  }
 0x589   : > { %24485 = vmatpush3.bf16.msra.mxu0 %v26500_v43  ;;  %v26531_v43 = vld [vmem:[%s26741_s6 + $0x2ce0] sm:$0xff]  }
 0x58a   : > { %24486 = vmatprep.subr.bf16.mxu0 %v26502_v51  ;;  %24507 = vmatpush3.bf16.msra.mxu1 %v26501_v12  ;;  %v26532_v12 = vld [vmem:[%s26741_s6 + $0x2c20] sm:$0xff]  }
 0x58b   : > { %v24184_v44 = vpop.f32.mrb[144].mxu0  ;;  %24508 = vmatprep.subr.bf16.mxu1 %v26503_v63  ;;  %v26536_v63 = vld [vmem:[%s26741_s6 + $0x2c28] sm:$0xff]  }
 0x58c   : > { %v24206_v46 = vpop.f32.mrb[144].mxu1  ;;  %v24185_v23 = vpop.f32.mrb[145].mxu0 }
 0x58d   : > { %v24207_v52 = vpop.f32.mrb[145].mxu1  ;;  %v24186_v31 = vadd.f32 %v24185_v23, %v24184_v44  ;;  %v24187_v57 = vpop.f32.mrb[146].mxu0  ;;  %24487 = vmatpush3.bf16.msra.mxu0 %v26504_v58  ;;  %v26533_v44 = vld [vmem:[%s26741_s6 + $0x2ca0] sm:$0xff]  }
 0x58e   : > { %v24208_v11 = vadd.f32 %v24207_v52, %v24206_v46  ;;  %v24209_v61 = vpop.f32.mrb[146].mxu1  ;;  %v24188_v62 = vpop.f32.mrb[147].mxu0  ;;  %24488 = vmatprep.subr.bf16.mxu0 %v26506_v4  ;;  %24509 = vmatpush3.bf16.msra.mxu1 %v26505_v1  ;;  %v26534_v46 = vld [vmem:[%s26741_s6 + $0x2c68] sm:$0xff]  }
 0x58f   : > { %v24210_v15 = vpop.f32.mrb[147].mxu1  ;;  %v19151_v48 = vadd.f32 %v24186_v31, %v29383_v60  ;;  %v997_v60 = vrot.slane %v29392_v35, %v26864_v45  ;;  %24510 = vmatprep.subr.bf16.mxu1 %v26507_v49  ;;  %v26516_v35 = vld [vmem:[%s26741_s6 + $0x2c00] sm:$0xff]   ;;  %v26537_v62 = vld [vmem:[%s26741_s6 + $0x2ca8] sm:$0xff]   ;;  %v26539_v49 = vld [vmem:[%s26741_s6 + $0x2cf0] sm:$0xff]  }
 0x591   : > { %v29465_v53 = vadd.f32 %v24208_v11, %v19151_v48  ;;  %24489 = vmatpush3.bf16.msra.mxu0 %v26508_v41  ;;  %v1458_v22 = vpack.c.bf16 %v997_v60, %v997_v60  ;;  %v26535_v11 = vld [vmem:[%s26741_s6 + $0x2ce8] sm:$0xff]   ;;  %v26538_v48 = vld [vmem:[%s26741_s6 + $0x2c70] sm:$0xff]   ;;  %v26542_v60 = vld [vmem:[%s26741_s6 + $0x2c78] sm:$0xff]  }
 0x592   : > { %24490 = vmatprep.subr.bf16.mxu0 %v26510_v20  ;;  %24511 = vmatpush3.bf16.msra.mxu1 %v26509_v7  ;;  %v26540_v41 = vld [vmem:[%s26741_s6 + $0x2c30] sm:$0xff]   ;;  %v26544_v20 = vld [vmem:[%s26741_s6 + $0x2c38] sm:$0xff]  }
 0x593   : > { %24512 = vmatprep.subr.bf16.mxu1 %v26511_v42  ;;  %v3667_v24 = vsel %vm26821_vm2, %v1458_v22, %v3225_v10  ;;  %v26541_v7 = vld [vmem:[%s26741_s6 + $0x2cb0] sm:$0xff]   ;;  %v2243_v10 = vrot.slane %v29522_v3, %v26774_v30 }
 0x594   : > { %v29517_v42 = vld [vmem:[%s26731_s24 + $0xb0] sm:$0xff] }
 0x595   : > { %24491 = vmatpush3.bf16.msra.mxu0 %v26512_v39  ;;  %v1017_v13 = vrot.slane %v29517_v42, %v26774_v30  ;;  %v1025_v39 = vrot.slane %v29517_v42, %v26778_v32  ;;  %v1021_v22 = vrot.slane %v29517_v42, %v26786_v36 }
 0x596   : > { %24520 = vmatprep.subr.bf16.mxu0 %v26514_v50  ;;  %24513 = vmatpush3.bf16.msra.mxu1 %v26513_v9  ;;  %v1013_v9 = vrot.slane %v29517_v42, %v26782_v34  ;;  %v2251_v50 = vrot.slane %v29522_v3, %v26778_v32 }
 0x597   : > { %24542 = vmatprep.subr.bf16.mxu1 %v26515_v37  ;;  %v26546_v37 = vld [vmem:[%s26741_s6 + $0x2d40] sm:$0xff]  }
 0x598   : > { %19709 = vmatmul.mubr.bf16.vlgmr.msra.gmra.mrb[172].mxu0 %v3667_v24  ;;  %v1465_v24 = vpack.c.bf16 %v1025_v39, %v1025_v39  ;;  %v26563_v39 = vld [vmem:[%s26741_s6 + $0x2de0] sm:$0xff]  }
 0x599   : > { %24521 = vmatpush3.bf16.msra.mxu0 %v26516_v35  ;;  %19749 = vmatmul.mubr.bf16.vlgmr.msra.gmra.mrb[172].mxu1 %v3669_v21  ;;  %v1463_v35 = vpack.c.bf16 %v1017_v13, %v1017_v13  ;;  %v26547_v21 = vld [vmem:[%s26741_s6 + $0x2dc0] sm:$0xff]  }
 0x59a   : > { %24522 = vmatprep.subr.bf16.mxu0 %v26518_v18  ;;  %24543 = vmatpush3.bf16.msra.mxu1 %v26517_v56  ;;  %v1462_v56 = vpack.c.bf16 %v1013_v9, %v1013_v9  ;;  %v1464_v18 = vpack.c.bf16 %v1021_v22, %v1021_v22  ;;  %v26562_v13 = vld [vmem:[%s26741_s6 + $0x2d60] sm:$0xff]  }
 0x59b   : > { %24544 = vmatprep.subr.bf16.mxu1 %v26519_v0  ;;  %v2689_v0 = vpack.c.bf16 %v2243_v10, %v2243_v10  ;;  %v26564_v9 = vld [vmem:[%s26741_s6 + $0x2d20] sm:$0xff]  }
 0x59c   : > { %v26565_v22 = vld [vmem:[%s26741_s6 + $0x2da0] sm:$0xff]  }
 0x59d   : > { %24523 = vmatpush3.bf16.msra.mxu0 %v26520_v27  ;;  %v2691_v27 = vpack.c.bf16 %v2251_v50, %v2251_v50 }
 0x59e   : > { %24524 = vmatprep.subr.bf16.mxu0 %v26522_v54  ;;  %24545 = vmatpush3.bf16.msra.mxu1 %v26521_v28  ;;  %v2688_v28 = vpack.c.bf16 %v2239_v14, %v2239_v14  ;;  %v2690_v54 = vpack.c.bf16 %v2247_v16, %v2247_v16  ;;  %v26566_v16 = vld [vmem:[%s26741_s6 + $0x2d68] sm:$0xff]  }
 0x59f   : > { %24546 = vmatprep.subr.bf16.mxu1 %v26523_v59  ;;  %v26548_v59 = vld [vmem:[%s26741_s6 + $0x2d00] sm:$0xff]  }
 0x5a1   : > { %24525 = vmatpush3.bf16.msra.mxu0 %v26524_v26  ;;  %v1033_v26 = vrot.slane %v29517_v42, %v26790_v38 }
 0x5a2   : > { %24526 = vmatprep.subr.bf16.mxu0 %v26526_v33  ;;  %24547 = vmatpush3.bf16.msra.mxu1 %v26525_v29  ;;  %v2259_v29 = vrot.slane %v29522_v3, %v26790_v38  ;;  %v1041_v33 = vrot.slane %v29517_v42, %v26794_v40 }
 0x5a3   : > { %24548 = vmatprep.subr.bf16.mxu1 %v26527_v17  ;;  %v2267_v17 = vrot.slane %v29522_v3, %v26794_v40 }
 0x5a5   : > { %24527 = vmatpush3.bf16.msra.mxu0 %v26528_v5  ;;  %v3240_v5 = vshll.u32 %v2689_v0, 16 }
 0x5a6   : > { %24528 = vmatprep.subr.bf16.mxu0 %v26530_v25  ;;  %24549 = vmatpush3.bf16.msra.mxu1 %v26529_v6  ;;  %v3246_v6 = vshll.u32 %v2691_v27, 16  ;;  %v3237_v25 = vshll.u32 %v2688_v28, 16 }
 0x5a7   : > { %24550 = vmatprep.subr.bf16.mxu1 %v26531_v43  ;;  %v3243_v43 = vshll.u32 %v2690_v54, 16  ;;  %v2255_v54 = vrot.slane %v29522_v3, %v26864_v45 }
 0x5a9   : > { %24529 = vmatpush3.bf16.msra.mxu0 %v26532_v12  ;;  %v26549_v12 = vld [vmem:[%s26741_s6 + $0x2d80] sm:$0xff]  }
 0x5aa   : > { %24530 = vmatprep.subr.bf16.mxu0 %v26534_v46  ;;  %24551 = vmatpush3.bf16.msra.mxu1 %v26533_v44  ;;  %v26550_v44 = vld [vmem:[%s26741_s6 + $0x2d48] sm:$0xff]   ;;  %v1467_v46 = vpack.c.bf16 %v1033_v26, %v1033_v26 }
 0x5ab   : > { %v24228_v51 = vpop.f32.mrb[148].mxu0  ;;  %24552 = vmatprep.subr.bf16.mxu1 %v26535_v11  ;;  %v3674_v11 = vsel %vm26821_vm2, %v1465_v24, %v3246_v6  ;;  %v26572_v6 = vld [vmem:[%s26741_s6 + $0x2d30] sm:$0xff]  }
 0x5ac   : > { %v24250_v23 = vpop.f32.mrb[148].mxu1  ;;  %v24229_v52 = vpop.f32.mrb[149].mxu0  ;;  %19828 = vmatprep.mubr.bf16.mxu1 %v3674_v11 }
 0x5ad   : > { %v24251_v31 = vpop.f32.mrb[149].mxu1  ;;  %v24230_v57 = vadd.f32 %v24229_v52, %v24228_v51  ;;  %v24231_v58 = vpop.f32.mrb[150].mxu0  ;;  %24531 = vmatpush3.bf16.msra.mxu0 %v26536_v63  ;;  %v2693_v51 = vpack.c.bf16 %v2259_v29, %v2259_v29  ;;  %v2695_v52 = vpack.c.bf16 %v2267_v17, %v2267_v17  ;;  %v3671_v63 = vsel %vm26821_vm2, %v1462_v56, %v3237_v25  ;;  %v26570_v29 = vld [vmem:[%s26741_s6 + $0x2d70] sm:$0xff]  }
 0x5ae   : > { %v24252_v61 = vadd.f32 %v24251_v31, %v24250_v23  ;;  %v24253_v1 = vpop.f32.mrb[150].mxu1  ;;  %v24232_v15 = vpop.f32.mrb[151].mxu0  ;;  %24532 = vmatprep.subr.bf16.mxu0 %v26538_v48  ;;  %24553 = vmatpush3.bf16.msra.mxu1 %v26537_v62  ;;  %v1469_v23 = vpack.c.bf16 %v1041_v33, %v1041_v33  ;;  %v3672_v31 = vsel %vm26821_vm2, %v1463_v35, %v3240_v5  ;;  %v26552_v58 = vld [vmem:[%s26741_s6 + $0x2d08] sm:$0xff]   ;;  %v26571_v17 = vld [vmem:[%s26741_s6 + $0x2df0] sm:$0xff]  }
 0x5af   : > { %v24254_v19 = vpop.f32.mrb[151].mxu1  ;;  %v19231_v4 = vadd.f32 %v24230_v57, %v29465_v53  ;;  %24554 = vmatprep.subr.bf16.mxu1 %v26539_v49  ;;  %v26545_v53 = vld [vmem:[%s26741_s6 + $0x2cb8] sm:$0xff]   ;;  %v3673_v57 = vsel %vm26821_vm2, %v1464_v18, %v3243_v43  ;;  %19788 = vmatprep.mubr.bf16.mxu0 %v3672_v31  ;;  %v3252_v1 = vshll.u32 %v2693_v51, 16  ;;  %v26553_v62 = vld [vmem:[%s26741_s6 + $0x2d88] sm:$0xff]   ;;  %v3258_v15 = vshll.u32 %v2695_v52, 16  ;;  %v26573_v25 = vld [vmem:[%s26741_s6 + $0x2db0] sm:$0xff]  }
 0x5b0   : > { %v26554_v19 = vld [vmem:[%s26741_s6 + $0x2d50] sm:$0xff]   ;;  %v26568_v18 = vld [vmem:[%s26741_s6 + $0x2d28] sm:$0xff]   ;;  %v2263_v33 = vrot.slane %v29522_v3, %v26868_v47  ;;  %v2692_v43 = vpack.c.bf16 %v2255_v54, %v2255_v54  ;;  %v1037_v3 = vrot.slane %v29517_v42, %v26868_v47  ;;  %v26576_v51 = vld [vmem:[%s26741_s6 + $0x2d38] sm:$0xff]  }
 0x5b1   : > { %v29508_v2 = vadd.f32 %v24252_v61, %v19231_v4  ;;  %24533 = vmatpush3.bf16.msra.mxu0 %v26540_v41  ;;  %v26551_v61 = vld [vmem:[%s26741_s6 + $0x2dc8] sm:$0xff]   ;;  %v3676_v48 = vsel %vm26821_vm2, %v1467_v46, %v3252_v1  ;;  %v26555_v4 = vld [vmem:[%s26741_s6 + $0x2dd0] sm:$0xff]   ;;  %v3678_v49 = vsel %vm26821_vm2, %v1469_v23, %v3258_v15  ;;  %v26575_v46 = vld [vmem:[%s26741_s6 + $0x2df8] sm:$0xff]  }
 0x5b2   : > { %24534 = vmatprep.subr.bf16.mxu0 %v26542_v60  ;;  %24555 = vmatpush3.bf16.msra.mxu1 %v26541_v7  ;;  %v26556_v41 = vld [vmem:[%s26741_s6 + $0x2d10] sm:$0xff]   ;;  %v26558_v60 = vld [vmem:[%s26741_s6 + $0x2d58] sm:$0xff]   ;;  %v3249_v52 = vshll.u32 %v2692_v43, 16  ;;  %v1468_v11 = vpack.c.bf16 %v1037_v3, %v1037_v3  ;;  %v26582_v15 = vld [vmem:[%s26741_s6 + $0x2e48] sm:$0xff]  }
 0x5b3   : > { %24556 = vmatprep.subr.bf16.mxu1 %v26543_v8  ;;  %v26557_v7 = vld [vmem:[%s26741_s6 + $0x2d90] sm:$0xff]   ;;  %v26559_v8 = vld [vmem:[%s26741_s6 + $0x2dd8] sm:$0xff]  }
 0x5b4   : > { %v26577_v23 = vld [vmem:[%s26741_s6 + $0x2db8] sm:$0xff]  }
 0x5b5   : > { %24535 = vmatpush3.bf16.msra.mxu0 %v26544_v20  ;;  %v26560_v20 = vld [vmem:[%s26741_s6 + $0x2d18] sm:$0xff]  }
 0x5b6   : > { %24564 = vmatprep.subr.bf16.mxu0 %v26546_v37  ;;  %24557 = vmatpush3.bf16.msra.mxu1 %v26545_v53  ;;  %v26561_v53 = vld [vmem:[%s26741_s6 + $0x2d98] sm:$0xff]   ;;  %v26567_v37 = vld [vmem:[%s26741_s6 + $0x2de8] sm:$0xff]  }
 0x5b7   : > { %24586 = vmatprep.subr.bf16.mxu1 %v26547_v21  ;;  %v26569_v21 = vld [vmem:[%s26741_s6 + $0x2da8] sm:$0xff]   ;;  %v26606_v43 = vld [vmem:[%s26741_s6 + $0x2e78] sm:$0xff]  }
 0x5b8   : > { %19789 = vmatmul.mubr.bf16.vlgmr.msra.gmra.mrb[176].mxu0 %v3671_v63  ;;  %v26609_v3 = vld [vmem:[%s26741_s6 + $0x2eb8] sm:$0xff]  }
 0x5b9   : > { %19829 = vmatmul.mubr.bf16.vlgmr.msra.gmra.mrb[176].mxu1 %v3673_v57  ;;  %24565 = vmatpush3.bf16.msra.mxu0 %v26548_v59  ;;  %v26578_v57 = vld [vmem:[%s26741_s6 + $0x2e40] sm:$0xff]  }
 0x5ba   : > { %24587 = vmatpush3.bf16.msra.mxu1 %v26549_v12  ;;  %24566 = vmatprep.subr.bf16.mxu0 %v26550_v44  ;;  %v1029_v12 = vrot.slane %v29517_v42, %v26864_v45  ;;  %v2694_v44 = vpack.c.bf16 %v2263_v33, %v2263_v33  ;;  %v26579_v42 = vld [vmem:[%s26741_s6 + $0x2ec0] sm:$0xff]   ;;  %v26603_v33 = vld [vmem:[%s26741_s6 + $0x2ef0] sm:$0xff]  }
 0x5bb   : > { %24588 = vmatprep.subr.bf16.mxu1 %v26551_v61  ;;  %19868 = vmatprep.mubr.bf16.mxu0 %v3676_v48  ;;  %v26580_v61 = vld [vmem:[%s26741_s6 + $0x2e00] sm:$0xff]   ;;  %v26584_v48 = vld [vmem:[%s26741_s6 + $0x2e08] sm:$0xff]  }
 0x5bc   : > { %19908 = vmatprep.mubr.bf16.mxu1 %v3678_v49  ;;  %v1466_v31 = vpack.c.bf16 %v1029_v12, %v1029_v12  ;;  %v3255_v63 = vshll.u32 %v2694_v44, 16  ;;  %v26586_v49 = vld [vmem:[%s26741_s6 + $0x2e50] sm:$0xff]   ;;  %v26608_v12 = vld [vmem:[%s26741_s6 + $0x2e38] sm:$0xff]  }
 0x5bd   : > { %24567 = vmatpush3.bf16.msra.mxu0 %v26552_v58  ;;  %v26581_v58 = vld [vmem:[%s26741_s6 + $0x2e80] sm:$0xff]  }
 0x5be   : > { %24589 = vmatpush3.bf16.msra.mxu1 %v26553_v62  ;;  %24568 = vmatprep.subr.bf16.mxu0 %v26554_v19  ;;  %v3675_v1 = vsel %vm26821_vm2, %v1466_v31, %v3249_v52  ;;  %v3677_v62 = vsel %vm26821_vm2, %v1468_v11, %v3255_v63  ;;  %v26583_v19 = vld [vmem:[%s26741_s6 + $0x2ec8] sm:$0xff]   ;;  %v26610_v63 = vld [vmem:[%s26741_s6 + $0x2f40] sm:$0xff]  }
 0x5bf   : > { %24590 = vmatprep.subr.bf16.mxu1 %v26555_v4  ;;  %v26585_v4 = vld [vmem:[%s26741_s6 + $0x2e88] sm:$0xff]  }
 0x5c1   : > { %24569 = vmatpush3.bf16.msra.mxu0 %v26556_v41  ;;  %v26587_v41 = vld [vmem:[%s26741_s6 + $0x2ed0] sm:$0xff]  }
 0x5c2   : > { %24591 = vmatpush3.bf16.msra.mxu1 %v26557_v7  ;;  %24570 = vmatprep.subr.bf16.mxu0 %v26558_v60  ;;  %v26588_v7 = vld [vmem:[%s26741_s6 + $0x2e10] sm:$0xff]  }
 0x5c3   : > { %24592 = vmatprep.subr.bf16.mxu1 %v26559_v8  ;;  %v26589_v60 = vld [vmem:[%s26741_s6 + $0x2e90] sm:$0xff]   ;;  %v26590_v8 = vld [vmem:[%s26741_s6 + $0x2e58] sm:$0xff]  }
 0x5c5   : > { %24571 = vmatpush3.bf16.msra.mxu0 %v26560_v20  ;;  %v26591_v20 = vld [vmem:[%s26741_s6 + $0x2ed8] sm:$0xff]  }
 0x5c6   : > { %24593 = vmatpush3.bf16.msra.mxu1 %v26561_v53  ;;  %24572 = vmatprep.subr.bf16.mxu0 %v26562_v13  ;;  %v26592_v53 = vld [vmem:[%s26741_s6 + $0x2e18] sm:$0xff]  }
 0x5c7   : > { %24594 = vmatprep.subr.bf16.mxu1 %v26563_v39  ;;  %v26593_v13 = vld [vmem:[%s26741_s6 + $0x2e98] sm:$0xff]   ;;  %v26594_v39 = vld [vmem:[%s26741_s6 + $0x2e60] sm:$0xff]  }
 0x5c9   : > { %24573 = vmatpush3.bf16.msra.mxu0 %v26564_v9  ;;  %v26595_v9 = vld [vmem:[%s26741_s6 + $0x2ee0] sm:$0xff]  }
 0x5ca   : > { %24595 = vmatpush3.bf16.msra.mxu1 %v26565_v22  ;;  %24574 = vmatprep.subr.bf16.mxu0 %v26566_v16  ;;  %v26596_v22 = vld [vmem:[%s26741_s6 + $0x2e20] sm:$0xff]  }
 0x5cb   : > { %v24272_v10 = vpop.f32.mrb[152].mxu0  ;;  %24596 = vmatprep.subr.bf16.mxu1 %v26567_v37  ;;  %v26598_v37 = vld [vmem:[%s26741_s6 + $0x2e68] sm:$0xff]  }
 0x5cc   : > { %v24294_v50 = vpop.f32.mrb[152].mxu1  ;;  %v24273_v14 = vpop.f32.mrb[153].mxu0 }
 0x5cd   : > { %v24274_v35 = vadd.f32 %v24273_v14, %v24272_v10  ;;  %v24295_v24 = vpop.f32.mrb[153].mxu1  ;;  %v24275_v56 = vpop.f32.mrb[154].mxu0  ;;  %24575 = vmatpush3.bf16.msra.mxu0 %v26568_v18  ;;  %v26597_v10 = vld [vmem:[%s26741_s6 + $0x2ea0] sm:$0xff]  }
 0x5ce   : > { %v24296_v0 = vadd.f32 %v24295_v24, %v24294_v50  ;;  %v24297_v27 = vpop.f32.mrb[154].mxu1  ;;  %v24276_v28 = vpop.f32.mrb[155].mxu0  ;;  %24597 = vmatpush3.bf16.msra.mxu1 %v26569_v21  ;;  %24576 = vmatprep.subr.bf16.mxu0 %v26570_v29  ;;  %v26600_v21 = vld [vmem:[%s26741_s6 + $0x2e28] sm:$0xff]  }
 0x5cf   : > { %v19311_v59 = vadd.f32 %v24274_v35, %v29508_v2  ;;  %v24298_v26 = vpop.f32.mrb[155].mxu1  ;;  %v26574_v2 = vld [vmem:[%s26741_s6 + $0x2d78] sm:$0xff]   ;;  %24598 = vmatprep.subr.bf16.mxu1 %v26571_v17  ;;  %v26599_v35 = vld [vmem:[%s26741_s6 + $0x2ee8] sm:$0xff]  }
 0x5d0   : > { %v26601_v28 = vld [vmem:[%s26741_s6 + $0x2ea8] sm:$0xff]  }
 0x5d1   : > { %v29589_v5 = vadd.f32 %v24296_v0, %v19311_v59  ;;  %24577 = vmatpush3.bf16.msra.mxu0 %v26572_v6  ;;  %v26602_v59 = vld [vmem:[%s26741_s6 + $0x2e70] sm:$0xff]  }
 0x5d2   : > { %24599 = vmatpush3.bf16.msra.mxu1 %v26573_v25  ;;  %24578 = vmatprep.subr.bf16.mxu0 %v26574_v2  ;;  %v26604_v6 = vld [vmem:[%s26741_s6 + $0x2e30] sm:$0xff]   ;;  %v26607_v2 = vld [vmem:[%s26741_s6 + $0x2ef8] sm:$0xff]  }
 0x5d3   : > { %24600 = vmatprep.subr.bf16.mxu1 %v26575_v46  ;;  %v26605_v25 = vld [vmem:[%s26741_s6 + $0x2eb0] sm:$0xff]   ;;  %v29646_v46 = vld [vmem:[%s26736_s27 + $0xb8] sm:$0xff] }
 0x5d4   : > { %v2275_v52 = vrot.slane %v29646_v46, %v26774_v30  ;;  %v2283_v31 = vrot.slane %v29646_v46, %v26778_v32  ;;  %v2271_v11 = vrot.slane %v29646_v46, %v26782_v34 }
 0x5d5   : > { %24579 = vmatpush3.bf16.msra.mxu0 %v26576_v51 }
 0x5d6   : > { %24601 = vmatpush3.bf16.msra.mxu1 %v26577_v23  ;;  %24608 = vmatprep.subr.bf16.mxu0 %v26578_v57 }
 0x5d7   : > { %24630 = vmatprep.subr.bf16.mxu1 %v26579_v42 }
 0x5d8   : > { %19869 = vmatmul.mubr.bf16.vlgmr.msra.gmra.mrb[180].mxu0 %v3675_v1  ;;  %v26611_v1 = vld [vmem:[%s26741_s6 + $0x2fc0] sm:$0xff]  }
 0x5d9   : > { %19909 = vmatmul.mubr.bf16.vlgmr.msra.gmra.mrb[180].mxu1 %v3677_v62  ;;  %24609 = vmatpush3.bf16.msra.mxu0 %v26580_v61  ;;  %v2697_v62 = vpack.c.bf16 %v2275_v52, %v2275_v52 }
 0x5da   : > { %24631 = vmatpush3.bf16.msra.mxu1 %v26581_v58  ;;  %24610 = vmatprep.subr.bf16.mxu0 %v26582_v15  ;;  %v2699_v15 = vpack.c.bf16 %v2283_v31, %v2283_v31 }
 0x5db   : > { %24632 = vmatprep.subr.bf16.mxu1 %v26583_v19  ;;  %v2696_v19 = vpack.c.bf16 %v2271_v11, %v2271_v11  ;;  %v26630_v11 = vld [vmem:[%s26741_s6 + $0x2f68] sm:$0xff]  }
 0x5dd   : > { %24611 = vmatpush3.bf16.msra.mxu0 %v26584_v48  ;;  %v2279_v48 = vrot.slane %v29646_v46, %v26786_v36 }
 0x5de   : > { %24633 = vmatpush3.bf16.msra.mxu1 %v26585_v4  ;;  %24612 = vmatprep.subr.bf16.mxu0 %v26586_v49 }
 0x5df   : > { %24634 = vmatprep.subr.bf16.mxu1 %v26587_v41  ;;  %v2291_v41 = vrot.slane %v29646_v46, %v26790_v38 }
 0x5e1   : > { %24613 = vmatpush3.bf16.msra.mxu0 %v26588_v7  ;;  %v3264_v7 = vshll.u32 %v2697_v62, 16 }
 0x5e2   : > { %24635 = vmatpush3.bf16.msra.mxu1 %v26589_v60  ;;  %24614 = vmatprep.subr.bf16.mxu0 %v26590_v8  ;;  %v3270_v60 = vshll.u32 %v2699_v15, 16  ;;  %v3261_v8 = vshll.u32 %v2696_v19, 16 }
 0x5e3   : > { %24636 = vmatprep.subr.bf16.mxu1 %v26591_v20  ;;  %v2698_v20 = vpack.c.bf16 %v2279_v48, %v2279_v48  ;;  %v26633_v48 = vld [vmem:[%s26741_s6 + $0x2fa8] sm:$0xff]  }
 0x5e5   : > { %24615 = vmatpush3.bf16.msra.mxu0 %v26592_v53  ;;  %v26612_v53 = vld [vmem:[%s26741_s6 + $0x2f00] sm:$0xff]  }
 0x5e6   : > { %24637 = vmatpush3.bf16.msra.mxu1 %v26593_v13  ;;  %24616 = vmatprep.subr.bf16.mxu0 %v26594_v39  ;;  %v26613_v13 = vld [vmem:[%s26741_s6 + $0x2f80] sm:$0xff]  }
 0x5e7   : > { %24638 = vmatprep.subr.bf16.mxu1 %v26595_v9  ;;  %v2701_v9 = vpack.c.bf16 %v2291_v41, %v2291_v41  ;;  %v26634_v41 = vld [vmem:[%s26741_s6 + $0x2f70] sm:$0xff]  }
 0x5e9   : > { %24617 = vmatpush3.bf16.msra.mxu0 %v26596_v22 }
 0x5ea   : > { %24639 = vmatpush3.bf16.msra.mxu1 %v26597_v10  ;;  %24618 = vmatprep.subr.bf16.mxu0 %v26598_v37  ;;  %v2299_v10 = vrot.slane %v29646_v46, %v26794_v40  ;;  %v26614_v37 = vld [vmem:[%s26741_s6 + $0x2f48] sm:$0xff]  }
 0x5eb   : > { %v24316_v50 = vpop.f32.mrb[156].mxu0  ;;  %24640 = vmatprep.subr.bf16.mxu1 %v26599_v35  ;;  %v26615_v35 = vld [vmem:[%s26741_s6 + $0x2fc8] sm:$0xff]  }
 0x5ec   : > { %v24338_v14 = vpop.f32.mrb[156].mxu1  ;;  %v24317_v16 = vpop.f32.mrb[157].mxu0 }
 0x5ed   : > { %v24318_v24 = vadd.f32 %v24317_v16, %v24316_v50  ;;  %v24339_v56 = vpop.f32.mrb[157].mxu1  ;;  %v24319_v18 = vpop.f32.mrb[158].mxu0  ;;  %24619 = vmatpush3.bf16.msra.mxu0 %v26600_v21  ;;  %v3267_v16 = vshll.u32 %v2698_v20, 16  ;;  %v26616_v21 = vld [vmem:[%s26741_s6 + $0x2f08] sm:$0xff]   ;;  %v26637_v20 = vld [vmem:[%s26741_s6 + $0x2fb0] sm:$0xff]  }
 0x5ee   : > { %v24340_v0 = vadd.f32 %v24339_v56, %v24338_v14  ;;  %v24341_v27 = vpop.f32.mrb[158].mxu1  ;;  %v24320_v54 = vpop.f32.mrb[159].mxu0  ;;  %24641 = vmatpush3.bf16.msra.mxu1 %v26601_v28  ;;  %24620 = vmatprep.subr.bf16.mxu0 %v26602_v59  ;;  %v26619_v59 = vld [vmem:[%s26741_s6 + $0x2fd0] sm:$0xff]  }
 0x5ef   : > { %v19391_v26 = vadd.f32 %v24318_v24, %v29589_v5  ;;  %v24342_v29 = vpop.f32.mrb[159].mxu1  ;;  %24642 = vmatprep.subr.bf16.mxu1 %v26603_v33  ;;  %v29641_v5 = vld [vmem:[%s26731_s24 + $0xb8] sm:$0xff]  ;;  %v3276_v24 = vshll.u32 %v2701_v9, 16  ;;  %v26618_v54 = vld [vmem:[%s26741_s6 + $0x2f50] sm:$0xff]  }
 0x5f0   : > { %v1049_v44 = vrot.slane %v29641_v5, %v26774_v30  ;;  %v1057_v51 = vrot.slane %v29641_v5, %v26778_v32  ;;  %v1045_v23 = vrot.slane %v29641_v5, %v26782_v34  ;;  %v1053_v58 = vrot.slane %v29641_v5, %v26786_v36  ;;  %v26620_v29 = vld [vmem:[%s26741_s6 + $0x2f10] sm:$0xff]  }
 0x5f1   : > { %v29632_v17 = vadd.f32 %v24340_v0, %v19391_v26  ;;  %24621 = vmatpush3.bf16.msra.mxu0 %v26604_v6  ;;  %v1065_v49 = vrot.slane %v29641_v5, %v26790_v38  ;;  %v1073_v22 = vrot.slane %v29641_v5, %v26794_v40  ;;  %v2703_v40 = vpack.c.bf16 %v2299_v10, %v2299_v10  ;;  %v26617_v0 = vld [vmem:[%s26741_s6 + $0x2f88] sm:$0xff]   ;;  %v26621_v33 = vld [vmem:[%s26741_s6 + $0x2f90] sm:$0xff]   ;;  %v26622_v6 = vld [vmem:[%s26741_s6 + $0x2f58] sm:$0xff]  }
 0x5f2   : > { %24643 = vmatpush3.bf16.msra.mxu1 %v26605_v25  ;;  %24622 = vmatprep.subr.bf16.mxu0 %v26606_v43  ;;  %v1471_v57 = vpack.c.bf16 %v1049_v44, %v1049_v44  ;;  %v1473_v42 = vpack.c.bf16 %v1057_v51, %v1057_v51  ;;  %v1470_v61 = vpack.c.bf16 %v1045_v23, %v1045_v23  ;;  %v26623_v25 = vld [vmem:[%s26741_s6 + $0x2fd8] sm:$0xff]   ;;  %v26628_v44 = vld [vmem:[%s26741_s6 + $0x2f20] sm:$0xff]  }
 0x5f3   : > { %24644 = vmatprep.subr.bf16.mxu1 %v26607_v2  ;;  %v1472_v4 = vpack.c.bf16 %v1053_v58, %v1053_v58  ;;  %v1475_v39 = vpack.c.bf16 %v1065_v49, %v1065_v49  ;;  %v1477_v56 = vpack.c.bf16 %v1073_v22, %v1073_v22  ;;  %v3282_v28 = vshll.u32 %v2703_v40, 16  ;;  %v26624_v43 = vld [vmem:[%s26741_s6 + $0x2f18] sm:$0xff]   ;;  %v26629_v51 = vld [vmem:[%s26741_s6 + $0x2fa0] sm:$0xff]   ;;  %v26632_v58 = vld [vmem:[%s26741_s6 + $0x2f28] sm:$0xff]  }
 0x5f4   : > { %v3680_v38 = vsel %vm26821_vm2, %v1471_v57, %v3264_v7  ;;  %v3682_v50 = vsel %vm26821_vm2, %v1473_v42, %v3270_v60  ;;  %v3679_v14 = vsel %vm26821_vm2, %v1470_v61, %v3261_v8  ;;  %v26625_v2 = vld [vmem:[%s26741_s6 + $0x2f98] sm:$0xff]   ;;  %v2287_v49 = vrot.slane %v29646_v46, %v26864_v45  ;;  %v26635_v8 = vld [vmem:[%s26741_s6 + $0x2ff0] sm:$0xff]   ;;  %v26646_v40 = vld [vmem:[%s26741_s6 + $0x3048] sm:$0xff]  }
 0x5f5   : > { %24623 = vmatpush3.bf16.msra.mxu0 %v26608_v12  ;;  %19948 = vmatprep.mubr.bf16.mxu0 %v3680_v38  ;;  %v3681_v18 = vsel %vm26821_vm2, %v1472_v4, %v3267_v16  ;;  %v3684_v27 = vsel %vm26821_vm2, %v1475_v39, %v3276_v24  ;;  %v3686_v26 = vsel %vm26821_vm2, %v1477_v56, %v3282_v28  ;;  %v26626_v12 = vld [vmem:[%s26741_s6 + $0x2f60] sm:$0xff]   ;;  %v26638_v39 = vld [vmem:[%s26741_s6 + $0x2f78] sm:$0xff]   ;;  %v26651_v28 = vld [vmem:[%s26741_s6 + $0x30d0] sm:$0xff]  }
 0x5f6   : > { %24645 = vmatpush3.bf16.msra.mxu1 %v26609_v3  ;;  %24652 = vmatprep.subr.bf16.mxu0 %v26610_v63  ;;  %v26627_v3 = vld [vmem:[%s26741_s6 + $0x2fe0] sm:$0xff]   ;;  %v26631_v63 = vld [vmem:[%s26741_s6 + $0x2fe8] sm:$0xff]   ;;  %v2295_v7 = vrot.slane %v29646_v46, %v26868_v47  ;;  %v1069_v46 = vrot.slane %v29641_v5, %v26868_v47  ;;  %v26639_v22 = vld [vmem:[%s26741_s6 + $0x2ff8] sm:$0xff]  }
 0x5f7   : > { %24674 = vmatprep.subr.bf16.mxu1 %v26611_v1  ;;  %19988 = vmatprep.mubr.bf16.mxu1 %v3682_v50  ;;  %v26640_v10 = vld [vmem:[%s26741_s6 + $0x2f38] sm:$0xff]   ;;  %v26643_v47 = vld [vmem:[%s26741_s6 + $0x30c0] sm:$0xff]  }
 0x5f8   : > { %19949 = vmatmul.mubr.bf16.vlgmr.msra.gmra.mrb[184].mxu0 %v3679_v14  ;;  %v2702_v9 = vpack.c.bf16 %v2295_v7, %v2295_v7  ;;  %v26641_v38 = vld [vmem:[%s26741_s6 + $0x2fb8] sm:$0xff]   ;;  %v1476_v14 = vpack.c.bf16 %v1069_v46, %v1069_v46  ;;  %v26645_v24 = vld [vmem:[%s26741_s6 + $0x3080] sm:$0xff]  }
 0x5f9   : > { %19989 = vmatmul.mubr.bf16.vlgmr.msra.gmra.mrb[184].mxu1 %v3681_v18  ;;  %24653 = vmatpush3.bf16.msra.mxu0 %v26612_v53  ;;  %v1061_v53 = vrot.slane %v29641_v5, %v26864_v45  ;;  %v26644_v5 = vld [vmem:[%s26741_s6 + $0x3000] sm:$0xff]   ;;  %v26647_v18 = vld [vmem:[%s26741_s6 + $0x30c8] sm:$0xff]   ;;  %v26670_v7 = vld [vmem:[%s26741_s6 + $0x3078] sm:$0xff]  }
 0x5fa   : > { %24675 = vmatpush3.bf16.msra.mxu1 %v26613_v13  ;;  %24654 = vmatprep.subr.bf16.mxu0 %v26614_v37  ;;  %v2700_v13 = vpack.c.bf16 %v2287_v49, %v2287_v49  ;;  %v3279_v16 = vshll.u32 %v2702_v9, 16  ;;  %v26642_v37 = vld [vmem:[%s26741_s6 + $0x3040] sm:$0xff]   ;;  %v26668_v49 = vld [vmem:[%s26741_s6 + $0x3030] sm:$0xff]   ;;  %v26673_v9 = vld [vmem:[%s26741_s6 + $0x30b8] sm:$0xff]  }
 0x5fb   : > { %24676 = vmatprep.subr.bf16.mxu1 %v26615_v35  ;;  %20028 = vmatprep.mubr.bf16.mxu0 %v3684_v27  ;;  %v1474_v50 = vpack.c.bf16 %v1061_v53, %v1061_v53  ;;  %v26650_v27 = vld [vmem:[%s26741_s6 + $0x3050] sm:$0xff]   ;;  %v1506_v53 = vld [vmem:[%s26736_s27 + $0xc0] sm:$0xf] }
 0x5fc   : > { %20068 = vmatprep.mubr.bf16.mxu1 %v3686_v26  ;;  %v3273_v45 = vshll.u32 %v2700_v13, 16  ;;  %v3685_v56 = vsel %vm26821_vm2, %v1476_v14, %v3279_v16  ;;  %v26654_v26 = vld [vmem:[%s26741_s6 + $0x3058] sm:$0xff]  }
 0x5fd   : > { %24655 = vmatpush3.bf16.msra.mxu0 %v26616_v21  ;;  %v26648_v21 = vld [vmem:[%s26741_s6 + $0x3008] sm:$0xff]  }
 0x5fe   : > { %24677 = vmatpush3.bf16.msra.mxu1 %v26617_v0  ;;  %24656 = vmatprep.subr.bf16.mxu0 %v26618_v54  ;;  %v3683_v35 = vsel %vm26821_vm2, %v1474_v50, %v3273_v45  ;;  %v26649_v0 = vld [vmem:[%s26741_s6 + $0x3088] sm:$0xff]   ;;  %v26652_v54 = vld [vmem:[%s26741_s6 + $0x3010] sm:$0xff]  }
 0x5ff   : > { %24678 = vmatprep.subr.bf16.mxu1 %v26619_v59  ;;  %v26653_v59 = vld [vmem:[%s26741_s6 + $0x3090] sm:$0xff]  }
 0x601   : > { %24657 = vmatpush3.bf16.msra.mxu0 %v26620_v29  ;;  %v26655_v29 = vld [vmem:[%s26741_s6 + $0x30d8] sm:$0xff]  }
 0x602   : > { %24679 = vmatpush3.bf16.msra.mxu1 %v26621_v33  ;;  %24658 = vmatprep.subr.bf16.mxu0 %v26622_v6  ;;  %v26656_v33 = vld [vmem:[%s26741_s6 + $0x3018] sm:$0xff]  }
 0x603   : > { %24680 = vmatprep.subr.bf16.mxu1 %v26623_v25  ;;  %v26657_v6 = vld [vmem:[%s26741_s6 + $0x3098] sm:$0xff]   ;;  %v26658_v25 = vld [vmem:[%s26741_s6 + $0x3060] sm:$0xff]  }
 0x605   : > { %24659 = vmatpush3.bf16.msra.mxu0 %v26624_v43  ;;  %v26659_v43 = vld [vmem:[%s26741_s6 + $0x30e0] sm:$0xff]  }
 0x606   : > { %24681 = vmatpush3.bf16.msra.mxu1 %v26625_v2  ;;  %24660 = vmatprep.subr.bf16.mxu0 %v26626_v12  ;;  %v26660_v2 = vld [vmem:[%s26741_s6 + $0x3020] sm:$0xff]  }
 0x607   : > { %24682 = vmatprep.subr.bf16.mxu1 %v26627_v3  ;;  %v26661_v12 = vld [vmem:[%s26741_s6 + $0x30a0] sm:$0xff]  }
 0x609   : > { %24661 = vmatpush3.bf16.msra.mxu0 %v26628_v44 }
 0x60a   : > { %24683 = vmatpush3.bf16.msra.mxu1 %v26629_v51  ;;  %24662 = vmatprep.subr.bf16.mxu0 %v26630_v11 }
 0x60b   : > { %v24360_v23 = vpop.f32.mrb[160].mxu0  ;;  %24684 = vmatprep.subr.bf16.mxu1 %v26631_v63 }
 0x60c   : > { %v24382_v52 = vpop.f32.mrb[160].mxu1  ;;  %v24361_v31 = vpop.f32.mrb[161].mxu0 }
 0x60d   : > { %v24362_v57 = vadd.f32 %v24361_v31, %v24360_v23  ;;  %v24383_v42 = vpop.f32.mrb[161].mxu1  ;;  %v24363_v61 = vpop.f32.mrb[162].mxu0  ;;  %24663 = vmatpush3.bf16.msra.mxu0 %v26632_v58  ;;  %v26662_v23 = vld [vmem:[%s26741_s6 + $0x3068] sm:$0xff]  }
 0x60e   : > { %v24384_v1 = vadd.f32 %v24383_v42, %v24382_v52  ;;  %v24385_v62 = vpop.f32.mrb[162].mxu1  ;;  %v24364_v15 = vpop.f32.mrb[163].mxu0  ;;  %24685 = vmatpush3.bf16.msra.mxu1 %v26633_v48  ;;  %24664 = vmatprep.subr.bf16.mxu0 %v26634_v41  ;;  %v26663_v52 = vld [vmem:[%s26741_s6 + $0x30e8] sm:$0xff]   ;;  %v26669_v41 = vld [vmem:[%s26741_s6 + $0x30b0] sm:$0xff]  }
 0x60f   : > { %v19471_v19 = vadd.f32 %v24362_v57, %v29632_v17  ;;  %v24386_v4 = vpop.f32.mrb[163].mxu1  ;;  %v26636_v17 = vld [vmem:[%s26741_s6 + $0x2f30] sm:$0xff]   ;;  %24686 = vmatprep.subr.bf16.mxu1 %v26635_v8  ;;  %v26664_v61 = vld [vmem:[%s26741_s6 + $0x3028] sm:$0xff]   ;;  %v26671_v8 = vld [vmem:[%s26741_s6 + $0x30f8] sm:$0xff]  }
 0x610   : > { %v26665_v58 = vld [vmem:[%s26741_s6 + $0x30a8] sm:$0xff]   ;;  %v26667_v4 = vld [vmem:[%s26741_s6 + $0x30f0] sm:$0xff]  }
 0x611   : > { %v29712_v60 = vadd.f32 %v24384_v1, %v19471_v19  ;;  %24665 = vmatpush3.bf16.msra.mxu0 %v26636_v17  ;;  %v26666_v19 = vld [vmem:[%s26741_s6 + $0x3070] sm:$0xff]   ;;  %v26672_v17 = vld [vmem:[%s26741_s6 + $0x3038] sm:$0xff]  }
 0x612   : > { %24687 = vmatpush3.bf16.msra.mxu1 %v26637_v20  ;;  %24666 = vmatprep.subr.bf16.mxu0 %v26638_v39 }
 0x613   : > { %24688 = vmatprep.subr.bf16.mxu1 %v26639_v22  ;;  %v2307_v22 = vrot.slane %v1506_v53, %v26774_v30 }
 0x615   : > { %24667 = vmatpush3.bf16.msra.mxu0 %v26640_v10  ;;  %v2315_v10 = vrot.slane %v1506_v53, %v26778_v32  ;;  %v2705_v16 = vpack.c.bf16 %v2307_v22, %v2307_v22 }
 0x616   : > { %24689 = vmatpush3.bf16.msra.mxu1 %v26641_v38  ;;  %24696 = vmatprep.subr.bf16.mxu0 %v26642_v37  ;;  %v2303_v38 = vrot.slane %v1506_v53, %v26782_v34 }
 0x617   : > { %24718 = vmatprep.subr.bf16.mxu1 %v26643_v47  ;;  %v2707_v37 = vpack.c.bf16 %v2315_v10, %v2315_v10 }
 0x618   : > { %20029 = vmatmul.mubr.bf16.vlgmr.msra.gmra.mrb[188].mxu0 %v3683_v35  ;;  %v2704_v47 = vpack.c.bf16 %v2303_v38, %v2303_v38 }
 0x619   : > { %20069 = vmatmul.mubr.bf16.vlgmr.msra.gmra.mrb[188].mxu1 %v3685_v56  ;;  %24697 = vmatpush3.bf16.msra.mxu0 %v26644_v5  ;;  %v2311_v5 = vrot.slane %v1506_v53, %v26786_v36  ;;  %v3294_v56 = vshll.u32 %v2707_v37, 16 }
 0x61a   : > { %24719 = vmatpush3.bf16.msra.mxu1 %v26645_v24  ;;  %24698 = vmatprep.subr.bf16.mxu0 %v26646_v40  ;;  %v3288_v24 = vshll.u32 %v2705_v16, 16  ;;  %v3285_v40 = vshll.u32 %v2704_v47, 16 }
 0x61b   : > { %24720 = vmatprep.subr.bf16.mxu1 %v26647_v18 }
 0x61d   : > { %24699 = vmatpush3.bf16.msra.mxu0 %v26648_v21 }
 0x61e   : > { %24721 = vmatpush3.bf16.msra.mxu1 %v26649_v0  ;;  %24700 = vmatprep.subr.bf16.mxu0 %v26650_v27 }
 0x61f   : > { %24722 = vmatprep.subr.bf16.mxu1 %v26651_v28 }
 0x621   : > { %24701 = vmatpush3.bf16.msra.mxu0 %v26652_v54 }
 0x622   : > { %24723 = vmatpush3.bf16.msra.mxu1 %v26653_v59  ;;  %24702 = vmatprep.subr.bf16.mxu0 %v26654_v26 }
 0x623   : > { %24724 = vmatprep.subr.bf16.mxu1 %v26655_v29 }
 0x625   : > { %24703 = vmatpush3.bf16.msra.mxu0 %v26656_v33 }
 0x626   : > { %24725 = vmatpush3.bf16.msra.mxu1 %v26657_v6  ;;  %24704 = vmatprep.subr.bf16.mxu0 %v26658_v25 }
 0x627   : > { %24726 = vmatprep.subr.bf16.mxu1 %v26659_v43 }
 0x629   : > { %24705 = vmatpush3.bf16.msra.mxu0 %v26660_v2 }
 0x62a   : > { %24727 = vmatpush3.bf16.msra.mxu1 %v26661_v12  ;;  %24706 = vmatprep.subr.bf16.mxu0 %v26662_v23 }
 0x62b   : > { %v24404_v3 = vpop.f32.mrb[164].mxu0  ;;  %24728 = vmatprep.subr.bf16.mxu1 %v26663_v52 }
 0x62c   : > { %v24426_v44 = vpop.f32.mrb[164].mxu1  ;;  %v24405_v51 = vpop.f32.mrb[165].mxu0 }
 0x62d   : > { %v24406_v31 = vadd.f32 %v24405_v51, %v24404_v3  ;;  %v24427_v11 = vpop.f32.mrb[165].mxu1  ;;  %v24407_v63 = vpop.f32.mrb[166].mxu0  ;;  %24707 = vmatpush3.bf16.msra.mxu0 %v26664_v61 }
 0x62e   : > { %v24428_v57 = vadd.f32 %v24427_v11, %v24426_v44  ;;  %v24429_v42 = vpop.f32.mrb[166].mxu1  ;;  %v24408_v1 = vpop.f32.mrb[167].mxu0  ;;  %24729 = vmatpush3.bf16.msra.mxu1 %v26665_v58  ;;  %24708 = vmatprep.subr.bf16.mxu0 %v26666_v19 }
 0x62f   : > { %v19551_v62 = vadd.f32 %v24406_v31, %v29712_v60  ;;  %v24430_v15 = vpop.f32.mrb[167].mxu1  ;;  %24730 = vmatprep.subr.bf16.mxu1 %v26667_v4  ;;  %v280_v60 = vld [vmem:[%s26731_s24 + $0xc0] sm:$0xf] }
 0x630   : > { %v1081_v20 = vrot.slane %v280_v60, %v26774_v30  ;;  %v1089_v13 = vrot.slane %v280_v60, %v26778_v32  ;;  %v1077_v39 = vrot.slane %v280_v60, %v26782_v34  ;;  %v1085_v46 = vrot.slane %v280_v60, %v26786_v36 }
 0x631   : > { %v19591_v48 = vadd.f32 %v24428_v57, %v19551_v62  ;;  %24709 = vmatpush3.bf16.msra.mxu0 %v26668_v49  ;;  %v2706_v30 = vpack.c.bf16 %v2311_v5, %v2311_v5 }
 0x632   : > { %24731 = vmatpush3.bf16.msra.mxu1 %v26669_v41  ;;  %24710 = vmatprep.subr.bf16.mxu0 %v26670_v7  ;;  %v1479_v50 = vpack.c.bf16 %v1081_v20, %v1081_v20  ;;  %v1481_v45 = vpack.c.bf16 %v1089_v13, %v1089_v13  ;;  %v1478_v14 = vpack.c.bf16 %v1077_v39, %v1077_v39 }
 0x633   : > { %24732 = vmatprep.subr.bf16.mxu1 %v26671_v8  ;;  %v1480_v35 = vpack.c.bf16 %v1085_v46, %v1085_v46  ;;  %v3291_v21 = vshll.u32 %v2706_v30, 16 }
 0x634   : > { %v3688_v32 = vsel %vm26821_vm2, %v1479_v50, %v3288_v24  ;;  %v3690_v34 = vsel %vm26821_vm2, %v1481_v45, %v3294_v56  ;;  %v3687_v18 = vsel %vm26821_vm2, %v1478_v14, %v3285_v40 }
 0x635   : > { %24711 = vmatpush3.bf16.msra.mxu0 %v26672_v17  ;;  %20108 = vmatprep.mubr.bf16.mxu0 %v3688_v32  ;;  %v3689_v36 = vsel %vm26821_vm2, %v1480_v35, %v3291_v21 }
 0x636   : > { %24733 = vmatpush3.bf16.msra.mxu1 %v26673_v9  ;;  %20148 = vmatprep.mubr.bf16.mxu1 %v3690_v34 }
 0x638   : > { %20109 = vmatmul.mubr.bf16.vlgmr.msra.gmra.mrb[192].mxu0 %v3687_v18 }
 0x639   : > { %20149 = vmatmul.mubr.bf16.vlgmr.msra.gmra.mrb[192].mxu1 %v3689_v36 }
 0x64b   : > { %v24448_v0 = vpop.f32.mrb[168].mxu0 }
 0x64c   : > { %v24449_v27 = vpop.f32.mrb[169].mxu0  ;;  %v24470_v28 = vpop.f32.mrb[168].mxu1 }
 0x64d   : > { %v24450_v54 = vadd.f32 %v24449_v27, %v24448_v0  ;;  %v24451_v59 = vpop.f32.mrb[170].mxu0  ;;  %v24471_v26 = vpop.f32.mrb[169].mxu1 }
 0x64e   : > { %v24452_v29 = vpop.f32.mrb[171].mxu0  ;;  %v24472_v6 = vadd.f32 %v24471_v26, %v24470_v28  ;;  %v24473_v25 = vpop.f32.mrb[170].mxu1 }
 0x64f   : > { %v19631_v33 = vadd.f32 %v24450_v54, %v19591_v48  ;;  %v24474_v43 = vpop.f32.mrb[171].mxu1 }
 0x651   : > { %v19671_v2 = vadd.f32 %v24472_v6, %v19631_v33 }
 0x66b   : > { %v24492_v12 = vpop.f32.mrb[172].mxu0 }
 0x66c   : > { %v24493_v3 = vpop.f32.mrb[173].mxu0  ;;  %v24514_v44 = vpop.f32.mrb[172].mxu1 }
 0x66d   : > { %v24494_v51 = vadd.f32 %v24493_v3, %v24492_v12  ;;  %v24495_v23 = vpop.f32.mrb[174].mxu0  ;;  %v24515_v55 = vpop.f32.mrb[173].mxu1 }
 0x66e   : > { %v24496_v52 = vpop.f32.mrb[175].mxu0  ;;  %v24516_v11 = vadd.f32 %v24515_v55, %v24514_v44  ;;  %v24517_v63 = vpop.f32.mrb[174].mxu1 }
 0x66f   : > { %v19711_v31 = vadd.f32 %v24494_v51, %v19671_v2  ;;  %v24518_v57 = vpop.f32.mrb[175].mxu1 }
 0x670   : > { %v20185_v57 = vld [vmem:[%s30096_s4 + $0x80] sm:$0xff] (!%p22568_p6) }
 0x671   : > { %v19751_v42 = vadd.f32 %v24516_v11, %v19711_v31  ;;  %v3691_v31 = vld [vmem:[#allocation2] sm:$0x3] }
 0x68b   : > { %v24536_v61 = vpop.f32.mrb[176].mxu0 }
 0x68c   : > { %v24558_v58 = vpop.f32.mrb[176].mxu1  ;;  %v24537_v1 = vpop.f32.mrb[177].mxu0 }
 0x68d   : > { %v24559_v62 = vpop.f32.mrb[177].mxu1  ;;  %v24538_v15 = vadd.f32 %v24537_v1, %v24536_v61  ;;  %v24539_v48 = vpop.f32.mrb[178].mxu0  ;;  %v20169_v61 = vld [vmem:[%s30096_s4] sm:$0xff] (!%p22568_p6) }
 0x68e   : > { %v24560_v19 = vadd.f32 %v24559_v62, %v24558_v58  ;;  %v24561_v4 = vpop.f32.mrb[178].mxu1  ;;  %v24540_v49 = vpop.f32.mrb[179].mxu0  ;;  %v26683_v58 = vmov (!%p22568_p6), 0.0|0.0   ;;  %v20170_v62 = vld [vmem:[%s30096_s4 + $0x8] sm:$0xff] (!%p22568_p6) }
 0x68f   : > { %v24562_v41 = vpop.f32.mrb[179].mxu1  ;;  %v19791_v7 = vadd.f32 %v24538_v15, %v19751_v42  ;;  %v20186_v42 = vld [vmem:[%s30096_s4 + $0x88] sm:$0xff] (!%p22568_p6)  ;;  %24989 = vmatprep.subr.bf16.mxu0 (!%p22568_p6), %v26683_v58  ;;  %25013 = vmatprep.subr.bf16.mxu1 (!%p22568_p6), %v26683_v58  ;;  %v20187_v15 = vld [vmem:[%s30096_s4 + $0x90] sm:$0xff] (!%p22568_p6)  ;;  %v25014_v48 = vpack.c.bf16 (!%p22568_p6), %v20170_v62, %v20169_v61  ;;  %v20172_v49 = vld [vmem:[%s30096_s4 + $0x18] sm:$0xff] (!%p22568_p6) }
 0x690   : > { %v24990_v1 = vpack.c.bf16 (!%p22568_p6), %v20186_v42, %v20185_v57  ;;  %v20171_v4 = vld [vmem:[%s30096_s4 + $0x10] sm:$0xff] (!%p22568_p6)  ;;  %v26685_v41 = vmov (!%p22568_p6), 0.0   ;;  %v20353_v57 = vld [vmem:[%s30096_s4 + $0x138] sm:$0xff] (!%p22568_p6)  ;;  %v20354_v61 = vld [vmem:[%s30096_s4 + $0x140] sm:$0xff] (!%p22568_p6) }
 0x691   : > { %v19831_v8 = vadd.f32 %v24560_v19, %v19791_v7  ;;  %v20188_v19 = vld [vmem:[%s30096_s4 + $0x98] sm:$0xff] (!%p22568_p6)  ;;  %24852 = vmatprep.mubr.msk.f32.mxu0 (!%p22568_p6), %vm26684_vm3, %v26685_v41  ;;  %24887 = vmatprep.mubr.msk.f32.mxu1 (!%p22568_p6), %vm26684_vm3, %v26685_v41 }
 0x692   : > { %24991 = vmatpush3.bf16.msra.mxu0 (!%p22568_p6), %v24990_v1  ;;  %v24993_v7 = vpack.c.bf16 (!%p22568_p6), %v20188_v19, %v20187_v15  ;;  %25015 = vmatpush3.bf16.msra.mxu1 (!%p22568_p6), %v25014_v48  ;;  %v20355_v1 = vld [vmem:[%s30096_s4 + $0x148] sm:$0xff] (!%p22568_p6)  ;;  %v20356_v15 = vld [vmem:[%s30096_s4 + $0x150] sm:$0xff] (!%p22568_p6)  ;;  %v20357_v19 = vld [vmem:[%s30096_s4 + $0x158] sm:$0xff] (!%p22568_p6) }
 0x693   : > { %24992 = vmatprep.subr.bf16.mxu0 (!%p22568_p6), %v26683_v58  ;;  %25016 = vmatprep.subr.bf16.mxu1 (!%p22568_p6), %v26683_v58  ;;  %v25050_v62 = vpack.c.bf16 (!%p22568_p6), %v20355_v1, %v20354_v61  ;;  %v25053_v48 = vpack.c.bf16 (!%p22568_p6), %v20357_v19, %v20356_v15  ;;  %v20848_v61 = vld [vmem:[%s30096_s4 + $0x218] sm:$0xff] (!%p22568_p6)  ;;  %v20849_v1 = vld [vmem:[%s30096_s4 + $0x220] sm:$0xff] (!%p22568_p6) }
 0x696   : > { %24994 = vmatpush3.bf16.msra.mxu0 (!%p22568_p6), %v24993_v7 }
 0x697   : > { %24995 = vmatprep.subr.bf16.mxu0 (!%p22568_p6), %v26683_v58 }
 0x6ab   : > { %v24580_v60 = vpop.f32.mrb[180].mxu0 }
 0x6ac   : > { %v24602_v17 = vpop.f32.mrb[180].mxu1  ;;  %v24581_v20 = vpop.f32.mrb[181].mxu0 }
 0x6ad   : > { %v24603_v53 = vpop.f32.mrb[181].mxu1  ;;  %v24582_v13 = vadd.f32 %v24581_v20, %v24580_v60  ;;  %v24583_v46 = vpop.f32.mrb[182].mxu0  ;;  %v20189_v60 = vld [vmem:[%s30096_s4 + $0xa0] sm:$0xff] (!%p22568_p6) }
 0x6ae   : > { %v24604_v39 = vadd.f32 %v24603_v53, %v24602_v17  ;;  %v24605_v9 = vpop.f32.mrb[182].mxu1  ;;  %v24584_v22 = vpop.f32.mrb[183].mxu0  ;;  %v20190_v17 = vld [vmem:[%s30096_s4 + $0xa8] sm:$0xff] (!%p22568_p6)  ;;  %v20173_v20 = vld [vmem:[%s30096_s4 + $0x20] sm:$0xff] (!%p22568_p6)  ;;  %v20191_v46 = vld [vmem:[%s30096_s4 + $0xb0] sm:$0xff] (!%p22568_p6) }
 0x6af   : > { %v24606_v10 = vpop.f32.mrb[183].mxu1  ;;  %v19871_v38 = vadd.f32 %v24582_v13, %v19831_v8  ;;  %v25017_v8 = vpack.c.bf16 (!%p22568_p6), %v20172_v49, %v20171_v4  ;;  %v20174_v53 = vld [vmem:[%s30096_s4 + $0x28] sm:$0xff] (!%p22568_p6)  ;;  %v24996_v13 = vpack.c.bf16 (!%p22568_p6), %v20190_v17, %v20189_v60  ;;  %v20192_v9 = vld [vmem:[%s30096_s4 + $0xb8] sm:$0xff] (!%p22568_p6)  ;;  %v20175_v22 = vld [vmem:[%s30096_s4 + $0x30] sm:$0xff] (!%p22568_p6) }
 0x6b0   : > { %v20176_v10 = vld [vmem:[%s30096_s4 + $0x38] sm:$0xff] (!%p22568_p6)  ;;  %v20358_v4 = vld [vmem:[%s30096_s4 + $0x160] sm:$0xff] (!%p22568_p6)  ;;  %v20359_v49 = vld [vmem:[%s30096_s4 + $0x168] sm:$0xff] (!%p22568_p6) }
 0x6b1   : > { %v19911_v50 = vadd.f32 %v24604_v39, %v19871_v38  ;;  %25018 = vmatpush3.bf16.msra.mxu1 (!%p22568_p6), %v25017_v8  ;;  %v25020_v39 = vpack.c.bf16 (!%p22568_p6), %v20174_v53, %v20173_v20  ;;  %24997 = vmatpush3.bf16.msra.mxu0 (!%p22568_p6), %v24996_v13  ;;  %v24999_v38 = vpack.c.bf16 (!%p22568_p6), %v20192_v9, %v20191_v46  ;;  %v20360_v8 = vld [vmem:[%s30096_s4 + $0x170] sm:$0xff] (!%p22568_p6)  ;;  %v20361_v60 = vld [vmem:[%s30096_s4 + $0x178] sm:$0xff] (!%p22568_p6)  ;;  %v20433_v20 = vld [vmem:[%s30096_s4 + $0x180] sm:$0xff] (!%p22568_p6) }
 0x6b2   : > { %25019 = vmatprep.subr.bf16.mxu1 (!%p22568_p6), %v26683_v58  ;;  %24998 = vmatprep.subr.bf16.mxu0 (!%p22568_p6), %v26683_v58  ;;  %v25056_v7 = vpack.c.bf16 (!%p22568_p6), %v20359_v49, %v20358_v4  ;;  %v25059_v17 = vpack.c.bf16 (!%p22568_p6), %v20361_v60, %v20360_v8  ;;  %v20434_v53 = vld [vmem:[%s30096_s4 + $0x188] sm:$0xff] (!%p22568_p6)  ;;  %v20435_v13 = vld [vmem:[%s30096_s4 + $0x190] sm:$0xff] (!%p22568_p6)  ;;  %v20436_v46 = vld [vmem:[%s30096_s4 + $0x198] sm:$0xff] (!%p22568_p6)  ;;  %v25089_v4 = vpack.c.bf16 (!%p22568_p6), %v20849_v1, %v20848_v61 }
 0x6b3   : > { %v25065_v9 = vpack.c.bf16 (!%p22568_p6), %v20436_v46, %v20435_v13  ;;  %v20850_v8 = vld [vmem:[%s30096_s4 + $0x228] sm:$0xff] (!%p22568_p6)  ;;  %v20851_v60 = vld [vmem:[%s30096_s4 + $0x230] sm:$0xff] (!%p22568_p6)  ;;  %v22577_v13 = vld [vmem:[%s30096_s4 + $0x23e] ss:$0 sm:$0xff] (!%p22568_p6) }
 0x6b5   : > { %25021 = vmatpush3.bf16.msra.mxu1 (!%p22568_p6), %v25020_v39  ;;  %25000 = vmatpush3.bf16.msra.mxu0 (!%p22568_p6), %v24999_v38  ;;  %v25062_v39 = vpack.c.bf16 (!%p22568_p6), %v20434_v53, %v20433_v20 }
 0x6b6   : > { %25022 = vmatprep.subr.bf16.mxu1 (!%p22568_p6), %v26683_v58  ;;  %25001 = vmatprep.subr.bf16.mxu0 (!%p22568_p6), %v26683_v58 }
 0x6cb   : > { %v24624_v45 = vpop.f32.mrb[184].mxu0 }
 0x6cc   : > { %v24646_v14 = vpop.f32.mrb[184].mxu1  ;;  %v24625_v16 = vpop.f32.mrb[185].mxu0 }
 0x6cd   : > { %v24626_v37 = vadd.f32 %v24625_v16, %v24624_v45  ;;  %v24647_v47 = vpop.f32.mrb[185].mxu1  ;;  %v24627_v5 = vpop.f32.mrb[186].mxu0  ;;  %v20193_v45 = vld [vmem:[%s30096_s4 + $0xc0] sm:$0xff] (!%p22568_p6) }
 0x6ce   : > { %v24648_v35 = vadd.f32 %v24647_v47, %v24646_v14  ;;  %v24649_v24 = vpop.f32.mrb[186].mxu1  ;;  %v24628_v56 = vpop.f32.mrb[187].mxu0  ;;  %v20194_v14 = vld [vmem:[%s30096_s4 + $0xc8] sm:$0xff] (!%p22568_p6)  ;;  %v20177_v16 = vld [vmem:[%s30096_s4 + $0x40] sm:$0xff] (!%p22568_p6) }
 0x6cf   : > { %v19951_v40 = vadd.f32 %v24626_v37, %v19911_v50  ;;  %v24650_v30 = vpop.f32.mrb[187].mxu1  ;;  %v25023_v50 = vpack.c.bf16 (!%p22568_p6), %v20176_v10, %v20175_v22  ;;  %v20178_v37 = vld [vmem:[%s30096_s4 + $0x48] sm:$0xff] (!%p22568_p6)  ;;  %v25002_v47 = vpack.c.bf16 (!%p22568_p6), %v20194_v14, %v20193_v45  ;;  %v20196_v24 = vld [vmem:[%s30096_s4 + $0xd8] sm:$0xff] (!%p22568_p6)  ;;  %v20179_v56 = vld [vmem:[%s30096_s4 + $0x50] sm:$0xff] (!%p22568_p6) }
 0x6d0   : > { %v25026_v5 = vpack.c.bf16 (!%p22568_p6), %v20178_v37, %v20177_v16  ;;  %v20437_v22 = vld [vmem:[%s30096_s4 + $0x1a0] sm:$0xff] (!%p22568_p6)  ;;  %v20438_v10 = vld [vmem:[%s30096_s4 + $0x1a8] sm:$0xff] (!%p22568_p6)  ;;  %v20440_v45 = vld [vmem:[%s30096_s4 + $0x1b8] sm:$0xff] (!%p22568_p6) }
 0x6d1   : > { %v19991_v32 = vadd.f32 %v24648_v35, %v19951_v40  ;;  %25024 = vmatpush3.bf16.msra.mxu1 (!%p22568_p6), %v25023_v50  ;;  %v20195_v35 = vld [vmem:[%s30096_s4 + $0xd0] sm:$0xff] (!%p22568_p6)  ;;  %v20180_v40 = vld [vmem:[%s30096_s4 + $0x58] sm:$0xff] (!%p22568_p6)  ;;  %25003 = vmatpush3.bf16.msra.mxu0 (!%p22568_p6), %v25002_v47  ;;  %v25068_v38 = vpack.c.bf16 (!%p22568_p6), %v20438_v10, %v20437_v22  ;;  %v22580_v10 = vld [vmem:[%s30096_s4 + $0x240] ss:$0 sm:$0xff] (!%p22568_p6) }
 0x6d2   : > { %25025 = vmatprep.subr.bf16.mxu1 (!%p22568_p6), %v26683_v58  ;;  %v25005_v30 = vpack.c.bf16 (!%p22568_p6), %v20196_v24, %v20195_v35  ;;  %25004 = vmatprep.subr.bf16.mxu0 (!%p22568_p6), %v26683_v58  ;;  %v20439_v50 = vld [vmem:[%s30096_s4 + $0x1b0] sm:$0xff] (!%p22568_p6)  ;;  %v20344_v47 = vld [vmem:[%s30096_s4 + $0x239] sm:$0x1] (!%p22568_p6) }
 0x6d3   : > { %v25071_v14 = vpack.c.bf16 (!%p22568_p6), %v20440_v45, %v20439_v50 }
 0x6d5   : > { %25027 = vmatpush3.bf16.msra.mxu1 (!%p22568_p6), %v25026_v5  ;;  %25006 = vmatpush3.bf16.msra.mxu0 (!%p22568_p6), %v25005_v30 }
 0x6d6   : > { %25028 = vmatprep.subr.bf16.mxu1 (!%p22568_p6), %v26683_v58  ;;  %25007 = vmatprep.subr.bf16.mxu0 (!%p22568_p6), %v26683_v58 }
 0x6eb   : > { %v24668_v34 = vpop.f32.mrb[188].mxu0 }
 0x6ec   : > { %v24690_v18 = vpop.f32.mrb[188].mxu1  ;;  %v24669_v21 = vpop.f32.mrb[189].mxu0 }
 0x6ed   : > { %v24670_v36 = vadd.f32 %v24669_v21, %v24668_v34  ;;  %v24691_v0 = vpop.f32.mrb[189].mxu1  ;;  %v24671_v27 = vpop.f32.mrb[190].mxu0  ;;  %v20197_v34 = vld [vmem:[%s30096_s4 + $0xe0] sm:$0xff] (!%p22568_p6) }
 0x6ee   : > { %v24692_v28 = vadd.f32 %v24691_v0, %v24690_v18  ;;  %v24693_v54 = vpop.f32.mrb[190].mxu1  ;;  %v24672_v59 = vpop.f32.mrb[191].mxu0  ;;  %v20198_v18 = vld [vmem:[%s30096_s4 + $0xe8] sm:$0xff] (!%p22568_p6)  ;;  %v20181_v21 = vld [vmem:[%s30096_s4 + $0x60] sm:$0xff] (!%p22568_p6) }
 0x6ef   : > { %v20031_v26 = vadd.f32 %v24670_v36, %v19991_v32  ;;  %v24694_v29 = vpop.f32.mrb[191].mxu1  ;;  %v25029_v32 = vpack.c.bf16 (!%p22568_p6), %v20180_v40, %v20179_v56  ;;  %v20182_v36 = vld [vmem:[%s30096_s4 + $0x68] sm:$0xff] (!%p22568_p6)  ;;  %v25008_v0 = vpack.c.bf16 (!%p22568_p6), %v20198_v18, %v20197_v34  ;;  %v20199_v59 = vld [vmem:[%s30096_s4 + $0xf0] sm:$0xff] (!%p22568_p6)  ;;  %v20362_v40 = vld [vmem:[%s30096_s4 + $0x23a] sm:$0x1] (!%p22568_p6) }
 0x6f0   : > { %v25032_v54 = vpack.c.bf16 (!%p22568_p6), %v20182_v36, %v20181_v21  ;;  %v20183_v29 = vld [vmem:[%s30096_s4 + $0x70] sm:$0xff] (!%p22568_p6)  ;;  %v20517_v18 = vld [vmem:[%s30096_s4 + $0x200] sm:$0xff] (!%p22568_p6)  ;;  %v20597_v36 = vld [vmem:[%s30096_s4 + $0x208] sm:$0xff] (!%p22568_p6) }
 0x6f1   : > { %v20071_v33 = vadd.f32 %v24692_v28, %v20031_v26  ;;  %v22569_v28 = vld [vmem:[%s30096_s4 + $0x238] ss:$0 sm:$0xff] (!%p22568_p6)  ;;  %25030 = vmatpush3.bf16.msra.mxu1 (!%p22568_p6), %v25029_v32  ;;  %25009 = vmatpush3.bf16.msra.mxu0 (!%p22568_p6), %v25008_v0  ;;  %v20516_v21 = vld [vmem:[%s30095_s3] sm:$0x7] (!%p22568_p6)  ;;  %v20598_v0 = vld [vmem:[%s30096_s4 + $0x210] sm:$0xff] (!%p22568_p6) }
 0x6f2   : > { %v20200_v26 = vld [vmem:[%s30096_s4 + $0xf8] sm:$0xff] (!%p22568_p6)  ;;  %25031 = vmatprep.subr.bf16.mxu1 (!%p22568_p6), %v26683_v58  ;;  %25010 = vmatprep.subr.bf16.mxu0 (!%p22568_p6), %v26683_v58 }
 0x6f5   : > { %25033 = vmatpush3.bf16.msra.mxu1 (!%p22568_p6), %v25032_v54  ;;  %v20688_v54 = vld [vmem:[%s30096_s4 + $0x1c8] sm:$0xff] (!%p22568_p6) }
 0x6f6   : > { %25034 = vmatprep.subr.bf16.mxu1 (!%p22568_p6), %v26683_v58 }
 0x70b   : > { %v24712_v6 = vpop.f32.mrb[192].mxu0 }
 0x70c   : > { %v24734_v25 = vpop.f32.mrb[192].mxu1  ;;  %v24713_v43 = vpop.f32.mrb[193].mxu0 }
 0x70d   : > { %v24714_v2 = vadd.f32 %v24713_v43, %v24712_v6  ;;  %v24735_v12 = vpop.f32.mrb[193].mxu1  ;;  %v24715_v3 = vpop.f32.mrb[194].mxu0 }
 0x70e   : > { %v24736_v44 = vadd.f32 %v24735_v12, %v24734_v25  ;;  %v24737_v51 = vpop.f32.mrb[194].mxu1  ;;  %v24716_v23 = vpop.f32.mrb[195].mxu0  ;;  %v25011_v25 = vpack.c.bf16 (!%p22568_p6), %v20200_v26, %v20199_v59  ;;  %v20347_v12 = vld [vmem:[%s30096_s4 + $0x108] sm:$0xff] (!%p22568_p6) }
 0x70f   : > { %v20111_v55 = vadd.f32 %v24714_v2, %v20071_v33  ;;  %v24738_v52 = vpop.f32.mrb[195].mxu1  ;;  %20161 = sbr.rel (%p22568_p6) target bundleno = 3268 (0xcc4), region = 48  ;;  %v20184_v33 = vld [vmem:[%s30096_s4 + $0x78] sm:$0xff] (!%p22568_p6)  ;;  %v20346_v2 = vld [vmem:[%s30096_s4 + $0x100] sm:$0xff] (!%p22568_p6)  ;;  %v20348_v51 = vld [vmem:[%s30096_s4 + $0x110] sm:$0xff] (!%p22568_p6) }
 0x710   : > { %v25035_v43 = vpack.c.bf16 (!%p22568_p6), %v20184_v33, %v20183_v29  ;;  %25012 = vmatpush3.bf16.msra.mxu0 (!%p22568_p6), %v25011_v25  ;;  %v20349_v23 = vld [vmem:[%s30096_s4 + $0x118] sm:$0xff] (!%p22568_p6)  ;;  %v20350_v52 = vld [vmem:[%s30096_s4 + $0x120] sm:$0xff] (!%p22568_p6) }
 0x711   : > { %v20151_v11 = vadd.f32 %v24736_v44, %v20111_v55  ;;  %v25038_v44 = vpack.c.bf16 (!%p22568_p6), %v20347_v12, %v20346_v2  ;;  %25037 = vmatprep.subr.bf16.mxu0 (!%p22568_p6), %v26683_v58  ;;  %v25041_v55 = vpack.c.bf16 (!%p22568_p6), %v20349_v23, %v20348_v51  ;;  %v20691_v33 = vld [vmem:[%s30096_s4 + $0x1e0] sm:$0xff] (!%p22568_p6)  ;;  %v22571_v25 = vld [vmem:[%s30096_s4 + $0x23c] ss:$0 sm:$0xff] (!%p22568_p6)  ;;  %v20689_v23 = vld [vmem:[%s30096_s4 + $0x1d0] sm:$0xff] (!%p22568_p6) }
 0x712   : > { %25036 = vmatpush3.bf16.msra.mxu1 (!%p22568_p6), %v25035_v43  ;;  %v20694_v51 = vld [vmem:[%s30096_s4 + $0x1f8] sm:$0xff] (!%p22568_p6) }
 0x713   : > { %v20156_v63 = vadd.f32 %v20151_v11, %v3691_v31  ;;  %25061 = vmatprep.subr.bf16.mxu1 (!%p22568_p6), %v26683_v58  ;;  %v20351_v31 = vld [vmem:[%s30096_s4 + $0x128] sm:$0xff] (!%p22568_p6) }
 0x714   : > { %v25044_v11 = vpack.c.bf16 (!%p22568_p6), %v20351_v31, %v20350_v52  ;;  %v20690_v52 = vld [vmem:[%s30096_s4 + $0x1d8] sm:$0xff] (!%p22568_p6) }
 0x715   : > { %20157 = vst [vmem:[#allocation2] sm:$0x3] %v20156_v63  ;;  %v20352_v63 = vld [vmem:[%s30096_s4 + $0x130] sm:$0xff] (!%p22568_p6)  ;;  %v25086_v31 = vpack.c.bf16 (!%p22568_p6), %v20690_v52, %v20689_v23 }
 0x716   : > { %v25047_v42 = vpack.c.bf16 %v20353_v57, %v20352_v63  ;;  %v22573_v63 = vld [vmem:[%s30096_s4 + $0x23d] ss:$0 sm:$0xff] }
 0x71c   : > { %v20162_v27 = vld [vmem:[#allocation2] sm:$0x3] }
 0x71d   : > { %v20168_v6 = vadd.f32 %v22569_v28, %v20162_v27  ;;  %v25074_v27 = vpack.c.bf16 %v20598_v0, %v20597_v36  ;;  %v20687_v28 = vld [vmem:[%s30096_s4 + $0x1c0] sm:$0xff] }
 0x71e   : > { %v25083_v59 = vpack.c.bf16 %v20688_v54, %v20687_v28 }
 0x71f   : > { %v20202_v3 = vrot.slane %v20168_v6, 1  ;;  %24888 = vmatmul.mubr.f32.vlgmr.msra.gmra.mrb[0].mxu1 %v20168_v6  ;;  %v20692_v6 = vld [vmem:[%s30096_s4 + $0x1e8] sm:$0xff] }
 0x720   : > { %24941 = vmatprep.mubr.msk.f32.mxu1 %vm26684_vm3, %v26685_v41  ;;  %25063 = vmatpush3.bf16.msra.mxu1 %v25062_v39  ;;  %v25077_v2 = vpack.c.bf16 %v20692_v6, %v20691_v33 }
 0x721   : > { %24853 = vmatmul.mubr.f32.vlgmr.msra.gmra.mrb[0].mxu0 %v20202_v3  ;;  %25064 = vmatprep.subr.bf16.mxu1 %v26683_v58 }
 0x722   : > { %25039 = vmatpush3.bf16.msra.mxu0 %v25038_v44  ;;  %24922 = vmatprep.mubr.msk.f32.mxu0 %vm26684_vm3, %v26685_v41  ;;  %v20693_v44 = vld [vmem:[%s30096_s4 + $0x1f0] sm:$0xff] }
 0x723   : > { %25040 = vmatprep.subr.bf16.mxu0 %v26683_v58 }
 0x724   : > { %25066 = vmatpush3.bf16.msra.mxu1 %v25065_v9  ;;  %v22578_v9 = vld [vmem:[%s30096_s4 + $0x23f] ss:$0 sm:$0xff] }
 0x725   : > { %25067 = vmatprep.subr.bf16.mxu1 %v26683_v58 }
 0x726   : > { %25042 = vmatpush3.bf16.msra.mxu0 %v25041_v55  ;;  %v25080_v55 = vpack.c.bf16 %v20694_v51, %v20693_v44 }
 0x727   : > { %25043 = vmatprep.subr.bf16.mxu0 %v26683_v58 }
 0x728   : > { %25069 = vmatpush3.bf16.msra.mxu1 %v25068_v38 }
 0x729   : > { %25070 = vmatprep.subr.bf16.mxu1 %v26683_v58 }
 0x72a   : > { %25045 = vmatpush3.bf16.msra.mxu0 %v25044_v11  ;;  %v20441_v11 = vld [vmem:[%s30096_s4 + $0x23b] sm:$0x1] }
 0x72b   : > { %25046 = vmatprep.subr.bf16.mxu0 %v26683_v58 }
 0x72c   : > { %25072 = vmatpush3.bf16.msra.mxu1 %v25071_v14 }
 0x72d   : > { %24944 = vmatprep.subr.mxu1 %v26685_v41 }
 0x72e   : > { %25048 = vmatpush3.bf16.msra.mxu0 %v25047_v42 }
 0x72f   : > { %25049 = vmatprep.subr.bf16.mxu0 %v26683_v58 }
 0x732   : > { %25051 = vmatpush3.bf16.msra.mxu0 %v25050_v62 }
 0x733   : > { %25052 = vmatprep.subr.bf16.mxu0 %v26683_v58 }
 0x736   : > { %25054 = vmatpush3.bf16.msra.mxu0 %v25053_v48 }
 0x737   : > { %25055 = vmatprep.subr.bf16.mxu0 %v26683_v58 }
 0x73a   : > { %25057 = vmatpush3.bf16.msra.mxu0 %v25056_v7 }
 0x73b   : > { %25058 = vmatprep.subr.bf16.mxu0 %v26683_v58 }
 0x73e   : > { %25060 = vmatpush3.bf16.msra.mxu0 %v25059_v17  ;;  %v25092_v17 = vpack.c.bf16 %v20851_v60, %v20850_v8 }
 0x73f   : > { %25082 = vmatprep.subr.bf16.mxu0 %v26683_v58 }
 0x7f2   : > { %v20340_v37 = vpop.f32.mrb[0].mxu1 }
 0x7f3   : > { %v24889_v24 = vpop.f32.mrb[1].mxu1 }
 0x7f4   : > { %v20270_v16 = vpop.f32.mrb[0].mxu0 }
 0x7f5   : > { %v24854_v5 = vpop.f32.mrb[1].mxu0  ;;  %v20341_v35 = vadd.f32 %v20340_v37, %v20270_v16  ;;  %v22581_v16 = vld [vmem:[%s30096_s4 + $0x241] ss:$0 sm:$0xff] }
 0x7f7   : > { %v20345_v56 = vadd.f32 %v20344_v47, %v20341_v35 }
 0x7f9   : > { %24923 = vmatmul.mubr.f32.vlgmr.msra.gmra.mrb[2].mxu0 %v20345_v56 }
 0x7fa   : > { %24975 = vmatprep.mubr.msk.f32.mxu0 %vm26684_vm3, %v26685_v41  ;;  %25084 = vmatpush3.bf16.msra.mxu0 %v25083_v59 }
 0x7fb   : > { %25085 = vmatprep.subr.bf16.mxu0 %v26683_v58 }
 0x7fe   : > { %25087 = vmatpush3.bf16.msra.mxu0 %v25086_v31 }
 0x8cc   : > { %v20429_v30 = vpop.f32.mrb[2].mxu0 }
 0x8cd   : > { %v20430_v32 = vadd.f32 %v20429_v30, %v20362_v40  ;;  %v24924_v34 = vpop.f32.mrb[3].mxu0 }
 0x8cf   : > { %24942 = vmatmul.mubr.msk.f32.vlgmr.msra.gmra.mrb[2].mxu1 %vm20442_vm4, %v20430_v32 }
 0x8d0   : > { %24945 = vmatpush3.msra.mxu1 %v20517_v18  ;;  %24946 = vmatprep.mubr.msk.f32.mxu1 %vm26684_vm3, %v26685_v41 }
 0x8d1   : > { %25073 = vmatprep.subr.bf16.mxu1 %v26683_v58 }
 0x8d3   : > { %24947 = vmatmul.mubr.msk.f32.vlgmr.msra.gmra.mrb[4].mxu1 %vm20523_vm5, %v20516_v21 }
 0x8d4   : > { %24953 = vmatprep.mubr.msk.f32.mxu1 %vm26684_vm3, %v26685_v41  ;;  %25075 = vmatpush3.bf16.msra.mxu1 %v25074_v27 }
 0x8d5   : > { %25076 = vmatprep.subr.bf16.mxu1 %v26683_v58 }
 0x9a2   : > { %v20512_v26 = vpop.f32.mrb[2].mxu1 }
 0x9a3   : > { %v24943_v29 = vpop.f32.mrb[3].mxu1  ;;  %v20513_v57 = vadd.f32 %v20512_v26, %v20441_v11 }
 0x9a5   : > { %v20684_v19 = vrot.slane %v20513_v57, 7 }
 0x9a6   : > { %v20593_v43 = vpop.f32.mrb[4].mxu1 }
 0x9a7   : > { %v20594_v12 = vadd.f32 %v22571_v25, %v20593_v43  ;;  %v24948_v3 = vpop.f32.mrb[5].mxu1 }
 0x9a9   : > { %24954 = vmatmul.mubr.msk.f32.vlgmr.msra.gmra.mrb[6].mxu1 %vm20604_vm6, %v20594_v12 }
 0x9aa   : > { %25078 = vmatpush3.bf16.msra.mxu1 %v25077_v2  ;;  %24964 = vmatprep.mubr.msk.f32.mxu1 %vm26684_vm3, %v26685_v41 }
 0x9ab   : > { %25079 = vmatprep.subr.bf16.mxu1 %v26683_v58 }
 0x9ae   : > { %25081 = vmatpush3.bf16.msra.mxu1 %v25080_v55 }
 0x9af   : > { %25088 = vmatprep.subr.bf16.mxu1 %v26683_v58 }
 0xa7c   : > { %v20674_v42 = vpop.f32.mrb[6].mxu1 }
 0xa7d   : > { %v20675_v62 = vadd.f32 %v22573_v63, %v20674_v42  ;;  %v24955_v15 = vpop.f32.mrb[7].mxu1 }
 0xa7f   : > { %v20679_v48 = vrot.slane %v20675_v62, 1 }
 0xa81   : > { %v20682_v49 = vsel %vm3492_vm0, %v20675_v62, %v20679_v48  ;;  %v20686_v7 = vsel %vm3492_vm0, %v20679_v48, %v20684_v19 }
 0xa82   : > { %24965 = vmatmul.mubr.msk.f32.vlgmr.msra.gmra.mrb[8].mxu1 %vm20695_vm7, %v20686_v7  ;;  %24976 = vmatmul.mubr.msk.f32.vlgmr.msra.gmra.mrb[4].mxu0 %vm20695_vm7, %v20682_v49 }
 0xa83   : > { %25090 = vmatpush3.bf16.msra.mxu1 %v25089_v4  ;;  %24986 = vmatprep.mubr.msk.f32.mxu1 %vm26684_vm3, %v26685_v41 }
 0xa84   : > { %25091 = vmatprep.subr.bf16.mxu1 %v26683_v58 }
 0xa87   : > { %25093 = vmatpush3.bf16.msra.mxu1 %v25092_v17 }
 0xb55   : > { %v20765_v20 = vpop.f32.mrb[8].mxu1  ;;  %v20838_v53 = vpop.f32.mrb[4].mxu0 }
 0xb56   : > { %v20839_v39 = vadd.f32 %v20838_v53, %v20765_v20  ;;  %v24966_v41 = vpop.f32.mrb[9].mxu1  ;;  %v24977_v46 = vpop.f32.mrb[5].mxu0 }
 0xb58   : > { %v20847_v58 = vadd.f32 %v22577_v13, %v20839_v39 }
 0xb5a   : > { %24987 = vmatmul.mubr.msk.f32.vlgmr.msra.gmra.mrb[10].mxu1 %vm20695_vm7, %v20847_v58 }
 0xc2d   : > { %v20926_v22 = vpop.f32.mrb[10].mxu1 }
 0xc2e   : > { %v20927_v38 = vadd.f32 %v22578_v9, %v20926_v22  ;;  %v24988_v50 = vpop.f32.mrb[11].mxu1 }
 0xc30   : > { %v20935_v45 = vmul.f32 %v22580_v10, %v20927_v38 }
 0xc32   : > { %v20937_v14 = vsel %vm20936_vm8, %v20935_v45, 0.0 }
 0xc33   : > { %20938 = vadd.xlane.f32.xlu0 %v20937_v14 }
 0xcc0   : > { %v20939_v37 = vpop.xlane.xlu0 %20938 }
 0xcc1   : > { %v20945_v47 = vadd.f32 %v22581_v16, %v20939_v37 }
 0xcc3   : > { %20947 = vst.msk [vmem:[%s30097_s5] sm:$0x3] %vm20946_vm9, %v20945_v47 }
 0xcc4 PF: > { %s15_s18 = sadd.s32 1, %s26680_s18  }
 0xcc5   : > { %p12_p7 = scmp.ge.s32.totalorder %s15_s18, 4  }
 0xcc7   :  { %14 = sbr.rel (!%p12_p7) target bundleno = 1 (0x1), region = 80 }

</bundles_post_ra>
